<compile_context>
chip_gen: v7x
topology: tpu7x:2x2x1
jax: 0.10.0
libtpu: 0.0.40
codegen_flags: <defaults>
</compile_context>

<pallas_src>
import functools
import math

import jax
import jax.numpy as jnp
from jax.experimental import pallas as pl
from jax.experimental.pallas import tpu as pltpu


# Row indices of the packed per-sub-layer [17, d_model] bias / LayerNorm array.
(_SA_QB, _SA_KB, _SA_VB, _SA_OB,
 _CA_QB, _CA_KB, _CA_VB, _CA_OB,
 _FFN_B2,
 _LN1_G, _LN1_B, _LN2_G, _LN2_B, _LN3_G, _LN3_B,
 _FIN_G, _FIN_B) = range(17)
_N_VEC_ROWS = 17


# ------------------------------ fused kernel ---------------------------------

def _decoder_layer_kernel(
    # per-batch activations
    x_ref, mem_ref, qpos_ref, kpos_ref,
    # compact RoPE tables [S, head_dim//2] (query tables pre-scaled by 1/sqrt(Dh))
    cqs_ref, sqs_ref, cq_ref, sq_ref, ck_ref, sk_ref,
    # sub-layer 1 (self_memory_attention) packed params
    wa1_ref, wf11_ref, wf12_ref, vec1_ref, fb1_ref,
    # sub-layer 2 (cross_memory_attention) packed params
    wa2_ref, wf21_ref, wf22_ref, vec2_ref, fb2_ref,
    # output
    out_ref,
    *, n_heads, head_dim):
    f32, bf16 = jnp.float32, jnp.bfloat16
    H, Dh = n_heads, head_dim
    D = H * Dh
    half = Dh // 2

    x0 = x_ref[0].astype(f32)
    mem = mem_ref[0].astype(f32)
    qpos = qpos_ref[0].astype(f32)
    kpos = kpos_ref[0].astype(f32)
    cqs, sqs = cqs_ref[...], sqs_ref[...]   # scaled query tables   [Sq, Dh/2]
    cq, sq = cq_ref[...], sq_ref[...]       # unscaled (Sq keys)    [Sq, Dh/2]
    ck, sk = ck_ref[...], sk_ref[...]       # unscaled (Sk keys)    [Sk, Dh/2]

    def split_heads(x):
        # [S, H*Dh] -> [H, S, Dh] via static lane slices + leading-dim stack
        # (no lane-splitting reshape; the per-head loop contains no matmuls).
        return jnp.stack([x[:, h * Dh:(h + 1) * Dh] for h in range(H)], axis=0)

    def merge_heads(x3):
        # [H, S, Dh] -> [S, H*Dh]
        return jnp.concatenate([x3[h] for h in range(H)], axis=-1)

    def rope(x3, cos, sin):
        # x3: [H, S, Dh] in de-interleaved (real-half | imag-half) per-head
        # layout; cos/sin: compact [S, Dh/2] broadcast across heads.  This is
        # the rotate-half form (no DxD swap matmul, no [S, D] tables).
        x1, x2 = x3[:, :, :half], x3[:, :, half:]
        c, s = cos[None, :, :], sin[None, :, :]
        return jnp.concatenate([x1 * c - x2 * s, x2 * c + x1 * s], axis=-1)

    def attention(q3, k3, v3, wo, bo):
        # Heads-batched bf16 MXU matmuls with f32 accumulation.
        s = jax.lax.dot_general(q3.astype(bf16), k3.astype(bf16),
                                (((2,), (2,)), ((0,), (0,))),
                                preferred_element_type=f32)          # [H, Sq, Sk]
        m = jnp.max(s, axis=-1, keepdims=True)
        p = jnp.exp(s - m)
        p = p / jnp.sum(p, axis=-1, keepdims=True)   # exact normalisation
        o3 = jax.lax.dot_general(p.astype(bf16), v3.astype(bf16),
                                 (((2,), (1,)), ((0,), (0,))),
                                 preferred_element_type=f32)         # [H, Sq, Dh]
        o = merge_heads(o3)                                          # [Sq, D]
        return jnp.dot(o.astype(bf16), wo, preferred_element_type=f32) + bo

    def sublayer(tgt, mem_c, kpos_c, ck_c, sk_c, wa, wf1, wf2, vec, fb1):
        def ln(x, gi, bi):
            mu = jnp.mean(x, axis=-1, keepdims=True)
            var = jnp.mean(jnp.square(x - mu), axis=-1, keepdims=True)
            return (x - mu) * jax.lax.rsqrt(var + 1e-5) * vec[gi:gi + 1] + vec[bi:bi + 1]

        # -- self-attention: q = k = LN1(tgt) + query_pos, v = LN1(tgt) --
        t2 = ln(tgt, _LN1_G, _LN1_B)
        qk = jnp.dot((t2 + qpos).astype(bf16), wa[:, 0:2 * D],
                     preferred_element_type=f32)
        q3 = rope(split_heads(qk[:, 0:D] + vec[_SA_QB:_SA_QB + 1]), cqs, sqs)
        k3 = rope(split_heads(qk[:, D:2 * D] + vec[_SA_KB:_SA_KB + 1]), cq, sq)
        v3 = split_heads(
            jnp.dot(t2.astype(bf16), wa[:, 2 * D:3 * D],
                    preferred_element_type=f32) + vec[_SA_VB:_SA_VB + 1])
        tgt = tgt + attention(q3, k3, v3, wa[:, 3 * D:4 * D],
                              vec[_SA_OB:_SA_OB + 1])

        # -- cross-attention: q = LN2(tgt)+query_pos, k = memory+pos, v = memory --
        # TODO(synk): num_k_exclude_rope (object-pointer tokens) path not modelled.
        t2 = ln(tgt, _LN2_G, _LN2_B)
        qc = jnp.dot((t2 + qpos).astype(bf16), wa[:, 4 * D:5 * D],
                     preferred_element_type=f32) + vec[_CA_QB:_CA_QB + 1]
        kc = jnp.dot((mem_c + kpos_c).astype(bf16), wa[:, 5 * D:6 * D],
                     preferred_element_type=f32) + vec[_CA_KB:_CA_KB + 1]
        vc = jnp.dot(mem_c.astype(bf16), wa[:, 6 * D:7 * D],
                     preferred_element_type=f32) + vec[_CA_VB:_CA_VB + 1]
        q3 = rope(split_heads(qc), cqs, sqs)
        k3 = rope(split_heads(kc), ck_c, sk_c)
        tgt = tgt + attention(q3, k3, split_heads(vc),
                              wa[:, 7 * D:8 * D], vec[_CA_OB:_CA_OB + 1])

        # -- feed-forward (relu; dropout = identity at inference) --
        t2 = ln(tgt, _LN3_G, _LN3_B)
        hdn = jnp.maximum(
            jnp.dot(t2.astype(bf16), wf1[...], preferred_element_type=f32) + fb1[...],
            0.0)
        tgt = tgt + jnp.dot(hdn.astype(bf16), wf2[...],
                            preferred_element_type=f32) + vec[_FFN_B2:_FFN_B2 + 1]

        # -- decoder-level LayerNorm folded into the sub-layer tail --
        return ln(tgt, _FIN_G, _FIN_B)

    vec1, vec2 = vec1_ref[...], vec2_ref[...]
    # self_memory_attention(x, x, pos=tgt_pos, query_pos=tgt_pos) + decoder norm1
    y = sublayer(x0, x0, qpos, cq, sq, wa1_ref, wf11_ref, wf12_ref, vec1, fb1_ref)
    # cross_memory_attention(y, memory, pos=src_pos, query_pos=tgt_pos) + decoder norm2
    z = sublayer(y, mem, kpos, ck, sk, wa2_ref, wf21_ref, wf22_ref, vec2, fb2_ref)
    out_ref[0] = z.astype(out_ref.dtype)


# ------------------------- RoPE (axial, SAM2-style) ---------------------------

def compute_axial_freqs(head_dim, end_x, end_y, theta=10000.0):
    """Compact cos/sin of the axial RoPE angles, shape [end_x*end_y, head_dim//2]."""
    idx = jnp.arange(0, head_dim, 4, dtype=jnp.float32)[: head_dim // 4]
    freqs = 1.0 / (theta ** (idx / head_dim))
    t = jnp.arange(end_x * end_y, dtype=jnp.float32)
    t_x = t % end_x
    t_y = jnp.floor(t / end_x)
    ang = jnp.concatenate([jnp.outer(t_x, freqs), jnp.outer(t_y, freqs)], axis=-1)
    return jnp.cos(ang), jnp.sin(ang)


# ----------------------------- decoder forward --------------------------------

def decoder_layer_forward(kp, x, memory, src_pos, tgt_pos, *, n_heads):
    # TODO(synk): tgt_mask path not implemented (reference call uses tgt_mask=None).
    B, Sq, D = x.shape
    Sk = memory.shape[1]
    Dh = D // n_heads

    side = int(round(math.sqrt(Sq)))
    assert side * side == Sq, "RoPEAttention requires a square query length"
    assert Sk % Sq == 0, "rope_k_repeat requires Sk to be a multiple of Sq"
    cos, sin = compute_axial_freqs(Dh, side, side)             # [Sq, Dh//2]
    scale = 1.0 / math.sqrt(Dh)
    cos_qs, sin_qs = cos * scale, sin * scale                  # 1/sqrt(Dh) on q only
    rep = Sk // Sq
    cos_k, sin_k = jnp.tile(cos, (rep, 1)), jnp.tile(sin, (rep, 1))   # rope_k_repeat

    kp1, kp2 = kp['self_mem'], kp['cross_mem']
    inputs = [
        x, memory, tgt_pos, src_pos,
        cos_qs, sin_qs, cos, sin, cos_k, sin_k,
        kp1['w_attn'], kp1['w_ffn1'], kp1['w_ffn2'], kp1['vecs'], kp1['b_ffn1'],
        kp2['w_attn'], kp2['w_ffn1'], kp2['w_ffn2'], kp2['vecs'], kp2['b_ffn1'],
    ]

    def batched(arr):
        seq = arr.shape[1]
        return pl.BlockSpec((1, seq, D), lambda b: (b, 0, 0))

    def full(arr):
        nd = arr.ndim
        return pl.BlockSpec(arr.shape, lambda b, _nd=nd: (0,) * _nd)

    in_specs = [batched(a) for a in inputs[:4]] + [full(a) for a in inputs[4:]]

    # Explicit scoped-VMEM budget sized from the double-buffered input footprint,
    # clamped below the smallest physical VMEM (v7x: 64 MiB per TensorCore).
    in_bytes = sum(int(a.size) * a.dtype.itemsize for a in inputs)
    vmem_limit = int(min(100 * 2**20, max(32 * 2**20, 8 * in_bytes)))

    kernel = functools.partial(_decoder_layer_kernel, n_heads=n_heads, head_dim=Dh)

    # TODO(synk): for SAM2-scale shapes (Sq~4k, Sk~tens of k, d_ff=2048) add a
    #             second 'parallel' grid axis over Sq tiles and stream memory /
    #             rope-k / K/V blocks flash-style over a trailing 'arbitrary'
    #             axis (m/l/acc scratch + pl.when init/finalise) so the working
    #             set fits v7x's 64 MiB VMEM and DMA overlaps compute.
    # TODO(synk): if d_model < 128, fold (B*Sq) into the lane dim of the output
    #             block so stores stay lane-dense (demo uses d_model = 128).
    return pl.pallas_call(
        kernel,
        grid=(B,),
        in_specs=in_specs,
        out_specs=pl.BlockSpec((1, Sq, D), lambda b: (b, 0, 0)),
        out_shape=jax.ShapeDtypeStruct((B, Sq, D), x.dtype),
        compiler_params=pltpu.CompilerParams(
            dimension_semantics=("parallel",),   # batch split across TCs
            vmem_limit_bytes=vmem_limit),
    )(*inputs)


# ------------------------- parameter preparation ------------------------------

def _deinterleave_perm(d_model, n_heads):
    """Per-head column permutation: interleaved (even, odd) pairs -> [evens | odds]."""
    dh = d_model // n_heads
    half = dh // 2
    idx = []
    for h in range(n_heads):
        base = h * dh
        idx += [base + 2 * j for j in range(half)]
        idx += [base + 2 * j + 1 for j in range(half)]
    return jnp.asarray(idx, dtype=jnp.int32)


def prepare_sublayer_params(p, final_g, final_b, d_model, n_heads):
    """Pack one MemoryAttentionLayer (+ trailing decoder LayerNorm) into the fused
    layout: bf16 [D, 8D] attention slab, bf16 FFN weights, f32 [17, D] bias/LN
    stack, f32 [1, d_ff] FFN bias.  Done once, offline."""
    perm = _deinterleave_perm(d_model, n_heads)
    sa, ca = p['self_attn'], p['cross_attn']

    def dw(lin):   # de-interleave q/k projection columns (RoPE rotate-half layout)
        return lin['w'][:, perm]

    def db(lin):
        return lin['b'][perm]

    w_attn = jnp.concatenate(
        [dw(sa['q']), dw(sa['k']), sa['v']['w'], sa['out']['w'],
         dw(ca['q']), dw(ca['k']), ca['v']['w'], ca['out']['w']],
        axis=1).astype(jnp.bfloat16)
    vecs = jnp.stack(
        [db(sa['q']), db(sa['k']), sa['v']['b'], sa['out']['b'],
         db(ca['q']), db(ca['k']), ca['v']['b'], ca['out']['b'],
         p['lin2']['b'],
         p['norm1_g'], p['norm1_b'], p['norm2_g'], p['norm2_b'],
         p['norm3_g'], p['norm3_b'], final_g, final_b]).astype(jnp.float32)
    assert vecs.shape[0] == _N_VEC_ROWS
    return {'w_attn': w_attn,
            'w_ffn1': p['lin1']['w'].astype(jnp.bfloat16),
            'w_ffn2': p['lin2']['w'].astype(jnp.bfloat16),
            'vecs': vecs,
            'b_ffn1': p['lin1']['b'].reshape(1, -1).astype(jnp.float32)}


def prepare_decoder_layer_params(p, d_model, n_heads):
    return {
        'self_mem': prepare_sublayer_params(p['self_mem'], p['norm1_g'], p['norm1_b'],
                                            d_model, n_heads),
        'cross_mem': prepare_sublayer_params(p['cross_mem'], p['norm2_g'], p['norm2_b'],
                                             d_model, n_heads),
    }


# ------------------------------ param init ------------------------------------

def init_linear_params(key, din, dout, scale=0.05):
    kw, kb = jax.random.split(key)
    return {'w': jax.random.normal(kw, (din, dout), jnp.float32) * scale,
            'b': jax.random.normal(kb, (dout,), jnp.float32) * scale}


def init_rope_attn_params(key, d_model):
    ks = jax.random.split(key, 4)
    return {'q': init_linear_params(ks[0], d_model, d_model),
            'k': init_linear_params(ks[1], d_model, d_model),
            'v': init_linear_params(ks[2], d_model, d_model),
            'out': init_linear_params(ks[3], d_model, d_model)}


def init_mem_layer_params(key, d_model, d_ff):
    ks = jax.random.split(key, 4)
    ones = jnp.ones((d_model,), jnp.float32)
    zeros = jnp.zeros((d_model,), jnp.float32)
    return {'self_attn': init_rope_attn_params(ks[0], d_model),
            'cross_attn': init_rope_attn_params(ks[1], d_model),
            'lin1': init_linear_params(ks[2], d_model, d_ff),
            'lin2': init_linear_params(ks[3], d_ff, d_model),
            'norm1_g': ones, 'norm1_b': zeros,
            'norm2_g': ones, 'norm2_b': zeros,
            'norm3_g': ones, 'norm3_b': zeros}


def init_decoder_layer_params(key, d_model, d_ff):
    k1, k2 = jax.random.split(key)
    ones = jnp.ones((d_model,), jnp.float32)
    zeros = jnp.zeros((d_model,), jnp.float32)
    return {'self_mem': init_mem_layer_params(k1, d_model, d_ff),
            'cross_mem': init_mem_layer_params(k2, d_model, d_ff),
            'norm1_g': ones, 'norm1_b': zeros,
            'norm2_g': ones, 'norm2_b': zeros}


# --------------------------------- main ----------------------------------------

if __name__ == "__main__":
    D_MODEL, D_FF, N_HEADS = 128, 256, 4       # head_dim = 32; lane-dense d_model
    B, S_X, S_MEM = 2, 16, 32                  # S_X = 4x4 spatial grid; S_MEM = 2*S_X

    key = jax.random.PRNGKey(0)
    k_params, k_x, k_mem, k_sp, k_tp = jax.random.split(key, 5)

    params = init_decoder_layer_params(k_params, D_MODEL, D_FF)
    kparams = prepare_decoder_layer_params(params, D_MODEL, N_HEADS)  # packed once

    x = jax.random.normal(k_x, (B, S_X, D_MODEL), jnp.float32)
    memory = jax.random.normal(k_mem, (B, S_MEM, D_MODEL), jnp.float32)
    src_pos = jax.random.normal(k_sp, (B, S_MEM, D_MODEL), jnp.float32)
    tgt_pos = jax.random.normal(k_tp, (B, S_X, D_MODEL), jnp.float32)

    fwd = jax.jit(functools.partial(decoder_layer_forward, n_heads=N_HEADS))
    out = fwd(kparams, x, memory, src_pos, tgt_pos)
    jax.block_until_ready(out)
    assert out.shape == (B, S_X, D_MODEL) and out.dtype == jnp.float32
    assert bool(jnp.all(jnp.isfinite(out)))
    print("KERNEL_OK")
</pallas_src>

<mosaic_0001>
module attributes {stable_mosaic.version = 11 : i64} {
  func.func @_decoder_layer_kernel(%arg0: i32, %arg1: memref<1x16x128xf32, #tpu.memory_space<vmem>>, %arg2: memref<1x32x128xf32, #tpu.memory_space<vmem>>, %arg3: memref<1x16x128xf32, #tpu.memory_space<vmem>>, %arg4: memref<1x32x128xf32, #tpu.memory_space<vmem>>, %arg5: memref<16x16xf32, #tpu.memory_space<vmem>>, %arg6: memref<16x16xf32, #tpu.memory_space<vmem>>, %arg7: memref<16x16xf32, #tpu.memory_space<vmem>>, %arg8: memref<16x16xf32, #tpu.memory_space<vmem>>, %arg9: memref<32x16xf32, #tpu.memory_space<vmem>>, %arg10: memref<32x16xf32, #tpu.memory_space<vmem>>, %arg11: memref<128x1024xbf16, #tpu.memory_space<vmem>>, %arg12: memref<128x256xbf16, #tpu.memory_space<vmem>>, %arg13: memref<256x128xbf16, #tpu.memory_space<vmem>>, %arg14: memref<17x128xf32, #tpu.memory_space<vmem>>, %arg15: memref<1x256xf32, #tpu.memory_space<vmem>>, %arg16: memref<128x1024xbf16, #tpu.memory_space<vmem>>, %arg17: memref<128x256xbf16, #tpu.memory_space<vmem>>, %arg18: memref<256x128xbf16, #tpu.memory_space<vmem>>, %arg19: memref<17x128xf32, #tpu.memory_space<vmem>>, %arg20: memref<1x256xf32, #tpu.memory_space<vmem>>, %arg21: memref<1x16x128xf32, #tpu.memory_space<vmem>>) attributes {dimension_semantics = [#tpu.dimension_semantics<parallel>], iteration_bounds = array<i64: 2>, scalar_prefetch = 0 : i64, scratch_operands = 0 : i64, tpu.core_type = #tpu.core_type<tc>, window_params = [{transform_indices = @transform_0, window_bounds = array<i64: 1, 16, 128>}, {transform_indices = @transform_1, window_bounds = array<i64: 1, 32, 128>}, {transform_indices = @transform_2, window_bounds = array<i64: 1, 16, 128>}, {transform_indices = @transform_3, window_bounds = array<i64: 1, 32, 128>}, {pipeline_mode = #tpu.pipeline_mode<synchronous>, transform_indices = @transform_4, window_bounds = array<i64: 16, 16>}, {pipeline_mode = #tpu.pipeline_mode<synchronous>, transform_indices = @transform_5, window_bounds = array<i64: 16, 16>}, {pipeline_mode = #tpu.pipeline_mode<synchronous>, transform_indices = @transform_6, window_bounds = array<i64: 16, 16>}, {pipeline_mode = #tpu.pipeline_mode<synchronous>, transform_indices = @transform_7, window_bounds = array<i64: 16, 16>}, {pipeline_mode = #tpu.pipeline_mode<synchronous>, transform_indices = @transform_8, window_bounds = array<i64: 32, 16>}, {pipeline_mode = #tpu.pipeline_mode<synchronous>, transform_indices = @transform_9, window_bounds = array<i64: 32, 16>}, {pipeline_mode = #tpu.pipeline_mode<synchronous>, transform_indices = @transform_10, window_bounds = array<i64: 128, 1024>}, {pipeline_mode = #tpu.pipeline_mode<synchronous>, transform_indices = @transform_11, window_bounds = array<i64: 128, 256>}, {pipeline_mode = #tpu.pipeline_mode<synchronous>, transform_indices = @transform_12, window_bounds = array<i64: 256, 128>}, {pipeline_mode = #tpu.pipeline_mode<synchronous>, transform_indices = @transform_13, window_bounds = array<i64: 17, 128>}, {pipeline_mode = #tpu.pipeline_mode<synchronous>, transform_indices = @transform_14, window_bounds = array<i64: 1, 256>}, {pipeline_mode = #tpu.pipeline_mode<synchronous>, transform_indices = @transform_15, window_bounds = array<i64: 128, 1024>}, {pipeline_mode = #tpu.pipeline_mode<synchronous>, transform_indices = @transform_16, window_bounds = array<i64: 128, 256>}, {pipeline_mode = #tpu.pipeline_mode<synchronous>, transform_indices = @transform_17, window_bounds = array<i64: 256, 128>}, {pipeline_mode = #tpu.pipeline_mode<synchronous>, transform_indices = @transform_18, window_bounds = array<i64: 17, 128>}, {pipeline_mode = #tpu.pipeline_mode<synchronous>, transform_indices = @transform_19, window_bounds = array<i64: 1, 256>}, {transform_indices = @transform_20, window_bounds = array<i64: 1, 16, 128>}]} {
    %c0 = arith.constant 0 : index
    %c0_0 = arith.constant 0 : index
    %c0_1 = arith.constant 0 : index
    %0 = vector.load %arg1[%c0, %c0_0, %c0_1] : memref<1x16x128xf32, #tpu.memory_space<vmem>>, vector<1x16x128xf32>
    %1 = vector.shape_cast %0 : vector<1x16x128xf32> to vector<16x128xf32>
    %c0_2 = arith.constant 0 : index
    %c0_3 = arith.constant 0 : index
    %c0_4 = arith.constant 0 : index
    %2 = vector.load %arg2[%c0_2, %c0_3, %c0_4] : memref<1x32x128xf32, #tpu.memory_space<vmem>>, vector<1x32x128xf32>
    %3 = vector.shape_cast %2 : vector<1x32x128xf32> to vector<32x128xf32>
    %c0_5 = arith.constant 0 : index
    %c0_6 = arith.constant 0 : index
    %c0_7 = arith.constant 0 : index
    %4 = vector.load %arg3[%c0_5, %c0_6, %c0_7] : memref<1x16x128xf32, #tpu.memory_space<vmem>>, vector<1x16x128xf32>
    %5 = vector.shape_cast %4 : vector<1x16x128xf32> to vector<16x128xf32>
    %c0_8 = arith.constant 0 : index
    %c0_9 = arith.constant 0 : index
    %c0_10 = arith.constant 0 : index
    %6 = vector.load %arg4[%c0_8, %c0_9, %c0_10] : memref<1x32x128xf32, #tpu.memory_space<vmem>>, vector<1x32x128xf32>
    %7 = vector.shape_cast %6 : vector<1x32x128xf32> to vector<32x128xf32>
    %c0_11 = arith.constant 0 : index
    %c0_12 = arith.constant 0 : index
    %8 = vector.load %arg5[%c0_11, %c0_12] : memref<16x16xf32, #tpu.memory_space<vmem>>, vector<16x16xf32>
    %c0_13 = arith.constant 0 : index
    %c0_14 = arith.constant 0 : index
    %9 = vector.load %arg6[%c0_13, %c0_14] : memref<16x16xf32, #tpu.memory_space<vmem>>, vector<16x16xf32>
    %c0_15 = arith.constant 0 : index
    %c0_16 = arith.constant 0 : index
    %10 = vector.load %arg7[%c0_15, %c0_16] : memref<16x16xf32, #tpu.memory_space<vmem>>, vector<16x16xf32>
    %c0_17 = arith.constant 0 : index
    %c0_18 = arith.constant 0 : index
    %11 = vector.load %arg8[%c0_17, %c0_18] : memref<16x16xf32, #tpu.memory_space<vmem>>, vector<16x16xf32>
    %c0_19 = arith.constant 0 : index
    %c0_20 = arith.constant 0 : index
    %12 = vector.load %arg9[%c0_19, %c0_20] : memref<32x16xf32, #tpu.memory_space<vmem>>, vector<32x16xf32>
    %c0_21 = arith.constant 0 : index
    %c0_22 = arith.constant 0 : index
    %13 = vector.load %arg10[%c0_21, %c0_22] : memref<32x16xf32, #tpu.memory_space<vmem>>, vector<32x16xf32>
    %c0_23 = arith.constant 0 : index
    %c0_24 = arith.constant 0 : index
    %14 = vector.load %arg14[%c0_23, %c0_24] : memref<17x128xf32, #tpu.memory_space<vmem>>, vector<17x128xf32>
    %c0_25 = arith.constant 0 : index
    %c0_26 = arith.constant 0 : index
    %15 = vector.load %arg19[%c0_25, %c0_26] : memref<17x128xf32, #tpu.memory_space<vmem>>, vector<17x128xf32>
    %cst = arith.constant dense<0.000000e+00> : vector<16xf32>
    %16 = vector.multi_reduction <add>, %1, %cst [1] : vector<16x128xf32> to vector<16xf32>
    %17 = vector.shape_cast %16 : vector<16xf32> to vector<16x1xf32>
    %cst_27 = arith.constant 1.280000e+02 : f32
    %18 = vector.broadcast %cst_27 : f32 to vector<16x1xf32>
    %19 = arith.divf %17, %18 : vector<16x1xf32>
    %20 = vector.broadcast %19 : vector<16x1xf32> to vector<16x128xf32>
    %21 = arith.subf %1, %20 : vector<16x128xf32>
    %22 = arith.mulf %21, %21 : vector<16x128xf32>
    %cst_28 = arith.constant dense<0.000000e+00> : vector<16xf32>
    %23 = vector.multi_reduction <add>, %22, %cst_28 [1] : vector<16x128xf32> to vector<16xf32>
    %24 = vector.shape_cast %23 : vector<16xf32> to vector<16x1xf32>
    %cst_29 = arith.constant 1.280000e+02 : f32
    %25 = vector.broadcast %cst_29 : f32 to vector<16x1xf32>
    %26 = arith.divf %24, %25 : vector<16x1xf32>
    %27 = vector.broadcast %19 : vector<16x1xf32> to vector<16x128xf32>
    %28 = arith.subf %1, %27 : vector<16x128xf32>
    %cst_30 = arith.constant 9.99999974E-6 : f32
    %29 = vector.broadcast %cst_30 : f32 to vector<16x1xf32>
    %30 = arith.addf %26, %29 : vector<16x1xf32>
    %31 = math.rsqrt %30 : vector<16x1xf32>
    %32 = vector.broadcast %31 : vector<16x1xf32> to vector<16x128xf32>
    %33 = arith.mulf %28, %32 : vector<16x128xf32>
    %34 = vector.extract_strided_slice %14 {offsets = [9, 0], sizes = [1, 128], strides = [1, 1]} : vector<17x128xf32> to vector<1x128xf32>
    %35 = vector.broadcast %34 : vector<1x128xf32> to vector<16x128xf32>
    %36 = arith.mulf %33, %35 : vector<16x128xf32>
    %37 = vector.extract_strided_slice %14 {offsets = [10, 0], sizes = [1, 128], strides = [1, 1]} : vector<17x128xf32> to vector<1x128xf32>
    %38 = vector.broadcast %37 : vector<1x128xf32> to vector<16x128xf32>
    %39 = arith.addf %36, %38 : vector<16x128xf32>
    %40 = arith.addf %39, %5 : vector<16x128xf32>
    %41 = arith.truncf %40 : vector<16x128xf32> to vector<16x128xbf16>
    %c0_31 = arith.constant 0 : index
    %c0_32 = arith.constant 0 : index
    %42 = vector.load %arg11[%c0_31, %c0_32] : memref<128x1024xbf16, #tpu.memory_space<vmem>>, vector<128x256xbf16>
    %cst_33 = arith.constant dense<0.000000e+00> : vector<16x256xf32>
    %43 = tpu.matmul %41, %42, %cst_33 {dimension_numbers = #tpu.dot_dimension_numbers<[1], [0], [0], [1], [0, 0, 1, 1], [], []>} : vector<16x128xbf16>, vector<128x256xbf16>, vector<16x256xf32> -> vector<16x256xf32>
    %44 = vector.extract_strided_slice %43 {offsets = [0, 0], sizes = [16, 128], strides = [1, 1]} : vector<16x256xf32> to vector<16x128xf32>
    %45 = vector.extract_strided_slice %14 {offsets = [0, 0], sizes = [1, 128], strides = [1, 1]} : vector<17x128xf32> to vector<1x128xf32>
    %46 = vector.broadcast %45 : vector<1x128xf32> to vector<16x128xf32>
    %47 = arith.addf %44, %46 : vector<16x128xf32>
    %48 = vector.extract_strided_slice %47 {offsets = [0, 0], sizes = [16, 32], strides = [1, 1]} : vector<16x128xf32> to vector<16x32xf32>
    %49 = vector.extract_strided_slice %47 {offsets = [0, 32], sizes = [16, 32], strides = [1, 1]} : vector<16x128xf32> to vector<16x32xf32>
    %50 = vector.extract_strided_slice %47 {offsets = [0, 64], sizes = [16, 32], strides = [1, 1]} : vector<16x128xf32> to vector<16x32xf32>
    %51 = vector.extract_strided_slice %47 {offsets = [0, 96], sizes = [16, 32], strides = [1, 1]} : vector<16x128xf32> to vector<16x32xf32>
    %52 = vector.shape_cast %48 : vector<16x32xf32> to vector<1x16x32xf32>
    %53 = vector.shape_cast %49 : vector<16x32xf32> to vector<1x16x32xf32>
    %54 = vector.shape_cast %50 : vector<16x32xf32> to vector<1x16x32xf32>
    %55 = vector.shape_cast %51 : vector<16x32xf32> to vector<1x16x32xf32>
    %56 = tpu.concatenate %52, %53, %54, %55 in 0 : vector<1x16x32xf32>, vector<1x16x32xf32>, vector<1x16x32xf32>, vector<1x16x32xf32> -> vector<4x16x32xf32>
    %57 = vector.extract_strided_slice %56 {offsets = [0, 0, 0], sizes = [4, 16, 16], strides = [1, 1, 1]} : vector<4x16x32xf32> to vector<4x16x16xf32>
    %58 = vector.extract_strided_slice %56 {offsets = [0, 0, 16], sizes = [4, 16, 16], strides = [1, 1, 1]} : vector<4x16x32xf32> to vector<4x16x16xf32>
    %59 = vector.shape_cast %8 : vector<16x16xf32> to vector<1x16x16xf32>
    %60 = vector.shape_cast %9 : vector<16x16xf32> to vector<1x16x16xf32>
    %61 = vector.broadcast %59 : vector<1x16x16xf32> to vector<4x16x16xf32>
    %62 = arith.mulf %57, %61 : vector<4x16x16xf32>
    %63 = vector.broadcast %60 : vector<1x16x16xf32> to vector<4x16x16xf32>
    %64 = arith.mulf %58, %63 : vector<4x16x16xf32>
    %65 = arith.subf %62, %64 : vector<4x16x16xf32>
    %66 = vector.broadcast %59 : vector<1x16x16xf32> to vector<4x16x16xf32>
    %67 = arith.mulf %58, %66 : vector<4x16x16xf32>
    %68 = vector.broadcast %60 : vector<1x16x16xf32> to vector<4x16x16xf32>
    %69 = arith.mulf %57, %68 : vector<4x16x16xf32>
    %70 = arith.addf %67, %69 : vector<4x16x16xf32>
    %71 = tpu.concatenate %65, %70 in 2 : vector<4x16x16xf32>, vector<4x16x16xf32> -> vector<4x16x32xf32>
    %72 = vector.extract_strided_slice %43 {offsets = [0, 128], sizes = [16, 128], strides = [1, 1]} : vector<16x256xf32> to vector<16x128xf32>
    %73 = vector.extract_strided_slice %14 {offsets = [1, 0], sizes = [1, 128], strides = [1, 1]} : vector<17x128xf32> to vector<1x128xf32>
    %74 = vector.broadcast %73 : vector<1x128xf32> to vector<16x128xf32>
    %75 = arith.addf %72, %74 : vector<16x128xf32>
    %76 = vector.extract_strided_slice %75 {offsets = [0, 0], sizes = [16, 32], strides = [1, 1]} : vector<16x128xf32> to vector<16x32xf32>
    %77 = vector.extract_strided_slice %75 {offsets = [0, 32], sizes = [16, 32], strides = [1, 1]} : vector<16x128xf32> to vector<16x32xf32>
    %78 = vector.extract_strided_slice %75 {offsets = [0, 64], sizes = [16, 32], strides = [1, 1]} : vector<16x128xf32> to vector<16x32xf32>
    %79 = vector.extract_strided_slice %75 {offsets = [0, 96], sizes = [16, 32], strides = [1, 1]} : vector<16x128xf32> to vector<16x32xf32>
    %80 = vector.shape_cast %76 : vector<16x32xf32> to vector<1x16x32xf32>
    %81 = vector.shape_cast %77 : vector<16x32xf32> to vector<1x16x32xf32>
    %82 = vector.shape_cast %78 : vector<16x32xf32> to vector<1x16x32xf32>
    %83 = vector.shape_cast %79 : vector<16x32xf32> to vector<1x16x32xf32>
    %84 = tpu.concatenate %80, %81, %82, %83 in 0 : vector<1x16x32xf32>, vector<1x16x32xf32>, vector<1x16x32xf32>, vector<1x16x32xf32> -> vector<4x16x32xf32>
    %85 = vector.extract_strided_slice %84 {offsets = [0, 0, 0], sizes = [4, 16, 16], strides = [1, 1, 1]} : vector<4x16x32xf32> to vector<4x16x16xf32>
    %86 = vector.extract_strided_slice %84 {offsets = [0, 0, 16], sizes = [4, 16, 16], strides = [1, 1, 1]} : vector<4x16x32xf32> to vector<4x16x16xf32>
    %87 = vector.shape_cast %10 : vector<16x16xf32> to vector<1x16x16xf32>
    %88 = vector.shape_cast %11 : vector<16x16xf32> to vector<1x16x16xf32>
    %89 = vector.broadcast %87 : vector<1x16x16xf32> to vector<4x16x16xf32>
    %90 = arith.mulf %85, %89 : vector<4x16x16xf32>
    %91 = vector.broadcast %88 : vector<1x16x16xf32> to vector<4x16x16xf32>
    %92 = arith.mulf %86, %91 : vector<4x16x16xf32>
    %93 = arith.subf %90, %92 : vector<4x16x16xf32>
    %94 = vector.broadcast %87 : vector<1x16x16xf32> to vector<4x16x16xf32>
    %95 = arith.mulf %86, %94 : vector<4x16x16xf32>
    %96 = vector.broadcast %88 : vector<1x16x16xf32> to vector<4x16x16xf32>
    %97 = arith.mulf %85, %96 : vector<4x16x16xf32>
    %98 = arith.addf %95, %97 : vector<4x16x16xf32>
    %99 = tpu.concatenate %93, %98 in 2 : vector<4x16x16xf32>, vector<4x16x16xf32> -> vector<4x16x32xf32>
    %100 = arith.truncf %39 : vector<16x128xf32> to vector<16x128xbf16>
    %c0_34 = arith.constant 0 : index
    %c256 = arith.constant 256 : index
    %101 = vector.load %arg11[%c0_34, %c256] : memref<128x1024xbf16, #tpu.memory_space<vmem>>, vector<128x128xbf16>
    %cst_35 = arith.constant dense<0.000000e+00> : vector<16x128xf32>
    %102 = tpu.matmul %100, %101, %cst_35 {dimension_numbers = #tpu.dot_dimension_numbers<[1], [0], [0], [1], [0, 0, 1, 1], [], []>} : vector<16x128xbf16>, vector<128x128xbf16>, vector<16x128xf32> -> vector<16x128xf32>
    %103 = vector.extract_strided_slice %14 {offsets = [2, 0], sizes = [1, 128], strides = [1, 1]} : vector<17x128xf32> to vector<1x128xf32>
    %104 = vector.broadcast %103 : vector<1x128xf32> to vector<16x128xf32>
    %105 = arith.addf %102, %104 : vector<16x128xf32>
    %106 = vector.extract_strided_slice %105 {offsets = [0, 0], sizes = [16, 32], strides = [1, 1]} : vector<16x128xf32> to vector<16x32xf32>
    %107 = vector.extract_strided_slice %105 {offsets = [0, 32], sizes = [16, 32], strides = [1, 1]} : vector<16x128xf32> to vector<16x32xf32>
    %108 = vector.extract_strided_slice %105 {offsets = [0, 64], sizes = [16, 32], strides = [1, 1]} : vector<16x128xf32> to vector<16x32xf32>
    %109 = vector.extract_strided_slice %105 {offsets = [0, 96], sizes = [16, 32], strides = [1, 1]} : vector<16x128xf32> to vector<16x32xf32>
    %110 = vector.shape_cast %106 : vector<16x32xf32> to vector<1x16x32xf32>
    %111 = vector.shape_cast %107 : vector<16x32xf32> to vector<1x16x32xf32>
    %112 = vector.shape_cast %108 : vector<16x32xf32> to vector<1x16x32xf32>
    %113 = vector.shape_cast %109 : vector<16x32xf32> to vector<1x16x32xf32>
    %114 = tpu.concatenate %110, %111, %112, %113 in 0 : vector<1x16x32xf32>, vector<1x16x32xf32>, vector<1x16x32xf32>, vector<1x16x32xf32> -> vector<4x16x32xf32>
    %c0_36 = arith.constant 0 : index
    %c384 = arith.constant 384 : index
    %115 = vector.load %arg11[%c0_36, %c384] : memref<128x1024xbf16, #tpu.memory_space<vmem>>, vector<128x128xbf16>
    %116 = vector.extract_strided_slice %14 {offsets = [3, 0], sizes = [1, 128], strides = [1, 1]} : vector<17x128xf32> to vector<1x128xf32>
    %117 = arith.truncf %71 : vector<4x16x32xf32> to vector<4x16x32xbf16>
    %118 = arith.truncf %99 : vector<4x16x32xf32> to vector<4x16x32xbf16>
    %cst_37 = arith.constant dense<0.000000e+00> : vector<4x16x16xf32>
    %119 = tpu.matmul %117, %118, %cst_37 {dimension_numbers = #tpu.dot_dimension_numbers<[2], [2], [1], [1], [0, 0, 0, 1, 1, 1], [0], [0]>} : vector<4x16x32xbf16>, vector<4x16x32xbf16>, vector<4x16x16xf32> -> vector<4x16x16xf32>
    %cst_38 = arith.constant dense<0xFF800000> : vector<4x16xf32>
    %120 = vector.multi_reduction <maximumf>, %119, %cst_38 [2] : vector<4x16x16xf32> to vector<4x16xf32>
    %121 = vector.shape_cast %120 : vector<4x16xf32> to vector<4x16x1xf32>
    %122 = vector.broadcast %121 : vector<4x16x1xf32> to vector<4x16x16xf32>
    %123 = arith.subf %119, %122 : vector<4x16x16xf32>
    %124 = math.exp %123 : vector<4x16x16xf32>
    %cst_39 = arith.constant dense<0.000000e+00> : vector<4x16xf32>
    %125 = vector.multi_reduction <add>, %124, %cst_39 [2] : vector<4x16x16xf32> to vector<4x16xf32>
    %126 = vector.shape_cast %125 : vector<4x16xf32> to vector<4x16x1xf32>
    %127 = vector.broadcast %126 : vector<4x16x1xf32> to vector<4x16x16xf32>
    %128 = arith.divf %124, %127 : vector<4x16x16xf32>
    %129 = arith.truncf %128 : vector<4x16x16xf32> to vector<4x16x16xbf16>
    %130 = arith.truncf %114 : vector<4x16x32xf32> to vector<4x16x32xbf16>
    %cst_40 = arith.constant dense<0.000000e+00> : vector<4x16x32xf32>
    %131 = tpu.matmul %129, %130, %cst_40 {dimension_numbers = #tpu.dot_dimension_numbers<[2], [1], [1], [2], [0, 0, 0, 1, 1, 2], [0], [0]>} : vector<4x16x16xbf16>, vector<4x16x32xbf16>, vector<4x16x32xf32> -> vector<4x16x32xf32>
    %132 = vector.extract_strided_slice %131 {offsets = [0, 0, 0], sizes = [1, 16, 32], strides = [1, 1, 1]} : vector<4x16x32xf32> to vector<1x16x32xf32>
    %133 = vector.shape_cast %132 : vector<1x16x32xf32> to vector<16x32xf32>
    %134 = vector.extract_strided_slice %131 {offsets = [1, 0, 0], sizes = [1, 16, 32], strides = [1, 1, 1]} : vector<4x16x32xf32> to vector<1x16x32xf32>
    %135 = vector.shape_cast %134 : vector<1x16x32xf32> to vector<16x32xf32>
    %136 = vector.extract_strided_slice %131 {offsets = [2, 0, 0], sizes = [1, 16, 32], strides = [1, 1, 1]} : vector<4x16x32xf32> to vector<1x16x32xf32>
    %137 = vector.shape_cast %136 : vector<1x16x32xf32> to vector<16x32xf32>
    %138 = vector.extract_strided_slice %131 {offsets = [3, 0, 0], sizes = [1, 16, 32], strides = [1, 1, 1]} : vector<4x16x32xf32> to vector<1x16x32xf32>
    %139 = vector.shape_cast %138 : vector<1x16x32xf32> to vector<16x32xf32>
    %140 = tpu.concatenate %133, %135, %137, %139 in 1 : vector<16x32xf32>, vector<16x32xf32>, vector<16x32xf32>, vector<16x32xf32> -> vector<16x128xf32>
    %141 = arith.truncf %140 : vector<16x128xf32> to vector<16x128xbf16>
    %cst_41 = arith.constant dense<0.000000e+00> : vector<16x128xf32>
    %142 = tpu.matmul %141, %115, %cst_41 {dimension_numbers = #tpu.dot_dimension_numbers<[1], [0], [0], [1], [0, 0, 1, 1], [], []>} : vector<16x128xbf16>, vector<128x128xbf16>, vector<16x128xf32> -> vector<16x128xf32>
    %143 = vector.broadcast %116 : vector<1x128xf32> to vector<16x128xf32>
    %144 = arith.addf %142, %143 : vector<16x128xf32>
    %145 = arith.addf %1, %144 : vector<16x128xf32>
    %cst_42 = arith.constant dense<0.000000e+00> : vector<16xf32>
    %146 = vector.multi_reduction <add>, %145, %cst_42 [1] : vector<16x128xf32> to vector<16xf32>
    %147 = vector.shape_cast %146 : vector<16xf32> to vector<16x1xf32>
    %cst_43 = arith.constant 1.280000e+02 : f32
    %148 = vector.broadcast %cst_43 : f32 to vector<16x1xf32>
    %149 = arith.divf %147, %148 : vector<16x1xf32>
    %150 = vector.broadcast %149 : vector<16x1xf32> to vector<16x128xf32>
    %151 = arith.subf %145, %150 : vector<16x128xf32>
    %152 = arith.mulf %151, %151 : vector<16x128xf32>
    %cst_44 = arith.constant dense<0.000000e+00> : vector<16xf32>
    %153 = vector.multi_reduction <add>, %152, %cst_44 [1] : vector<16x128xf32> to vector<16xf32>
    %154 = vector.shape_cast %153 : vector<16xf32> to vector<16x1xf32>
    %cst_45 = arith.constant 1.280000e+02 : f32
    %155 = vector.broadcast %cst_45 : f32 to vector<16x1xf32>
    %156 = arith.divf %154, %155 : vector<16x1xf32>
    %157 = vector.broadcast %149 : vector<16x1xf32> to vector<16x128xf32>
    %158 = arith.subf %145, %157 : vector<16x128xf32>
    %cst_46 = arith.constant 9.99999974E-6 : f32
    %159 = vector.broadcast %cst_46 : f32 to vector<16x1xf32>
    %160 = arith.addf %156, %159 : vector<16x1xf32>
    %161 = math.rsqrt %160 : vector<16x1xf32>
    %162 = vector.broadcast %161 : vector<16x1xf32> to vector<16x128xf32>
    %163 = arith.mulf %158, %162 : vector<16x128xf32>
    %164 = vector.extract_strided_slice %14 {offsets = [11, 0], sizes = [1, 128], strides = [1, 1]} : vector<17x128xf32> to vector<1x128xf32>
    %165 = vector.broadcast %164 : vector<1x128xf32> to vector<16x128xf32>
    %166 = arith.mulf %163, %165 : vector<16x128xf32>
    %167 = vector.extract_strided_slice %14 {offsets = [12, 0], sizes = [1, 128], strides = [1, 1]} : vector<17x128xf32> to vector<1x128xf32>
    %168 = vector.broadcast %167 : vector<1x128xf32> to vector<16x128xf32>
    %169 = arith.addf %166, %168 : vector<16x128xf32>
    %170 = arith.addf %169, %5 : vector<16x128xf32>
    %171 = arith.truncf %170 : vector<16x128xf32> to vector<16x128xbf16>
    %c0_47 = arith.constant 0 : index
    %c512 = arith.constant 512 : index
    %172 = vector.load %arg11[%c0_47, %c512] : memref<128x1024xbf16, #tpu.memory_space<vmem>>, vector<128x128xbf16>
    %cst_48 = arith.constant dense<0.000000e+00> : vector<16x128xf32>
    %173 = tpu.matmul %171, %172, %cst_48 {dimension_numbers = #tpu.dot_dimension_numbers<[1], [0], [0], [1], [0, 0, 1, 1], [], []>} : vector<16x128xbf16>, vector<128x128xbf16>, vector<16x128xf32> -> vector<16x128xf32>
    %174 = vector.extract_strided_slice %14 {offsets = [4, 0], sizes = [1, 128], strides = [1, 1]} : vector<17x128xf32> to vector<1x128xf32>
    %175 = vector.broadcast %174 : vector<1x128xf32> to vector<16x128xf32>
    %176 = arith.addf %173, %175 : vector<16x128xf32>
    %177 = arith.addf %1, %5 : vector<16x128xf32>
    %178 = arith.truncf %177 : vector<16x128xf32> to vector<16x128xbf16>
    %c0_49 = arith.constant 0 : index
    %c640 = arith.constant 640 : index
    %179 = vector.load %arg11[%c0_49, %c640] : memref<128x1024xbf16, #tpu.memory_space<vmem>>, vector<128x128xbf16>
    %cst_50 = arith.constant dense<0.000000e+00> : vector<16x128xf32>
    %180 = tpu.matmul %178, %179, %cst_50 {dimension_numbers = #tpu.dot_dimension_numbers<[1], [0], [0], [1], [0, 0, 1, 1], [], []>} : vector<16x128xbf16>, vector<128x128xbf16>, vector<16x128xf32> -> vector<16x128xf32>
    %181 = vector.extract_strided_slice %14 {offsets = [5, 0], sizes = [1, 128], strides = [1, 1]} : vector<17x128xf32> to vector<1x128xf32>
    %182 = vector.broadcast %181 : vector<1x128xf32> to vector<16x128xf32>
    %183 = arith.addf %180, %182 : vector<16x128xf32>
    %184 = arith.truncf %1 : vector<16x128xf32> to vector<16x128xbf16>
    %c0_51 = arith.constant 0 : index
    %c768 = arith.constant 768 : index
    %185 = vector.load %arg11[%c0_51, %c768] : memref<128x1024xbf16, #tpu.memory_space<vmem>>, vector<128x128xbf16>
    %cst_52 = arith.constant dense<0.000000e+00> : vector<16x128xf32>
    %186 = tpu.matmul %184, %185, %cst_52 {dimension_numbers = #tpu.dot_dimension_numbers<[1], [0], [0], [1], [0, 0, 1, 1], [], []>} : vector<16x128xbf16>, vector<128x128xbf16>, vector<16x128xf32> -> vector<16x128xf32>
    %187 = vector.extract_strided_slice %14 {offsets = [6, 0], sizes = [1, 128], strides = [1, 1]} : vector<17x128xf32> to vector<1x128xf32>
    %188 = vector.broadcast %187 : vector<1x128xf32> to vector<16x128xf32>
    %189 = arith.addf %186, %188 : vector<16x128xf32>
    %190 = vector.extract_strided_slice %176 {offsets = [0, 0], sizes = [16, 32], strides = [1, 1]} : vector<16x128xf32> to vector<16x32xf32>
    %191 = vector.extract_strided_slice %176 {offsets = [0, 32], sizes = [16, 32], strides = [1, 1]} : vector<16x128xf32> to vector<16x32xf32>
    %192 = vector.extract_strided_slice %176 {offsets = [0, 64], sizes = [16, 32], strides = [1, 1]} : vector<16x128xf32> to vector<16x32xf32>
    %193 = vector.extract_strided_slice %176 {offsets = [0, 96], sizes = [16, 32], strides = [1, 1]} : vector<16x128xf32> to vector<16x32xf32>
    %194 = vector.shape_cast %190 : vector<16x32xf32> to vector<1x16x32xf32>
    %195 = vector.shape_cast %191 : vector<16x32xf32> to vector<1x16x32xf32>
    %196 = vector.shape_cast %192 : vector<16x32xf32> to vector<1x16x32xf32>
    %197 = vector.shape_cast %193 : vector<16x32xf32> to vector<1x16x32xf32>
    %198 = tpu.concatenate %194, %195, %196, %197 in 0 : vector<1x16x32xf32>, vector<1x16x32xf32>, vector<1x16x32xf32>, vector<1x16x32xf32> -> vector<4x16x32xf32>
    %199 = vector.extract_strided_slice %198 {offsets = [0, 0, 0], sizes = [4, 16, 16], strides = [1, 1, 1]} : vector<4x16x32xf32> to vector<4x16x16xf32>
    %200 = vector.extract_strided_slice %198 {offsets = [0, 0, 16], sizes = [4, 16, 16], strides = [1, 1, 1]} : vector<4x16x32xf32> to vector<4x16x16xf32>
    %201 = vector.shape_cast %8 : vector<16x16xf32> to vector<1x16x16xf32>
    %202 = vector.shape_cast %9 : vector<16x16xf32> to vector<1x16x16xf32>
    %203 = vector.broadcast %201 : vector<1x16x16xf32> to vector<4x16x16xf32>
    %204 = arith.mulf %199, %203 : vector<4x16x16xf32>
    %205 = vector.broadcast %202 : vector<1x16x16xf32> to vector<4x16x16xf32>
    %206 = arith.mulf %200, %205 : vector<4x16x16xf32>
    %207 = arith.subf %204, %206 : vector<4x16x16xf32>
    %208 = vector.broadcast %201 : vector<1x16x16xf32> to vector<4x16x16xf32>
    %209 = arith.mulf %200, %208 : vector<4x16x16xf32>
    %210 = vector.broadcast %202 : vector<1x16x16xf32> to vector<4x16x16xf32>
    %211 = arith.mulf %199, %210 : vector<4x16x16xf32>
    %212 = arith.addf %209, %211 : vector<4x16x16xf32>
    %213 = tpu.concatenate %207, %212 in 2 : vector<4x16x16xf32>, vector<4x16x16xf32> -> vector<4x16x32xf32>
    %214 = vector.extract_strided_slice %183 {offsets = [0, 0], sizes = [16, 32], strides = [1, 1]} : vector<16x128xf32> to vector<16x32xf32>
    %215 = vector.extract_strided_slice %183 {offsets = [0, 32], sizes = [16, 32], strides = [1, 1]} : vector<16x128xf32> to vector<16x32xf32>
    %216 = vector.extract_strided_slice %183 {offsets = [0, 64], sizes = [16, 32], strides = [1, 1]} : vector<16x128xf32> to vector<16x32xf32>
    %217 = vector.extract_strided_slice %183 {offsets = [0, 96], sizes = [16, 32], strides = [1, 1]} : vector<16x128xf32> to vector<16x32xf32>
    %218 = vector.shape_cast %214 : vector<16x32xf32> to vector<1x16x32xf32>
    %219 = vector.shape_cast %215 : vector<16x32xf32> to vector<1x16x32xf32>
    %220 = vector.shape_cast %216 : vector<16x32xf32> to vector<1x16x32xf32>
    %221 = vector.shape_cast %217 : vector<16x32xf32> to vector<1x16x32xf32>
    %222 = tpu.concatenate %218, %219, %220, %221 in 0 : vector<1x16x32xf32>, vector<1x16x32xf32>, vector<1x16x32xf32>, vector<1x16x32xf32> -> vector<4x16x32xf32>
    %223 = vector.extract_strided_slice %222 {offsets = [0, 0, 0], sizes = [4, 16, 16], strides = [1, 1, 1]} : vector<4x16x32xf32> to vector<4x16x16xf32>
    %224 = vector.extract_strided_slice %222 {offsets = [0, 0, 16], sizes = [4, 16, 16], strides = [1, 1, 1]} : vector<4x16x32xf32> to vector<4x16x16xf32>
    %225 = vector.shape_cast %10 : vector<16x16xf32> to vector<1x16x16xf32>
    %226 = vector.shape_cast %11 : vector<16x16xf32> to vector<1x16x16xf32>
    %227 = vector.broadcast %225 : vector<1x16x16xf32> to vector<4x16x16xf32>
    %228 = arith.mulf %223, %227 : vector<4x16x16xf32>
    %229 = vector.broadcast %226 : vector<1x16x16xf32> to vector<4x16x16xf32>
    %230 = arith.mulf %224, %229 : vector<4x16x16xf32>
    %231 = arith.subf %228, %230 : vector<4x16x16xf32>
    %232 = vector.broadcast %225 : vector<1x16x16xf32> to vector<4x16x16xf32>
    %233 = arith.mulf %224, %232 : vector<4x16x16xf32>
    %234 = vector.broadcast %226 : vector<1x16x16xf32> to vector<4x16x16xf32>
    %235 = arith.mulf %223, %234 : vector<4x16x16xf32>
    %236 = arith.addf %233, %235 : vector<4x16x16xf32>
    %237 = tpu.concatenate %231, %236 in 2 : vector<4x16x16xf32>, vector<4x16x16xf32> -> vector<4x16x32xf32>
    %238 = vector.extract_strided_slice %189 {offsets = [0, 0], sizes = [16, 32], strides = [1, 1]} : vector<16x128xf32> to vector<16x32xf32>
    %239 = vector.extract_strided_slice %189 {offsets = [0, 32], sizes = [16, 32], strides = [1, 1]} : vector<16x128xf32> to vector<16x32xf32>
    %240 = vector.extract_strided_slice %189 {offsets = [0, 64], sizes = [16, 32], strides = [1, 1]} : vector<16x128xf32> to vector<16x32xf32>
    %241 = vector.extract_strided_slice %189 {offsets = [0, 96], sizes = [16, 32], strides = [1, 1]} : vector<16x128xf32> to vector<16x32xf32>
    %242 = vector.shape_cast %238 : vector<16x32xf32> to vector<1x16x32xf32>
    %243 = vector.shape_cast %239 : vector<16x32xf32> to vector<1x16x32xf32>
    %244 = vector.shape_cast %240 : vector<16x32xf32> to vector<1x16x32xf32>
    %245 = vector.shape_cast %241 : vector<16x32xf32> to vector<1x16x32xf32>
    %246 = tpu.concatenate %242, %243, %244, %245 in 0 : vector<1x16x32xf32>, vector<1x16x32xf32>, vector<1x16x32xf32>, vector<1x16x32xf32> -> vector<4x16x32xf32>
    %c0_53 = arith.constant 0 : index
    %c896 = arith.constant 896 : index
    %247 = vector.load %arg11[%c0_53, %c896] : memref<128x1024xbf16, #tpu.memory_space<vmem>>, vector<128x128xbf16>
    %248 = vector.extract_strided_slice %14 {offsets = [7, 0], sizes = [1, 128], strides = [1, 1]} : vector<17x128xf32> to vector<1x128xf32>
    %249 = arith.truncf %213 : vector<4x16x32xf32> to vector<4x16x32xbf16>
    %250 = arith.truncf %237 : vector<4x16x32xf32> to vector<4x16x32xbf16>
    %cst_54 = arith.constant dense<0.000000e+00> : vector<4x16x16xf32>
    %251 = tpu.matmul %249, %250, %cst_54 {dimension_numbers = #tpu.dot_dimension_numbers<[2], [2], [1], [1], [0, 0, 0, 1, 1, 1], [0], [0]>} : vector<4x16x32xbf16>, vector<4x16x32xbf16>, vector<4x16x16xf32> -> vector<4x16x16xf32>
    %cst_55 = arith.constant dense<0xFF800000> : vector<4x16xf32>
    %252 = vector.multi_reduction <maximumf>, %251, %cst_55 [2] : vector<4x16x16xf32> to vector<4x16xf32>
    %253 = vector.shape_cast %252 : vector<4x16xf32> to vector<4x16x1xf32>
    %254 = vector.broadcast %253 : vector<4x16x1xf32> to vector<4x16x16xf32>
    %255 = arith.subf %251, %254 : vector<4x16x16xf32>
    %256 = math.exp %255 : vector<4x16x16xf32>
    %cst_56 = arith.constant dense<0.000000e+00> : vector<4x16xf32>
    %257 = vector.multi_reduction <add>, %256, %cst_56 [2] : vector<4x16x16xf32> to vector<4x16xf32>
    %258 = vector.shape_cast %257 : vector<4x16xf32> to vector<4x16x1xf32>
    %259 = vector.broadcast %258 : vector<4x16x1xf32> to vector<4x16x16xf32>
    %260 = arith.divf %256, %259 : vector<4x16x16xf32>
    %261 = arith.truncf %260 : vector<4x16x16xf32> to vector<4x16x16xbf16>
    %262 = arith.truncf %246 : vector<4x16x32xf32> to vector<4x16x32xbf16>
    %cst_57 = arith.constant dense<0.000000e+00> : vector<4x16x32xf32>
    %263 = tpu.matmul %261, %262, %cst_57 {dimension_numbers = #tpu.dot_dimension_numbers<[2], [1], [1], [2], [0, 0, 0, 1, 1, 2], [0], [0]>} : vector<4x16x16xbf16>, vector<4x16x32xbf16>, vector<4x16x32xf32> -> vector<4x16x32xf32>
    %264 = vector.extract_strided_slice %263 {offsets = [0, 0, 0], sizes = [1, 16, 32], strides = [1, 1, 1]} : vector<4x16x32xf32> to vector<1x16x32xf32>
    %265 = vector.shape_cast %264 : vector<1x16x32xf32> to vector<16x32xf32>
    %266 = vector.extract_strided_slice %263 {offsets = [1, 0, 0], sizes = [1, 16, 32], strides = [1, 1, 1]} : vector<4x16x32xf32> to vector<1x16x32xf32>
    %267 = vector.shape_cast %266 : vector<1x16x32xf32> to vector<16x32xf32>
    %268 = vector.extract_strided_slice %263 {offsets = [2, 0, 0], sizes = [1, 16, 32], strides = [1, 1, 1]} : vector<4x16x32xf32> to vector<1x16x32xf32>
    %269 = vector.shape_cast %268 : vector<1x16x32xf32> to vector<16x32xf32>
    %270 = vector.extract_strided_slice %263 {offsets = [3, 0, 0], sizes = [1, 16, 32], strides = [1, 1, 1]} : vector<4x16x32xf32> to vector<1x16x32xf32>
    %271 = vector.shape_cast %270 : vector<1x16x32xf32> to vector<16x32xf32>
    %272 = tpu.concatenate %265, %267, %269, %271 in 1 : vector<16x32xf32>, vector<16x32xf32>, vector<16x32xf32>, vector<16x32xf32> -> vector<16x128xf32>
    %273 = arith.truncf %272 : vector<16x128xf32> to vector<16x128xbf16>
    %cst_58 = arith.constant dense<0.000000e+00> : vector<16x128xf32>
    %274 = tpu.matmul %273, %247, %cst_58 {dimension_numbers = #tpu.dot_dimension_numbers<[1], [0], [0], [1], [0, 0, 1, 1], [], []>} : vector<16x128xbf16>, vector<128x128xbf16>, vector<16x128xf32> -> vector<16x128xf32>
    %275 = vector.broadcast %248 : vector<1x128xf32> to vector<16x128xf32>
    %276 = arith.addf %274, %275 : vector<16x128xf32>
    %277 = arith.addf %145, %276 : vector<16x128xf32>
    %cst_59 = arith.constant dense<0.000000e+00> : vector<16xf32>
    %278 = vector.multi_reduction <add>, %277, %cst_59 [1] : vector<16x128xf32> to vector<16xf32>
    %279 = vector.shape_cast %278 : vector<16xf32> to vector<16x1xf32>
    %cst_60 = arith.constant 1.280000e+02 : f32
    %280 = vector.broadcast %cst_60 : f32 to vector<16x1xf32>
    %281 = arith.divf %279, %280 : vector<16x1xf32>
    %282 = vector.broadcast %281 : vector<16x1xf32> to vector<16x128xf32>
    %283 = arith.subf %277, %282 : vector<16x128xf32>
    %284 = arith.mulf %283, %283 : vector<16x128xf32>
    %cst_61 = arith.constant dense<0.000000e+00> : vector<16xf32>
    %285 = vector.multi_reduction <add>, %284, %cst_61 [1] : vector<16x128xf32> to vector<16xf32>
    %286 = vector.shape_cast %285 : vector<16xf32> to vector<16x1xf32>
    %cst_62 = arith.constant 1.280000e+02 : f32
    %287 = vector.broadcast %cst_62 : f32 to vector<16x1xf32>
    %288 = arith.divf %286, %287 : vector<16x1xf32>
    %289 = vector.broadcast %281 : vector<16x1xf32> to vector<16x128xf32>
    %290 = arith.subf %277, %289 : vector<16x128xf32>
    %cst_63 = arith.constant 9.99999974E-6 : f32
    %291 = vector.broadcast %cst_63 : f32 to vector<16x1xf32>
    %292 = arith.addf %288, %291 : vector<16x1xf32>
    %293 = math.rsqrt %292 : vector<16x1xf32>
    %294 = vector.broadcast %293 : vector<16x1xf32> to vector<16x128xf32>
    %295 = arith.mulf %290, %294 : vector<16x128xf32>
    %296 = vector.extract_strided_slice %14 {offsets = [13, 0], sizes = [1, 128], strides = [1, 1]} : vector<17x128xf32> to vector<1x128xf32>
    %297 = vector.broadcast %296 : vector<1x128xf32> to vector<16x128xf32>
    %298 = arith.mulf %295, %297 : vector<16x128xf32>
    %299 = vector.extract_strided_slice %14 {offsets = [14, 0], sizes = [1, 128], strides = [1, 1]} : vector<17x128xf32> to vector<1x128xf32>
    %300 = vector.broadcast %299 : vector<1x128xf32> to vector<16x128xf32>
    %301 = arith.addf %298, %300 : vector<16x128xf32>
    %302 = arith.truncf %301 : vector<16x128xf32> to vector<16x128xbf16>
    %c0_64 = arith.constant 0 : index
    %c0_65 = arith.constant 0 : index
    %303 = vector.load %arg12[%c0_64, %c0_65] : memref<128x256xbf16, #tpu.memory_space<vmem>>, vector<128x256xbf16>
    %cst_66 = arith.constant dense<0.000000e+00> : vector<16x256xf32>
    %304 = tpu.matmul %302, %303, %cst_66 {dimension_numbers = #tpu.dot_dimension_numbers<[1], [0], [0], [1], [0, 0, 1, 1], [], []>} : vector<16x128xbf16>, vector<128x256xbf16>, vector<16x256xf32> -> vector<16x256xf32>
    %c0_67 = arith.constant 0 : index
    %c0_68 = arith.constant 0 : index
    %305 = vector.load %arg15[%c0_67, %c0_68] : memref<1x256xf32, #tpu.memory_space<vmem>>, vector<1x256xf32>
    %306 = vector.broadcast %305 : vector<1x256xf32> to vector<16x256xf32>
    %307 = arith.addf %304, %306 : vector<16x256xf32>
    %cst_69 = arith.constant 0.000000e+00 : f32
    %308 = vector.broadcast %cst_69 : f32 to vector<16x256xf32>
    %309 = arith.maximumf %307, %308 : vector<16x256xf32>
    %310 = arith.truncf %309 : vector<16x256xf32> to vector<16x256xbf16>
    %c0_70 = arith.constant 0 : index
    %c0_71 = arith.constant 0 : index
    %311 = vector.load %arg13[%c0_70, %c0_71] : memref<256x128xbf16, #tpu.memory_space<vmem>>, vector<256x128xbf16>
    %cst_72 = arith.constant dense<0.000000e+00> : vector<16x128xf32>
    %312 = tpu.matmul %310, %311, %cst_72 {dimension_numbers = #tpu.dot_dimension_numbers<[1], [0], [0], [1], [0, 0, 1, 1], [], []>} : vector<16x256xbf16>, vector<256x128xbf16>, vector<16x128xf32> -> vector<16x128xf32>
    %313 = arith.addf %277, %312 : vector<16x128xf32>
    %314 = vector.extract_strided_slice %14 {offsets = [8, 0], sizes = [1, 128], strides = [1, 1]} : vector<17x128xf32> to vector<1x128xf32>
    %315 = vector.broadcast %314 : vector<1x128xf32> to vector<16x128xf32>
    %316 = arith.addf %313, %315 : vector<16x128xf32>
    %cst_73 = arith.constant dense<0.000000e+00> : vector<16xf32>
    %317 = vector.multi_reduction <add>, %316, %cst_73 [1] : vector<16x128xf32> to vector<16xf32>
    %318 = vector.shape_cast %317 : vector<16xf32> to vector<16x1xf32>
    %cst_74 = arith.constant 1.280000e+02 : f32
    %319 = vector.broadcast %cst_74 : f32 to vector<16x1xf32>
    %320 = arith.divf %318, %319 : vector<16x1xf32>
    %321 = vector.broadcast %320 : vector<16x1xf32> to vector<16x128xf32>
    %322 = arith.subf %316, %321 : vector<16x128xf32>
    %323 = arith.mulf %322, %322 : vector<16x128xf32>
    %cst_75 = arith.constant dense<0.000000e+00> : vector<16xf32>
    %324 = vector.multi_reduction <add>, %323, %cst_75 [1] : vector<16x128xf32> to vector<16xf32>
    %325 = vector.shape_cast %324 : vector<16xf32> to vector<16x1xf32>
    %cst_76 = arith.constant 1.280000e+02 : f32
    %326 = vector.broadcast %cst_76 : f32 to vector<16x1xf32>
    %327 = arith.divf %325, %326 : vector<16x1xf32>
    %328 = vector.broadcast %320 : vector<16x1xf32> to vector<16x128xf32>
    %329 = arith.subf %316, %328 : vector<16x128xf32>
    %cst_77 = arith.constant 9.99999974E-6 : f32
    %330 = vector.broadcast %cst_77 : f32 to vector<16x1xf32>
    %331 = arith.addf %327, %330 : vector<16x1xf32>
    %332 = math.rsqrt %331 : vector<16x1xf32>
    %333 = vector.broadcast %332 : vector<16x1xf32> to vector<16x128xf32>
    %334 = arith.mulf %329, %333 : vector<16x128xf32>
    %335 = vector.extract_strided_slice %14 {offsets = [15, 0], sizes = [1, 128], strides = [1, 1]} : vector<17x128xf32> to vector<1x128xf32>
    %336 = vector.broadcast %335 : vector<1x128xf32> to vector<16x128xf32>
    %337 = arith.mulf %334, %336 : vector<16x128xf32>
    %338 = vector.extract_strided_slice %14 {offsets = [16, 0], sizes = [1, 128], strides = [1, 1]} : vector<17x128xf32> to vector<1x128xf32>
    %339 = vector.broadcast %338 : vector<1x128xf32> to vector<16x128xf32>
    %340 = arith.addf %337, %339 : vector<16x128xf32>
    %cst_78 = arith.constant dense<0.000000e+00> : vector<16xf32>
    %341 = vector.multi_reduction <add>, %340, %cst_78 [1] : vector<16x128xf32> to vector<16xf32>
    %342 = vector.shape_cast %341 : vector<16xf32> to vector<16x1xf32>
    %cst_79 = arith.constant 1.280000e+02 : f32
    %343 = vector.broadcast %cst_79 : f32 to vector<16x1xf32>
    %344 = arith.divf %342, %343 : vector<16x1xf32>
    %345 = vector.broadcast %344 : vector<16x1xf32> to vector<16x128xf32>
    %346 = arith.subf %340, %345 : vector<16x128xf32>
    %347 = arith.mulf %346, %346 : vector<16x128xf32>
    %cst_80 = arith.constant dense<0.000000e+00> : vector<16xf32>
    %348 = vector.multi_reduction <add>, %347, %cst_80 [1] : vector<16x128xf32> to vector<16xf32>
    %349 = vector.shape_cast %348 : vector<16xf32> to vector<16x1xf32>
    %cst_81 = arith.constant 1.280000e+02 : f32
    %350 = vector.broadcast %cst_81 : f32 to vector<16x1xf32>
    %351 = arith.divf %349, %350 : vector<16x1xf32>
    %352 = vector.broadcast %344 : vector<16x1xf32> to vector<16x128xf32>
    %353 = arith.subf %340, %352 : vector<16x128xf32>
    %cst_82 = arith.constant 9.99999974E-6 : f32
    %354 = vector.broadcast %cst_82 : f32 to vector<16x1xf32>
    %355 = arith.addf %351, %354 : vector<16x1xf32>
    %356 = math.rsqrt %355 : vector<16x1xf32>
    %357 = vector.broadcast %356 : vector<16x1xf32> to vector<16x128xf32>
    %358 = arith.mulf %353, %357 : vector<16x128xf32>
    %359 = vector.extract_strided_slice %15 {offsets = [9, 0], sizes = [1, 128], strides = [1, 1]} : vector<17x128xf32> to vector<1x128xf32>
    %360 = vector.broadcast %359 : vector<1x128xf32> to vector<16x128xf32>
    %361 = arith.mulf %358, %360 : vector<16x128xf32>
    %362 = vector.extract_strided_slice %15 {offsets = [10, 0], sizes = [1, 128], strides = [1, 1]} : vector<17x128xf32> to vector<1x128xf32>
    %363 = vector.broadcast %362 : vector<1x128xf32> to vector<16x128xf32>
    %364 = arith.addf %361, %363 : vector<16x128xf32>
    %365 = arith.addf %364, %5 : vector<16x128xf32>
    %366 = arith.truncf %365 : vector<16x128xf32> to vector<16x128xbf16>
    %c0_83 = arith.constant 0 : index
    %c0_84 = arith.constant 0 : index
    %367 = vector.load %arg16[%c0_83, %c0_84] : memref<128x1024xbf16, #tpu.memory_space<vmem>>, vector<128x256xbf16>
    %cst_85 = arith.constant dense<0.000000e+00> : vector<16x256xf32>
    %368 = tpu.matmul %366, %367, %cst_85 {dimension_numbers = #tpu.dot_dimension_numbers<[1], [0], [0], [1], [0, 0, 1, 1], [], []>} : vector<16x128xbf16>, vector<128x256xbf16>, vector<16x256xf32> -> vector<16x256xf32>
    %369 = vector.extract_strided_slice %368 {offsets = [0, 0], sizes = [16, 128], strides = [1, 1]} : vector<16x256xf32> to vector<16x128xf32>
    %370 = vector.extract_strided_slice %15 {offsets = [0, 0], sizes = [1, 128], strides = [1, 1]} : vector<17x128xf32> to vector<1x128xf32>
    %371 = vector.broadcast %370 : vector<1x128xf32> to vector<16x128xf32>
    %372 = arith.addf %369, %371 : vector<16x128xf32>
    %373 = vector.extract_strided_slice %372 {offsets = [0, 0], sizes = [16, 32], strides = [1, 1]} : vector<16x128xf32> to vector<16x32xf32>
    %374 = vector.extract_strided_slice %372 {offsets = [0, 32], sizes = [16, 32], strides = [1, 1]} : vector<16x128xf32> to vector<16x32xf32>
    %375 = vector.extract_strided_slice %372 {offsets = [0, 64], sizes = [16, 32], strides = [1, 1]} : vector<16x128xf32> to vector<16x32xf32>
    %376 = vector.extract_strided_slice %372 {offsets = [0, 96], sizes = [16, 32], strides = [1, 1]} : vector<16x128xf32> to vector<16x32xf32>
    %377 = vector.shape_cast %373 : vector<16x32xf32> to vector<1x16x32xf32>
    %378 = vector.shape_cast %374 : vector<16x32xf32> to vector<1x16x32xf32>
    %379 = vector.shape_cast %375 : vector<16x32xf32> to vector<1x16x32xf32>
    %380 = vector.shape_cast %376 : vector<16x32xf32> to vector<1x16x32xf32>
    %381 = tpu.concatenate %377, %378, %379, %380 in 0 : vector<1x16x32xf32>, vector<1x16x32xf32>, vector<1x16x32xf32>, vector<1x16x32xf32> -> vector<4x16x32xf32>
    %382 = vector.extract_strided_slice %381 {offsets = [0, 0, 0], sizes = [4, 16, 16], strides = [1, 1, 1]} : vector<4x16x32xf32> to vector<4x16x16xf32>
    %383 = vector.extract_strided_slice %381 {offsets = [0, 0, 16], sizes = [4, 16, 16], strides = [1, 1, 1]} : vector<4x16x32xf32> to vector<4x16x16xf32>
    %384 = vector.shape_cast %8 : vector<16x16xf32> to vector<1x16x16xf32>
    %385 = vector.shape_cast %9 : vector<16x16xf32> to vector<1x16x16xf32>
    %386 = vector.broadcast %384 : vector<1x16x16xf32> to vector<4x16x16xf32>
    %387 = arith.mulf %382, %386 : vector<4x16x16xf32>
    %388 = vector.broadcast %385 : vector<1x16x16xf32> to vector<4x16x16xf32>
    %389 = arith.mulf %383, %388 : vector<4x16x16xf32>
    %390 = arith.subf %387, %389 : vector<4x16x16xf32>
    %391 = vector.broadcast %384 : vector<1x16x16xf32> to vector<4x16x16xf32>
    %392 = arith.mulf %383, %391 : vector<4x16x16xf32>
    %393 = vector.broadcast %385 : vector<1x16x16xf32> to vector<4x16x16xf32>
    %394 = arith.mulf %382, %393 : vector<4x16x16xf32>
    %395 = arith.addf %392, %394 : vector<4x16x16xf32>
    %396 = tpu.concatenate %390, %395 in 2 : vector<4x16x16xf32>, vector<4x16x16xf32> -> vector<4x16x32xf32>
    %397 = vector.extract_strided_slice %368 {offsets = [0, 128], sizes = [16, 128], strides = [1, 1]} : vector<16x256xf32> to vector<16x128xf32>
    %398 = vector.extract_strided_slice %15 {offsets = [1, 0], sizes = [1, 128], strides = [1, 1]} : vector<17x128xf32> to vector<1x128xf32>
    %399 = vector.broadcast %398 : vector<1x128xf32> to vector<16x128xf32>
    %400 = arith.addf %397, %399 : vector<16x128xf32>
    %401 = vector.extract_strided_slice %400 {offsets = [0, 0], sizes = [16, 32], strides = [1, 1]} : vector<16x128xf32> to vector<16x32xf32>
    %402 = vector.extract_strided_slice %400 {offsets = [0, 32], sizes = [16, 32], strides = [1, 1]} : vector<16x128xf32> to vector<16x32xf32>
    %403 = vector.extract_strided_slice %400 {offsets = [0, 64], sizes = [16, 32], strides = [1, 1]} : vector<16x128xf32> to vector<16x32xf32>
    %404 = vector.extract_strided_slice %400 {offsets = [0, 96], sizes = [16, 32], strides = [1, 1]} : vector<16x128xf32> to vector<16x32xf32>
    %405 = vector.shape_cast %401 : vector<16x32xf32> to vector<1x16x32xf32>
    %406 = vector.shape_cast %402 : vector<16x32xf32> to vector<1x16x32xf32>
    %407 = vector.shape_cast %403 : vector<16x32xf32> to vector<1x16x32xf32>
    %408 = vector.shape_cast %404 : vector<16x32xf32> to vector<1x16x32xf32>
    %409 = tpu.concatenate %405, %406, %407, %408 in 0 : vector<1x16x32xf32>, vector<1x16x32xf32>, vector<1x16x32xf32>, vector<1x16x32xf32> -> vector<4x16x32xf32>
    %410 = vector.extract_strided_slice %409 {offsets = [0, 0, 0], sizes = [4, 16, 16], strides = [1, 1, 1]} : vector<4x16x32xf32> to vector<4x16x16xf32>
    %411 = vector.extract_strided_slice %409 {offsets = [0, 0, 16], sizes = [4, 16, 16], strides = [1, 1, 1]} : vector<4x16x32xf32> to vector<4x16x16xf32>
    %412 = vector.shape_cast %10 : vector<16x16xf32> to vector<1x16x16xf32>
    %413 = vector.shape_cast %11 : vector<16x16xf32> to vector<1x16x16xf32>
    %414 = vector.broadcast %412 : vector<1x16x16xf32> to vector<4x16x16xf32>
    %415 = arith.mulf %410, %414 : vector<4x16x16xf32>
    %416 = vector.broadcast %413 : vector<1x16x16xf32> to vector<4x16x16xf32>
    %417 = arith.mulf %411, %416 : vector<4x16x16xf32>
    %418 = arith.subf %415, %417 : vector<4x16x16xf32>
    %419 = vector.broadcast %412 : vector<1x16x16xf32> to vector<4x16x16xf32>
    %420 = arith.mulf %411, %419 : vector<4x16x16xf32>
    %421 = vector.broadcast %413 : vector<1x16x16xf32> to vector<4x16x16xf32>
    %422 = arith.mulf %410, %421 : vector<4x16x16xf32>
    %423 = arith.addf %420, %422 : vector<4x16x16xf32>
    %424 = tpu.concatenate %418, %423 in 2 : vector<4x16x16xf32>, vector<4x16x16xf32> -> vector<4x16x32xf32>
    %425 = arith.truncf %364 : vector<16x128xf32> to vector<16x128xbf16>
    %c0_86 = arith.constant 0 : index
    %c256_87 = arith.constant 256 : index
    %426 = vector.load %arg16[%c0_86, %c256_87] : memref<128x1024xbf16, #tpu.memory_space<vmem>>, vector<128x128xbf16>
    %cst_88 = arith.constant dense<0.000000e+00> : vector<16x128xf32>
    %427 = tpu.matmul %425, %426, %cst_88 {dimension_numbers = #tpu.dot_dimension_numbers<[1], [0], [0], [1], [0, 0, 1, 1], [], []>} : vector<16x128xbf16>, vector<128x128xbf16>, vector<16x128xf32> -> vector<16x128xf32>
    %428 = vector.extract_strided_slice %15 {offsets = [2, 0], sizes = [1, 128], strides = [1, 1]} : vector<17x128xf32> to vector<1x128xf32>
    %429 = vector.broadcast %428 : vector<1x128xf32> to vector<16x128xf32>
    %430 = arith.addf %427, %429 : vector<16x128xf32>
    %431 = vector.extract_strided_slice %430 {offsets = [0, 0], sizes = [16, 32], strides = [1, 1]} : vector<16x128xf32> to vector<16x32xf32>
    %432 = vector.extract_strided_slice %430 {offsets = [0, 32], sizes = [16, 32], strides = [1, 1]} : vector<16x128xf32> to vector<16x32xf32>
    %433 = vector.extract_strided_slice %430 {offsets = [0, 64], sizes = [16, 32], strides = [1, 1]} : vector<16x128xf32> to vector<16x32xf32>
    %434 = vector.extract_strided_slice %430 {offsets = [0, 96], sizes = [16, 32], strides = [1, 1]} : vector<16x128xf32> to vector<16x32xf32>
    %435 = vector.shape_cast %431 : vector<16x32xf32> to vector<1x16x32xf32>
    %436 = vector.shape_cast %432 : vector<16x32xf32> to vector<1x16x32xf32>
    %437 = vector.shape_cast %433 : vector<16x32xf32> to vector<1x16x32xf32>
    %438 = vector.shape_cast %434 : vector<16x32xf32> to vector<1x16x32xf32>
    %439 = tpu.concatenate %435, %436, %437, %438 in 0 : vector<1x16x32xf32>, vector<1x16x32xf32>, vector<1x16x32xf32>, vector<1x16x32xf32> -> vector<4x16x32xf32>
    %c0_89 = arith.constant 0 : index
    %c384_90 = arith.constant 384 : index
    %440 = vector.load %arg16[%c0_89, %c384_90] : memref<128x1024xbf16, #tpu.memory_space<vmem>>, vector<128x128xbf16>
    %441 = vector.extract_strided_slice %15 {offsets = [3, 0], sizes = [1, 128], strides = [1, 1]} : vector<17x128xf32> to vector<1x128xf32>
    %442 = arith.truncf %396 : vector<4x16x32xf32> to vector<4x16x32xbf16>
    %443 = arith.truncf %424 : vector<4x16x32xf32> to vector<4x16x32xbf16>
    %cst_91 = arith.constant dense<0.000000e+00> : vector<4x16x16xf32>
    %444 = tpu.matmul %442, %443, %cst_91 {dimension_numbers = #tpu.dot_dimension_numbers<[2], [2], [1], [1], [0, 0, 0, 1, 1, 1], [0], [0]>} : vector<4x16x32xbf16>, vector<4x16x32xbf16>, vector<4x16x16xf32> -> vector<4x16x16xf32>
    %cst_92 = arith.constant dense<0xFF800000> : vector<4x16xf32>
    %445 = vector.multi_reduction <maximumf>, %444, %cst_92 [2] : vector<4x16x16xf32> to vector<4x16xf32>
    %446 = vector.shape_cast %445 : vector<4x16xf32> to vector<4x16x1xf32>
    %447 = vector.broadcast %446 : vector<4x16x1xf32> to vector<4x16x16xf32>
    %448 = arith.subf %444, %447 : vector<4x16x16xf32>
    %449 = math.exp %448 : vector<4x16x16xf32>
    %cst_93 = arith.constant dense<0.000000e+00> : vector<4x16xf32>
    %450 = vector.multi_reduction <add>, %449, %cst_93 [2] : vector<4x16x16xf32> to vector<4x16xf32>
    %451 = vector.shape_cast %450 : vector<4x16xf32> to vector<4x16x1xf32>
    %452 = vector.broadcast %451 : vector<4x16x1xf32> to vector<4x16x16xf32>
    %453 = arith.divf %449, %452 : vector<4x16x16xf32>
    %454 = arith.truncf %453 : vector<4x16x16xf32> to vector<4x16x16xbf16>
    %455 = arith.truncf %439 : vector<4x16x32xf32> to vector<4x16x32xbf16>
    %cst_94 = arith.constant dense<0.000000e+00> : vector<4x16x32xf32>
    %456 = tpu.matmul %454, %455, %cst_94 {dimension_numbers = #tpu.dot_dimension_numbers<[2], [1], [1], [2], [0, 0, 0, 1, 1, 2], [0], [0]>} : vector<4x16x16xbf16>, vector<4x16x32xbf16>, vector<4x16x32xf32> -> vector<4x16x32xf32>
    %457 = vector.extract_strided_slice %456 {offsets = [0, 0, 0], sizes = [1, 16, 32], strides = [1, 1, 1]} : vector<4x16x32xf32> to vector<1x16x32xf32>
    %458 = vector.shape_cast %457 : vector<1x16x32xf32> to vector<16x32xf32>
    %459 = vector.extract_strided_slice %456 {offsets = [1, 0, 0], sizes = [1, 16, 32], strides = [1, 1, 1]} : vector<4x16x32xf32> to vector<1x16x32xf32>
    %460 = vector.shape_cast %459 : vector<1x16x32xf32> to vector<16x32xf32>
    %461 = vector.extract_strided_slice %456 {offsets = [2, 0, 0], sizes = [1, 16, 32], strides = [1, 1, 1]} : vector<4x16x32xf32> to vector<1x16x32xf32>
    %462 = vector.shape_cast %461 : vector<1x16x32xf32> to vector<16x32xf32>
    %463 = vector.extract_strided_slice %456 {offsets = [3, 0, 0], sizes = [1, 16, 32], strides = [1, 1, 1]} : vector<4x16x32xf32> to vector<1x16x32xf32>
    %464 = vector.shape_cast %463 : vector<1x16x32xf32> to vector<16x32xf32>
    %465 = tpu.concatenate %458, %460, %462, %464 in 1 : vector<16x32xf32>, vector<16x32xf32>, vector<16x32xf32>, vector<16x32xf32> -> vector<16x128xf32>
    %466 = arith.truncf %465 : vector<16x128xf32> to vector<16x128xbf16>
    %cst_95 = arith.constant dense<0.000000e+00> : vector<16x128xf32>
    %467 = tpu.matmul %466, %440, %cst_95 {dimension_numbers = #tpu.dot_dimension_numbers<[1], [0], [0], [1], [0, 0, 1, 1], [], []>} : vector<16x128xbf16>, vector<128x128xbf16>, vector<16x128xf32> -> vector<16x128xf32>
    %468 = vector.broadcast %441 : vector<1x128xf32> to vector<16x128xf32>
    %469 = arith.addf %467, %468 : vector<16x128xf32>
    %470 = arith.addf %340, %469 : vector<16x128xf32>
    %cst_96 = arith.constant dense<0.000000e+00> : vector<16xf32>
    %471 = vector.multi_reduction <add>, %470, %cst_96 [1] : vector<16x128xf32> to vector<16xf32>
    %472 = vector.shape_cast %471 : vector<16xf32> to vector<16x1xf32>
    %cst_97 = arith.constant 1.280000e+02 : f32
    %473 = vector.broadcast %cst_97 : f32 to vector<16x1xf32>
    %474 = arith.divf %472, %473 : vector<16x1xf32>
    %475 = vector.broadcast %474 : vector<16x1xf32> to vector<16x128xf32>
    %476 = arith.subf %470, %475 : vector<16x128xf32>
    %477 = arith.mulf %476, %476 : vector<16x128xf32>
    %cst_98 = arith.constant dense<0.000000e+00> : vector<16xf32>
    %478 = vector.multi_reduction <add>, %477, %cst_98 [1] : vector<16x128xf32> to vector<16xf32>
    %479 = vector.shape_cast %478 : vector<16xf32> to vector<16x1xf32>
    %cst_99 = arith.constant 1.280000e+02 : f32
    %480 = vector.broadcast %cst_99 : f32 to vector<16x1xf32>
    %481 = arith.divf %479, %480 : vector<16x1xf32>
    %482 = vector.broadcast %474 : vector<16x1xf32> to vector<16x128xf32>
    %483 = arith.subf %470, %482 : vector<16x128xf32>
    %cst_100 = arith.constant 9.99999974E-6 : f32
    %484 = vector.broadcast %cst_100 : f32 to vector<16x1xf32>
    %485 = arith.addf %481, %484 : vector<16x1xf32>
    %486 = math.rsqrt %485 : vector<16x1xf32>
    %487 = vector.broadcast %486 : vector<16x1xf32> to vector<16x128xf32>
    %488 = arith.mulf %483, %487 : vector<16x128xf32>
    %489 = vector.extract_strided_slice %15 {offsets = [11, 0], sizes = [1, 128], strides = [1, 1]} : vector<17x128xf32> to vector<1x128xf32>
    %490 = vector.broadcast %489 : vector<1x128xf32> to vector<16x128xf32>
    %491 = arith.mulf %488, %490 : vector<16x128xf32>
    %492 = vector.extract_strided_slice %15 {offsets = [12, 0], sizes = [1, 128], strides = [1, 1]} : vector<17x128xf32> to vector<1x128xf32>
    %493 = vector.broadcast %492 : vector<1x128xf32> to vector<16x128xf32>
    %494 = arith.addf %491, %493 : vector<16x128xf32>
    %495 = arith.addf %494, %5 : vector<16x128xf32>
    %496 = arith.truncf %495 : vector<16x128xf32> to vector<16x128xbf16>
    %c0_101 = arith.constant 0 : index
    %c512_102 = arith.constant 512 : index
    %497 = vector.load %arg16[%c0_101, %c512_102] : memref<128x1024xbf16, #tpu.memory_space<vmem>>, vector<128x128xbf16>
    %cst_103 = arith.constant dense<0.000000e+00> : vector<16x128xf32>
    %498 = tpu.matmul %496, %497, %cst_103 {dimension_numbers = #tpu.dot_dimension_numbers<[1], [0], [0], [1], [0, 0, 1, 1], [], []>} : vector<16x128xbf16>, vector<128x128xbf16>, vector<16x128xf32> -> vector<16x128xf32>
    %499 = vector.extract_strided_slice %15 {offsets = [4, 0], sizes = [1, 128], strides = [1, 1]} : vector<17x128xf32> to vector<1x128xf32>
    %500 = vector.broadcast %499 : vector<1x128xf32> to vector<16x128xf32>
    %501 = arith.addf %498, %500 : vector<16x128xf32>
    %502 = arith.addf %3, %7 : vector<32x128xf32>
    %503 = arith.truncf %502 : vector<32x128xf32> to vector<32x128xbf16>
    %c0_104 = arith.constant 0 : index
    %c640_105 = arith.constant 640 : index
    %504 = vector.load %arg16[%c0_104, %c640_105] : memref<128x1024xbf16, #tpu.memory_space<vmem>>, vector<128x128xbf16>
    %cst_106 = arith.constant dense<0.000000e+00> : vector<32x128xf32>
    %505 = tpu.matmul %503, %504, %cst_106 {dimension_numbers = #tpu.dot_dimension_numbers<[1], [0], [0], [1], [0, 0, 1, 1], [], []>} : vector<32x128xbf16>, vector<128x128xbf16>, vector<32x128xf32> -> vector<32x128xf32>
    %506 = vector.extract_strided_slice %15 {offsets = [5, 0], sizes = [1, 128], strides = [1, 1]} : vector<17x128xf32> to vector<1x128xf32>
    %507 = vector.broadcast %506 : vector<1x128xf32> to vector<32x128xf32>
    %508 = arith.addf %505, %507 : vector<32x128xf32>
    %509 = arith.truncf %3 : vector<32x128xf32> to vector<32x128xbf16>
    %c0_107 = arith.constant 0 : index
    %c768_108 = arith.constant 768 : index
    %510 = vector.load %arg16[%c0_107, %c768_108] : memref<128x1024xbf16, #tpu.memory_space<vmem>>, vector<128x128xbf16>
    %cst_109 = arith.constant dense<0.000000e+00> : vector<32x128xf32>
    %511 = tpu.matmul %509, %510, %cst_109 {dimension_numbers = #tpu.dot_dimension_numbers<[1], [0], [0], [1], [0, 0, 1, 1], [], []>} : vector<32x128xbf16>, vector<128x128xbf16>, vector<32x128xf32> -> vector<32x128xf32>
    %512 = vector.extract_strided_slice %15 {offsets = [6, 0], sizes = [1, 128], strides = [1, 1]} : vector<17x128xf32> to vector<1x128xf32>
    %513 = vector.broadcast %512 : vector<1x128xf32> to vector<32x128xf32>
    %514 = arith.addf %511, %513 : vector<32x128xf32>
    %515 = vector.extract_strided_slice %501 {offsets = [0, 0], sizes = [16, 32], strides = [1, 1]} : vector<16x128xf32> to vector<16x32xf32>
    %516 = vector.extract_strided_slice %501 {offsets = [0, 32], sizes = [16, 32], strides = [1, 1]} : vector<16x128xf32> to vector<16x32xf32>
    %517 = vector.extract_strided_slice %501 {offsets = [0, 64], sizes = [16, 32], strides = [1, 1]} : vector<16x128xf32> to vector<16x32xf32>
    %518 = vector.extract_strided_slice %501 {offsets = [0, 96], sizes = [16, 32], strides = [1, 1]} : vector<16x128xf32> to vector<16x32xf32>
    %519 = vector.shape_cast %515 : vector<16x32xf32> to vector<1x16x32xf32>
    %520 = vector.shape_cast %516 : vector<16x32xf32> to vector<1x16x32xf32>
    %521 = vector.shape_cast %517 : vector<16x32xf32> to vector<1x16x32xf32>
    %522 = vector.shape_cast %518 : vector<16x32xf32> to vector<1x16x32xf32>
    %523 = tpu.concatenate %519, %520, %521, %522 in 0 : vector<1x16x32xf32>, vector<1x16x32xf32>, vector<1x16x32xf32>, vector<1x16x32xf32> -> vector<4x16x32xf32>
    %524 = vector.extract_strided_slice %523 {offsets = [0, 0, 0], sizes = [4, 16, 16], strides = [1, 1, 1]} : vector<4x16x32xf32> to vector<4x16x16xf32>
    %525 = vector.extract_strided_slice %523 {offsets = [0, 0, 16], sizes = [4, 16, 16], strides = [1, 1, 1]} : vector<4x16x32xf32> to vector<4x16x16xf32>
    %526 = vector.shape_cast %8 : vector<16x16xf32> to vector<1x16x16xf32>
    %527 = vector.shape_cast %9 : vector<16x16xf32> to vector<1x16x16xf32>
    %528 = vector.broadcast %526 : vector<1x16x16xf32> to vector<4x16x16xf32>
    %529 = arith.mulf %524, %528 : vector<4x16x16xf32>
    %530 = vector.broadcast %527 : vector<1x16x16xf32> to vector<4x16x16xf32>
    %531 = arith.mulf %525, %530 : vector<4x16x16xf32>
    %532 = arith.subf %529, %531 : vector<4x16x16xf32>
    %533 = vector.broadcast %526 : vector<1x16x16xf32> to vector<4x16x16xf32>
    %534 = arith.mulf %525, %533 : vector<4x16x16xf32>
    %535 = vector.broadcast %527 : vector<1x16x16xf32> to vector<4x16x16xf32>
    %536 = arith.mulf %524, %535 : vector<4x16x16xf32>
    %537 = arith.addf %534, %536 : vector<4x16x16xf32>
    %538 = tpu.concatenate %532, %537 in 2 : vector<4x16x16xf32>, vector<4x16x16xf32> -> vector<4x16x32xf32>
    %539 = vector.extract_strided_slice %508 {offsets = [0, 0], sizes = [32, 32], strides = [1, 1]} : vector<32x128xf32> to vector<32x32xf32>
    %540 = vector.extract_strided_slice %508 {offsets = [0, 32], sizes = [32, 32], strides = [1, 1]} : vector<32x128xf32> to vector<32x32xf32>
    %541 = vector.extract_strided_slice %508 {offsets = [0, 64], sizes = [32, 32], strides = [1, 1]} : vector<32x128xf32> to vector<32x32xf32>
    %542 = vector.extract_strided_slice %508 {offsets = [0, 96], sizes = [32, 32], strides = [1, 1]} : vector<32x128xf32> to vector<32x32xf32>
    %543 = vector.shape_cast %539 : vector<32x32xf32> to vector<1x32x32xf32>
    %544 = vector.shape_cast %540 : vector<32x32xf32> to vector<1x32x32xf32>
    %545 = vector.shape_cast %541 : vector<32x32xf32> to vector<1x32x32xf32>
    %546 = vector.shape_cast %542 : vector<32x32xf32> to vector<1x32x32xf32>
    %547 = tpu.concatenate %543, %544, %545, %546 in 0 : vector<1x32x32xf32>, vector<1x32x32xf32>, vector<1x32x32xf32>, vector<1x32x32xf32> -> vector<4x32x32xf32>
    %548 = vector.extract_strided_slice %547 {offsets = [0, 0, 0], sizes = [4, 32, 16], strides = [1, 1, 1]} : vector<4x32x32xf32> to vector<4x32x16xf32>
    %549 = vector.extract_strided_slice %547 {offsets = [0, 0, 16], sizes = [4, 32, 16], strides = [1, 1, 1]} : vector<4x32x32xf32> to vector<4x32x16xf32>
    %550 = vector.shape_cast %12 : vector<32x16xf32> to vector<1x32x16xf32>
    %551 = vector.shape_cast %13 : vector<32x16xf32> to vector<1x32x16xf32>
    %552 = vector.broadcast %550 : vector<1x32x16xf32> to vector<4x32x16xf32>
    %553 = arith.mulf %548, %552 : vector<4x32x16xf32>
    %554 = vector.broadcast %551 : vector<1x32x16xf32> to vector<4x32x16xf32>
    %555 = arith.mulf %549, %554 : vector<4x32x16xf32>
    %556 = arith.subf %553, %555 : vector<4x32x16xf32>
    %557 = vector.broadcast %550 : vector<1x32x16xf32> to vector<4x32x16xf32>
    %558 = arith.mulf %549, %557 : vector<4x32x16xf32>
    %559 = vector.broadcast %551 : vector<1x32x16xf32> to vector<4x32x16xf32>
    %560 = arith.mulf %548, %559 : vector<4x32x16xf32>
    %561 = arith.addf %558, %560 : vector<4x32x16xf32>
    %562 = tpu.concatenate %556, %561 in 2 : vector<4x32x16xf32>, vector<4x32x16xf32> -> vector<4x32x32xf32>
    %563 = vector.extract_strided_slice %514 {offsets = [0, 0], sizes = [32, 32], strides = [1, 1]} : vector<32x128xf32> to vector<32x32xf32>
    %564 = vector.extract_strided_slice %514 {offsets = [0, 32], sizes = [32, 32], strides = [1, 1]} : vector<32x128xf32> to vector<32x32xf32>
    %565 = vector.extract_strided_slice %514 {offsets = [0, 64], sizes = [32, 32], strides = [1, 1]} : vector<32x128xf32> to vector<32x32xf32>
    %566 = vector.extract_strided_slice %514 {offsets = [0, 96], sizes = [32, 32], strides = [1, 1]} : vector<32x128xf32> to vector<32x32xf32>
    %567 = vector.shape_cast %563 : vector<32x32xf32> to vector<1x32x32xf32>
    %568 = vector.shape_cast %564 : vector<32x32xf32> to vector<1x32x32xf32>
    %569 = vector.shape_cast %565 : vector<32x32xf32> to vector<1x32x32xf32>
    %570 = vector.shape_cast %566 : vector<32x32xf32> to vector<1x32x32xf32>
    %571 = tpu.concatenate %567, %568, %569, %570 in 0 : vector<1x32x32xf32>, vector<1x32x32xf32>, vector<1x32x32xf32>, vector<1x32x32xf32> -> vector<4x32x32xf32>
    %c0_110 = arith.constant 0 : index
    %c896_111 = arith.constant 896 : index
    %572 = vector.load %arg16[%c0_110, %c896_111] : memref<128x1024xbf16, #tpu.memory_space<vmem>>, vector<128x128xbf16>
    %573 = vector.extract_strided_slice %15 {offsets = [7, 0], sizes = [1, 128], strides = [1, 1]} : vector<17x128xf32> to vector<1x128xf32>
    %574 = arith.truncf %538 : vector<4x16x32xf32> to vector<4x16x32xbf16>
    %575 = arith.truncf %562 : vector<4x32x32xf32> to vector<4x32x32xbf16>
    %cst_112 = arith.constant dense<0.000000e+00> : vector<4x16x32xf32>
    %576 = tpu.matmul %574, %575, %cst_112 {dimension_numbers = #tpu.dot_dimension_numbers<[2], [2], [1], [1], [0, 0, 0, 1, 1, 1], [0], [0]>} : vector<4x16x32xbf16>, vector<4x32x32xbf16>, vector<4x16x32xf32> -> vector<4x16x32xf32>
    %cst_113 = arith.constant dense<0xFF800000> : vector<4x16xf32>
    %577 = vector.multi_reduction <maximumf>, %576, %cst_113 [2] : vector<4x16x32xf32> to vector<4x16xf32>
    %578 = vector.shape_cast %577 : vector<4x16xf32> to vector<4x16x1xf32>
    %579 = vector.broadcast %578 : vector<4x16x1xf32> to vector<4x16x32xf32>
    %580 = arith.subf %576, %579 : vector<4x16x32xf32>
    %581 = math.exp %580 : vector<4x16x32xf32>
    %cst_114 = arith.constant dense<0.000000e+00> : vector<4x16xf32>
    %582 = vector.multi_reduction <add>, %581, %cst_114 [2] : vector<4x16x32xf32> to vector<4x16xf32>
    %583 = vector.shape_cast %582 : vector<4x16xf32> to vector<4x16x1xf32>
    %584 = vector.broadcast %583 : vector<4x16x1xf32> to vector<4x16x32xf32>
    %585 = arith.divf %581, %584 : vector<4x16x32xf32>
    %586 = arith.truncf %585 : vector<4x16x32xf32> to vector<4x16x32xbf16>
    %587 = arith.truncf %571 : vector<4x32x32xf32> to vector<4x32x32xbf16>
    %cst_115 = arith.constant dense<0.000000e+00> : vector<4x16x32xf32>
    %588 = tpu.matmul %586, %587, %cst_115 {dimension_numbers = #tpu.dot_dimension_numbers<[2], [1], [1], [2], [0, 0, 0, 1, 1, 2], [0], [0]>} : vector<4x16x32xbf16>, vector<4x32x32xbf16>, vector<4x16x32xf32> -> vector<4x16x32xf32>
    %589 = vector.extract_strided_slice %588 {offsets = [0, 0, 0], sizes = [1, 16, 32], strides = [1, 1, 1]} : vector<4x16x32xf32> to vector<1x16x32xf32>
    %590 = vector.shape_cast %589 : vector<1x16x32xf32> to vector<16x32xf32>
    %591 = vector.extract_strided_slice %588 {offsets = [1, 0, 0], sizes = [1, 16, 32], strides = [1, 1, 1]} : vector<4x16x32xf32> to vector<1x16x32xf32>
    %592 = vector.shape_cast %591 : vector<1x16x32xf32> to vector<16x32xf32>
    %593 = vector.extract_strided_slice %588 {offsets = [2, 0, 0], sizes = [1, 16, 32], strides = [1, 1, 1]} : vector<4x16x32xf32> to vector<1x16x32xf32>
    %594 = vector.shape_cast %593 : vector<1x16x32xf32> to vector<16x32xf32>
    %595 = vector.extract_strided_slice %588 {offsets = [3, 0, 0], sizes = [1, 16, 32], strides = [1, 1, 1]} : vector<4x16x32xf32> to vector<1x16x32xf32>
    %596 = vector.shape_cast %595 : vector<1x16x32xf32> to vector<16x32xf32>
    %597 = tpu.concatenate %590, %592, %594, %596 in 1 : vector<16x32xf32>, vector<16x32xf32>, vector<16x32xf32>, vector<16x32xf32> -> vector<16x128xf32>
    %598 = arith.truncf %597 : vector<16x128xf32> to vector<16x128xbf16>
    %cst_116 = arith.constant dense<0.000000e+00> : vector<16x128xf32>
    %599 = tpu.matmul %598, %572, %cst_116 {dimension_numbers = #tpu.dot_dimension_numbers<[1], [0], [0], [1], [0, 0, 1, 1], [], []>} : vector<16x128xbf16>, vector<128x128xbf16>, vector<16x128xf32> -> vector<16x128xf32>
    %600 = vector.broadcast %573 : vector<1x128xf32> to vector<16x128xf32>
    %601 = arith.addf %599, %600 : vector<16x128xf32>
    %602 = arith.addf %470, %601 : vector<16x128xf32>
    %cst_117 = arith.constant dense<0.000000e+00> : vector<16xf32>
    %603 = vector.multi_reduction <add>, %602, %cst_117 [1] : vector<16x128xf32> to vector<16xf32>
    %604 = vector.shape_cast %603 : vector<16xf32> to vector<16x1xf32>
    %cst_118 = arith.constant 1.280000e+02 : f32
    %605 = vector.broadcast %cst_118 : f32 to vector<16x1xf32>
    %606 = arith.divf %604, %605 : vector<16x1xf32>
    %607 = vector.broadcast %606 : vector<16x1xf32> to vector<16x128xf32>
    %608 = arith.subf %602, %607 : vector<16x128xf32>
    %609 = arith.mulf %608, %608 : vector<16x128xf32>
    %cst_119 = arith.constant dense<0.000000e+00> : vector<16xf32>
    %610 = vector.multi_reduction <add>, %609, %cst_119 [1] : vector<16x128xf32> to vector<16xf32>
    %611 = vector.shape_cast %610 : vector<16xf32> to vector<16x1xf32>
    %cst_120 = arith.constant 1.280000e+02 : f32
    %612 = vector.broadcast %cst_120 : f32 to vector<16x1xf32>
    %613 = arith.divf %611, %612 : vector<16x1xf32>
    %614 = vector.broadcast %606 : vector<16x1xf32> to vector<16x128xf32>
    %615 = arith.subf %602, %614 : vector<16x128xf32>
    %cst_121 = arith.constant 9.99999974E-6 : f32
    %616 = vector.broadcast %cst_121 : f32 to vector<16x1xf32>
    %617 = arith.addf %613, %616 : vector<16x1xf32>
    %618 = math.rsqrt %617 : vector<16x1xf32>
    %619 = vector.broadcast %618 : vector<16x1xf32> to vector<16x128xf32>
    %620 = arith.mulf %615, %619 : vector<16x128xf32>
    %621 = vector.extract_strided_slice %15 {offsets = [13, 0], sizes = [1, 128], strides = [1, 1]} : vector<17x128xf32> to vector<1x128xf32>
    %622 = vector.broadcast %621 : vector<1x128xf32> to vector<16x128xf32>
    %623 = arith.mulf %620, %622 : vector<16x128xf32>
    %624 = vector.extract_strided_slice %15 {offsets = [14, 0], sizes = [1, 128], strides = [1, 1]} : vector<17x128xf32> to vector<1x128xf32>
    %625 = vector.broadcast %624 : vector<1x128xf32> to vector<16x128xf32>
    %626 = arith.addf %623, %625 : vector<16x128xf32>
    %627 = arith.truncf %626 : vector<16x128xf32> to vector<16x128xbf16>
    %c0_122 = arith.constant 0 : index
    %c0_123 = arith.constant 0 : index
    %628 = vector.load %arg17[%c0_122, %c0_123] : memref<128x256xbf16, #tpu.memory_space<vmem>>, vector<128x256xbf16>
    %cst_124 = arith.constant dense<0.000000e+00> : vector<16x256xf32>
    %629 = tpu.matmul %627, %628, %cst_124 {dimension_numbers = #tpu.dot_dimension_numbers<[1], [0], [0], [1], [0, 0, 1, 1], [], []>} : vector<16x128xbf16>, vector<128x256xbf16>, vector<16x256xf32> -> vector<16x256xf32>
    %c0_125 = arith.constant 0 : index
    %c0_126 = arith.constant 0 : index
    %630 = vector.load %arg20[%c0_125, %c0_126] : memref<1x256xf32, #tpu.memory_space<vmem>>, vector<1x256xf32>
    %631 = vector.broadcast %630 : vector<1x256xf32> to vector<16x256xf32>
    %632 = arith.addf %629, %631 : vector<16x256xf32>
    %cst_127 = arith.constant 0.000000e+00 : f32
    %633 = vector.broadcast %cst_127 : f32 to vector<16x256xf32>
    %634 = arith.maximumf %632, %633 : vector<16x256xf32>
    %635 = arith.truncf %634 : vector<16x256xf32> to vector<16x256xbf16>
    %c0_128 = arith.constant 0 : index
    %c0_129 = arith.constant 0 : index
    %636 = vector.load %arg18[%c0_128, %c0_129] : memref<256x128xbf16, #tpu.memory_space<vmem>>, vector<256x128xbf16>
    %cst_130 = arith.constant dense<0.000000e+00> : vector<16x128xf32>
    %637 = tpu.matmul %635, %636, %cst_130 {dimension_numbers = #tpu.dot_dimension_numbers<[1], [0], [0], [1], [0, 0, 1, 1], [], []>} : vector<16x256xbf16>, vector<256x128xbf16>, vector<16x128xf32> -> vector<16x128xf32>
    %638 = arith.addf %602, %637 : vector<16x128xf32>
    %639 = vector.extract_strided_slice %15 {offsets = [8, 0], sizes = [1, 128], strides = [1, 1]} : vector<17x128xf32> to vector<1x128xf32>
    %640 = vector.broadcast %639 : vector<1x128xf32> to vector<16x128xf32>
    %641 = arith.addf %638, %640 : vector<16x128xf32>
    %cst_131 = arith.constant dense<0.000000e+00> : vector<16xf32>
    %642 = vector.multi_reduction <add>, %641, %cst_131 [1] : vector<16x128xf32> to vector<16xf32>
    %643 = vector.shape_cast %642 : vector<16xf32> to vector<16x1xf32>
    %cst_132 = arith.constant 1.280000e+02 : f32
    %644 = vector.broadcast %cst_132 : f32 to vector<16x1xf32>
    %645 = arith.divf %643, %644 : vector<16x1xf32>
    %646 = vector.broadcast %645 : vector<16x1xf32> to vector<16x128xf32>
    %647 = arith.subf %641, %646 : vector<16x128xf32>
    %648 = arith.mulf %647, %647 : vector<16x128xf32>
    %cst_133 = arith.constant dense<0.000000e+00> : vector<16xf32>
    %649 = vector.multi_reduction <add>, %648, %cst_133 [1] : vector<16x128xf32> to vector<16xf32>
    %650 = vector.shape_cast %649 : vector<16xf32> to vector<16x1xf32>
    %cst_134 = arith.constant 1.280000e+02 : f32
    %651 = vector.broadcast %cst_134 : f32 to vector<16x1xf32>
    %652 = arith.divf %650, %651 : vector<16x1xf32>
    %653 = vector.broadcast %645 : vector<16x1xf32> to vector<16x128xf32>
    %654 = arith.subf %641, %653 : vector<16x128xf32>
    %cst_135 = arith.constant 9.99999974E-6 : f32
    %655 = vector.broadcast %cst_135 : f32 to vector<16x1xf32>
    %656 = arith.addf %652, %655 : vector<16x1xf32>
    %657 = math.rsqrt %656 : vector<16x1xf32>
    %658 = vector.broadcast %657 : vector<16x1xf32> to vector<16x128xf32>
    %659 = arith.mulf %654, %658 : vector<16x128xf32>
    %660 = vector.extract_strided_slice %15 {offsets = [15, 0], sizes = [1, 128], strides = [1, 1]} : vector<17x128xf32> to vector<1x128xf32>
    %661 = vector.broadcast %660 : vector<1x128xf32> to vector<16x128xf32>
    %662 = arith.mulf %659, %661 : vector<16x128xf32>
    %663 = vector.extract_strided_slice %15 {offsets = [16, 0], sizes = [1, 128], strides = [1, 1]} : vector<17x128xf32> to vector<1x128xf32>
    %664 = vector.broadcast %663 : vector<1x128xf32> to vector<16x128xf32>
    %665 = arith.addf %662, %664 : vector<16x128xf32>
    %c0_136 = arith.constant 0 : index
    %c0_137 = arith.constant 0 : index
    %c0_138 = arith.constant 0 : index
    %666 = vector.load %arg21[%c0_136, %c0_137, %c0_138] : memref<1x16x128xf32, #tpu.memory_space<vmem>>, vector<1x16x128xf32>
    %667 = vector.shape_cast %666 : vector<1x16x128xf32> to vector<16x128xf32>
    %668 = vector.shape_cast %665 : vector<16x128xf32> to vector<1x16x128xf32>
    tpu.vector_store %arg21[%c0_136, %c0_137, %c0_138], %668 {strides = array<i32>} : memref<1x16x128xf32, #tpu.memory_space<vmem>>, vector<1x16x128xf32>,
    return
  }
  func.func @transform_0(%arg0: i32) -> (i32, i32, i32) {
    %c0_i32 = arith.constant 0 : i32
    %c0_i32_0 = arith.constant 0 : i32
    %c0_i32_1 = arith.constant 0 : i32
    return %arg0, %c0_i32, %c0_i32_0 : i32, i32, i32
  }
  func.func @transform_1(%arg0: i32) -> (i32, i32, i32) {
    %c0_i32 = arith.constant 0 : i32
    %c0_i32_0 = arith.constant 0 : i32
    %c0_i32_1 = arith.constant 0 : i32
    return %arg0, %c0_i32, %c0_i32_0 : i32, i32, i32
  }
  func.func @transform_2(%arg0: i32) -> (i32, i32, i32) {
    %c0_i32 = arith.constant 0 : i32
    %c0_i32_0 = arith.constant 0 : i32
    %c0_i32_1 = arith.constant 0 : i32
    return %arg0, %c0_i32, %c0_i32_0 : i32, i32, i32
  }
  func.func @transform_3(%arg0: i32) -> (i32, i32, i32) {
    %c0_i32 = arith.constant 0 : i32
    %c0_i32_0 = arith.constant 0 : i32
    %c0_i32_1 = arith.constant 0 : i32
    return %arg0, %c0_i32, %c0_i32_0 : i32, i32, i32
  }
  func.func @transform_4(%arg0: i32) -> (i32, i32) {
    %c0_i32 = arith.constant 0 : i32
    %c0_i32_0 = arith.constant 0 : i32
    %c0_i32_1 = arith.constant 0 : i32
    return %c0_i32, %c0_i32_0 : i32, i32
  }
  func.func @transform_5(%arg0: i32) -> (i32, i32) {
    %c0_i32 = arith.constant 0 : i32
    %c0_i32_0 = arith.constant 0 : i32
    %c0_i32_1 = arith.constant 0 : i32
    return %c0_i32, %c0_i32_0 : i32, i32
  }
  func.func @transform_6(%arg0: i32) -> (i32, i32) {
    %c0_i32 = arith.constant 0 : i32
    %c0_i32_0 = arith.constant 0 : i32
    %c0_i32_1 = arith.constant 0 : i32
    return %c0_i32, %c0_i32_0 : i32, i32
  }
  func.func @transform_7(%arg0: i32) -> (i32, i32) {
    %c0_i32 = arith.constant 0 : i32
    %c0_i32_0 = arith.constant 0 : i32
    %c0_i32_1 = arith.constant 0 : i32
    return %c0_i32, %c0_i32_0 : i32, i32
  }
  func.func @transform_8(%arg0: i32) -> (i32, i32) {
    %c0_i32 = arith.constant 0 : i32
    %c0_i32_0 = arith.constant 0 : i32
    %c0_i32_1 = arith.constant 0 : i32
    return %c0_i32, %c0_i32_0 : i32, i32
  }
  func.func @transform_9(%arg0: i32) -> (i32, i32) {
    %c0_i32 = arith.constant 0 : i32
    %c0_i32_0 = arith.constant 0 : i32
    %c0_i32_1 = arith.constant 0 : i32
    return %c0_i32, %c0_i32_0 : i32, i32
  }
  func.func @transform_10(%arg0: i32) -> (i32, i32) {
    %c0_i32 = arith.constant 0 : i32
    %c0_i32_0 = arith.constant 0 : i32
    %c0_i32_1 = arith.constant 0 : i32
    return %c0_i32, %c0_i32_0 : i32, i32
  }
  func.func @transform_11(%arg0: i32) -> (i32, i32) {
    %c0_i32 = arith.constant 0 : i32
    %c0_i32_0 = arith.constant 0 : i32
    %c0_i32_1 = arith.constant 0 : i32
    return %c0_i32, %c0_i32_0 : i32, i32
  }
  func.func @transform_12(%arg0: i32) -> (i32, i32) {
    %c0_i32 = arith.constant 0 : i32
    %c0_i32_0 = arith.constant 0 : i32
    %c0_i32_1 = arith.constant 0 : i32
    return %c0_i32, %c0_i32_0 : i32, i32
  }
  func.func @transform_13(%arg0: i32) -> (i32, i32) {
    %c0_i32 = arith.constant 0 : i32
    %c0_i32_0 = arith.constant 0 : i32
    %c0_i32_1 = arith.constant 0 : i32
    return %c0_i32, %c0_i32_0 : i32, i32
  }
  func.func @transform_14(%arg0: i32) -> (i32, i32) {
    %c0_i32 = arith.constant 0 : i32
    %c0_i32_0 = arith.constant 0 : i32
    %c0_i32_1 = arith.constant 0 : i32
    return %c0_i32, %c0_i32_0 : i32, i32
  }
  func.func @transform_15(%arg0: i32) -> (i32, i32) {
    %c0_i32 = arith.constant 0 : i32
    %c0_i32_0 = arith.constant 0 : i32
    %c0_i32_1 = arith.constant 0 : i32
    return %c0_i32, %c0_i32_0 : i32, i32
  }
  func.func @transform_16(%arg0: i32) -> (i32, i32) {
    %c0_i32 = arith.constant 0 : i32
    %c0_i32_0 = arith.constant 0 : i32
    %c0_i32_1 = arith.constant 0 : i32
    return %c0_i32, %c0_i32_0 : i32, i32
  }
  func.func @transform_17(%arg0: i32) -> (i32, i32) {
    %c0_i32 = arith.constant 0 : i32
    %c0_i32_0 = arith.constant 0 : i32
    %c0_i32_1 = arith.constant 0 : i32
    return %c0_i32, %c0_i32_0 : i32, i32
  }
  func.func @transform_18(%arg0: i32) -> (i32, i32) {
    %c0_i32 = arith.constant 0 : i32
    %c0_i32_0 = arith.constant 0 : i32
    %c0_i32_1 = arith.constant 0 : i32
    return %c0_i32, %c0_i32_0 : i32, i32
  }
  func.func @transform_19(%arg0: i32) -> (i32, i32) {
    %c0_i32 = arith.constant 0 : i32
    %c0_i32_0 = arith.constant 0 : i32
    %c0_i32_1 = arith.constant 0 : i32
    return %c0_i32, %c0_i32_0 : i32, i32
  }
  func.func @transform_20(%arg0: i32) -> (i32, i32, i32) {
    %c0_i32 = arith.constant 0 : i32
    %c0_i32_0 = arith.constant 0 : i32
    %c0_i32_1 = arith.constant 0 : i32
    return %arg0, %c0_i32, %c0_i32_0 : i32, i32, i32
  }
}

</mosaic_0001>

<bundles_post_ra>
// kernel: decoder_layer_forward.1
= control target key start
LH: loop header
LB: loop body
LE: loop exit
PB: predicated region body
PF: predicated region fallthrough
CT: control target
= control target key end

     0   :  { %s11743_s0 = inlined_call_operand.vmem [shape: f32[2,16,128], index: 0, kind: input, shape index: {}]   ;;  %s11744_s1 = inlined_call_operand.hbm [shape: f32[2,32,128], index: 1, kind: input, shape index: {}]   ;;  %s11745_s2 = inlined_call_operand.vmem [shape: f32[2,16,128], index: 2, kind: input, shape index: {}]   ;;  %s11746_s3 = inlined_call_operand.hbm [shape: f32[2,32,128], index: 3, kind: input, shape index: {}]   ;;  %s11747_s4 = inlined_call_operand.vmem [shape: f32[16,16], index: 4, kind: input, shape index: {}]   ;;  %s11748_s5 = inlined_call_operand.vmem [shape: f32[16,16], index: 5, kind: input, shape index: {}]   ;;  %s11749_s6 = inlined_call_operand.vmem [shape: f32[16,16], index: 6, kind: input, shape index: {}]   ;;  %s11750_s7 = inlined_call_operand.vmem [shape: f32[16,16], index: 7, kind: input, shape index: {}]   ;;  %s11751_s8 = inlined_call_operand.vmem [shape: f32[32,16], index: 8, kind: input, shape index: {}]   ;;  %s11752_s9 = inlined_call_operand.vmem [shape: f32[32,16], index: 9, kind: input, shape index: {}]   ;;  %s11753_s10 = inlined_call_operand.hbm [shape: bf16[128,1024], index: 10, kind: input, shape index: {}]   ;;  %s11754_s11 = inlined_call_operand.vmem [shape: bf16[128,256], index: 11, kind: input, shape index: {}]   ;;  %s11755_s12 = inlined_call_operand.vmem [shape: bf16[256,128], index: 12, kind: input, shape index: {}]   ;;  %s11756_s13 = inlined_call_operand.hbm [shape: f32[17,128], index: 13, kind: input, shape index: {}]   ;;  %s11757_s14 = inlined_call_operand.hbm [shape: f32[1,256], index: 14, kind: input, shape index: {}]   ;;  %s11758_s15 = inlined_call_operand.hbm [shape: bf16[128,1024], index: 15, kind: input, shape index: {}]   ;;  %s11759_s16 = inlined_call_operand.hbm [shape: bf16[128,256], index: 16, kind: input, shape index: {}]   ;;  %s11760_s17 = inlined_call_operand.hbm [shape: bf16[256,128], index: 17, kind: input, shape index: {}]   ;;  %s11761_s18 = inlined_call_operand.hbm [shape: f32[17,128], index: 18, kind: input, shape index: {}]   ;;  %s11762_s19 = inlined_call_operand.hbm [shape: f32[1,256], index: 19, kind: input, shape index: {}]   ;;  %s11763_s20 = inlined_call_operand.hbm [shape: f32[2,16,128], index: 20, kind: output, shape index: {}]  }
   0x1   :  { %11798 = sst [smem:[#allocation30_spill]] %s11743_s0 }
   0x2   :  { %11799 = sst [smem:[#allocation31_spill]] %s11744_s1 }
   0x3   :  { %11800 = sst [smem:[#allocation32_spill]] %s11745_s2 }
   0x4   :  { %11801 = sst [smem:[#allocation33_spill]] %s11746_s3 }
   0x5   :  { %11802 = sst [smem:[#allocation34_spill]] %s11747_s4 }
   0x6   :  { %11803 = sst [smem:[#allocation35_spill]] %s11748_s5 }
   0x7   :  { %11804 = sst [smem:[#allocation36_spill]] %s11749_s6 }
   0x8   :  { %11805 = sst [smem:[#allocation37_spill]] %s11751_s8 }
   0x9   :  { %11806 = sst [smem:[#allocation38_spill]] %s11752_s9 }
   0xa   :  { %11807 = sst [smem:[#allocation39_spill]] %s11753_s10 }
   0xb   :  { %11808 = sst [smem:[#allocation40_spill]] %s11754_s11 }
   0xc   :  { %11809 = sst [smem:[#allocation41_spill]] %s11755_s12 }
   0xd   :  { %11810 = sst [smem:[#allocation42_spill]] %s11756_s13 }
   0xe   :  { %11811 = sst [smem:[#allocation43_spill]] %s11757_s14 }
   0xf   :  { %11812 = sst [smem:[#allocation44_spill]] %s11758_s15 }
  0x10   :  { %11813 = sst [smem:[#allocation45_spill]] %s11759_s16 }
  0x11   :  { %11814 = sst [smem:[#allocation46_spill]] %s11760_s17 }
  0x12   :  { %11815 = sst [smem:[#allocation47_spill]] %s11761_s18 }
  0x13   :  { %11816 = sst [smem:[#allocation48_spill]] %s11762_s19 }
  0x14   :  { %11817 = sst [smem:[#allocation49_spill]] %s11763_s20 }
  0x15   :  { %25 = vsyncpa [#allocation3], 0 }
  0x16   :  { %27 = vsyncpa [#allocation3 + $0x1], 0 }
  0x17   :  { %28 = vsyncpa [#allocation6], 0 }
  0x18   :  { %30 = vsyncpa [#allocation6 + $0x1], 0 }
  0x19   :  { %31 = vsyncpa [#allocation9], 0 }
  0x1a   :  { %32 = vsyncpa [#allocation12], 0 }
  0x1b   :  { %33 = vsyncpa [#allocation15], 0 }
  0x1c   :  { %34 = vsyncpa [#allocation18], 0 }
  0x1d   :  { %35 = vsyncpa [#allocation4], 0 }
  0x1e   :  { %37 = vsyncpa [#allocation4 + $0x1], 0  ;;  %s9144_s1 = smov 0   ;;  %s9146_s22 = smov 0  }
  0x1f   :  { %s9148_s23 = smov 0   ;;  %s9150_s24 = smov 0  }
  0x20 LB: > { %s9012_s2 = smov [#allocation7]   ;;  %s9165_s3 = sadd.s32 4294967295, %s9010_s24   ;;  %s9010_s24 = sphi %s9150_s24, %s11878_s24   ;;  %s9006_s23 = sphi %s9148_s23, %s11877_s23   ;;  %s9002_s22 = sphi %s9146_s22, %s11876_s22   ;;  %s8998_s1 = sphi %s9144_s1, %s11875_s1  }
  0x21   : > { %s544_s25 = sshll.u32 %s9012_s2, 4  ;;  %p7135_p0 = scmp.ge.s32.totalorder %s9010_s24, 1  ;;  %s9170_s25 = int_to_ptr.vmem [resolvable:$true] %s544_s25 }
  0x22   : > { %p11775_p1 = scmp.eq.s32.totalorder %s9165_s3, 0  ;;  %p514_p2 = scmp.lt.s32.totalorder %s9010_s24, 3 }
  0x23   : > { %s9013_s27 = smov [#allocation8]   ;;  %s9014_s29 = smov [#allocation11]  }
  0x24   : > { %p9172_p3 = pnand %p7135_p0, %p514_p2  ;;  %s563_s28 = sshll.u32 %s9013_s27, 4  ;;  %s9185_s28 = int_to_ptr.vmem [resolvable:$true] %s563_s28 }
  0x25   : > { %s9187_s30 = sshll.u32 %s9014_s29, 4  ;;  %s11820_s10 = sld [smem:[#allocation39_spill]]  ;;  %s588_s30 = int_to_ptr.vmem [resolvable:$true] %s9187_s30 }
  0x26   : > { %s11818_s26 = scalar_select %p9172_p3, 1, 0 }
  0x27   : > { %p8115_p5 = pneg %p9172_p3 }
  0x29   : > { %p9181_p6 = pnand %p8115_p5, %p11775_p1 }
  0x2b   : > { %s8636_s2 = scalar_lea.hbm %s11820_s10, 8192  ;;  %p9197_p8 = pneg %p9181_p6 }
  0x2c   : > { %p8637_p7 = scmp.ne.s32.totalorder %s11820_s10, %s8636_s2  ;;  %p8643_p11 = scmp.lt.u32.totalorder %s8636_s2, %s11820_s10 }
  0x2e   : > { %p8639_p9 = pnand %p9197_p8, %p8637_p7 }
  0x30   : > { %p8640_p10 = pneg %p8639_p9 }
  0x32   : > { %p8645_p12 = pnand %p8643_p11, %p8640_p10 }
  0x34   : > { %8648 = shalt.err (!%p8645_p12)
}
  0x35   : > { %s8649_s8 = scalar_lea.vmem %s9170_s25, 8192  ;;  %p8657_p5 = scmp.lt.s32.totalorder %s9170_s25, %s9170_s25 }
  0x36   : > { %p8650_p13 = scmp.ne.s32.totalorder %s9170_s25, %s8649_s8  ;;  %p8658_p4 = scmp.lt.s32.totalorder %s8649_s8, %s8649_s8 }
  0x38   : > { %p8652_p0 = pnand %p8650_p13, %p9197_p8  ;;  %p8659_p7 = por %p8658_p4, %p8657_p5 }
  0x3a   : > { %p8653_p2 = pneg %p8652_p0 }
  0x3c   : > { %p8660_p9 = pnand %p8659_p7, %p8653_p2 }
  0x3e   : > { %8663 = shalt.err (!%p8660_p9)
}
  0x3f   : > { %s11774_s20 = smov 512   ;;  %s9016_s9 = smov 32  }
  0x40   : > { %8118 = dma.hbm_to_vmem [thread:$0]  (!%p9181_p6), %s11820_s10, 8192, %s9170_s25, [#allocation6], %s11774_s20, %s11774_s20, %s9016_s9  }
  0x41   : > { %s11822_s13 = sld [smem:[#allocation42_spill]] }
  0x47   : > { %s8664_s8 = scalar_lea.hbm %s11822_s13, 384 }
  0x48   : > { %p8665_p4 = scmp.ne.s32.totalorder %s11822_s13, %s8664_s8  ;;  %p8671_p12 = scmp.lt.u32.totalorder %s8664_s8, %s11822_s13 }
  0x4a   : > { %p8667_p10 = pnand %p8665_p4, %p9197_p8 }
  0x4c   : > { %p8668_p11 = pneg %p8667_p10 }
  0x4e   : > { %p8673_p13 = pnand %p8671_p12, %p8668_p11 }
  0x50   : > { %8676 = shalt.err (!%p8673_p13)
}
  0x51   : > { %s8677_s25 = scalar_lea.vmem %s9185_s28, 384  ;;  %p8685_p7 = scmp.lt.s32.totalorder %s9185_s28, %s9185_s28 }
  0x52   : > { %p8678_p0 = scmp.ne.s32.totalorder %s9185_s28, %s8677_s25  ;;  %p8686_p9 = scmp.lt.s32.totalorder %s8677_s25, %s8677_s25 }
  0x54   : > { %p8680_p2 = pnand %p8678_p0, %p9197_p8  ;;  %p8687_p4 = por %p8686_p9, %p8685_p7 }
  0x56   : > { %p8681_p5 = pneg %p8680_p2 }
  0x58   : > { %p8688_p10 = pnand %p8687_p4, %p8681_p5 }
  0x5a   : > { %8691 = shalt.err (!%p8688_p10)
}
  0x5b   : > { %s11777_s11 = smov 128   ;;  %s11779_s5 = smov 8  }
  0x5c   : > { %8121 = dma.hbm_to_vmem [thread:$0]  (!%p9181_p6), %s11822_s13, 384, %s9185_s28, [#allocation9], %s11777_s11, %s11777_s11, %s11779_s5  }
  0x5d   : > { %s11823_s15 = sld [smem:[#allocation44_spill]] }
  0x63   : > { %s8692_s2 = scalar_lea.hbm %s11823_s15, 8192 }
  0x64   : > { %p8693_p11 = scmp.ne.s32.totalorder %s11823_s15, %s8692_s2  ;;  %p8699_p0 = scmp.lt.u32.totalorder %s8692_s2, %s11823_s15 }
  0x66   : > { %p8695_p12 = pnand %p8693_p11, %p9197_p8 }
  0x68   : > { %p8696_p13 = pneg %p8695_p12 }
  0x6a   : > { %p8701_p2 = pnand %p8699_p0, %p8696_p13 }
  0x6c   : > { %8704 = shalt.err (!%p8701_p2)
}
  0x6d   : > { %s8705_s6 = scalar_lea.vmem %s588_s30, 8192  ;;  %p8713_p4 = scmp.lt.s32.totalorder %s588_s30, %s588_s30 }
  0x6e   : > { %p8706_p5 = scmp.ne.s32.totalorder %s588_s30, %s8705_s6  ;;  %p8714_p10 = scmp.lt.s32.totalorder %s8705_s6, %s8705_s6 }
  0x70   : > { %p8708_p7 = pnand %p8706_p5, %p9197_p8  ;;  %p8715_p1 = por %p8714_p10, %p8713_p4 }
  0x72   : > { %p8709_p9 = pneg %p8708_p7 }
  0x74   : > { %p8716_p3 = pnand %p8715_p1, %p8709_p9 }
  0x76   : > { %8719 = shalt.err (!%p8716_p3)
}
  0x77   : > { %s11824_s28 = smov 512   ;;  %s9019_s0 = smov [#allocation14]  }
  0x78   : > { %8127 = dma.hbm_to_vmem [thread:$0]  (!%p9181_p6), %s11823_s15, 8192, %s588_s30, [#allocation12], %s11824_s28, %s11824_s28, %s9016_s9  }
  0x79   : > { %s613_s21 = sshll.u32 %s9019_s0, 4  ;;  %s11825_s17 = sld [smem:[#allocation46_spill]]  ;;  %s614_s21 = int_to_ptr.vmem [resolvable:$true] %s613_s21 }
  0x7f   : > { %s8720_s8 = scalar_lea.hbm %s11825_s17, 2048 }
  0x80   : > { %p8721_p1 = scmp.ne.s32.totalorder %s11825_s17, %s8720_s8  ;;  %p8727_p12 = scmp.lt.u32.totalorder %s8720_s8, %s11825_s17 }
  0x82   : > { %p8723_p3 = pnand %p8721_p1, %p9197_p8 }
  0x84   : > { %p8724_p11 = pneg %p8723_p3 }
  0x86   : > { %p8729_p13 = pnand %p8727_p12, %p8724_p11 }
  0x88   : > { %8732 = shalt.err (!%p8729_p13)
}
  0x89   : > { %s8733_s30 = scalar_lea.vmem %s614_s21, 2048  ;;  %p8741_p7 = scmp.lt.s32.totalorder %s614_s21, %s614_s21 }
  0x8a   : > { %p8734_p0 = scmp.ne.s32.totalorder %s614_s21, %s8733_s30  ;;  %p8742_p9 = scmp.lt.s32.totalorder %s8733_s30, %s8733_s30 }
  0x8c   : > { %p8736_p2 = pnand %p8734_p0, %p9197_p8  ;;  %p8743_p4 = por %p8742_p9, %p8741_p7 }
  0x8e   : > { %p8737_p5 = pneg %p8736_p2 }
  0x90   : > { %p8744_p10 = pnand %p8743_p4, %p8737_p5 }
  0x92   : > { %8747 = shalt.err (!%p8744_p10)
}
  0x93   : > { %s9020_s9 = smov 64   ;;  %s9021_s28 = smov 4  }
  0x94   : > { %8133 = dma.hbm_to_vmem [thread:$0]  (!%p9181_p6), %s11825_s17, 2048, %s614_s21, [#allocation15], %s9020_s9, %s9020_s9, %s9021_s28  }
  0x95   : > { %s9022_s20 = smov [#allocation10]   ;;  %s9023_s0 = smov [#allocation13]  }
  0x96   : > { %s577_s12 = sshll.u32 %s9022_s20, 4  ;;  %s600_s2 = sshll.u32 %s9023_s0, 4  ;;  %s578_s12 = int_to_ptr.vmem [resolvable:$true] %s577_s12  ;;  %s9287_s2 = int_to_ptr.vmem [resolvable:$true] %s600_s2 }
  0x97   : > { %s11826_s14 = sld [smem:[#allocation43_spill]] }
  0x9d   : > { %s8748_s25 = scalar_lea.hbm %s11826_s14, 32 }
  0x9e   : > { %p8749_p1 = scmp.ne.s32.totalorder %s11826_s14, %s8748_s25  ;;  %p8755_p12 = scmp.lt.u32.totalorder %s8748_s25, %s11826_s14 }
  0xa0   : > { %p8751_p3 = pnand %p8749_p1, %p9197_p8 }
  0xa2   : > { %p8752_p11 = pneg %p8751_p3 }
  0xa4   : > { %p8757_p13 = pnand %p8755_p12, %p8752_p11 }
  0xa6   : > { %8760 = shalt.err (!%p8757_p13)
}
  0xa7   : > { %s8761_s9 = scalar_lea.vmem %s578_s12, 32  ;;  %p8769_p7 = scmp.lt.s32.totalorder %s578_s12, %s578_s12 }
  0xa8   : > { %p8762_p0 = scmp.ne.s32.totalorder %s578_s12, %s8761_s9  ;;  %p8770_p9 = scmp.lt.s32.totalorder %s8761_s9, %s8761_s9 }
  0xaa   : > { %p8764_p2 = pnand %p8762_p0, %p9197_p8  ;;  %p8771_p4 = por %p8770_p9, %p8769_p7 }
  0xac   : > { %p8765_p5 = pneg %p8764_p2 }
  0xae   : > { %p8772_p10 = pnand %p8771_p4, %p8765_p5 }
  0xb0   : > { %8775 = shalt.err (!%p8772_p10)
}
  0xb1   : > { %8124 = dma.hbm_to_vmem [thread:$0]  (!%p9181_p6), %s11826_s14, 32, %s578_s12, [#allocation9]  }
  0xb2   : > { %s11827_s16 = sld [smem:[#allocation45_spill]] }
  0xb8   : > { %s8776_s29 = scalar_lea.hbm %s11827_s16, 2048 }
  0xb9   : > { %p8777_p1 = scmp.ne.s32.totalorder %s11827_s16, %s8776_s29  ;;  %p8783_p12 = scmp.lt.u32.totalorder %s8776_s29, %s11827_s16 }
  0xbb   : > { %p8779_p3 = pnand %p8777_p1, %p9197_p8 }
  0xbd   : > { %p8780_p11 = pneg %p8779_p3 }
  0xbf   : > { %p8785_p13 = pnand %p8783_p12, %p8780_p11 }
  0xc1   : > { %8788 = shalt.err (!%p8785_p13)
}
  0xc2   : > { %s8789_s12 = scalar_lea.vmem %s9287_s2, 2048  ;;  %p8797_p7 = scmp.lt.s32.totalorder %s9287_s2, %s9287_s2 }
  0xc3   : > { %p8790_p0 = scmp.ne.s32.totalorder %s9287_s2, %s8789_s12  ;;  %p8798_p9 = scmp.lt.s32.totalorder %s8789_s12, %s8789_s12 }
  0xc5   : > { %p8792_p2 = pnand %p8790_p0, %p9197_p8  ;;  %p8799_p4 = por %p8798_p9, %p8797_p7 }
  0xc7   : > { %p8793_p5 = pneg %p8792_p2 }
  0xc9   : > { %p8800_p10 = pnand %p8799_p4, %p8793_p5 }
  0xcb   : > { %8803 = shalt.err (!%p8800_p10)
}
  0xcc   : > { %s11828_s11 = smov 8   ;;  %s11829_s21 = smov 128  }
  0xcd   : > { %8130 = dma.hbm_to_vmem [thread:$0]  (!%p9181_p6), %s11827_s16, 2048, %s9287_s2, [#allocation12], %s11829_s21, %s11829_s21, %s11828_s11  }
  0xce   : > { %s9024_s5 = smov [#allocation16]   ;;  %s9025_s0 = smov [#allocation17]  }
  0xcf   : > { %s626_s20 = sshll.u32 %s9024_s5, 4  ;;  %s640_s29 = sshll.u32 %s9025_s0, 4  ;;  %s627_s20 = int_to_ptr.vmem [resolvable:$true] %s626_s20  ;;  %s9333_s29 = int_to_ptr.vmem [resolvable:$true] %s640_s29 }
  0xd0   : > { %s11830_s18 = sld [smem:[#allocation47_spill]] }
  0xd6   : > { %s8804_s6 = scalar_lea.hbm %s11830_s18, 384 }
  0xd7   : > { %p8805_p1 = scmp.ne.s32.totalorder %s11830_s18, %s8804_s6  ;;  %p8811_p12 = scmp.lt.u32.totalorder %s8804_s6, %s11830_s18 }
  0xd9   : > { %p8807_p3 = pnand %p8805_p1, %p9197_p8 }
  0xdb   : > { %p8808_p11 = pneg %p8807_p3 }
  0xdd   : > { %p8813_p13 = pnand %p8811_p12, %p8808_p11 }
  0xdf   : > { %8816 = shalt.err (!%p8813_p13)
}
  0xe0   : > { %s8817_s28 = scalar_lea.vmem %s627_s20, 384  ;;  %p8825_p7 = scmp.lt.s32.totalorder %s627_s20, %s627_s20 }
  0xe1   : > { %p8818_p0 = scmp.ne.s32.totalorder %s627_s20, %s8817_s28  ;;  %p8826_p9 = scmp.lt.s32.totalorder %s8817_s28, %s8817_s28 }
  0xe3   : > { %p8820_p2 = pnand %p8818_p0, %p9197_p8  ;;  %p8827_p4 = por %p8826_p9, %p8825_p7 }
  0xe5   : > { %p8821_p5 = pneg %p8820_p2 }
  0xe7   : > { %p8828_p10 = pnand %p8827_p4, %p8821_p5 }
  0xe9   : > { %8831 = shalt.err (!%p8828_p10)
}
  0xea   : > { %8136 = dma.hbm_to_vmem [thread:$0]  (!%p9181_p6), %s11830_s18, 384, %s627_s20, [#allocation15], %s11829_s21, %s11829_s21, %s11828_s11  }
  0xeb   : > { %s11831_s19 = sld [smem:[#allocation48_spill]] }
  0xf1   : > { %s8832_s6 = scalar_lea.hbm %s11831_s19, 32 }
  0xf2   : > { %p8833_p1 = scmp.ne.s32.totalorder %s11831_s19, %s8832_s6  ;;  %p8839_p12 = scmp.lt.u32.totalorder %s8832_s6, %s11831_s19 }
  0xf4   : > { %p8835_p3 = pnand %p8833_p1, %p9197_p8 }
  0xf6   : > { %p8836_p11 = pneg %p8835_p3 }
  0xf8   : > { %p8841_p13 = pnand %p8839_p12, %p8836_p11 }
  0xfa   : > { %8844 = shalt.err (!%p8841_p13)
}
  0xfb   : > { %s8845_s20 = scalar_lea.vmem %s9333_s29, 32  ;;  %p8853_p7 = scmp.lt.s32.totalorder %s9333_s29, %s9333_s29 }
  0xfc   : > { %p8846_p0 = scmp.ne.s32.totalorder %s9333_s29, %s8845_s20  ;;  %p8854_p9 = scmp.lt.s32.totalorder %s8845_s20, %s8845_s20 }
  0xfe   : > { %p8848_p2 = pnand %p8846_p0, %p9197_p8  ;;  %p8855_p4 = por %p8854_p9, %p8853_p7 }
 0x100   : > { %p8849_p5 = pneg %p8848_p2 }
 0x102   : > { %p8856_p10 = pnand %p8855_p4, %p8849_p5 }
 0x104   : > { %8859 = shalt.err (!%p8856_p10)
}
 0x105   : > { %8139 = dma.hbm_to_vmem [thread:$0]  (!%p9181_p6), %s11831_s19, 32, %s9333_s29, [#allocation18]  }
 0x106   : > { %s7134_s4 = sadd.s32 4294967294, %s9010_s24   ;;  %s9381_s27 = sadd.s32 1, %s9010_s24  }
 0x107   : > { %s73_s0 = ssub.s32 %s9010_s24, %s9381_s27  ;;  %s76_s8 = sadd.s32 1, %s9006_s23 }
 0x108   : > { %p74_p8 = scmp.eq.s32.totalorder %s73_s0, 0  ;;  %p83_p1 = scmp.ne.s32.totalorder %s9006_s23, %s9002_s22 }
 0x109   : > { %p84_p3 = scmp.eq.s32.totalorder %s9010_s24, 0  ;;  %p89_p11 = scmp.ne.s32.totalorder %s9002_s22, %s8998_s1 }
 0x10a   : > { %s9392_s25 = scalar_select %p74_p8, %s9006_s23, %s76_s8  }
 0x10b   : > { %p9394_p12 = por %p84_p3, %p83_p1  ;;  %p11833_p13 = scmp.eq.s32.totalorder %s9165_s3, 0 }
 0x10c   : > { %p501_p0 = scmp.eq.s32.totalorder %s9165_s3, 1  ;;  %p507_p2 = scmp.eq.s32.totalorder %s7134_s4, 1 }
 0x10d   : > { %p9400_p6 = por %p11833_p13, %p89_p11  ;;  %p8159_p5 = scmp.lt.s32.totalorder %s9010_s24, 2 }
 0x10e   : > { %s659_s30 = sand.u32 1, %s9006_s23   ;;  %p9407_p7 = por %p501_p0, %p83_p1 }
 0x10f   : > { %p9411_p9 = por %p507_p2, %p89_p11  ;;  %s7145_s2 = sshll.u32 %s659_s30, 5 }
 0x110   : > { %s11835_s12 = scalar_select %p9407_p7, 1, 0 }
 0x111   : > { %s11836_s9 = scalar_select %p9411_p9, 1, 0 }
 0x112   : > { %s7398_s20 = sshll.u32 %s9010_s24, 9  ;;  %s11837_s0 = sld [smem:[#allocation31_spill]] }
 0x113   : > { %s663_s4 = scalar_lea.vmem [#allocation2], %s7145_s2  ;;  %p9425_p4 = pnand %p8159_p5, %p9394_p12 }
 0x114   : > { %s670_s10 = sshll.u32 %s663_s4, 4  ;;  %s11839_s16 = sld [smem:[#allocation33_spill]]  ;;  %s9421_s10 = int_to_ptr.vmem [resolvable:$true] %s670_s10 }
 0x115   : > { %s692_s5 = scalar_lea.vmem [#allocation5], %s7145_s2  ;;  %s9436_s18 = scalar_lea.sflag [#allocation3], %s659_s30 }
 0x116   : > { %s9434_s17 = sshll.u32 %s692_s5, 4  ;;  %p8862_p8 = pneg %p9425_p4  ;;  %s9468_s17 = int_to_ptr.vmem [resolvable:$true] %s9434_s17 }
 0x118   : > { %s9419_s8 = scalar_lea.hbm %s11837_s0, %s7398_s20  ;;  %s8865_s14 = scalar_lea.hbm %s11837_s0, 1024 }
 0x119   : > { %s8860_s4 = scalar_lea.hbm %s9419_s8, 512  ;;  %p8866_p11 = scmp.lt.u32.totalorder %s9419_s8, %s11837_s0 }
 0x11a   : > { %s9432_s28 = scalar_lea.hbm %s11839_s16, %s7398_s20  ;;  %p8861_p10 = scmp.ne.s32.totalorder %s9419_s8, %s8860_s4 }
 0x11b   : > { %p8867_p12 = scmp.lt.u32.totalorder %s8865_s14, %s8860_s4  ;;  %p8869_p0 = scmp.lt.u32.totalorder %s8860_s4, %s9419_s8 }
 0x11c   : > { %p8863_p1 = pnand %p8862_p8, %p8861_p10 }
 0x11d   : > { %p8868_p13 = por %p8867_p12, %p8866_p11 }
 0x11e   : > { %p8864_p3 = pneg %p8863_p1 }
 0x11f   : > { %p8870_p2 = por %p8869_p0, %p8868_p13 }
 0x121   : > { %p8871_p5 = pnand %p8870_p2, %p8864_p3 }
 0x123   : > { %8874 = shalt.err (!%p8871_p5)
}
 0x124   : > { %s8875_s30 = scalar_lea.vmem %s9421_s10, 512  ;;  %s9026_s19 = smov [#allocation2]  }
 0x125   : > { %p8876_p10 = scmp.ne.s32.totalorder %s9421_s10, %s8875_s30  ;;  %s8880_s2 = sshll.u32 %s9026_s19, 4  ;;  %s8881_s2 = int_to_ptr.vmem [resolvable:$false] %s8880_s2 }
 0x126   : > { %s8882_s5 = scalar_lea.vmem %s8881_s2, 1024  ;;  %p8883_p7 = scmp.lt.s32.totalorder %s9421_s10, %s8881_s2 }
 0x127   : > { %p8878_p1 = pnand %p8876_p10, %p8862_p8  ;;  %p8884_p11 = scmp.lt.s32.totalorder %s8882_s5, %s8875_s30 }
 0x129   : > { %p8879_p9 = pneg %p8878_p1  ;;  %p8885_p12 = por %p8884_p11, %p8883_p7 }
 0x12b   : > { %p8886_p13 = pnand %p8885_p12, %p8879_p9 }
 0x12d   : > { %8889 = shalt.err (!%p8886_p13)
}
 0x12e   : > { %8143 = dma.hbm_to_vmem [thread:$0]  (!%p9425_p4), %s9419_s8, 512, %s9421_s10, %s9436_s18, %s11829_s21, %s11829_s21, %s11828_s11  }
 0x12f   : > { %s688_s4 = sand.u32 1, %s9010_s24   ;;  %s8890_s14 = scalar_lea.hbm %s9432_s28, 512 }
 0x130   : > { %s9471_s6 = scalar_lea.sflag [#allocation6], %s688_s4  ;;  %p8891_p7 = scmp.ne.s32.totalorder %s9432_s28, %s8890_s14 }
 0x131   : > { %s8895_s30 = scalar_lea.hbm %s11839_s16, 1024  ;;  %p8896_p0 = scmp.lt.u32.totalorder %s9432_s28, %s11839_s16 }
 0x132   : > { %p8893_p9 = pnand %p8891_p7, %p8862_p8  ;;  %p8897_p2 = scmp.lt.u32.totalorder %s8895_s30, %s8890_s14 }
 0x133   : > { %p8899_p10 = scmp.lt.u32.totalorder %s8890_s14, %s9432_s28 }
 0x134   : > { %p8894_p3 = pneg %p8893_p9  ;;  %p8898_p5 = por %p8897_p2, %p8896_p0 }
 0x136   : > { %p8900_p1 = por %p8899_p10, %p8898_p5 }
 0x138   : > { %p8901_p11 = pnand %p8900_p1, %p8894_p3 }
 0x13a   : > { %8904 = shalt.err (!%p8901_p11)
}
 0x13b   : > { %s8905_s10 = scalar_lea.vmem %s9468_s17, 512  ;;  %s9027_s18 = smov [#allocation5]  }
 0x13c   : > { %p8906_p12 = scmp.ne.s32.totalorder %s9468_s17, %s8905_s10  ;;  %s8910_s8 = sshll.u32 %s9027_s18, 4  ;;  %s8911_s8 = int_to_ptr.vmem [resolvable:$false] %s8910_s8 }
 0x13d   : > { %s8912_s5 = scalar_lea.vmem %s8911_s8, 1024  ;;  %p8913_p9 = scmp.lt.s32.totalorder %s9468_s17, %s8911_s8 }
 0x13e   : > { %p8908_p13 = pnand %p8906_p12, %p8862_p8  ;;  %p8914_p0 = scmp.lt.s32.totalorder %s8912_s5, %s8905_s10 }
 0x140   : > { %p8909_p7 = pneg %p8908_p13  ;;  %p8915_p2 = por %p8914_p0, %p8913_p9 }
 0x142   : > { %p8916_p5 = pnand %p8915_p2, %p8909_p7 }
 0x144   : > { %8919 = shalt.err (!%p8916_p5)
}
 0x145   : > { %8146 = dma.hbm_to_vmem [thread:$0]  (!%p9425_p4), %s9432_s28, 512, %s9468_s17, %s9471_s6, %s11829_s21, %s11829_s21, %s11828_s11  }
 0x146   : > { %p11840_p8 = scmp.ne.s32.totalorder %s11818_s26, 0 }
 0x148   : > { %711 = sbr.rel (%p11840_p8) target bundleno = 10211 (0x27e3), region = 100 }
 0x14f   : > { %s9503_s4 = sand.u32 1, %s9002_s22  }
 0x150   : > { %s7152_s14 = sshll.u32 %s9503_s4, 5  ;;  %s714_s15 = scalar_lea.sflag [#allocation3], %s9503_s4 }
 0x151   : > { %s9507_s20 = scalar_lea.vmem [#allocation2], %s7152_s14 }
 0x152   : > { %8965 = dma.done.wait (%p9400_p6), %s714_s15, 512  }
 0x153   : > { %8967 = vsyncadd (%p9400_p6), %s714_s15, 4294966784  ;;  %s722_s13 = sand.u32 1, %s9165_s3   ;;  %s9514_s26 = scalar_lea.vmem [#allocation5], %s7152_s14 }
 0x154   : > { %s723_s17 = scalar_lea.sflag [#allocation6], %s722_s13 }
 0x155   : > { %8969 = dma.done.wait (%p9400_p6), %s723_s17, 512  }
 0x156   : > { %8971 = vsyncadd (%p9400_p6), %s723_s17, 4294966784  ;;  %p11841_p4 = scmp.eq.s32.totalorder %s9165_s3, 0 }
 0x158   : > { %8973 = dma.done.wait (%p11841_p4), [#allocation6], 8192   ;;  %p11842_p3 = pmov %p11841_p4 }
 0x15a   : > { %8975 = vsyncadd (%p11842_p3), [#allocation6], 4294959104  ;;  %p11843_p10 = pmov %p11842_p3 }
 0x15b   : > { %p11844_p1 = pmov %p11842_p3 }
 0x15c   : > { %8977 = dma.done.wait (%p11843_p10), [#allocation9], 416  }
 0x15d   : > { %8979 = vsyncadd (%p11844_p1), [#allocation9], 4294966880  ;;  %p11845_p11 = pmov %p11844_p1 }
 0x15e   : > { %p11846_p12 = pmov %p11844_p1 }
 0x15f   : > { %8981 = dma.done.wait (%p11845_p11), [#allocation12], 10240  }
 0x160   : > { %8983 = vsyncadd (%p11846_p12), [#allocation12], 4294957056  ;;  %p11847_p6 = pmov %p11844_p1 }
 0x161   : > { %p11848_p13 = pmov %p11844_p1 }
 0x162   : > { %8985 = dma.done.wait (%p11847_p6), [#allocation15], 2432  }
 0x163   : > { %8987 = vsyncadd (%p11848_p13), [#allocation15], 4294964864  ;;  %p11849_p7 = pmov %p11844_p1 }
 0x164   : > { %p11850_p9 = pmov %p11844_p1 }
 0x165   : > { %8989 = dma.done.wait (%p11849_p7), [#allocation18], 32  }
 0x166   : > { %8991 = vsyncadd (%p11850_p9), [#allocation18], 4294967264  ;;  %p830_p0 = scmp.lt.s32.totalorder %s9165_s3, 1  ;;  %s11851_s6 = sld [smem:[#allocation30_spill]]  ;;  %v1378_v2 = vld [vmem:[#allocation7 + $0x8] sm:$0xf] }
 0x167   : > { %v1379_v3 = vld [vmem:[#allocation7 + $0x28] sm:$0xf]  ;;  %v913_v4 = vld [vmem:[#allocation7] sm:$0xff]  ;;  %v11793_v5 = vmov 0.0   ;;  %vm9029_vm0 = vmmov 0   ;;  %s11782_s8 = smov 16  }
 0x168   : > { %s9542_s11 = scalar_select %p830_p0, %s9165_s3, 1  ;;  %7629 = vmatprep.subr.bf16.mxu1 %v11793_v5  ;;  %v7183_v6 = vcombine.low %v1378_v2, %v1379_v3  ;;  %v914_v7 = vld [vmem:[#allocation7 + $0x20] sm:$0xff]  ;;  %v1380_v18 = vld [vmem:[#allocation7 + $0x48] sm:$0xf]  ;;  %7645 = vmatprep.mubr.msk.bf16.mxu1 %vm9029_vm0, %v11793_v5  ;;  %v11792_v3 = vmov 0   ;;  %vm1206_vm1 = vcmask 130048  }
 0x169   : > { %v7168_v8 = vcombine.high %v913_v4, %v914_v7  ;;  %v7167_v9 = vcombine.low %v913_v4, %v914_v7  ;;  %v1381_v19 = vld [vmem:[#allocation7 + $0x68] sm:$0xf]  ;;  %v915_v21 = vld [vmem:[#allocation7 + $0x40] sm:$0xff]  ;;  %1041 = vmatprep.mubr.bf16.mxu0 %v11792_v3  ;;  %s11852_s15 = sld [smem:[#allocation35_spill]]  ;;  %s11855_s5 = sld [smem:[#allocation32_spill]]  ;;  %vm1531_vm2 = vcmask 261120  }
 0x16a   : > { %s7400_s21 = sshll.u32 %s9542_s11, 4  ;;  %7630 = vmatpush3.bf16.msra.mxu1 %v7183_v6  ;;  %v7184_v20 = vcombine.low %v1380_v18, %v1381_v19  ;;  %v916_v22 = vld [vmem:[#allocation7 + $0x60] sm:$0xff]  ;;  %v1382_v25 = vld [vmem:[#allocation7 + $0x88] sm:$0xf]  ;;  %s11790_s11 = smov 96   ;;  %vm2018_vm3 = vcmask 523264  }
 0x16b   : > { %1009 = vmatprep.subr.bf16.mxu0 %v7168_v8  ;;  %7631 = vmatprep.subr.bf16.mxu1 %v11793_v5  ;;  %v7170_v23 = vcombine.high %v915_v21, %v916_v22  ;;  %v7169_v24 = vcombine.low %v915_v21, %v916_v22  ;;  %v1383_v26 = vld [vmem:[#allocation7 + $0xa8] sm:$0xf]  ;;  %v917_v28 = vld [vmem:[#allocation7 + $0x80] sm:$0xff]  ;;  %s11786_s13 = smov 32   ;;  %s11857_s28 = sld [smem:[#allocation34_spill]]  ;;  %vm2021_vm4 = vcmask 785408  }
 0x16c   : > { %s9550_s30 = scalar_lea.vmem %s11851_s6, %s7400_s21  ;;  %1010 = vmatpush1.bf16.msra.mxu0 %v7167_v9  ;;  %v7185_v27 = vcombine.low %v1382_v25, %v1383_v26  ;;  %v918_v29 = vld [vmem:[#allocation7 + $0xa0] sm:$0xff]  ;;  %v1384_v32 = vld [vmem:[#allocation7 + $0xc8] sm:$0xf]  ;;  %s11853_s6 = sld [smem:[#allocation36_spill]] }
 0x16d   : > { %v841_v0 = vld [vmem:[%s9550_s30] sm:$0xff]  ;;  %v842_v1 = vld [vmem:[%s9550_s30 + $0x8] sm:$0xff]  ;;  %1011 = vmatprep.subr.bf16.mxu0 %v7170_v23  ;;  %v7172_v30 = vcombine.high %v917_v28, %v918_v29  ;;  %v7171_v31 = vcombine.low %v917_v28, %v918_v29  ;;  %s11784_s19 = smov 112   ;;  %s11858_s29 = sld [smem:[#allocation40_spill]] }
 0x16e   : > { %875 = vadd.xlane.f32.xlu0 %v841_v0  ;;  %7632 = vmatpush3.bf16.msra.mxu1 %v7184_v20  ;;  %v1385_v33 = vld [vmem:[#allocation7 + $0xe8] sm:$0xf]  ;;  %v919_v35 = vld [vmem:[#allocation7 + $0xc0] sm:$0xff]  ;;  %s11863_s18 = smov 112   ;;  %s11866_s17 = sld [smem:[#allocation37_spill]] }
 0x16f   : > { %7633 = vmatprep.subr.bf16.mxu1 %v11793_v5  ;;  %v7186_v34 = vcombine.low %v1384_v32, %v1385_v33  ;;  %v920_v36 = vld [vmem:[#allocation7 + $0xe0] sm:$0xff]  ;;  %v1386_v39 = vld [vmem:[#allocation7 + $0x108] sm:$0xf]  ;;  %s9633_s14 = scalar_lea.vmem %s11855_s5, %s7400_s21  ;;  %s11788_s21 = smov 64  }
 0x170   : > { %1012 = vmatpush1.bf16.msra.mxu0 %v7169_v24  ;;  %v7174_v37 = vcombine.high %v919_v35, %v920_v36  ;;  %v7173_v38 = vcombine.low %v919_v35, %v920_v36  ;;  %v1387_v40 = vld [vmem:[#allocation7 + $0x128] sm:$0xf]  ;;  %v921_v41 = vld [vmem:[#allocation7 + $0x100] sm:$0xff]  ;;  %s11871_s2 = sld [smem:[#allocation49_spill]]  ;;  %p11872_p5 = scmp.ne.s32.totalorder %s11835_s12, 0 }
 0x171   : > { %1013 = vmatprep.subr.bf16.mxu0 %v7172_v30  ;;  %v7187_v42 = vcombine.low %v1386_v39, %v1387_v40  ;;  %v922_v43 = vld [vmem:[#allocation7 + $0x120] sm:$0xff]  ;;  %v1388_v44 = vld [vmem:[#allocation7 + $0x148] sm:$0xf] }
 0x172   : > { %877 = vadd.xlane.f32.xlu0 %v842_v1  ;;  %7634 = vmatpush3.bf16.msra.mxu1 %v7185_v27  ;;  %v1389_v45 = vld [vmem:[#allocation7 + $0x168] sm:$0xf]  ;;  %v7176_v46 = vcombine.high %v921_v41, %v922_v43  ;;  %v7175_v47 = vcombine.low %v921_v41, %v922_v43  ;;  %v923_v48 = vld [vmem:[#allocation7 + $0x140] sm:$0xff] }
 0x173   : > { %7635 = vmatprep.subr.bf16.mxu1 %v11793_v5  ;;  %v924_v49 = vld [vmem:[#allocation7 + $0x160] sm:$0xff]  ;;  %v7188_v51 = vcombine.low %v1388_v44, %v1389_v45  ;;  %v1390_v54 = vld [vmem:[#allocation7 + $0x188] sm:$0xf] }
 0x174   : > { %1014 = vmatpush1.bf16.msra.mxu0 %v7171_v31  ;;  %v7178_v50 = vcombine.high %v923_v48, %v924_v49  ;;  %v925_v52 = vld [vmem:[#allocation7 + $0x180] sm:$0xff]  ;;  %v1391_v55 = vld [vmem:[#allocation7 + $0x1a8] sm:$0xf]  ;;  %v7177_v56 = vcombine.low %v923_v48, %v924_v49 }
 0x175   : > { %1015 = vmatprep.subr.bf16.mxu0 %v7174_v37  ;;  %v926_v53 = vld [vmem:[#allocation7 + $0x1a0] sm:$0xff]  ;;  %v7189_v58 = vcombine.low %v1390_v54, %v1391_v55  ;;  %v1392_v61 = vld [vmem:[#allocation7 + $0x1c8] sm:$0xf] }
 0x176   : > { %7636 = vmatpush3.bf16.msra.mxu1 %v7186_v34  ;;  %v7180_v57 = vcombine.high %v925_v52, %v926_v53  ;;  %v927_v59 = vld [vmem:[#allocation7 + $0x1c0] sm:$0xff]  ;;  %v1393_v62 = vld [vmem:[#allocation7 + $0x1e8] sm:$0xf]  ;;  %v7179_v63 = vcombine.low %v925_v52, %v926_v53 }
 0x177   : > { %7637 = vmatprep.subr.bf16.mxu1 %v11793_v5  ;;  %v928_v60 = vld [vmem:[#allocation7 + $0x1e0] sm:$0xff]  ;;  %v9583_v6 = vld [vmem:[%s11750_s7 + $0x8] sm:$0xff] }
 0x178   : > { %1016 = vmatpush1.bf16.msra.mxu0 %v7173_v38  ;;  %v7181_v2 = vcombine.low %v927_v59, %v928_v60  ;;  %v9578_v4 = vld [vmem:[%s11750_s7] sm:$0xff]  ;;  %v9597_v8 = vld [vmem:[%s11852_s15 + $0x8] sm:$0xff] }
 0x179   : > { %1017 = vmatprep.subr.bf16.mxu0 %v7176_v46  ;;  %v9592_v7 = vld [vmem:[%s11852_s15] sm:$0xff]  ;;  %v870_v22 = vld [vmem:[#allocation8 + $0x8] sm:$0xff] }
 0x17a   : > { %7638 = vmatpush3.bf16.msra.mxu1 %v7187_v42  ;;  %v9606_v9 = vld [vmem:[%s11853_s6] sm:$0xff]  ;;  %v848_v34 = vld [vmem:[%s9633_s14 + $0x8] sm:$0xff] }
 0x17b   : > { %7639 = vmatprep.subr.bf16.mxu1 %v11793_v5  ;;  %v847_v33 = vld [vmem:[%s9633_s14] sm:$0xff] }
 0x17c   : > { %1018 = vmatpush1.bf16.msra.mxu0 %v7175_v47 }
 0x17d   : > { %1019 = vmatprep.subr.bf16.mxu0 %v7178_v50 }
 0x17e   : > { %7640 = vmatpush3.bf16.msra.mxu1 %v7188_v51 }
 0x17f   : > { %7641 = vmatprep.subr.bf16.mxu1 %v11793_v5 }
 0x180   : > { %1020 = vmatpush1.bf16.msra.mxu0 %v7177_v56 }
 0x181   : > { %1021 = vmatprep.subr.bf16.mxu0 %v7180_v57 }
 0x182   : > { %7642 = vmatpush3.bf16.msra.mxu1 %v7189_v58 }
 0x183   : > { %7643 = vmatprep.subr.bf16.mxu1 %v11793_v5 }
 0x184   : > { %1022 = vmatpush1.bf16.msra.mxu0 %v7179_v63 }
 0x188   : > { %1251 = vrot.lane.b32.xlu0 %v9578_v4, %s11782_s8 }
 0x18c   : > { %1088 = vrot.lane.b32.xlu0 %v9592_v7, %s11782_s8 }
 0x190   : > { %1307 = vrot.lane.b32.xlu0 %v9606_v9, %s11782_s8 }
 0x1fb   : > { %v876_v10 = vpop.xlane.xlu0 %875 }
 0x1fc   : > { %v880_v11 = vmul.f32 0.0078125, %v876_v10  ;;  %v9611_v10 = vld [vmem:[%s11853_s6 + $0x8] sm:$0xff] }
 0x1fe   : > { %v9556_v12 = vsub.f32 %v841_v0, %v880_v11  ;;  %v7182_v0 = vcombine.high %v927_v59, %v928_v60  ;;  %v9691_v60 = vld [vmem:[%s11857_s28] sm:$0xff] }
 0x1ff   : > { %v878_v13 = vpop.xlane.xlu0 %877 }
 0x200   : > { %v881_v14 = vmul.f32 0.0078125, %v878_v13  ;;  %v884_v15 = vmul.f32 %v9556_v12, %v9556_v12  ;;  %1023 = vmatprep.subr.bf16.mxu0 %v7182_v0 }
 0x201   : > { %1024 = vmatpush1.bf16.msra.mxu0 %v7181_v2 }
 0x202   : > { %886 = vadd.xlane.f32.xlu1 %v884_v15  ;;  %v9560_v16 = vsub.f32 %v842_v1, %v881_v14  ;;  %v7190_v1 = vcombine.low %v1392_v61, %v1393_v62  ;;  %7649 = vmatprep.subr.bf16.mxu0 %v11793_v5  ;;  %v898_v14 = vlaneseq }
 0x203   : > { %v9680_v58 = vpop.permute.xlu0 %1251 }
 0x204   : > { %v885_v17 = vmul.f32 %v9560_v16, %v9560_v16  ;;  %7644 = vmatpush3.bf16.msra.mxu1 %v7190_v1  ;;  %v9617_v19 = vshrl.u32 %v898_v14, 7  ;;  %v9712_v1 = vld [vmem:[%s11857_s28 + $0x8] sm:$0xff] }
 0x205   : > { %7655 = vmatprep.subr.bf16.mxu1 %v11793_v5 }
 0x206   : > { %888 = vadd.xlane.f32.xlu1 %v885_v17  ;;  %v9620_v21 = vsub.s32 1, %v9617_v19  ;;  %v9624_v24 = vsub.s32 2, %v9617_v19  ;;  %v9643_v39 = vsub.s32 0, %v9617_v19 }
 0x207   : > { %v9695_v61 = vpop.permute.xlu0 %1088 }
 0x208   : > { %11854 = vst [vmem:[#allocation28_spill] sm:$0xff] %v9620_v21  ;;  %v901_v23 = vrot.slane %v870_v22, %v9620_v21  ;;  %v907_v28 = vrot.slane %v870_v22, %v9624_v24  ;;  %11856 = vst [vmem:[#allocation29_spill] sm:$0xff] %v9643_v39 }
 0x217   : > { %1253 = vrot.lane.b32.xlu1 %v9583_v6, %s11782_s8 }
 0x21b   : > { %1090 = vrot.lane.b32.xlu1 %v9597_v8, %s11782_s8 }
 0x21f   : > { %1309 = vrot.lane.b32.xlu1 %v9611_v10, %s11782_s8 }
 0x28f   : > { %v887_v11 = vpop.xlane.xlu1 %886 }
 0x290   : > { %v890_v13 = vmul.f32 0.0078125, %v887_v11 }
 0x292   : > { %v892_v15 = vadd.f32 1e-05, %v890_v13 }
 0x293   : > { %v889_v17 = vpop.xlane.xlu1 %888 }
 0x294   : > { %8440 = vrsqrt.f32 %v892_v15  ;;  %v891_v18 = vmul.f32 0.0078125, %v889_v17 }
 0x296   : > { %v893_v20 = vadd.f32 1e-05, %v891_v18 }
 0x297   : > { %v9701_v63 = vpop.permute.xlu1 %1253 }
 0x298   : > { %8442 = vrsqrt.f32 %v893_v20  ;;  %v9736_v20 = vpop.permute.xlu0 %1307 }
 0x29b   : > { %v9716_v2 = vpop.permute.xlu1 %1090 }
 0x29e   : > { %v8441_v25 = vpop.eup %8440 }
 0x29f   : > { %v896_v26 = vmul.f32 %v8441_v25, %v9556_v12  ;;  %v9738_v22 = vpop.permute.xlu1 %1309 }
 0x2a1   : > { %v902_v27 = vmul.f32 %v901_v23, %v896_v26 }
 0x2a2   : > { %v8443_v29 = vpop.eup %8442 }
 0x2a3   : > { %v897_v30 = vmul.f32 %v8443_v29, %v9560_v16  ;;  %v908_v32 = vadd.f32 %v907_v28, %v902_v27  ;;  %v869_v16 = vld [vmem:[#allocation8] sm:$0xff] }
 0x2a4   : > { %v1055_v40 = vrot.slane %v869_v16, %v9643_v39  ;;  %v1218_v42 = vrot.slane %v869_v16, %v9620_v21  ;;  %v1397_v46 = vrot.slane %v869_v16, %v9624_v24 }
 0x2a5   : > { %v903_v31 = vmul.f32 %v901_v23, %v897_v30  ;;  %v910_v36 = vadd.f32 %v908_v32, %v847_v33 }
 0x2a7   : > { %v909_v35 = vadd.f32 %v907_v28, %v903_v31 }
 0x2a9   : > { %v1377_v12 = vpack.c.bf16 %v909_v35, %v908_v32  ;;  %v911_v37 = vadd.f32 %v909_v35, %v848_v34 }
 0x2ab   : > { %7646 = vmatmul.mubr.bf16.vlgmr.msra.gmra.mrb[0].mxu1 %v1377_v12  ;;  %v912_v38 = vpack.c.bf16 %v911_v37, %v910_v36 }
 0x2ac   : > { %7657 = vmatprep.mubr.msk.bf16.mxu1 %vm9029_vm0, %v11793_v5 }
 0x2ad   : > { %1042 = vmatmul.mubr.bf16.vlgmr.msra.gmra.mrb[0].mxu0 %v912_v38 }
 0x2ae   : > { %7651 = vmatprep.mubr.msk.bf16.mxu0 %vm9029_vm0, %v11793_v5 }
 0x37e   : > { %v1480_v41 = vpop.f32.mrb[0].mxu1 }
 0x37f   : > { %v7647_v43 = vpop.f32.mrb[1].mxu1  ;;  %v9658_v54 = vadd.f32 %v1480_v41, %v1397_v46 }
 0x380   : > { %v1043_v44 = vpop.f32.mrb[0].mxu0  ;;  %v1483_v45 = vpop.f32.mrb[2].mxu1 }
 0x381   : > { %v9648_v47 = vadd.f32 %v1055_v40, %v1043_v44  ;;  %v1045_v48 = vpop.f32.mrb[1].mxu0  ;;  %v7648_v49 = vpop.f32.mrb[3].mxu1  ;;  %v9652_v52 = vadd.f32 %v1483_v45, %v1397_v46 }
 0x382   : > { %v9650_v50 = vadd.f32 %v1218_v42, %v1045_v48  ;;  %v1047_v51 = vpop.f32.mrb[2].mxu0 }
 0x383   : > { %1060 = vrot.lane.b32.xlu0 %v9648_v47, %s11790_s11  ;;  %v1049_v53 = vpop.f32.mrb[3].mxu0  ;;  %v9660_v55 = vadd.f32 %v1055_v40, %v1047_v51  ;;  %v1812_v56 = vpack.c.bf16 %v9652_v52, %v9658_v54  ;;  %v9668_v57 = vpack.i.bf16 %v9652_v52, %v9658_v54  ;;  %v1094_v62 = vmul.f32 %v9695_v61, %v9648_v47 }
 0x384   : > { %1223 = vrot.lane.b32.xlu1 %v9650_v50, %s11790_s11  ;;  %v9682_v59 = vadd.f32 %v1218_v42, %v1049_v53  ;;  %v1158_v0 = vmul.f32 %v9648_v47, %v9592_v7  ;;  %v1257_v11 = vmul.f32 %v9680_v58, %v9650_v50  ;;  %v1321_v14 = vmul.f32 %v9650_v50, %v9578_v4 }
 0x385   : > { %v1095_v13 = vmul.f32 %v9716_v2, %v9660_v55  ;;  %v1159_v15 = vmul.f32 %v9660_v55, %v9597_v8 }
 0x386   : > { %v1258_v17 = vmul.f32 %v9701_v63, %v9682_v59  ;;  %v1322_v18 = vmul.f32 %v9682_v59, %v9583_v6 }
 0x387   : > { %1066 = vrot.lane.b32.xlu0 %v9648_v47, %s11788_s21 }
 0x388   : > { %1062 = vrot.lane.b32.xlu1 %v9660_v55, %s11790_s11 }
 0x38b   : > { %1072 = vrot.lane.b32.xlu0 %v9648_v47, %s11786_s13 }
 0x38c   : > { %1068 = vrot.lane.b32.xlu1 %v9660_v55, %s11788_s21 }
 0x38f   : > { %1229 = vrot.lane.b32.xlu0 %v9650_v50, %s11788_s21 }
 0x390   : > { %1074 = vrot.lane.b32.xlu1 %v9660_v55, %s11786_s13 }
 0x393   : > { %1235 = vrot.lane.b32.xlu0 %v9650_v50, %s11786_s13 }
 0x394   : > { %1225 = vrot.lane.b32.xlu1 %v9682_v59, %s11790_s11 }
 0x397   : > { %1144 = vrot.lane.b32.xlu0 %v9691_v60, %s11782_s8 }
 0x398   : > { %1231 = vrot.lane.b32.xlu1 %v9682_v59, %s11788_s21 }
 0x39b   : > { %1110 = vrot.lane.b32.xlu0 %v1094_v62, %s11784_s19 }
 0x39c   : > { %1237 = vrot.lane.b32.xlu1 %v9682_v59, %s11786_s13 }
 0x39f   : > { %1174 = vrot.lane.b32.xlu0 %v1158_v0, %s11782_s8 }
 0x3a0   : > { %1146 = vrot.lane.b32.xlu1 %v9712_v1, %s11782_s8 }
 0x3a3   : > { %1273 = vrot.lane.b32.xlu0 %v1257_v11, %s11784_s19 }
 0x3a4   : > { %1112 = vrot.lane.b32.xlu1 %v1095_v13, %s11784_s19 }
 0x3a7   : > { %1337 = vrot.lane.b32.xlu0 %v1321_v14, %s11782_s8 }
 0x3a8   : > { %1176 = vrot.lane.b32.xlu1 %v1159_v15, %s11782_s8 }
 0x3ac   : > { %1275 = vrot.lane.b32.xlu1 %v1258_v17, %s11784_s19 }
 0x3b0   : > { %1339 = vrot.lane.b32.xlu1 %v1322_v18, %s11782_s8 }
 0x3f5   : > { %v9740_v23 = vpop.permute.xlu0 %1060 }
 0x3f6   : > { %v9742_v25 = vpop.permute.xlu1 %1223  ;;  %v1096_v26 = vmul.f32 %v9695_v61, %v9740_v23  ;;  %v1160_v29 = vmul.f32 %v9740_v23, %v9592_v7 }
 0x3f7   : > { %v1259_v40 = vmul.f32 %v9680_v58, %v9742_v25  ;;  %v1323_v44 = vmul.f32 %v9742_v25, %v9578_v4 }
 0x3f8   : > { %1114 = vrot.lane.b32.xlu0 %v1096_v26, %s11784_s19 }
 0x3f9   : > { %v9747_v27 = vpop.permute.xlu0 %1066 }
 0x3fa   : > { %v9749_v28 = vpop.permute.xlu1 %1062  ;;  %v1098_v33 = vmul.f32 %v9695_v61, %v9747_v27  ;;  %v1162_v36 = vmul.f32 %v9747_v27, %v9592_v7 }
 0x3fb   : > { %v1097_v30 = vmul.f32 %v9716_v2, %v9749_v28  ;;  %v1161_v34 = vmul.f32 %v9749_v28, %v9597_v8 }
 0x3fc   : > { %1178 = vrot.lane.b32.xlu0 %v1160_v29, %s11782_s8 }
 0x3fd   : > { %1116 = vrot.lane.b32.xlu1 %v1097_v30, %s11784_s19  ;;  %v9757_v31 = vpop.permute.xlu0 %1072 }
 0x3fe   : > { %v9759_v32 = vpop.permute.xlu1 %1068 }
 0x3ff   : > { %v1099_v37 = vmul.f32 %v9716_v2, %v9759_v32  ;;  %v1163_v41 = vmul.f32 %v9759_v32, %v9597_v8 }
 0x400   : > { %1118 = vrot.lane.b32.xlu0 %v1098_v33, %s11784_s19 }
 0x401   : > { %1180 = vrot.lane.b32.xlu1 %v1161_v34, %s11782_s8  ;;  %v9767_v35 = vpop.permute.xlu0 %1229  ;;  %v1100_v34 = vmul.f32 %v9695_v61, %v9757_v31 }
 0x402   : > { %v9769_v12 = vpop.permute.xlu1 %1074  ;;  %v1261_v49 = vmul.f32 %v9680_v58, %v9767_v35  ;;  %v1325_v0 = vmul.f32 %v9767_v35, %v9578_v4 }
 0x404   : > { %1182 = vrot.lane.b32.xlu0 %v1162_v36, %s11782_s8  ;;  %v1313_v36 = vmul.f32 %v9736_v20, %v9650_v50 }
 0x405   : > { %1120 = vrot.lane.b32.xlu1 %v1099_v37, %s11784_s19  ;;  %v9777_v38 = vpop.permute.xlu0 %1235 }
 0x406   : > { %v9779_v16 = vpop.permute.xlu1 %1225  ;;  %v1263_v14 = vmul.f32 %v9680_v58, %v9777_v38  ;;  %v1327_v26 = vmul.f32 %v9777_v38, %v9578_v4  ;;  %v1241_v4 = vmul.f32 %v9650_v50, %v9606_v9 }
 0x407   : > { %v1260_v45 = vmul.f32 %v9701_v63, %v9779_v16  ;;  %v1324_v51 = vmul.f32 %v9779_v16, %v9583_v6 }
 0x408   : > { %1277 = vrot.lane.b32.xlu0 %v1259_v40, %s11784_s19 }
 0x409   : > { %1184 = vrot.lane.b32.xlu1 %v1163_v41, %s11782_s8  ;;  %v9787_v42 = vpop.permute.xlu0 %1144  ;;  %v1242_v41 = vmul.f32 %v9682_v59, %v9611_v10 }
 0x40a   : > { %v9789_v43 = vpop.permute.xlu1 %1231 }
 0x40b   : > { %v1262_v11 = vmul.f32 %v9701_v63, %v9789_v43  ;;  %v1326_v15 = vmul.f32 %v9789_v43, %v9583_v6 }
 0x40c   : > { %1341 = vrot.lane.b32.xlu0 %v1323_v44, %s11782_s8  ;;  %v1314_v44 = vmul.f32 %v9738_v22, %v9682_v59 }
 0x40d   : > { %1279 = vrot.lane.b32.xlu1 %v1260_v45, %s11784_s19  ;;  %v9797_v46 = vpop.permute.xlu0 %1110 }
 0x40e   : > { %v9799_v48 = vpop.permute.xlu1 %1237 }
 0x40f   : > { %v1264_v29 = vmul.f32 %v9701_v63, %v9799_v48  ;;  %v1328_v37 = vmul.f32 %v9799_v48, %v9583_v6 }
 0x410   : > { %1281 = vrot.lane.b32.xlu0 %v1261_v49, %s11784_s19  ;;  %v1164_v49 = vmul.f32 %v9757_v31, %v9592_v7 }
 0x411   : > { %1343 = vrot.lane.b32.xlu1 %v1324_v51, %s11782_s8  ;;  %v1175_v53 = vpop.permute.xlu0 %1174 }
 0x412   : > { %v9807_v62 = vpop.permute.xlu1 %1146 }
 0x414   : > { %1345 = vrot.lane.b32.xlu0 %v1325_v0, %s11782_s8 }
 0x415   : > { %1283 = vrot.lane.b32.xlu1 %v1262_v11, %s11784_s19  ;;  %v1274_v17 = vpop.permute.xlu0 %1273  ;;  %v1101_v11 = vmul.f32 %v9716_v2, %v9769_v12 }
 0x416   : > { %v1113_v13 = vpop.permute.xlu1 %1112  ;;  %v1297_v51 = vsub.f32 %v1241_v4, %v1274_v17  ;;  %v1079_v17 = vmul.f32 %v9660_v55, %v9712_v1 }
 0x418   : > { %1285 = vrot.lane.b32.xlu0 %v1263_v14, %s11784_s19  ;;  %v1151_v14 = vmul.f32 %v9807_v62, %v9660_v55 }
 0x419   : > { %1347 = vrot.lane.b32.xlu1 %v1326_v15, %s11782_s8  ;;  %v1338_v30 = vpop.permute.xlu0 %1337  ;;  %v1150_v15 = vmul.f32 %v9787_v42, %v9648_v47 }
 0x41a   : > { %v1177_v18 = vpop.permute.xlu1 %1176  ;;  %v1361_v40 = vadd.f32 %v1338_v30, %v1313_v36  ;;  %v1135_v36 = vsub.f32 %v1079_v17, %v1113_v13 }
 0x41c   : > { %1349 = vrot.lane.b32.xlu0 %v1327_v26, %s11782_s8  ;;  %v1369_v50 = vsel %vm1206_vm1, %v1297_v51, %v1361_v40  ;;  %v1199_v26 = vadd.f32 %v1177_v18, %v1151_v14 }
 0x41d   : > { %1287 = vrot.lane.b32.xlu1 %v1264_v29, %s11784_s19  ;;  %v1165_v29 = vmul.f32 %v9769_v12, %v9597_v8 }
 0x41e   : > { %v1276_v33 = vpop.permute.xlu1 %1275  ;;  %v1208_v55 = vsel %vm1206_vm1, %v1135_v36, %v1199_v26 }
 0x41f   : > { %v1298_v6 = vsub.f32 %v1242_v41, %v1276_v33  ;;  %v1078_v33 = vmul.f32 %v9648_v47, %v9691_v60 }
 0x420   : > { %1122 = vrot.lane.b32.xlu0 %v1100_v34, %s11784_s19  ;;  %v1198_v34 = vadd.f32 %v1175_v53, %v1150_v15 }
 0x421   : > { %1351 = vrot.lane.b32.xlu1 %v1328_v37, %s11782_s8  ;;  %v1134_v37 = vsub.f32 %v1078_v33, %v9797_v46 }
 0x422   : > { %v1340_v45 = vpop.permute.xlu1 %1339 }
 0x423   : > { %v1362_v0 = vadd.f32 %v1340_v45, %v1314_v44  ;;  %v1207_v18 = vsel %vm1206_vm1, %v1134_v37, %v1198_v34  ;;  %v1152_v37 = vmul.f32 %v9787_v42, %v9740_v23 }
 0x424   : > { %1186 = vrot.lane.b32.xlu0 %v1164_v49, %s11782_s8  ;;  %v1523_v4 = vpack.c.bf16 %v1208_v55, %v1207_v18  ;;  %v1317_v18 = vmul.f32 %v9736_v20, %v9767_v35 }
 0x425   : > { %v1370_v59 = vsel %vm1206_vm1, %v1298_v6, %v1362_v0  ;;  %1124 = vrot.lane.b32.xlu1 %v1101_v11, %s11784_s19  ;;  %v1315_v6 = vmul.f32 %v9736_v20, %v9742_v25  ;;  %v1243_v0 = vmul.f32 %v9742_v25, %v9606_v9 }
 0x426   : > { %v1527_v7 = vpack.c.bf16 %v1370_v59, %v1369_v50  ;;  %v1244_v50 = vmul.f32 %v9779_v16, %v9611_v10  ;;  %v1316_v59 = vmul.f32 %v9738_v22, %v9779_v16  ;;  %v1081_v16 = vmul.f32 %v9749_v28, %v9712_v1 }
 0x428   : > { %v1536_v30 = vsel %vm1531_vm2, %v1527_v7, 0 }
 0x429   : > { %1188 = vrot.lane.b32.xlu1 %v1165_v29, %s11782_s8  ;;  %7650 = vmatpush3.bf16.xpose.msra.mxu0 %v1536_v30  ;;  %v1153_v29 = vmul.f32 %v9807_v62, %v9749_v28 }
 0x42a   : > { %7661 = vmatprep.subr.bf16.mxu0 %v11793_v5 }
 0x430   : > { %7652 = vmatmul.mubr.msk.bf16.vlgmr.msra.gmra.mrb[4].mxu0 %vm1531_vm2, %v1523_v4  ;;  %v1080_v4 = vmul.f32 %v9740_v23, %v9691_v60 }
 0x431   : > { %7663 = vmatprep.mubr.msk.bf16.mxu0 %vm9029_vm0, %v11793_v5 }
 0x46a   : > { %v1115_v8 = vpop.permute.xlu0 %1114 }
 0x46e   : > { %v1179_v47 = vpop.permute.xlu0 %1178 }
 0x46f   : > { %v1117_v53 = vpop.permute.xlu1 %1116 }
 0x472   : > { %v9868_v13 = vpop.permute.xlu0 %1118 }
 0x473   : > { %v1181_v40 = vpop.permute.xlu1 %1180 }
 0x474   : > { %v1201_v55 = vadd.f32 %v1181_v40, %v1153_v29  ;;  %v1318_v40 = vmul.f32 %v9738_v22, %v9789_v43 }
 0x476   : > { %v1183_v41 = vpop.permute.xlu0 %1182 }
 0x477   : > { %v9870_v44 = vpop.permute.xlu1 %1120 }
 0x47a   : > { %v1278_v46 = vpop.permute.xlu0 %1277 }
 0x47b   : > { %v1185_v45 = vpop.permute.xlu1 %1184  ;;  %v1299_v15 = vsub.f32 %v1243_v0, %v1278_v46  ;;  %v1245_v46 = vmul.f32 %v9767_v35, %v9606_v9  ;;  %v1137_v0 = vsub.f32 %v1081_v16, %v1117_v53  ;;  %v1248_v16 = vmul.f32 %v9799_v48, %v9611_v10 }
 0x47d   : > { %v1210_v23 = vsel %vm1206_vm1, %v1137_v0, %v1201_v55 }
 0x47e   : > { %v1342_v49 = vpop.permute.xlu0 %1341 }
 0x47f   : > { %v1280_v51 = vpop.permute.xlu1 %1279  ;;  %v1363_v11 = vadd.f32 %v1342_v49, %v1315_v6  ;;  %v1246_v49 = vmul.f32 %v9789_v43, %v9611_v10  ;;  %v1200_v6 = vadd.f32 %v1179_v47, %v1152_v37  ;;  %v1155_v47 = vmul.f32 %v9807_v62, %v9759_v32 }
 0x480   : > { %v1300_v17 = vsub.f32 %v1244_v50, %v1280_v51  ;;  %v1136_v50 = vsub.f32 %v1080_v4, %v1115_v8  ;;  %v1082_v43 = vmul.f32 %v9747_v27, %v9691_v60  ;;  %v1247_v37 = vmul.f32 %v9777_v38, %v9606_v9 }
 0x481   : > { %v1371_v30 = vsel %vm1206_vm1, %v1299_v15, %v1363_v11 }
 0x482   : > { %v1282_v14 = vpop.permute.xlu0 %1281  ;;  %v1138_v9 = vsub.f32 %v1082_v43, %v9868_v13  ;;  %v1156_v13 = vmul.f32 %v9787_v42, %v9757_v31 }
 0x483   : > { %v1344_v7 = vpop.permute.xlu1 %1343  ;;  %v1301_v35 = vsub.f32 %v1245_v46, %v1282_v14  ;;  %v1154_v14 = vmul.f32 %v9787_v42, %v9747_v27  ;;  %v1320_v27 = vmul.f32 %v9738_v22, %v9799_v48 }
 0x484   : > { %v1364_v26 = vadd.f32 %v1344_v7, %v1316_v59 }
 0x486   : > { %v1372_v33 = vsel %vm1206_vm1, %v1300_v17, %v1364_v26  ;;  %v1346_v25 = vpop.permute.xlu0 %1345  ;;  %v1209_v17 = vsel %vm1206_vm1, %v1136_v50, %v1200_v6  ;;  %v1084_v50 = vmul.f32 %v9757_v31, %v9691_v60 }
 0x487   : > { %v1284_v34 = vpop.permute.xlu1 %1283  ;;  %v1528_v36 = vpack.c.bf16 %v1372_v33, %v1371_v30  ;;  %v1365_v11 = vadd.f32 %v1346_v25, %v1317_v18  ;;  %v1524_v8 = vpack.c.bf16 %v1210_v23, %v1209_v17  ;;  %v1083_v25 = vmul.f32 %v9759_v32, %v9712_v1 }
 0x488   : > { %v1302_v7 = vsub.f32 %v1246_v49, %v1284_v34  ;;  %v1203_v34 = vadd.f32 %v1185_v45, %v1155_v47  ;;  %v1202_v18 = vadd.f32 %v1183_v41, %v1154_v14  ;;  %v1085_v23 = vmul.f32 %v9769_v12, %v9712_v1 }
 0x489   : > { %v1583_v51 = vsel %vm1531_vm2, %v1528_v36, 0  ;;  %v1373_v53 = vsel %vm1206_vm1, %v1301_v35, %v1365_v11  ;;  %v1319_v36 = vmul.f32 %v9736_v20, %v9777_v38  ;;  %v1139_v32 = vsub.f32 %v1083_v25, %v9870_v44 }
 0x48a   : > { %7656 = vmatpush3.bf16.xpose.msra.mxu1 %v1583_v51  ;;  %v1286_v28 = vpop.permute.xlu0 %1285  ;;  %v1211_v48 = vsel %vm1206_vm1, %v1138_v9, %v1202_v18  ;;  %v1157_v35 = vmul.f32 %v9807_v62, %v9769_v12 }
 0x48b   : > { %v1348_v59 = vpop.permute.xlu1 %1347  ;;  %7667 = vmatprep.subr.bf16.mxu1 %v11793_v5  ;;  %v1212_v10 = vsel %vm1206_vm1, %v1139_v32, %v1203_v34  ;;  %v1303_v46 = vsub.f32 %v1247_v37, %v1286_v28 }
 0x48c   : > { %v1366_v15 = vadd.f32 %v1348_v59, %v1318_v40  ;;  %v1525_v6 = vpack.c.bf16 %v1212_v10, %v1211_v48 }
 0x48e   : > { %v1374_v26 = vsel %vm1206_vm1, %v1302_v7, %v1366_v15  ;;  %v1350_v29 = vpop.permute.xlu0 %1349 }
 0x48f   : > { %v1288_v30 = vpop.permute.xlu1 %1287  ;;  %v1529_v33 = vpack.c.bf16 %v1374_v26, %v1373_v53  ;;  %v1367_v45 = vadd.f32 %v1350_v29, %v1319_v36 }
 0x490   : > { %v1304_v49 = vsub.f32 %v1248_v16, %v1288_v30 }
 0x491   : > { %7658 = vmatmul.mubr.msk.bf16.vlgmr.msra.gmra.mrb[4].mxu1 %vm1531_vm2, %v1524_v8  ;;  %v1630_v55 = vsel %vm1531_vm2, %v1529_v33, 0  ;;  %v1375_v41 = vsel %vm1206_vm1, %v1303_v46, %v1367_v45 }
 0x492   : > { %7662 = vmatpush3.bf16.xpose.msra.mxu0 %v1630_v55  ;;  %v1123_v4 = vpop.permute.xlu0 %1122  ;;  %7669 = vmatprep.mubr.msk.bf16.mxu1 %vm9029_vm0, %v11793_v5 }
 0x493   : > { %v1352_v38 = vpop.permute.xlu1 %1351  ;;  %7673 = vmatprep.subr.bf16.mxu0 %v11793_v5  ;;  %v1140_v60 = vsub.f32 %v1084_v50, %v1123_v4 }
 0x494   : > { %v1368_v51 = vadd.f32 %v1352_v38, %v1320_v27 }
 0x496   : > { %v1376_v44 = vsel %vm1206_vm1, %v1304_v49, %v1368_v51  ;;  %v1187_v0 = vpop.permute.xlu0 %1186 }
 0x497   : > { %v1125_v11 = vpop.permute.xlu1 %1124  ;;  %v1530_v40 = vpack.c.bf16 %v1376_v44, %v1375_v41  ;;  %v1204_v59 = vadd.f32 %v1187_v0, %v1156_v13 }
 0x498   : > { %v1141_v31 = vsub.f32 %v1085_v23, %v1125_v11 }
 0x499   : > { %7664 = vmatmul.mubr.msk.bf16.vlgmr.msra.gmra.mrb[8].mxu0 %vm1531_vm2, %v1525_v6  ;;  %v1677_v28 = vsel %vm1531_vm2, %v1530_v40, 0  ;;  %v1213_v1 = vsel %vm1206_vm1, %v1140_v60, %v1204_v59 }
 0x49a   : > { %7668 = vmatpush3.bf16.xpose.msra.mxu1 %v1677_v28  ;;  %7674 = vmatpush3.bf16.msra.mxu0 %v1812_v56 }
 0x49b   : > { %v1189_v7 = vpop.permute.xlu1 %1188  ;;  %7675 = vmatprep.mubr.msk.bf16.mxu0 %vm9029_vm0, %v11793_v5  ;;  %7685 = vmatprep.subr.bf16.mxu0 %v11793_v5 }
 0x49c   : > { %v1205_v15 = vadd.f32 %v1189_v7, %v1157_v35  ;;  %7679 = vmatprep.subr.bf16.mxu1 %v11793_v5 }
 0x49e   : > { %v1214_v17 = vsel %vm1206_vm1, %v1141_v31, %v1205_v15 }
 0x49f   : > { %v1526_v52 = vpack.c.bf16 %v1214_v17, %v1213_v1 }
 0x4a1   : > { %7670 = vmatmul.mubr.msk.bf16.vlgmr.msra.gmra.mrb[8].mxu1 %vm1531_vm2, %v1526_v52 }
 0x4a2   : > { %7681 = vmatprep.mubr.msk.bf16.mxu1 %vm9029_vm0, %v11793_v5 }
 0x503   : > { %v1572_v54 = vpop.f32.mrb[4].mxu0 }
 0x504   : > { %v7653_v56 = vpop.f32.mrb[5].mxu0  ;;  %v1720_v12 = vsel %vm1206_vm1, %v1572_v54, -inf }
 0x505   : > { %1721 = vmax.xlane.f32.xlu0 %v1720_v12  ;;  %v1575_v47 = vpop.f32.mrb[6].mxu0 }
 0x506   : > { %v7654_v53 = vpop.f32.mrb[7].mxu0  ;;  %v1723_v26 = vsel %vm1206_vm1, %v1575_v47, -inf }
 0x507   : > { %1724 = vmax.xlane.f32.xlu1 %v1723_v26 }
 0x564   : > { %v1619_v29 = vpop.f32.mrb[4].mxu1 }
 0x565   : > { %v7659_v43 = vpop.f32.mrb[5].mxu1  ;;  %v1726_v8 = vsel %vm1206_vm1, %v1619_v29, -inf }
 0x566   : > { %1727 = vmax.xlane.f32.xlu0 %v1726_v8  ;;  %v1622_v30 = vpop.f32.mrb[6].mxu1 }
 0x567   : > { %v7660_v33 = vpop.f32.mrb[7].mxu1  ;;  %v1729_v14 = vsel %vm1206_vm1, %v1622_v30, -inf }
 0x56a   : > { %1730 = vmax.xlane.f32.xlu0 %v1729_v14 }
 0x56c   : > { %v1666_v25 = vpop.f32.mrb[8].mxu0 }
 0x56d   : > { %v7665_v34 = vpop.f32.mrb[9].mxu0  ;;  %v1732_v36 = vsel %vm1206_vm1, %v1666_v25, -inf }
 0x56e   : > { %1733 = vmax.xlane.f32.xlu0 %v1732_v36  ;;  %v1669_v37 = vpop.f32.mrb[10].mxu0 }
 0x56f   : > { %v7666_v16 = vpop.f32.mrb[11].mxu0  ;;  %v1735_v55 = vsel %vm1206_vm1, %v1669_v37, -inf }
 0x570   : > { %1736 = vmax.xlane.f32.xlu1 %v1735_v55 }
 0x574   : > { %v1713_v27 = vpop.f32.mrb[8].mxu1 }
 0x575   : > { %v7671_v18 = vpop.f32.mrb[9].mxu1  ;;  %v1738_v32 = vsel %vm1206_vm1, %v1713_v27, -inf }
 0x576   : > { %1739 = vmax.xlane.f32.xlu0 %v1738_v32  ;;  %v1716_v45 = vpop.f32.mrb[10].mxu1 }
 0x577   : > { %v7672_v4 = vpop.f32.mrb[11].mxu1  ;;  %v1741_v9 = vsel %vm1206_vm1, %v1716_v45, -inf }
 0x578   : > { %1742 = vmax.xlane.f32.xlu1 %v1741_v9 }
 0x592   : > { %v1722_v38 = vpop.xlane.xlu0 %1721 }
 0x593   : > { %v1744_v10 = vsub.f32 %v1572_v54, %v1722_v38 }
 0x594   : > { %v1725_v46 = vpop.xlane.xlu1 %1724 }
 0x595   : > { %v1752_v49 = vmul.f32 1.442695, %v1744_v10  ;;  %v1745_v51 = vsub.f32 %v1575_v47, %v1725_v46 }
 0x597   : > { %8444 = vpow2.f32 %v1752_v49  ;;  %v1754_v48 = vmul.f32 1.442695, %v1745_v51 }
 0x599   : > { %8446 = vpow2.f32 %v1754_v48 }
 0x5a1   : > { %v8445_v41 = vpop.eup %8444 }
 0x5a2   : > { %v1768_v44 = vsel %vm1206_vm1, %v8445_v41, 0.0 }
 0x5a3   : > { %v8447_v6 = vpop.eup %8446  ;;  %1769 = vadd.xlane.f32.xlu0 %v1768_v44 }
 0x5a4   : > { %v1771_v0 = vsel %vm1206_vm1, %v8447_v6, 0.0 }
 0x5a5   : > { %1772 = vadd.xlane.f32.xlu1 %v1771_v0 }
 0x5f3   : > { %v1728_v11 = vpop.xlane.xlu0 %1727 }
 0x5f4   : > { %v1746_v40 = vsub.f32 %v1619_v29, %v1728_v11 }
 0x5f6   : > { %v1756_v13 = vmul.f32 1.442695, %v1746_v40 }
 0x5f7   : > { %v1731_v50 = vpop.xlane.xlu0 %1730 }
 0x5f8   : > { %8448 = vpow2.f32 %v1756_v13  ;;  %v1747_v28 = vsub.f32 %v1622_v30, %v1731_v50 }
 0x5fa   : > { %v1758_v59 = vmul.f32 1.442695, %v1747_v28 }
 0x5fb   : > { %v1734_v23 = vpop.xlane.xlu0 %1733 }
 0x5fc   : > { %8450 = vpow2.f32 %v1758_v59  ;;  %v1748_v35 = vsub.f32 %v1666_v25, %v1734_v23 }
 0x5fd   : > { %v1737_v7 = vpop.xlane.xlu1 %1736 }
 0x5fe   : > { %v1760_v60 = vmul.f32 1.442695, %v1748_v35  ;;  %v1749_v31 = vsub.f32 %v1669_v37, %v1737_v7 }
 0x600   : > { %8452 = vpow2.f32 %v1760_v60  ;;  %v1762_v15 = vmul.f32 1.442695, %v1749_v31 }
 0x602   : > { %v9963_v1 = vpop.eup %8448  ;;  %8454 = vpow2.f32 %v1762_v15 }
 0x603   : > { %v1740_v17 = vpop.xlane.xlu0 %1739  ;;  %v1774_v52 = vsel %vm1206_vm1, %v9963_v1, 0.0 }
 0x604   : > { %v1750_v54 = vsub.f32 %v1713_v27, %v1740_v17  ;;  %1775 = vadd.xlane.f32.xlu0 %v1774_v52 }
 0x605   : > { %v1743_v33 = vpop.xlane.xlu1 %1742 }
 0x606   : > { %v8451_v56 = vpop.eup %8450  ;;  %v1764_v12 = vmul.f32 1.442695, %v1750_v54  ;;  %v1751_v14 = vsub.f32 %v1716_v45, %v1743_v33  ;;  %v1507_v33 = vld [vmem:[#allocation7 + $0xc] sm:$0xf] }
 0x607   : > { %v1777_v47 = vsel %vm1206_vm1, %v8451_v56, 0.0 }
 0x608   : > { %8456 = vpow2.f32 %v1764_v12  ;;  %1778 = vadd.xlane.f32.xlu1 %v1777_v47  ;;  %v1766_v34 = vmul.f32 1.442695, %v1751_v14  ;;  %v1508_v14 = vld [vmem:[#allocation7 + $0x2c] sm:$0xf] }
 0x60a   : > { %v8453_v53 = vpop.eup %8452 }
 0x60b   : > { %v1780_v26 = vsel %vm1206_vm1, %v8453_v53, 0.0 }
 0x60c   : > { %v8455_v29 = vpop.eup %8454  ;;  %1781 = vadd.xlane.f32.xlu0 %v1780_v26 }
 0x60d   : > { %v1783_v43 = vsel %vm1206_vm1, %v8455_v29, 0.0 }
 0x60e   : > { %1784 = vadd.xlane.f32.xlu1 %v1783_v43 }
 0x612   : > { %v9970_v8 = vpop.eup %8456 }
 0x613   : > { %v1786_v30 = vsel %vm1206_vm1, %v9970_v8, 0.0 }
 0x614   : > { %1787 = vadd.xlane.f32.xlu0 %v1786_v30 }
 0x61f   : > { %8231 = vrot.lane.b32.xlu1 %v9668_v57, %s11788_s21 }
 0x62a   : > { %8226 = vrot.lane.b32.xlu0 %v9668_v57, %s11790_s11 }
 0x630   : > { %v1770_v25 = vpop.xlane.xlu0 %1769 }
 0x631   : > { %8458 = vrcp.f32 %v1770_v25  ;;  %v1509_v25 = vld [vmem:[#allocation7 + $0x4c] sm:$0xf] }
 0x632   : > { %v1773_v36 = vpop.xlane.xlu1 %1772 }
 0x633   : > { %8460 = vrcp.f32 %v1773_v36  ;;  %v1510_v36 = vld [vmem:[#allocation7 + $0x6c] sm:$0xf] }
 0x634   : > { %8462 = vpow2.f32 %v1766_v34  ;;  %v7199_v34 = vcombine.low %v1507_v33, %v1508_v14  ;;  %v2269_v33 = vld [vmem:[#allocation7 + $0x14] sm:$0xf] }
 0x635   : > { %v2270_v14 = vld [vmem:[#allocation7 + $0x34] sm:$0xf] }
 0x63b   : > { %v8459_v37 = vpop.eup %8458 }
 0x63c   : > { %v1793_v55 = vmul.f32 %v8459_v37, %v8445_v41 }
 0x63d   : > { %v8461_v16 = vpop.eup %8460 }
 0x63e   : > { %v1795_v27 = vmul.f32 %v8461_v16, %v8447_v6  ;;  %v8463_v18 = vpop.eup %8462  ;;  %v1511_v16 = vld [vmem:[#allocation7 + $0x8c] sm:$0xf] }
 0x63f   : > { %v1789_v4 = vsel %vm1206_vm1, %v8463_v18, 0.0 }
 0x640   : > { %v1808_v32 = vpack.c.bf16 %v1795_v27, %v1793_v55  ;;  %v1512_v55 = vld [vmem:[#allocation7 + $0xac] sm:$0xf] }
 0x642   : > { %7676 = vmatmul.mubr.msk.bf16.vlgmr.msra.gmra.mrb[12].mxu0 %vm1206_vm1, %v1808_v32 }
 0x643   : > { %1790 = vadd.xlane.f32.xlu1 %v1789_v4  ;;  %7687 = vmatprep.mubr.msk.bf16.mxu0 %vm9029_vm0, %v11793_v5 }
 0x654   : > { %8236 = vrot.lane.b32.xlu1 %v9668_v57, %s11786_s13 }
 0x691   : > { %v1776_v45 = vpop.xlane.xlu0 %1775 }
 0x695   : > { %v1779_v9 = vpop.xlane.xlu1 %1778 }
 0x696   : > { %8464 = vrcp.f32 %v1779_v9 }
 0x699   : > { %v1782_v38 = vpop.xlane.xlu0 %1781 }
 0x69a   : > { %8466 = vrcp.f32 %v1782_v38  ;;  %v7201_v38 = vcombine.low %v1511_v16, %v1512_v55  ;;  %v7215_v16 = vcombine.low %v2269_v33, %v2270_v14 }
 0x69b   : > { %8468 = vrcp.f32 %v1776_v45  ;;  %v1785_v10 = vpop.xlane.xlu1 %1784 }
 0x69c   : > { %8470 = vrcp.f32 %v1785_v10 }
 0x69f   : > { %v8232_v46 = vpop.permute.xlu1 %8231 }
 0x6a0   : > { %v8234_v49 = vunpack.i.h.bf16 %v8232_v46  ;;  %v8233_v51 = vunpack.i.l.bf16 %v8232_v46  ;;  %v8465_v44 = vpop.eup %8464  ;;  %v1513_v46 = vld [vmem:[#allocation7 + $0xcc] sm:$0xf] }
 0x6a1   : > { %v1788_v48 = vpop.xlane.xlu0 %1787  ;;  %v1799_v50 = vmul.f32 %v8465_v44, %v8451_v56  ;;  %v1515_v44 = vld [vmem:[#allocation7 + $0x10c] sm:$0xf] }
 0x6a2   : > { %v1814_v41 = vpack.c.bf16 %v8234_v49, %v8233_v51  ;;  %8472 = vrcp.f32 %v1788_v48  ;;  %v1514_v49 = vld [vmem:[#allocation7 + $0xec] sm:$0xf] }
 0x6a4   : > { %v8467_v6 = vpop.eup %8466  ;;  %7686 = vmatpush3.bf16.msra.mxu0 %v1814_v41  ;;  %v7202_v41 = vcombine.low %v1513_v46, %v1514_v49  ;;  %v2277_v46 = vld [vmem:[#allocation7 + $0x114] sm:$0xf] }
 0x6a5   : > { %v8469_v0 = vpop.eup %8468  ;;  %v8227_v11 = vpop.permute.xlu0 %8226  ;;  %7697 = vmatprep.subr.bf16.mxu0 %v11793_v5  ;;  %v1801_v28 = vmul.f32 %v8467_v6, %v8453_v53  ;;  %v1516_v6 = vld [vmem:[#allocation7 + $0x12c] sm:$0xf]  ;;  %v2278_v49 = vld [vmem:[#allocation7 + $0x134] sm:$0xf] }
 0x6a6   : > { %v8471_v57 = vpop.eup %8470  ;;  %v8229_v40 = vunpack.i.h.bf16 %v8227_v11  ;;  %v8228_v13 = vunpack.i.l.bf16 %v8227_v11  ;;  %v1797_v35 = vmul.f32 %v8469_v0, %v9963_v1  ;;  %v7203_v0 = vcombine.low %v1515_v44, %v1516_v6  ;;  %v1517_v11 = vld [vmem:[#allocation7 + $0x14c] sm:$0xf]  ;;  %v2281_v6 = vld [vmem:[#allocation7 + $0x194] sm:$0xf] }
 0x6a7   : > { %v1803_v59 = vmul.f32 %v8471_v57, %v8455_v29  ;;  %v1518_v57 = vld [vmem:[#allocation7 + $0x16c] sm:$0xf] }
 0x6a8   : > { %v1813_v23 = vpack.c.bf16 %v8229_v40, %v8228_v13  ;;  %v1809_v60 = vpack.c.bf16 %v1799_v50, %v1797_v35  ;;  %v7204_v40 = vcombine.low %v1517_v11, %v1518_v57  ;;  %v1519_v13 = vld [vmem:[#allocation7 + $0x18c] sm:$0xf]  ;;  %v2283_v57 = vld [vmem:[#allocation7 + $0x1d4] sm:$0xf] }
 0x6a9   : > { %v1810_v7 = vpack.c.bf16 %v1803_v59, %v1801_v28  ;;  %v1520_v50 = vld [vmem:[#allocation7 + $0x1ac] sm:$0xf] }
 0x6aa   : > { %7680 = vmatpush3.bf16.msra.mxu1 %v1813_v23  ;;  %v7205_v28 = vcombine.low %v1519_v13, %v1520_v50  ;;  %v1521_v59 = vld [vmem:[#allocation7 + $0x1cc] sm:$0xf]  ;;  %v10030_v13 = vld [vmem:[%s9550_s30] sm:$0xff] }
 0x6ab   : > { %7688 = vmatmul.mubr.msk.bf16.vlgmr.msra.gmra.mrb[16].mxu0 %vm1206_vm1, %v1810_v7  ;;  %7691 = vmatprep.subr.bf16.mxu1 %v11793_v5  ;;  %v1522_v23 = vld [vmem:[#allocation7 + $0x1ec] sm:$0xf]  ;;  %v10033_v50 = vld [vmem:[%s9633_s14] sm:$0xff] }
 0x6ac   : > { %7713 = vmatprep.mubr.msk.bf16.mxu0 %vm9029_vm0, %v11793_v5  ;;  %v8473_v54 = vpop.eup %8472  ;;  %7698 = vmatpush3.bf16.msra.mxu0 %v7199_v34  ;;  %v7206_v35 = vcombine.low %v1521_v59, %v1522_v23  ;;  %v10038_v59 = vld [vmem:[%s9550_s30 + $0x8] sm:$0xff]  ;;  %s11859_s30 = sld [smem:[#allocation41_spill]] }
 0x6ad   : > { %7682 = vmatmul.mubr.msk.bf16.vlgmr.msra.gmra.mrb[12].mxu1 %vm1206_vm1, %v1809_v60  ;;  %v1805_v12 = vmul.f32 %v8473_v54, %v9970_v8  ;;  %v7200_v8 = vcombine.low %v1509_v25, %v1510_v36  ;;  %7699 = vmatprep.subr.bf16.mxu0 %v11793_v5  ;;  %v10041_v23 = vld [vmem:[%s9633_s14 + $0x8] sm:$0xff] }
 0x6ae   : > { %7693 = vmatprep.mubr.msk.bf16.mxu1 %vm9029_vm0, %v11793_v5 }
 0x6b0   : > { %7700 = vmatpush3.bf16.msra.mxu0 %v7200_v8 }
 0x6b1   : > { %7701 = vmatprep.subr.bf16.mxu0 %v11793_v5 }
 0x6b4   : > { %7702 = vmatpush3.bf16.msra.mxu0 %v7201_v38  ;;  %v2276_v38 = vld [vmem:[#allocation7 + $0xf4] sm:$0xf] }
 0x6b5   : > { %7703 = vmatprep.subr.bf16.mxu0 %v11793_v5 }
 0x6b8   : > { %7704 = vmatpush3.bf16.msra.mxu0 %v7202_v41  ;;  %v2280_v41 = vld [vmem:[#allocation7 + $0x174] sm:$0xf] }
 0x6b9   : > { %7705 = vmatprep.subr.bf16.mxu0 %v11793_v5 }
 0x6bc   : > { %7706 = vmatpush3.bf16.msra.mxu0 %v7203_v0  ;;  %v2282_v0 = vld [vmem:[#allocation7 + $0x1b4] sm:$0xf] }
 0x6bd   : > { %7707 = vmatprep.subr.bf16.mxu0 %v11793_v5  ;;  %v7221_v11 = vcombine.low %v2281_v6, %v2282_v0  ;;  %v2163_v6 = vld [vmem:[#allocation7 + $0xd0] sm:$0xf] }
 0x6be   : > { %v2164_v0 = vld [vmem:[#allocation7 + $0xf0] sm:$0xf] }
 0x6c0   : > { %7708 = vmatpush3.bf16.msra.mxu0 %v7204_v40  ;;  %v2284_v40 = vld [vmem:[#allocation7 + $0x1f4] sm:$0xf] }
 0x6c1   : > { %7709 = vmatprep.subr.bf16.mxu0 %v11793_v5 }
 0x6c4   : > { %7710 = vmatpush3.bf16.msra.mxu0 %v7205_v28  ;;  %v2266_v28 = vadd.f32 %v10033_v50, %v10030_v13 }
 0x6c5   : > { %7711 = vmatprep.subr.bf16.mxu0 %v11793_v5 }
 0x6c8   : > { %7712 = vmatpush3.bf16.msra.mxu0 %v7206_v35  ;;  %v2267_v35 = vadd.f32 %v10041_v23, %v10038_v59 }
 0x6c9   : > { %7737 = vmatprep.subr.bf16.mxu0 %v11793_v5 }
 0x6d0   : > { %v1791_v31 = vpop.xlane.xlu1 %1790 }
 0x6d1   : > { %8474 = vrcp.f32 %v1791_v31 }
 0x6d4   : > { %v8237_v15 = vpop.permute.xlu1 %8236 }
 0x6d5   : > { %v8239_v1 = vunpack.i.h.bf16 %v8237_v15  ;;  %v8238_v17 = vunpack.i.l.bf16 %v8237_v15 }
 0x6d7   : > { %v1815_v52 = vpack.c.bf16 %v8239_v1, %v8238_v17 }
 0x6d9   : > { %7692 = vmatpush3.bf16.msra.mxu1 %v1815_v52 }
 0x6da   : > { %7717 = vmatprep.subr.bf16.mxu1 %v11793_v5 }
 0x6db   : > { %v8475_v56 = vpop.eup %8474 }
 0x6dc   : > { %v1807_v47 = vmul.f32 %v8475_v56, %v8463_v18 }
 0x6de   : > { %v1811_v53 = vpack.c.bf16 %v1807_v47, %v1805_v12 }
 0x6e0   : > { %7694 = vmatmul.mubr.msk.bf16.vlgmr.msra.gmra.mrb[16].mxu1 %vm1206_vm1, %v1811_v53 }
 0x6e1   : > { %7733 = vmatprep.mubr.msk.bf16.mxu1 %vm9029_vm0, %v11793_v5 }
 0x715   : > { %v9998_v26 = vpop.f32.mrb[12].mxu0 }
 0x716   : > { %v7677_v29 = vpop.f32.mrb[13].mxu0 }
 0x717   : > { %v10000_v43 = vpop.f32.mrb[14].mxu0 }
 0x718   : > { %v7678_v30 = vpop.f32.mrb[15].mxu0 }
 0x77e   : > { %v1941_v37 = vpop.f32.mrb[16].mxu0 }
 0x77f   : > { %v7689_v27 = vpop.f32.mrb[17].mxu0 }
 0x780   : > { %v1897_v18 = vpop.f32.mrb[12].mxu1  ;;  %v1944_v32 = vpop.f32.mrb[18].mxu0  ;;  %v2272_v27 = vld [vmem:[#allocation7 + $0x74] sm:$0xf] }
 0x781   : > { %v8245_v4 = vpack.i.bf16 %v1944_v32, %v1941_v37  ;;  %v7683_v45 = vpop.f32.mrb[13].mxu1  ;;  %v7690_v9 = vpop.f32.mrb[19].mxu0  ;;  %v2273_v32 = vld [vmem:[#allocation7 + $0x94] sm:$0xf] }
 0x782   : > { %v1900_v10 = vpop.f32.mrb[14].mxu1  ;;  %v2275_v9 = vld [vmem:[#allocation7 + $0xd4] sm:$0xf] }
 0x783   : > { %v8240_v51 = vpack.i.bf16 %v1900_v10, %v1897_v18  ;;  %8246 = vrot.lane.b32.xlu0 %v8245_v4, %s11788_s21  ;;  %v7684_v48 = vpop.f32.mrb[15].mxu1  ;;  %v2274_v4 = vld [vmem:[#allocation7 + $0xb4] sm:$0xf]  ;;  %v7218_v10 = vcombine.low %v2275_v9, %v2276_v38 }
 0x784   : > { %v7217_v45 = vcombine.low %v2273_v32, %v2274_v4  ;;  %v2279_v48 = vld [vmem:[#allocation7 + $0x154] sm:$0xf] }
 0x785   : > { %8241 = vrot.lane.b32.xlu1 %v8240_v51, %s11786_s13  ;;  %v7219_v51 = vcombine.low %v2277_v46, %v2278_v49  ;;  %v7220_v44 = vcombine.low %v2279_v48, %v2280_v41  ;;  %v2159_v46 = vld [vmem:[#allocation7 + $0x50] sm:$0xf] }
 0x786   : > { %v2160_v49 = vld [vmem:[#allocation7 + $0x70] sm:$0xf] }
 0x787   : > { %v2161_v48 = vld [vmem:[#allocation7 + $0x90] sm:$0xf] }
 0x788   : > { %v2162_v41 = vld [vmem:[#allocation7 + $0xb0] sm:$0xf] }
 0x7b3   : > { %v1985_v7 = vpop.f32.mrb[16].mxu1 }
 0x7b4   : > { %v7695_v60 = vpop.f32.mrb[17].mxu1 }
 0x7b5   : > { %v1988_v31 = vpop.f32.mrb[18].mxu1  ;;  %v2268_v60 = vpack.c.bf16 %v2267_v35, %v2266_v28 }
 0x7b6   : > { %v8250_v15 = vpack.i.bf16 %v1988_v31, %v1985_v7  ;;  %v7696_v1 = vpop.f32.mrb[19].mxu1  ;;  %v7222_v7 = vcombine.low %v2283_v57, %v2284_v40  ;;  %v10050_v31 = vsub.s32 3, %v9617_v19  ;;  %v2165_v57 = vld [vmem:[#allocation7 + $0x110] sm:$0xf] }
 0x7b7   : > { %v2166_v40 = vld [vmem:[#allocation7 + $0x130] sm:$0xf] }
 0x7b8   : > { %8251 = vrot.lane.b32.xlu1 %v8250_v15, %s11790_s11  ;;  %v10052_v15 = vld [vmem:[#allocation8] sm:$0xff]  ;;  %v7211_v28 = vcombine.low %v2165_v57, %v2166_v40  ;;  %v2382_v57 = vld [vmem:[#allocation7 + $0x78] sm:$0xf] }
 0x7b9   : > { %v2028_v1 = vrot.slane %v10052_v15, %v10050_v31 }
 0x7f5   : > { %v8247_v56 = vpop.permute.xlu0 %8246 }
 0x7f6   : > { %v8249_v53 = vunpack.i.h.bf16 %v8247_v56  ;;  %v8248_v29 = vunpack.i.l.bf16 %v8247_v56 }
 0x7f7   : > { %v8242_v17 = vpop.permute.xlu1 %8241 }
 0x7f8   : > { %v8244_v52 = vunpack.i.h.bf16 %v8242_v17  ;;  %v8243_v54 = vunpack.i.l.bf16 %v8242_v17 }
 0x7fa   : > { %v2017_v12 = vsel %vm1531_vm2, %v10000_v43, %v8244_v52  ;;  %v2016_v47 = vsel %vm1531_vm2, %v9998_v26, %v8243_v54  ;;  %v2271_v26 = vld [vmem:[#allocation7 + $0x54] sm:$0xf] }
 0x7fb   : > { %v2019_v36 = vsel %vm2018_vm3, %v2016_v47, %v8248_v29  ;;  %v2020_v8 = vsel %vm2018_vm3, %v2017_v12, %v8249_v53  ;;  %v7216_v18 = vcombine.low %v2271_v26, %v2272_v27 }
 0x82a   : > { %v8252_v30 = vpop.permute.xlu1 %8251 }
 0x82b   : > { %v8254_v25 = vunpack.i.h.bf16 %v8252_v30  ;;  %v8253_v34 = vunpack.i.l.bf16 %v8252_v30  ;;  %v10065_v30 = vsub.s32 5, %v9617_v19 }
 0x82d   : > { %v2023_v37 = vsel %vm2021_vm4, %v2020_v8, %v8254_v25  ;;  %v2022_v43 = vsel %vm2021_vm4, %v2019_v36, %v8253_v34  ;;  %v2288_v14 = vrot.slane %v10052_v15, %v10065_v30 }
 0x82e   : > { %v2024_v55 = vpack.c.bf16 %v2023_v37, %v2022_v43 }
 0x830   : > { %7714 = vmatmul.mubr.bf16.vlgmr.msra.gmra.mrb[20].mxu0 %v2024_v55  ;;  %v2158_v55 = vld [vmem:[#allocation7 + $0x30] sm:$0xf] }
 0x831   : > { %7738 = vmatpush3.bf16.msra.mxu0 %v7215_v16  ;;  %7753 = vmatprep.mubr.msk.bf16.mxu0 %vm9029_vm0, %v11793_v5  ;;  %v2157_v16 = vld [vmem:[#allocation7 + $0x10] sm:$0xf] }
 0x832   : > { %7739 = vmatprep.subr.bf16.mxu0 %v11793_v5  ;;  %v7207_v26 = vcombine.low %v2157_v16, %v2158_v55  ;;  %v8605_v16 = vld [vmem:[#allocation8 + $0x8] sm:$0xff] }
 0x833   : > { %v2145_v55 = vrot.slane %v8605_v16, %v10050_v31 }
 0x834   : > { %7718 = vmatpush3.bf16.msra.mxu1 %v7207_v26  ;;  %v10103_v26 = vsub.s32 4, %v9617_v19 }
 0x835   : > { %7740 = vmatpush3.bf16.msra.mxu0 %v7216_v18  ;;  %7719 = vmatprep.subr.bf16.mxu1 %v11793_v5 }
 0x836   : > { %7741 = vmatprep.subr.bf16.mxu0 %v11793_v5 }
 0x839   : > { %7742 = vmatpush3.bf16.msra.mxu0 %v7217_v45 }
 0x83a   : > { %7743 = vmatprep.subr.bf16.mxu0 %v11793_v5 }
 0x83d   : > { %7744 = vmatpush3.bf16.msra.mxu0 %v7218_v10 }
 0x83e   : > { %7745 = vmatprep.subr.bf16.mxu0 %v11793_v5 }
 0x841   : > { %7746 = vmatpush3.bf16.msra.mxu0 %v7219_v51  ;;  %v7208_v51 = vcombine.low %v2159_v46, %v2160_v49 }
 0x842   : > { %7747 = vmatprep.subr.bf16.mxu0 %v11793_v5 }
 0x843   : > { %7720 = vmatpush3.bf16.msra.mxu1 %v7208_v51 }
 0x844   : > { %7721 = vmatprep.subr.bf16.mxu1 %v11793_v5 }
 0x845   : > { %7748 = vmatpush3.bf16.msra.mxu0 %v7220_v44  ;;  %v7209_v44 = vcombine.low %v2161_v48, %v2162_v41 }
 0x846   : > { %7749 = vmatprep.subr.bf16.mxu0 %v11793_v5 }
 0x847   : > { %7722 = vmatpush3.bf16.msra.mxu1 %v7209_v44 }
 0x848   : > { %7723 = vmatprep.subr.bf16.mxu1 %v11793_v5 }
 0x849   : > { %7750 = vmatpush3.bf16.msra.mxu0 %v7221_v11  ;;  %v7210_v11 = vcombine.low %v2163_v6, %v2164_v0  ;;  %v2379_v6 = vld [vmem:[#allocation7 + $0x18] sm:$0xf] }
 0x84a   : > { %7751 = vmatprep.subr.bf16.mxu0 %v11793_v5  ;;  %v2380_v0 = vld [vmem:[#allocation7 + $0x38] sm:$0xf] }
 0x84b   : > { %7724 = vmatpush3.bf16.msra.mxu1 %v7210_v11  ;;  %v7223_v11 = vcombine.low %v2379_v6, %v2380_v0  ;;  %v2378_v0 = vpack.c.bf16 %v10038_v59, %v10030_v13 }
 0x84c   : > { %7725 = vmatprep.subr.bf16.mxu1 %v11793_v5 }
 0x84d   : > { %7752 = vmatpush3.bf16.msra.mxu0 %v7222_v7  ;;  %v2167_v7 = vld [vmem:[#allocation7 + $0x150] sm:$0xf] }
 0x84e   : > { %7777 = vmatprep.subr.bf16.mxu0 %v11793_v5 }
 0x84f   : > { %7726 = vmatpush3.bf16.msra.mxu1 %v7211_v28  ;;  %v2384_v28 = vld [vmem:[#allocation7 + $0xb8] sm:$0xf] }
 0x850   : > { %7754 = vmatmul.mubr.bf16.vlgmr.msra.gmra.mrb[24].mxu0 %v2268_v60  ;;  %7727 = vmatprep.subr.bf16.mxu1 %v11793_v5  ;;  %v2168_v60 = vld [vmem:[#allocation7 + $0x170] sm:$0xf] }
 0x851   : > { %7779 = vmatprep.mubr.msk.bf16.mxu0 %vm9029_vm0, %v11793_v5 }
 0x903   : > { %v2111_v17 = vpop.f32.mrb[20].mxu0 }
 0x904   : > { %v2112_v52 = vadd.f32 %v2111_v17, %v2028_v1  ;;  %v7715_v54 = vpop.f32.mrb[21].mxu0  ;;  %v7212_v17 = vcombine.low %v2167_v7, %v2168_v60  ;;  %v2387_v60 = vld [vmem:[#allocation7 + $0x118] sm:$0xf] }
 0x905   : > { %v2114_v56 = vpop.f32.mrb[22].mxu0 }
 0x906   : > { %v10057_v12 = vadd.f32 %v10030_v13, %v2112_v52  ;;  %v2115_v47 = vadd.f32 %v2114_v56, %v2028_v1  ;;  %v7716_v53 = vpop.f32.mrb[23].mxu0  ;;  %v2169_v1 = vld [vmem:[#allocation7 + $0x190] sm:$0xf]  ;;  %7728 = vmatpush3.bf16.msra.mxu1 %v7212_v17  ;;  %v2176_v17 = vrot.slane %v10052_v15, %v10103_v26 }
 0x907   : > { %v2170_v52 = vld [vmem:[#allocation7 + $0x1b0] sm:$0xf]  ;;  %7729 = vmatprep.subr.bf16.mxu1 %v11793_v5 }
 0x908   : > { %v10060_v29 = vadd.f32 %v10038_v59, %v2115_v47  ;;  %2120 = vadd.xlane.f32.xlu0 %v10057_v12  ;;  %v7213_v54 = vcombine.low %v2169_v1, %v2170_v52  ;;  %v2171_v56 = vld [vmem:[#allocation7 + $0x1d0] sm:$0xf]  ;;  %v2388_v1 = vld [vmem:[#allocation7 + $0x138] sm:$0xf] }
 0x909   : > { %v2172_v47 = vld [vmem:[#allocation7 + $0x1f0] sm:$0xf]  ;;  %v7227_v52 = vcombine.low %v2387_v60, %v2388_v1 }
 0x90a   : > { %2122 = vadd.xlane.f32.xlu1 %v10060_v29  ;;  %7730 = vmatpush3.bf16.msra.mxu1 %v7213_v54  ;;  %v7214_v53 = vcombine.low %v2171_v56, %v2172_v47  ;;  %v2389_v56 = vld [vmem:[#allocation7 + $0x158] sm:$0xf] }
 0x90b   : > { %7731 = vmatprep.subr.bf16.mxu1 %v11793_v5  ;;  %v2390_v47 = vld [vmem:[#allocation7 + $0x178] sm:$0xf] }
 0x90e   : > { %7732 = vmatpush3.bf16.msra.mxu1 %v7214_v53 }
 0x90f   : > { %7757 = vmatprep.subr.bf16.mxu1 %v11793_v5 }
 0x923   : > { %v2371_v33 = vpop.f32.mrb[24].mxu0 }
 0x924   : > { %v7755_v25 = vpop.f32.mrb[25].mxu0  ;;  %v10073_v37 = vadd.f32 %v2371_v33, %v2288_v14 }
 0x925   : > { %v2374_v34 = vpop.f32.mrb[26].mxu0 }
 0x926   : > { %v10069_v36 = vadd.f32 %v2374_v34, %v2288_v14  ;;  %v7756_v8 = vpop.f32.mrb[27].mxu0  ;;  %v2656_v35 = vmul.f32 %v10073_v37, %v9680_v58 }
 0x928   : > { %2632 = vrot.lane.b32.xlu1 %v10069_v36, %s11790_s11  ;;  %v2657_v43 = vmul.f32 %v10069_v36, %v9701_v63 }
 0x92c   : > { %2636 = vrot.lane.b32.xlu1 %v10073_v37, %s11788_s21 }
 0x930   : > { %2638 = vrot.lane.b32.xlu1 %v10069_v36, %s11788_s21 }
 0x934   : > { %2644 = vrot.lane.b32.xlu1 %v10069_v36, %s11786_s13 }
 0x938   : > { %2674 = vrot.lane.b32.xlu1 %v2657_v43, %s11784_s19 }
 0x995   : > { %v2121_v27 = vpop.xlane.xlu0 %2120 }
 0x996   : > { %v2124_v18 = vmul.f32 0.0078125, %v2121_v27 }
 0x997   : > { %v2123_v32 = vpop.xlane.xlu1 %2122 }
 0x998   : > { %v2125_v4 = vmul.f32 0.0078125, %v2123_v32  ;;  %v2126_v45 = vsub.f32 %v10057_v12, %v2124_v18 }
 0x99a   : > { %v2128_v9 = vmul.f32 %v2126_v45, %v2126_v45  ;;  %v2127_v38 = vsub.f32 %v10060_v29, %v2125_v4  ;;  %v2151_v4 = vrot.slane %v8605_v16, %v10103_v26  ;;  %v2392_v16 = vld [vmem:[#allocation7 + $0x1b8] sm:$0xf] }
 0x99c   : > { %2130 = vadd.xlane.f32.xlu0 %v2128_v9  ;;  %v2129_v10 = vmul.f32 %v2127_v38, %v2127_v38 }
 0x9a0   : > { %2132 = vadd.xlane.f32.xlu0 %v2129_v10 }
 0x9b6   : > { %2630 = vrot.lane.b32.xlu0 %v10073_v37, %s11790_s11 }
 0x9ba   : > { %2642 = vrot.lane.b32.xlu0 %v10073_v37, %s11786_s13 }
 0x9be   : > { %2672 = vrot.lane.b32.xlu0 %v2656_v35, %s11784_s19  ;;  %v2386_v35 = vld [vmem:[#allocation7 + $0xf8] sm:$0xf] }
 0xa29   : > { %v2131_v33 = vpop.xlane.xlu0 %2130 }
 0xa2a   : > { %v2134_v14 = vmul.f32 0.0078125, %v2131_v33 }
 0xa2c   : > { %v2136_v25 = vadd.f32 1e-05, %v2134_v14  ;;  %v7228_v14 = vcombine.low %v2389_v56, %v2390_v47 }
 0xa2d   : > { %v2133_v34 = vpop.xlane.xlu0 %2132 }
 0xa2e   : > { %8476 = vrsqrt.f32 %v2136_v25  ;;  %v2135_v8 = vmul.f32 0.0078125, %v2133_v34 }
 0xa30   : > { %v2137_v43 = vadd.f32 1e-05, %v2135_v8 }
 0xa32   : > { %8478 = vrsqrt.f32 %v2137_v43  ;;  %v2391_v43 = vld [vmem:[#allocation7 + $0x198] sm:$0xf] }
 0xa38   : > { %v8477_v27 = vpop.eup %8476 }
 0xa39   : > { %v2140_v18 = vmul.f32 %v8477_v27, %v2126_v45  ;;  %v2381_v45 = vld [vmem:[#allocation7 + $0x58] sm:$0xf] }
 0xa3a   : > { %v7224_v40 = vcombine.low %v2381_v45, %v2382_v57  ;;  %v2393_v27 = vld [vmem:[#allocation7 + $0x1d8] sm:$0xf] }
 0xa3b   : > { %v2146_v32 = vmul.f32 %v2145_v55, %v2140_v18  ;;  %v2394_v18 = vld [vmem:[#allocation7 + $0x1f8] sm:$0xf] }
 0xa3c   : > { %v8479_v9 = vpop.eup %8478 }
 0xa3d   : > { %v2141_v10 = vmul.f32 %v8479_v9, %v2127_v38  ;;  %v2152_v49 = vadd.f32 %v2151_v4, %v2146_v32  ;;  %v2383_v38 = vld [vmem:[#allocation7 + $0x98] sm:$0xf]  ;;  %v7230_v32 = vcombine.low %v2393_v27, %v2394_v18  ;;  %v8606_v9 = vld [vmem:[%s11750_s7] sm:$0xff] }
 0xa3f   : > { %v2147_v46 = vmul.f32 %v2145_v55, %v2141_v10  ;;  %v2154_v48 = vadd.f32 %v10033_v50, %v2152_v49  ;;  %v7225_v50 = vcombine.low %v2383_v38, %v2384_v28  ;;  %v7229_v55 = vcombine.low %v2391_v43, %v2392_v16  ;;  %v8607_v49 = vld [vmem:[%s11750_s7 + $0x8] sm:$0xff] }
 0xa40   : > { %v2712_v10 = vmul.f32 %v8606_v9, %v10073_v37 }
 0xa41   : > { %v2153_v51 = vadd.f32 %v2151_v4, %v2147_v46  ;;  %v10133_v4 = vpop.permute.xlu1 %2632  ;;  %v10141_v46 = vpop.permute.xlu0 %2630 }
 0xa42   : > { %v2714_v6 = vmul.f32 %v8606_v9, %v10141_v46  ;;  %v2715_v45 = vmul.f32 %v8607_v49, %v10133_v4 }
 0xa43   : > { %v2155_v41 = vadd.f32 %v10041_v23, %v2153_v51  ;;  %v2385_v23 = vld [vmem:[#allocation7 + $0xd8] sm:$0xf]  ;;  %v2713_v51 = vmul.f32 %v8607_v49, %v10069_v36 }
 0xa44   : > { %v7226_v7 = vcombine.low %v2385_v23, %v2386_v35 }
 0xa45   : > { %v2156_v44 = vpack.c.bf16 %v2155_v41, %v2154_v48  ;;  %v2658_v48 = vmul.f32 %v10141_v46, %v9680_v58  ;;  %v10152_v41 = vpop.permute.xlu1 %2636  ;;  %v10176_v38 = vpop.permute.xlu0 %2642 }
 0xa46   : > { %v2660_v57 = vmul.f32 %v10152_v41, %v9680_v58  ;;  %v2716_v59 = vmul.f32 %v8606_v9, %v10152_v41  ;;  %v2718_v35 = vmul.f32 %v8606_v9, %v10176_v38 }
 0xa47   : > { %7734 = vmatmul.mubr.bf16.vlgmr.msra.gmra.mrb[20].mxu1 %v2156_v44  ;;  %v2659_v44 = vmul.f32 %v10133_v4, %v9701_v63 }
 0xa48   : > { %7773 = vmatprep.mubr.msk.bf16.mxu1 %vm9029_vm0, %v11793_v5  ;;  %7758 = vmatpush3.bf16.msra.mxu1 %v7223_v11 }
 0xa49   : > { %7759 = vmatprep.subr.bf16.mxu1 %v11793_v5  ;;  %v10165_v11 = vpop.permute.xlu1 %2638  ;;  %v2673_v47 = vpop.permute.xlu0 %2672 }
 0xa4a   : > { %v2661_v13 = vmul.f32 %v10165_v11, %v9701_v63 }
 0xa4c   : > { %7760 = vmatpush3.bf16.msra.mxu1 %v7224_v40  ;;  %v2717_v40 = vmul.f32 %v8607_v49, %v10165_v11 }
 0xa4d   : > { %7761 = vmatprep.subr.bf16.mxu1 %v11793_v5  ;;  %v10179_v28 = vpop.permute.xlu1 %2644 }
 0xa4e   : > { %v2663_v23 = vmul.f32 %v10179_v28, %v9701_v63 }
 0xa50   : > { %7762 = vmatpush3.bf16.msra.mxu1 %v7225_v50  ;;  %v2662_v50 = vmul.f32 %v10176_v38, %v9680_v58 }
 0xa51   : > { %7763 = vmatprep.subr.bf16.mxu1 %v11793_v5 }
 0xa54   : > { %7764 = vmatpush3.bf16.msra.mxu1 %v7226_v7  ;;  %v2719_v7 = vmul.f32 %v8607_v49, %v10179_v28  ;;  %v10239_v49 = vld [vmem:[%s11853_s6 + $0x8] sm:$0xff] }
 0xa55   : > { %7765 = vmatprep.subr.bf16.mxu1 %v11793_v5 }
 0xa58   : > { %7766 = vmatpush3.bf16.msra.mxu1 %v7227_v52 }
 0xa59   : > { %7767 = vmatprep.subr.bf16.mxu1 %v11793_v5 }
 0xa5c   : > { %7768 = vmatpush3.bf16.msra.mxu1 %v7228_v14 }
 0xa5d   : > { %7769 = vmatprep.subr.bf16.mxu1 %v11793_v5 }
 0xa60   : > { %7770 = vmatpush3.bf16.msra.mxu1 %v7229_v55 }
 0xa61   : > { %7771 = vmatprep.subr.bf16.mxu1 %v11793_v5 }
 0xa64   : > { %7772 = vmatpush3.bf16.msra.mxu1 %v7230_v32 }
 0xa65   : > { %7783 = vmatprep.subr.bf16.mxu1 %v11793_v5 }
 0xa67   : > { %7774 = vmatmul.mubr.bf16.vlgmr.msra.gmra.mrb[24].mxu1 %v2378_v0 }
 0xa68   : > { %7785 = vmatprep.mubr.msk.bf16.mxu1 %vm9029_vm0, %v11793_v5 }
 0xb1a   : > { %v2259_v54 = vpop.f32.mrb[20].mxu1 }
 0xb1b   : > { %v10117_v53 = vadd.f32 %v2259_v54, %v2176_v17  ;;  %v7735_v33 = vpop.f32.mrb[21].mxu1  ;;  %v10206_v54 = vld [vmem:[%s11852_s15 + $0x8] sm:$0xff] }
 0xb1c   : > { %v2262_v25 = vpop.f32.mrb[22].mxu1  ;;  %v2675_v33 = vpop.permute.xlu1 %2674 }
 0xb1d   : > { %v10119_v34 = vadd.f32 %v2262_v25, %v2176_v17  ;;  %v7736_v8 = vpop.f32.mrb[23].mxu1  ;;  %2490 = vrot.lane.b32.xlu0 %v10117_v53, %s11790_s11  ;;  %v2516_v60 = vmul.f32 %v10117_v53, %v9695_v61  ;;  %v8608_v17 = vld [vmem:[%s11852_s15] sm:$0xff] }
 0xb1e   : > { %v2572_v52 = vmul.f32 %v8608_v17, %v10117_v53 }
 0xb1f   : > { %2492 = vrot.lane.b32.xlu1 %v10119_v34, %s11790_s11  ;;  %v2517_v1 = vmul.f32 %v10119_v34, %v9716_v2  ;;  %v2573_v56 = vmul.f32 %v10206_v54, %v10119_v34 }
 0xb21   : > { %2496 = vrot.lane.b32.xlu0 %v10117_v53, %s11788_s21 }
 0xb23   : > { %2498 = vrot.lane.b32.xlu1 %v10119_v34, %s11788_s21 }
 0xb25   : > { %2502 = vrot.lane.b32.xlu0 %v10117_v53, %s11786_s13 }
 0xb27   : > { %2504 = vrot.lane.b32.xlu1 %v10119_v34, %s11786_s13 }
 0xb29   : > { %2728 = vrot.lane.b32.xlu0 %v2712_v10, %s11782_s8 }
 0xb2b   : > { %2730 = vrot.lane.b32.xlu1 %v2713_v51, %s11782_s8  ;;  %v2649_v51 = vmul.f32 %v10239_v49, %v10069_v36 }
 0xb2d   : > { %2676 = vrot.lane.b32.xlu0 %v2658_v48, %s11784_s19  ;;  %v10246_v48 = vld [vmem:[%s11853_s6] sm:$0xff] }
 0xb2f   : > { %2678 = vrot.lane.b32.xlu1 %v2659_v44, %s11784_s19  ;;  %v2648_v44 = vmul.f32 %v10246_v48, %v10073_v37 }
 0xb31   : > { %2732 = vrot.lane.b32.xlu0 %v2714_v6, %s11782_s8  ;;  %v2704_v6 = vmul.f32 %v10073_v37, %v9736_v20 }
 0xb33   : > { %2734 = vrot.lane.b32.xlu1 %v2715_v45, %s11782_s8 }
 0xb35   : > { %2680 = vrot.lane.b32.xlu0 %v2660_v57, %s11784_s19 }
 0xb37   : > { %2682 = vrot.lane.b32.xlu1 %v2661_v13, %s11784_s19  ;;  %v2705_v13 = vmul.f32 %v10069_v36, %v9738_v22 }
 0xb39   : > { %2736 = vrot.lane.b32.xlu0 %v2716_v59, %s11782_s8 }
 0xb3b   : > { %2738 = vrot.lane.b32.xlu1 %v2717_v40, %s11782_s8 }
 0xb3d   : > { %2684 = vrot.lane.b32.xlu0 %v2662_v50, %s11784_s19  ;;  %v2697_v50 = vsub.f32 %v2649_v51, %v2675_v33 }
 0xb3f   : > { %2686 = vrot.lane.b32.xlu1 %v2663_v23, %s11784_s19  ;;  %v2696_v23 = vsub.f32 %v2648_v44, %v2673_v47  ;;  %v2706_v47 = vmul.f32 %v10141_v46, %v9736_v20 }
 0xb41   : > { %2740 = vrot.lane.b32.xlu0 %v2718_v35, %s11782_s8 }
 0xb43   : > { %2742 = vrot.lane.b32.xlu1 %v2719_v7, %s11782_s8 }
 0xb45   : > { %2532 = vrot.lane.b32.xlu0 %v2516_v60, %s11784_s19 }
 0xb47   : > { %2534 = vrot.lane.b32.xlu1 %v2517_v1, %s11784_s19 }
 0xb49   : > { %2588 = vrot.lane.b32.xlu0 %v2572_v52, %s11782_s8 }
 0xb4b   : > { %2590 = vrot.lane.b32.xlu1 %v2573_v56, %s11782_s8 }
 0xb8f   : > { %v10211_v14 = vpop.permute.xlu0 %2490 }
 0xb90   : > { %v2518_v25 = vmul.f32 %v10211_v14, %v9695_v61  ;;  %v2574_v55 = vmul.f32 %v8608_v17, %v10211_v14 }
 0xb91   : > { %v10215_v8 = vpop.permute.xlu1 %2492 }
 0xb92   : > { %2536 = vrot.lane.b32.xlu0 %v2518_v25, %s11784_s19  ;;  %v2519_v43 = vmul.f32 %v10215_v8, %v9716_v2  ;;  %v2575_v18 = vmul.f32 %v10206_v54, %v10215_v8  ;;  %v2650_v25 = vmul.f32 %v10246_v48, %v10141_v46 }
 0xb93   : > { %v10220_v16 = vpop.permute.xlu0 %2496 }
 0xb94   : > { %2538 = vrot.lane.b32.xlu1 %v2519_v43, %s11784_s19  ;;  %v2520_v9 = vmul.f32 %v10220_v16, %v9695_v61  ;;  %v2576_v59 = vmul.f32 %v8608_v17, %v10220_v16 }
 0xb95   : > { %v10224_v27 = vpop.permute.xlu1 %2498 }
 0xb96   : > { %2592 = vrot.lane.b32.xlu0 %v2574_v55, %s11782_s8  ;;  %v2521_v0 = vmul.f32 %v10224_v27, %v9716_v2  ;;  %v2577_v37 = vmul.f32 %v10206_v54, %v10224_v27 }
 0xb97   : > { %v10229_v32 = vpop.permute.xlu0 %2502 }
 0xb98   : > { %2594 = vrot.lane.b32.xlu1 %v2575_v18, %s11782_s8  ;;  %v2522_v36 = vmul.f32 %v10229_v32, %v9695_v61  ;;  %v2707_v18 = vmul.f32 %v10133_v4, %v9738_v22  ;;  %v2578_v44 = vmul.f32 %v8608_v17, %v10229_v32 }
 0xb99   : > { %v10234_v10 = vpop.permute.xlu1 %2504 }
 0xb9a   : > { %2540 = vrot.lane.b32.xlu0 %v2520_v9, %s11784_s19  ;;  %v2523_v33 = vmul.f32 %v10234_v10, %v9716_v2  ;;  %v2651_v9 = vmul.f32 %v10239_v49, %v10133_v4 }
 0xb9b   : > { %v2729_v45 = vpop.permute.xlu0 %2728 }
 0xb9c   : > { %v2752_v57 = vadd.f32 %v2729_v45, %v2704_v6  ;;  %2542 = vrot.lane.b32.xlu1 %v2521_v0, %s11784_s19 }
 0xb9d   : > { %v2731_v40 = vpop.permute.xlu1 %2730 }
 0xb9e   : > { %v2753_v35 = vadd.f32 %v2731_v40, %v2705_v13  ;;  %2596 = vrot.lane.b32.xlu0 %v2576_v59, %s11782_s8  ;;  %v2760_v60 = vsel %vm1206_vm1, %v2696_v23, %v2752_v57  ;;  %v2579_v57 = vmul.f32 %v10206_v54, %v10234_v10 }
 0xb9f   : > { %v2677_v7 = vpop.permute.xlu0 %2676 }
 0xba0   : > { %v2761_v1 = vsel %vm1206_vm1, %v2697_v50, %v2753_v35  ;;  %2598 = vrot.lane.b32.xlu1 %v2577_v37, %s11782_s8  ;;  %v2698_v0 = vsub.f32 %v2650_v25, %v2677_v7  ;;  %v2652_v25 = vmul.f32 %v10246_v48, %v10152_v41 }
 0xba1   : > { %v2679_v52 = vpop.permute.xlu1 %2678  ;;  %v2808_v56 = vpack.c.bf16 %v2761_v1, %v2760_v60  ;;  %v2709_v1 = vmul.f32 %v10165_v11, %v9738_v22 }
 0xba2   : > { %2544 = vrot.lane.b32.xlu0 %v2522_v36, %s11784_s19  ;;  %v2699_v46 = vsub.f32 %v2651_v9, %v2679_v52  ;;  %v2653_v52 = vmul.f32 %v10239_v49, %v10165_v11  ;;  %v10303_v9 = vld [vmem:[%s11857_s28] sm:$0xff] }
 0xba3   : > { %v2733_v43 = vpop.permute.xlu0 %2732  ;;  %v2816_v55 = vsel %vm1531_vm2, %v2808_v56, 0  ;;  %v2708_v56 = vmul.f32 %v10152_v41, %v9736_v20  ;;  %v2508_v11 = vmul.f32 %v10303_v9, %v10117_v53 }
 0xba4   : > { %v2754_v51 = vadd.f32 %v2733_v43, %v2706_v47  ;;  %2546 = vrot.lane.b32.xlu1 %v2523_v33, %s11784_s19  ;;  %7778 = vmatpush3.bf16.xpose.msra.mxu0 %v2816_v55  ;;  %s11864_s19 = smov 16  }
 0xba5   : > { %v2735_v6 = vpop.permute.xlu1 %2734  ;;  %7789 = vmatprep.subr.bf16.mxu0 %v11793_v5 }
 0xba6   : > { %v2755_v45 = vadd.f32 %v2735_v6, %v2707_v18  ;;  %2600 = vrot.lane.b32.xlu0 %v2578_v44, %s11782_s8  ;;  %v2762_v4 = vsel %vm1206_vm1, %v2698_v0, %v2754_v51  ;;  %v2564_v18 = vmul.f32 %v10117_v53, %v9787_v42  ;;  %v10310_v51 = vld [vmem:[%s11857_s28 + $0x8] sm:$0xff] }
 0xba7   : > { %v2681_v13 = vpop.permute.xlu0 %2680  ;;  %v2509_v41 = vmul.f32 %v10310_v51, %v10119_v34 }
 0xba8   : > { %v2763_v59 = vsel %vm1206_vm1, %v2699_v46, %v2755_v45  ;;  %2602 = vrot.lane.b32.xlu1 %v2579_v57, %s11782_s8  ;;  %v2700_v6 = vsub.f32 %v2652_v25, %v2681_v13  ;;  %v2565_v45 = vmul.f32 %v10119_v34, %v9807_v62  ;;  %v2711_v34 = vmul.f32 %v10179_v28, %v9738_v22  ;;  %s11865_s8 = sld [smem:[#allocation38_spill]] }
 0xba9   : > { %v2683_v40 = vpop.permute.xlu1 %2682  ;;  %v2809_v17 = vpack.c.bf16 %v2763_v59, %v2762_v4 }
 0xbaa   : > { %v2701_v43 = vsub.f32 %v2653_v52, %v2683_v40  ;;  %v2710_v52 = vmul.f32 %v10176_v38, %v9736_v20 }
 0xbab   : > { %v2737_v50 = vpop.permute.xlu0 %2736  ;;  %v2863_v23 = vsel %vm1531_vm2, %v2809_v17, 0 }
 0xbac   : > { %7784 = vmatpush3.bf16.xpose.msra.mxu1 %v2863_v23  ;;  %v2756_v55 = vadd.f32 %v2737_v50, %v2708_v56 }
 0xbad   : > { %v2739_v35 = vpop.permute.xlu1 %2738  ;;  %7795 = vmatprep.subr.bf16.mxu1 %v11793_v5 }
 0xbae   : > { %v2757_v47 = vadd.f32 %v2739_v35, %v2709_v1  ;;  %v2764_v4 = vsel %vm1206_vm1, %v2700_v6, %v2756_v55  ;;  %v2566_v55 = vmul.f32 %v10211_v14, %v9787_v42 }
 0xbaf   : > { %v2685_v37 = vpop.permute.xlu0 %2684 }
 0xbb0   : > { %v2765_v0 = vsel %vm1206_vm1, %v2701_v43, %v2757_v47 }
 0xbb1   : > { %v2687_v7 = vpop.permute.xlu1 %2686  ;;  %v2810_v17 = vpack.c.bf16 %v2765_v0, %v2764_v4  ;;  %v2568_v4 = vmul.f32 %v10220_v16, %v9787_v42 }
 0xbb3   : > { %v2741_v60 = vpop.permute.xlu0 %2740  ;;  %v2910_v13 = vsel %vm1531_vm2, %v2810_v17, 0 }
 0xbb4   : > { %v2758_v43 = vadd.f32 %v2741_v60, %v2710_v52 }
 0xbb5   : > { %v2743_v54 = vpop.permute.xlu1 %2742 }
 0xbb6   : > { %v2759_v56 = vadd.f32 %v2743_v54, %v2711_v34 }
 0xbb7   : > { %v2533_v36 = vpop.permute.xlu0 %2532 }
 0xbb8   : > { %v2556_v53 = vsub.f32 %v2508_v11, %v2533_v36  ;;  %v2655_v36 = vmul.f32 %v10239_v49, %v10179_v28  ;;  %v2511_v11 = vmul.f32 %v10310_v51, %v10215_v8 }
 0xbb9   : > { %v2535_v33 = vpop.permute.xlu1 %2534 }
 0xbba   : > { %v2557_v59 = vsub.f32 %v2509_v41, %v2535_v33  ;;  %v2654_v33 = vmul.f32 %v10246_v48, %v10176_v38  ;;  %v2703_v25 = vsub.f32 %v2655_v36, %v2687_v7 }
 0xbbb   : > { %v2589_v44 = vpop.permute.xlu0 %2588 }
 0xbbc   : > { %v2612_v46 = vadd.f32 %v2589_v44, %v2564_v18  ;;  %v2510_v18 = vmul.f32 %v10303_v9, %v10211_v14  ;;  %v2702_v49 = vsub.f32 %v2654_v33, %v2685_v37  ;;  %v2767_v41 = vsel %vm1206_vm1, %v2703_v25, %v2759_v56 }
 0xbbd   : > { %v2591_v57 = vpop.permute.xlu1 %2590  ;;  %v2567_v44 = vmul.f32 %v10215_v8, %v9807_v62  ;;  %v2512_v8 = vmul.f32 %v10303_v9, %v10220_v16  ;;  %v2514_v33 = vmul.f32 %v10303_v9, %v10229_v32  ;;  %v2515_v25 = vmul.f32 %v10310_v51, %v10234_v10 }
 0xbbe   : > { %v2613_v40 = vadd.f32 %v2591_v57, %v2565_v45  ;;  %v2620_v50 = vsel %vm1206_vm1, %v2556_v53, %v2612_v46  ;;  %v2766_v48 = vsel %vm1206_vm1, %v2702_v49, %v2758_v43 }
 0xbbf   : > { %v2811_v46 = vpack.c.bf16 %v2767_v41, %v2766_v48 }
 0xbc0   : > { %v2621_v23 = vsel %vm1206_vm1, %v2557_v59, %v2613_v40  ;;  %v2513_v40 = vmul.f32 %v10310_v51, %v10224_v27 }
 0xbc1   : > { %v2804_v35 = vpack.c.bf16 %v2621_v23, %v2620_v50  ;;  %v2957_v59 = vsel %vm1531_vm2, %v2811_v46, 0  ;;  %v2569_v50 = vmul.f32 %v10224_v27, %v9807_v62 }
 0xbc3   : > { %7780 = vmatmul.mubr.msk.bf16.vlgmr.msra.gmra.mrb[28].mxu0 %vm1531_vm2, %v2804_v35 }
 0xbc4   : > { %7790 = vmatpush3.bf16.xpose.msra.mxu0 %v2910_v13  ;;  %7791 = vmatprep.mubr.msk.bf16.mxu0 %vm9029_vm0, %v11793_v5 }
 0xbc5   : > { %7801 = vmatprep.subr.bf16.mxu0 %v11793_v5 }
 0xc04   : > { %v2537_v1 = vpop.permute.xlu0 %2536 }
 0xc05   : > { %v2558_v7 = vsub.f32 %v2510_v18, %v2537_v1 }
 0xc06   : > { %v2539_v47 = vpop.permute.xlu1 %2538 }
 0xc07   : > { %v2559_v60 = vsub.f32 %v2511_v11, %v2539_v47  ;;  %v2570_v47 = vmul.f32 %v10229_v32, %v9787_v42  ;;  %v10372_v11 = vsub.s32 6, %v9617_v19 }
 0xc08   : > { %v2593_v28 = vpop.permute.xlu0 %2592 }
 0xc09   : > { %v2614_v54 = vadd.f32 %v2593_v28, %v2566_v55  ;;  %v2571_v55 = vmul.f32 %v10234_v10, %v9807_v62  ;;  %v2481_v28 = vpop.f32.mrb[24].mxu1  ;;  %v2398_v32 = vrot.slane %v10052_v15, %v10372_v11 }
 0xc0a   : > { %v2595_v38 = vpop.permute.xlu1 %2594 }
 0xc0b   : > { %v2615_v6 = vadd.f32 %v2595_v38, %v2567_v44  ;;  %v2622_v14 = vsel %vm1206_vm1, %v2558_v7, %v2614_v54  ;;  %v7775_v44 = vpop.f32.mrb[25].mxu1  ;;  %v10378_v7 = vadd.f32 %v2481_v28, %v2398_v32 }
 0xc0c   : > { %v2541_v0 = vpop.permute.xlu0 %2540  ;;  %v2484_v9 = vpop.f32.mrb[26].mxu1 }
 0xc0d   : > { %v2623_v45 = vsel %vm1206_vm1, %v2559_v60, %v2615_v6  ;;  %v2560_v16 = vsub.f32 %v2512_v8, %v2541_v0  ;;  %v7776_v38 = vpop.f32.mrb[27].mxu1  ;;  %v10380_v60 = vadd.f32 %v2484_v9, %v2398_v32 }
 0xc0e   : > { %v2805_v57 = vpack.c.bf16 %v2623_v45, %v2622_v14  ;;  %v2543_v37 = vpop.permute.xlu1 %2542 }
 0xc0f   : > { %v2561_v35 = vsub.f32 %v2513_v40, %v2543_v37  ;;  %v3092_v6 = vpack.c.bf16 %v10380_v60, %v10378_v7 }
 0xc10   : > { %v2597_v53 = vpop.permute.xlu0 %2596  ;;  %7786 = vmatmul.mubr.msk.bf16.vlgmr.msra.gmra.mrb[28].mxu1 %vm1531_vm2, %v2805_v57 }
 0xc11   : > { %v2616_v17 = vadd.f32 %v2597_v53, %v2568_v4  ;;  %7796 = vmatpush3.bf16.xpose.msra.mxu1 %v2957_v59  ;;  %7797 = vmatprep.mubr.msk.bf16.mxu1 %vm9029_vm0, %v11793_v5 }
 0xc12   : > { %v2599_v23 = vpop.permute.xlu1 %2598  ;;  %7807 = vmatprep.subr.bf16.mxu1 %v11793_v5 }
 0xc13   : > { %v2617_v13 = vadd.f32 %v2599_v23, %v2569_v50  ;;  %v2624_v1 = vsel %vm1206_vm1, %v2560_v16, %v2616_v17 }
 0xc14   : > { %v2545_v34 = vpop.permute.xlu0 %2544 }
 0xc15   : > { %v2625_v36 = vsel %vm1206_vm1, %v2561_v35, %v2617_v13  ;;  %v2562_v49 = vsub.f32 %v2514_v33, %v2545_v34 }
 0xc16   : > { %v2806_v52 = vpack.c.bf16 %v2625_v36, %v2624_v1  ;;  %v2547_v56 = vpop.permute.xlu1 %2546 }
 0xc17   : > { %v2563_v41 = vsub.f32 %v2515_v25, %v2547_v56 }
 0xc18   : > { %v2601_v27 = vpop.permute.xlu0 %2600  ;;  %7792 = vmatmul.mubr.msk.bf16.vlgmr.msra.gmra.mrb[32].mxu0 %vm1531_vm2, %v2806_v52 }
 0xc19   : > { %v2618_v43 = vadd.f32 %v2601_v27, %v2570_v47  ;;  %7803 = vmatprep.mubr.msk.bf16.mxu0 %vm9029_vm0, %v11793_v5  ;;  %7802 = vmatpush3.bf16.msra.mxu0 %v3092_v6 }
 0xc1a   : > { %v2603_v18 = vpop.permute.xlu1 %2602  ;;  %7813 = vmatprep.subr.bf16.mxu0 %v11793_v5 }
 0xc1b   : > { %v2619_v54 = vadd.f32 %v2603_v18, %v2571_v55  ;;  %v2626_v51 = vsel %vm1206_vm1, %v2562_v49, %v2618_v43 }
 0xc1d   : > { %v2627_v10 = vsel %vm1206_vm1, %v2563_v41, %v2619_v54 }
 0xc1e   : > { %v2807_v48 = vpack.c.bf16 %v2627_v10, %v2626_v51 }
 0xc20   : > { %7798 = vmatmul.mubr.msk.bf16.vlgmr.msra.gmra.mrb[32].mxu1 %vm1531_vm2, %v2807_v48 }
 0xc21   : > { %7809 = vmatprep.mubr.msk.bf16.mxu1 %vm9029_vm0, %v11793_v5 }
 0xc96   : > { %v2852_v15 = vpop.f32.mrb[28].mxu0 }
 0xc97   : > { %v7781_v0 = vpop.f32.mrb[29].mxu0  ;;  %v3000_v46 = vsel %vm1206_vm1, %v2852_v15, -inf }
 0xc98   : > { %3001 = vmax.xlane.f32.xlu0 %v3000_v46  ;;  %v2855_v14 = vpop.f32.mrb[30].mxu0 }
 0xc99   : > { %v7782_v45 = vpop.f32.mrb[31].mxu0  ;;  %v3003_v57 = vsel %vm1206_vm1, %v2855_v14, -inf }
 0xc9a   : > { %3004 = vmax.xlane.f32.xlu1 %v3003_v57 }
 0xce3   : > { %v2899_v37 = vpop.f32.mrb[28].mxu1 }
 0xce4   : > { %v7787_v4 = vpop.f32.mrb[29].mxu1  ;;  %v3006_v8 = vsel %vm1206_vm1, %v2899_v37, -inf }
 0xce5   : > { %v2902_v53 = vpop.f32.mrb[30].mxu1  ;;  %3007 = vmax.xlane.f32.xlu0 %v3006_v8 }
 0xce6   : > { %v7788_v59 = vpop.f32.mrb[31].mxu1  ;;  %v3009_v40 = vsel %vm1206_vm1, %v2902_v53, -inf }
 0xce9   : > { %3010 = vmax.xlane.f32.xlu0 %v3009_v40 }
 0xceb   : > { %v2946_v17 = vpop.f32.mrb[32].mxu0 }
 0xcec   : > { %v7793_v50 = vpop.f32.mrb[33].mxu0  ;;  %v3012_v23 = vsel %vm1206_vm1, %v2946_v17, -inf }
 0xced   : > { %3013 = vmax.xlane.f32.xlu0 %v3012_v23  ;;  %v2949_v16 = vpop.f32.mrb[34].mxu0 }
 0xcee   : > { %v7794_v35 = vpop.f32.mrb[35].mxu0  ;;  %v3015_v13 = vsel %vm1206_vm1, %v2949_v16, -inf }
 0xcef   : > { %3016 = vmax.xlane.f32.xlu1 %v3015_v13  ;;  %v8260_v13 = vpack.i.bf16 %v10380_v60, %v10378_v7 }
 0xcf3   : > { %v2993_v34 = vpop.f32.mrb[32].mxu1 }
 0xcf4   : > { %v7799_v1 = vpop.f32.mrb[33].mxu1  ;;  %v3018_v36 = vsel %vm1206_vm1, %v2993_v34, -inf }
 0xcf5   : > { %v2996_v52 = vpop.f32.mrb[34].mxu1  ;;  %3019 = vmax.xlane.f32.xlu0 %v3018_v36 }
 0xcf6   : > { %v7800_v56 = vpop.f32.mrb[35].mxu1  ;;  %v3021_v47 = vsel %vm1206_vm1, %v2996_v52, -inf }
 0xcf7   : > { %3022 = vmax.xlane.f32.xlu1 %v3021_v47 }
 0xd25   : > { %v3002_v27 = vpop.xlane.xlu0 %3001 }
 0xd26   : > { %v3024_v33 = vsub.f32 %v2852_v15, %v3002_v27 }
 0xd27   : > { %v3005_v25 = vpop.xlane.xlu1 %3004 }
 0xd28   : > { %v3032_v43 = vmul.f32 1.442695, %v3024_v33  ;;  %v3025_v55 = vsub.f32 %v2855_v14, %v3005_v25 }
 0xd2a   : > { %8480 = vpow2.f32 %v3032_v43  ;;  %v3034_v18 = vmul.f32 1.442695, %v3025_v55 }
 0xd2c   : > { %8482 = vpow2.f32 %v3034_v18 }
 0xd34   : > { %v8481_v28 = vpop.eup %8480 }
 0xd35   : > { %v3048_v49 = vsel %vm1206_vm1, %v8481_v28, 0.0 }
 0xd36   : > { %v8483_v41 = vpop.eup %8482  ;;  %3049 = vadd.xlane.f32.xlu0 %v3048_v49 }
 0xd37   : > { %v3051_v54 = vsel %vm1206_vm1, %v8483_v41, 0.0 }
 0xd38   : > { %3052 = vadd.xlane.f32.xlu1 %v3051_v54 }
 0xd72   : > { %v3008_v44 = vpop.xlane.xlu0 %3007 }
 0xd73   : > { %v3026_v32 = vsub.f32 %v2899_v37, %v3008_v44 }
 0xd75   : > { %v3036_v9 = vmul.f32 1.442695, %v3026_v32 }
 0xd76   : > { %v3011_v51 = vpop.xlane.xlu0 %3010 }
 0xd77   : > { %8484 = vpow2.f32 %v3036_v9  ;;  %v3027_v10 = vsub.f32 %v2902_v53, %v3011_v51 }
 0xd79   : > { %v3038_v38 = vmul.f32 1.442695, %v3027_v10 }
 0xd7a   : > { %v3014_v48 = vpop.xlane.xlu0 %3013 }
 0xd7b   : > { %8486 = vpow2.f32 %v3038_v38  ;;  %v3028_v6 = vsub.f32 %v2946_v17, %v3014_v48 }
 0xd7c   : > { %v3017_v15 = vpop.xlane.xlu1 %3016 }
 0xd7d   : > { %v3040_v0 = vmul.f32 1.442695, %v3028_v6  ;;  %v3029_v46 = vsub.f32 %v2949_v16, %v3017_v15 }
 0xd7f   : > { %8488 = vpow2.f32 %v3040_v0  ;;  %v3042_v14 = vmul.f32 1.442695, %v3029_v46 }
 0xd81   : > { %v10398_v45 = vpop.eup %8484  ;;  %8490 = vpow2.f32 %v3042_v14 }
 0xd82   : > { %v3020_v57 = vpop.xlane.xlu0 %3019  ;;  %v3054_v37 = vsel %vm1206_vm1, %v10398_v45, 0.0 }
 0xd83   : > { %v3030_v4 = vsub.f32 %v2993_v34, %v3020_v57  ;;  %3055 = vadd.xlane.f32.xlu0 %v3054_v37 }
 0xd84   : > { %v3023_v34 = vpop.xlane.xlu1 %3022 }
 0xd85   : > { %v8487_v8 = vpop.eup %8486  ;;  %v3044_v53 = vmul.f32 1.442695, %v3030_v4  ;;  %v3031_v1 = vsub.f32 %v2996_v52, %v3023_v34 }
 0xd86   : > { %v3057_v59 = vsel %vm1206_vm1, %v8487_v8, 0.0 }
 0xd87   : > { %8492 = vpow2.f32 %v3044_v53  ;;  %3058 = vadd.xlane.f32.xlu1 %v3057_v59  ;;  %v3046_v36 = vmul.f32 1.442695, %v3031_v1 }
 0xd89   : > { %v8489_v40 = vpop.eup %8488  ;;  %8494 = vpow2.f32 %v3046_v36 }
 0xd8a   : > { %v3060_v17 = vsel %vm1206_vm1, %v8489_v40, 0.0 }
 0xd8b   : > { %v8491_v50 = vpop.eup %8490  ;;  %3061 = vadd.xlane.f32.xlu0 %v3060_v17 }
 0xd8c   : > { %v3063_v23 = vsel %vm1206_vm1, %v8491_v50, 0.0 }
 0xd8d   : > { %3064 = vadd.xlane.f32.xlu1 %v3063_v23 }
 0xd91   : > { %v10405_v16 = vpop.eup %8492 }
 0xd92   : > { %v3066_v35 = vsel %vm1206_vm1, %v10405_v16, 0.0 }
 0xd93   : > { %3067 = vadd.xlane.f32.xlu0 %v3066_v35  ;;  %v8495_v56 = vpop.eup %8494 }
 0xd94   : > { %v3069_v47 = vsel %vm1206_vm1, %v8495_v56, 0.0 }
 0xd9e   : > { %8261 = vrot.lane.b32.xlu1 %v8260_v13, %s11788_s21 }
 0xda9   : > { %8256 = vrot.lane.b32.xlu0 %v8260_v13, %s11790_s11 }
 0xdc2   : > { %3070 = vadd.xlane.f32.xlu1 %v3069_v47 }
 0xdc3   : > { %v3050_v27 = vpop.xlane.xlu0 %3049 }
 0xdc4   : > { %8496 = vrcp.f32 %v3050_v27 }
 0xdc5   : > { %v3053_v33 = vpop.xlane.xlu1 %3052 }
 0xdc6   : > { %8498 = vrcp.f32 %v3053_v33 }
 0xdce   : > { %v8497_v25 = vpop.eup %8496 }
 0xdcf   : > { %v3073_v55 = vmul.f32 %v8497_v25, %v8481_v28  ;;  %v2788_v25 = vld [vmem:[#allocation7 + $0x1c] sm:$0xf] }
 0xdd0   : > { %v8499_v43 = vpop.eup %8498 }
 0xdd1   : > { %v3075_v7 = vmul.f32 %v8499_v43, %v8483_v41  ;;  %v2789_v43 = vld [vmem:[#allocation7 + $0x3c] sm:$0xf] }
 0xdd3   : > { %8266 = vrot.lane.b32.xlu1 %v8260_v13, %s11786_s13  ;;  %v3088_v60 = vpack.c.bf16 %v3075_v7, %v3073_v55  ;;  %v2790_v55 = vld [vmem:[#allocation7 + $0x5c] sm:$0xf]  ;;  %v7239_v7 = vcombine.low %v2788_v25, %v2789_v43 }
 0xdd5   : > { %7804 = vmatmul.mubr.msk.bf16.vlgmr.msra.gmra.mrb[36].mxu0 %vm1206_vm1, %v3088_v60  ;;  %v2791_v60 = vld [vmem:[#allocation7 + $0x7c] sm:$0xf] }
 0xdd6   : > { %7815 = vmatprep.mubr.msk.bf16.mxu0 %vm9029_vm0, %v11793_v5 }
 0xe10   : > { %v3056_v52 = vpop.xlane.xlu0 %3055 }
 0xe14   : > { %v3059_v18 = vpop.xlane.xlu1 %3058 }
 0xe15   : > { %8500 = vrcp.f32 %v3059_v18  ;;  %v2793_v18 = vld [vmem:[#allocation7 + $0xbc] sm:$0xf] }
 0xe18   : > { %v3062_v49 = vpop.xlane.xlu0 %3061 }
 0xe19   : > { %8502 = vrcp.f32 %v3062_v49 }
 0xe1a   : > { %8504 = vrcp.f32 %v3056_v52  ;;  %v3065_v54 = vpop.xlane.xlu1 %3064  ;;  %v7240_v52 = vcombine.low %v2790_v55, %v2791_v60 }
 0xe1b   : > { %8506 = vrcp.f32 %v3065_v54 }
 0xe1e   : > { %v8262_v44 = vpop.permute.xlu1 %8261 }
 0xe1f   : > { %v8264_v32 = vunpack.i.h.bf16 %v8262_v44  ;;  %v8263_v28 = vunpack.i.l.bf16 %v8262_v44  ;;  %v8501_v51 = vpop.eup %8500 }
 0xe20   : > { %v3068_v41 = vpop.xlane.xlu0 %3067  ;;  %v3079_v46 = vmul.f32 %v8501_v51, %v8487_v8 }
 0xe21   : > { %v3094_v9 = vpack.c.bf16 %v8264_v32, %v8263_v28  ;;  %8508 = vrcp.f32 %v3068_v41 }
 0xe23   : > { %v8503_v10 = vpop.eup %8502  ;;  %7814 = vmatpush3.bf16.msra.mxu0 %v3094_v9 }
 0xe24   : > { %v8505_v38 = vpop.eup %8504  ;;  %v8257_v48 = vpop.permute.xlu0 %8256  ;;  %7825 = vmatprep.subr.bf16.mxu0 %v11793_v5  ;;  %v3081_v14 = vmul.f32 %v8503_v10, %v8489_v40  ;;  %v2794_v10 = vld [vmem:[#allocation7 + $0xdc] sm:$0xf] }
 0xe25   : > { %v8507_v6 = vpop.eup %8506  ;;  %v8259_v15 = vunpack.i.h.bf16 %v8257_v48  ;;  %v8258_v0 = vunpack.i.l.bf16 %v8257_v48  ;;  %v3077_v4 = vmul.f32 %v8505_v38, %v10398_v45  ;;  %v2795_v38 = vld [vmem:[#allocation7 + $0xfc] sm:$0xf] }
 0xe26   : > { %v3083_v57 = vmul.f32 %v8507_v6, %v8491_v50 }
 0xe27   : > { %v3093_v37 = vpack.c.bf16 %v8259_v15, %v8258_v0  ;;  %v3089_v59 = vpack.c.bf16 %v3079_v46, %v3077_v4  ;;  %v7242_v15 = vcombine.low %v2794_v10, %v2795_v38  ;;  %v2796_v0 = vld [vmem:[#allocation7 + $0x11c] sm:$0xf] }
 0xe28   : > { %v3090_v53 = vpack.c.bf16 %v3083_v57, %v3081_v14  ;;  %v2797_v46 = vld [vmem:[#allocation7 + $0x13c] sm:$0xf] }
 0xe29   : > { %7808 = vmatpush3.bf16.msra.mxu1 %v3093_v37  ;;  %v7243_v14 = vcombine.low %v2796_v0, %v2797_v46  ;;  %v2798_v57 = vld [vmem:[#allocation7 + $0x15c] sm:$0xf]  ;;  %v8362_v0 = vld [vmem:[%s11858_s29 + $0x4] ss:$8 sps:$4 sm:$0xff]  }
 0xe2a   : > { %7816 = vmatmul.mubr.msk.bf16.vlgmr.msra.gmra.mrb[40].mxu0 %vm1206_vm1, %v3090_v53  ;;  %7819 = vmatprep.subr.bf16.mxu1 %v11793_v5  ;;  %v2799_v37 = vld [vmem:[#allocation7 + $0x17c] sm:$0xf] }
 0xe2b   : > { %7841 = vmatprep.mubr.msk.bf16.mxu0 %vm9029_vm0, %v11793_v5  ;;  %v8509_v23 = vpop.eup %8508  ;;  %7826 = vmatpush3.bf16.msra.mxu0 %v7239_v7  ;;  %v7244_v4 = vcombine.low %v2798_v57, %v2799_v37  ;;  %v2800_v53 = vld [vmem:[#allocation7 + $0x19c] sm:$0xf] }
 0xe2c   : > { %7810 = vmatmul.mubr.msk.bf16.vlgmr.msra.gmra.mrb[36].mxu1 %vm1206_vm1, %v3089_v59  ;;  %v3085_v13 = vmul.f32 %v8509_v23, %v10405_v16  ;;  %7827 = vmatprep.subr.bf16.mxu0 %v11793_v5  ;;  %v2801_v59 = vld [vmem:[#allocation7 + $0x1bc] sm:$0xf] }
 0xe2d   : > { %7821 = vmatprep.mubr.msk.bf16.mxu1 %vm9029_vm0, %v11793_v5 }
 0xe2f   : > { %7828 = vmatpush3.bf16.msra.mxu0 %v7240_v52 }
 0xe30   : > { %7829 = vmatprep.subr.bf16.mxu0 %v11793_v5 }
 0xe4f   : > { %v3071_v8 = vpop.xlane.xlu1 %3070 }
 0xe50   : > { %8510 = vrcp.f32 %v3071_v8  ;;  %v7245_v8 = vcombine.low %v2800_v53, %v2801_v59 }
 0xe53   : > { %v8267_v40 = vpop.permute.xlu1 %8266 }
 0xe54   : > { %v8269_v45 = vunpack.i.h.bf16 %v8267_v40  ;;  %v8268_v17 = vunpack.i.l.bf16 %v8267_v40  ;;  %v2802_v40 = vld [vmem:[#allocation7 + $0x1dc] sm:$0xf] }
 0xe56   : > { %v3095_v50 = vpack.c.bf16 %v8269_v45, %v8268_v17  ;;  %v2803_v45 = vld [vmem:[#allocation7 + $0x1fc] sm:$0xf] }
 0xe57   : > { %v7246_v17 = vcombine.low %v2802_v40, %v2803_v45  ;;  %v8366_v40 = vld [vmem:[%s11858_s29 + $0x20] ss:$8 sps:$4 sm:$0xff]   ;;  %v8368_v45 = vld [vmem:[%s11858_s29 + $0x24] ss:$8 sps:$4 sm:$0xff]  }
 0xe58   : > { %7820 = vmatpush3.bf16.msra.mxu1 %v3095_v50 }
 0xe59   : > { %3541 = vmatprep.subr.bf16.mxu1 %v8362_v0 }
 0xe5a   : > { %v8511_v35 = vpop.eup %8510 }
 0xe5b   : > { %v3087_v34 = vmul.f32 %v8511_v35, %v8495_v56  ;;  %v2792_v56 = vld [vmem:[#allocation7 + $0x9c] sm:$0xf] }
 0xe5c   : > { %v7241_v9 = vcombine.low %v2792_v56, %v2793_v18 }
 0xe5d   : > { %v3091_v1 = vpack.c.bf16 %v3087_v34, %v3085_v13 }
 0xe5e   : > { %7830 = vmatpush3.bf16.msra.mxu0 %v7241_v9 }
 0xe5f   : > { %7822 = vmatmul.mubr.msk.bf16.vlgmr.msra.gmra.mrb[40].mxu1 %vm1206_vm1, %v3091_v1  ;;  %7831 = vmatprep.subr.bf16.mxu0 %v11793_v5 }
 0xe60   : > { %3573 = vmatprep.mubr.bf16.mxu1 %v11792_v3 }
 0xe62   : > { %7832 = vmatpush3.bf16.msra.mxu0 %v7242_v15 }
 0xe63   : > { %7833 = vmatprep.subr.bf16.mxu0 %v11793_v5 }
 0xe66   : > { %7834 = vmatpush3.bf16.msra.mxu0 %v7243_v14 }
 0xe67   : > { %7835 = vmatprep.subr.bf16.mxu0 %v11793_v5 }
 0xe6a   : > { %7836 = vmatpush3.bf16.msra.mxu0 %v7244_v4 }
 0xe6b   : > { %7837 = vmatprep.subr.bf16.mxu0 %v11793_v5 }
 0xe6e   : > { %7838 = vmatpush3.bf16.msra.mxu0 %v7245_v8 }
 0xe6f   : > { %7839 = vmatprep.subr.bf16.mxu0 %v11793_v5 }
 0xe72   : > { %7840 = vmatpush3.bf16.msra.mxu0 %v7246_v17  ;;  %v8369_v17 = vld [vmem:[%s11858_s29 + $0x30] ss:$8 sps:$4 sm:$0xff]  }
 0xea8   : > { %v10430_v36 = vpop.f32.mrb[36].mxu0 }
 0xea9   : > { %v7805_v47 = vpop.f32.mrb[37].mxu0 }
 0xeaa   : > { %v10432_v27 = vpop.f32.mrb[38].mxu0 }
 0xeab   : > { %v7806_v33 = vpop.f32.mrb[39].mxu0 }
 0xefd   : > { %v3221_v16 = vpop.f32.mrb[40].mxu0 }
 0xefe   : > { %v7817_v49 = vpop.f32.mrb[41].mxu0 }
 0xeff   : > { %v3177_v54 = vpop.f32.mrb[36].mxu1  ;;  %v3224_v44 = vpop.f32.mrb[42].mxu0 }
 0xf00   : > { %v8275_v32 = vpack.i.bf16 %v3224_v44, %v3221_v16  ;;  %v7811_v28 = vpop.f32.mrb[37].mxu1  ;;  %v7818_v41 = vpop.f32.mrb[43].mxu0 }
 0xf01   : > { %v3180_v51 = vpop.f32.mrb[38].mxu1  ;;  %v8614_v28 = vld [vmem:[#allocation8] sm:$0xff] }
 0xf02   : > { %v8270_v48 = vpack.i.bf16 %v3180_v51, %v3177_v54  ;;  %v7812_v6 = vpop.f32.mrb[39].mxu1  ;;  %8276 = vrot.lane.b32.xlu0 %v8275_v32, %s11788_s21  ;;  %s11861_s21 = smov 64  }
 0xf04   : > { %8271 = vrot.lane.b32.xlu1 %v8270_v48, %s11786_s13  ;;  %s11862_s13 = smov 32  }
 0xf32   : > { %v3265_v50 = vpop.f32.mrb[40].mxu1 }
 0xf33   : > { %v7823_v23 = vpop.f32.mrb[41].mxu1 }
 0xf34   : > { %v3268_v35 = vpop.f32.mrb[42].mxu1  ;;  %v8374_v23 = vld [vmem:[%s11858_s29 + $0x44] ss:$8 sps:$4 sm:$0xff]  }
 0xf35   : > { %v8280_v13 = vpack.i.bf16 %v3268_v35, %v3265_v50  ;;  %v7824_v34 = vpop.f32.mrb[43].mxu1  ;;  %v8371_v50 = vld [vmem:[%s11858_s29 + $0x34] ss:$8 sps:$4 sm:$0xff]   ;;  %v8372_v35 = vld [vmem:[%s11858_s29 + $0x40] ss:$8 sps:$4 sm:$0xff]  }
 0xf36   : > { %v8375_v34 = vld [vmem:[%s11858_s29 + $0x50] ss:$8 sps:$4 sm:$0xff]  }
 0xf37   : > { %8281 = vrot.lane.b32.xlu1 %v8280_v13, %s11790_s11  ;;  %v8377_v13 = vld [vmem:[%s11858_s29 + $0x54] ss:$8 sps:$4 sm:$0xff]   ;;  %s11860_s11 = smov 96  }
 0xf74   : > { %v8277_v25 = vpop.permute.xlu0 %8276 }
 0xf75   : > { %v8279_v7 = vunpack.i.h.bf16 %v8277_v25  ;;  %v8278_v60 = vunpack.i.l.bf16 %v8277_v25  ;;  %v8381_v25 = vld [vmem:[%s11858_s29 + $0x70] ss:$8 sps:$4 sm:$0xff]  }
 0xf76   : > { %v8272_v1 = vpop.permute.xlu1 %8271 }
 0xf77   : > { %v8274_v47 = vunpack.i.h.bf16 %v8272_v1  ;;  %v8273_v33 = vunpack.i.l.bf16 %v8272_v1  ;;  %v8380_v1 = vld [vmem:[%s11858_s29 + $0x64] ss:$8 sps:$4 sm:$0xff]  }
 0xf79   : > { %v3296_v43 = vsel %vm1531_vm2, %v10430_v36, %v8273_v33  ;;  %v3297_v55 = vsel %vm1531_vm2, %v10432_v27, %v8274_v47  ;;  %v10453_v36 = vsub.s32 7, %v9617_v19  ;;  %v8360_v19 = vld [vmem:[%s11858_s29] ss:$8 sps:$4 sm:$0xff]   ;;  %v8383_v33 = vld [vmem:[%s11858_s29 + $0x74] ss:$8 sps:$4 sm:$0xff]  }
 0xf7a   : > { %v3298_v18 = vsel %vm2018_vm3, %v3296_v43, %v8278_v60  ;;  %v3299_v49 = vsel %vm2018_vm3, %v3297_v55, %v8279_v7  ;;  %3542 = vmatpush1.bf16.msra.mxu1 %v8360_v19  ;;  %v8378_v47 = vld [vmem:[%s11858_s29 + $0x60] ss:$8 sps:$4 sm:$0xff]  }
 0xf7b   : > { %v3306_v27 = vrot.slane %v8614_v28, %v10453_v36  ;;  %v8384_v43 = vld [vmem:[%s11859_s30 + $0x40] sm:$0xff]   ;;  %v8386_v7 = vld [vmem:[%s11859_s30 + $0x48] sm:$0xff]  }
 0xf7c   : > { %v8385_v55 = vld [vmem:[%s11859_s30] sm:$0xff]   ;;  %7489 = vmatprep.subr.bf16.mxu0 %v8384_v43  ;;  %v8387_v60 = vld [vmem:[%s11859_s30 + $0x8] sm:$0xff]  }
 0xfa9   : > { %v8282_v52 = vpop.permute.xlu1 %8281 }
 0xfaa   : > { %v8284_v16 = vunpack.i.h.bf16 %v8282_v52  ;;  %v8283_v56 = vunpack.i.l.bf16 %v8282_v52  ;;  %v8388_v52 = vld [vmem:[%s11859_s30 + $0x50] sm:$0xff]  }
 0xfac   : > { %v3300_v54 = vsel %vm2021_vm4, %v3298_v18, %v8283_v56  ;;  %v3301_v44 = vsel %vm2021_vm4, %v3299_v49, %v8284_v16  ;;  %v8389_v16 = vld [vmem:[%s11859_s30 + $0x10] sm:$0xff]   ;;  %v8390_v56 = vld [vmem:[%s11859_s30 + $0x58] sm:$0xff]   ;;  %v8392_v49 = vld [vmem:[%s11859_s30 + $0x60] sm:$0xff]  }
 0xfad   : > { %v3302_v32 = vpack.c.bf16 %v3301_v44, %v3300_v54  ;;  %v8391_v18 = vld [vmem:[%s11859_s30 + $0x18] sm:$0xff]   ;;  %v8393_v54 = vld [vmem:[%s11859_s30 + $0x20] sm:$0xff]   ;;  %v8394_v44 = vld [vmem:[%s11859_s30 + $0x68] sm:$0xff]  }
 0xfaf   : > { %7842 = vmatmul.mubr.bf16.vlgmr.msra.gmra.mrb[44].mxu0 %v3302_v32 }
 0xfb0   : > { %7490 = vmatpush3.bf16.msra.mxu0 %v8385_v55 }
 0xfb1   : > { %7491 = vmatprep.subr.bf16.mxu0 %v8386_v7 }
 0xfb4   : > { %7492 = vmatpush3.bf16.msra.mxu0 %v8387_v60 }
 0xfb5   : > { %7493 = vmatprep.subr.bf16.mxu0 %v8388_v52 }
 0xfb8   : > { %7494 = vmatpush3.bf16.msra.mxu0 %v8389_v16 }
 0xfb9   : > { %7495 = vmatprep.subr.bf16.mxu0 %v8390_v56 }
 0xfbc   : > { %7496 = vmatpush3.bf16.msra.mxu0 %v8391_v18 }
 0xfbd   : > { %7497 = vmatprep.subr.bf16.mxu0 %v8392_v49 }
 0xfc0   : > { %7498 = vmatpush3.bf16.msra.mxu0 %v8393_v54 }
 0xfc1   : > { %7499 = vmatprep.subr.bf16.mxu0 %v8394_v44 }
0x1082   : > { %v3389_v41 = vpop.f32.mrb[44].mxu0 }
0x1083   : > { %v3390_v9 = vadd.f32 %v3389_v41, %v3306_v27  ;;  %v7843_v51 = vpop.f32.mrb[45].mxu0 }
0x1084   : > { %v3392_v10 = vpop.f32.mrb[46].mxu0 }
0x1085   : > { %v10457_v38 = vadd.f32 %v3390_v9, %v10057_v12  ;;  %v3393_v48 = vadd.f32 %v3392_v10, %v3306_v27  ;;  %v7844_v6 = vpop.f32.mrb[47].mxu0  ;;  %v8365_v12 = vld [vmem:[%s11858_s29 + $0x14] ss:$8 sps:$4 sm:$0xff]  }
0x1086   : > { %3543 = vmatprep.subr.bf16.mxu1 %v8365_v12  ;;  %v10551_v6 = vld [vmem:[#allocation8 + $0x8] sm:$0xff] }
0x1087   : > { %v10460_v15 = vadd.f32 %v3393_v48, %v10060_v29  ;;  %3398 = vadd.xlane.f32.xlu0 %v10457_v38  ;;  %v8363_v29 = vld [vmem:[%s11858_s29 + $0x10] ss:$8 sps:$4 sm:$0xff]   ;;  %v3423_v19 = vrot.slane %v10551_v6, %v10065_v30 }
0x1088   : > { %3544 = vmatpush1.bf16.msra.mxu1 %v8363_v29 }
0x1089   : > { %3400 = vadd.xlane.f32.xlu1 %v10460_v15  ;;  %3545 = vmatprep.subr.bf16.mxu1 %v8368_v45  ;;  %v8399_v45 = vld [vmem:[%s11859_s30 + $0x38] sm:$0xff]  }
0x108c   : > { %3546 = vmatpush1.bf16.msra.mxu1 %v8366_v40  ;;  %v8398_v40 = vld [vmem:[%s11859_s30 + $0x78] sm:$0xff]  }
0x108d   : > { %3547 = vmatprep.subr.bf16.mxu1 %v8371_v50 }
0x1090   : > { %3548 = vmatpush1.bf16.msra.mxu1 %v8369_v17  ;;  %v3449_v17 = vld [vmem:[#allocation10] sm:$0x3] }
0x1091   : > { %3549 = vmatprep.subr.bf16.mxu1 %v8374_v23  ;;  %v3454_v50 = vrot.slane %v3449_v17, %v9643_v39  ;;  %v3458_v23 = vrot.slane %v3449_v17, %v9620_v21 }
0x1094   : > { %3550 = vmatpush1.bf16.msra.mxu1 %v8372_v35 }
0x1095   : > { %3551 = vmatprep.subr.bf16.mxu1 %v8377_v13 }
0x1098   : > { %3552 = vmatpush1.bf16.msra.mxu1 %v8375_v34 }
0x1099   : > { %3553 = vmatprep.subr.bf16.mxu1 %v8380_v1 }
0x109c   : > { %3554 = vmatpush1.bf16.msra.mxu1 %v8378_v47 }
0x109d   : > { %3555 = vmatprep.subr.bf16.mxu1 %v8383_v33 }
0x10a0   : > { %3556 = vmatpush1.bf16.msra.mxu1 %v8381_v25 }
0x1114   : > { %v3399_v46 = vpop.xlane.xlu0 %3398 }
0x1115   : > { %v3402_v14 = vmul.f32 0.0078125, %v3399_v46  ;;  %v3429_v46 = vrot.slane %v10551_v6, %v10372_v11 }
0x1116   : > { %v3401_v57 = vpop.xlane.xlu1 %3400 }
0x1117   : > { %v3404_v37 = vsub.f32 %v10457_v38, %v3402_v14  ;;  %v3403_v4 = vmul.f32 0.0078125, %v3401_v57 }
0x1119   : > { %v10478_v53 = vsub.f32 %v10460_v15, %v3403_v4  ;;  %v3406_v59 = vmul.f32 %v3404_v37, %v3404_v37 }
0x111b   : > { %3408 = vadd.xlane.f32.xlu0 %v3406_v59  ;;  %v3407_v8 = vmul.f32 %v10478_v53, %v10478_v53 }
0x111f   : > { %3410 = vadd.xlane.f32.xlu0 %v3407_v8  ;;  %v8397_v8 = vld [vmem:[%s11859_s30 + $0x30] sm:$0xff]  }
0x11a8   : > { %v3409_v32 = vpop.xlane.xlu0 %3408 }
0x11a9   : > { %v3412_v28 = vmul.f32 0.0078125, %v3409_v32  ;;  %v3764_v32 = vrot.slane %v10551_v6, %v9643_v39 }
0x11ab   : > { %v3414_v27 = vadd.f32 1e-05, %v3412_v28 }
0x11ac   : > { %v3411_v41 = vpop.xlane.xlu0 %3410 }
0x11ad   : > { %8512 = vrsqrt.f32 %v3414_v27  ;;  %v3413_v9 = vmul.f32 0.0078125, %v3411_v41 }
0x11af   : > { %v3415_v51 = vadd.f32 1e-05, %v3413_v9 }
0x11b1   : > { %8514 = vrsqrt.f32 %v3415_v51 }
0x11b7   : > { %v8513_v10 = vpop.eup %8512 }
0x11b8   : > { %v3418_v48 = vmul.f32 %v8513_v10, %v3404_v37  ;;  %v8395_v37 = vld [vmem:[%s11859_s30 + $0x28] sm:$0xff]  }
0x11b9   : > { %7500 = vmatpush3.bf16.msra.mxu0 %v8395_v37 }
0x11ba   : > { %v3424_v29 = vmul.f32 %v3423_v19, %v3418_v48 }
0x11bb   : > { %v8515_v0 = vpop.eup %8514 }
0x11bc   : > { %v3419_v12 = vmul.f32 %v8515_v0, %v10478_v53  ;;  %v3430_v57 = vadd.f32 %v3429_v46, %v3424_v29  ;;  %v8396_v53 = vld [vmem:[%s11859_s30 + $0x70] sm:$0xff]  }
0x11bd   : > { %7501 = vmatprep.subr.bf16.mxu0 %v8396_v53 }
0x11be   : > { %v3425_v14 = vmul.f32 %v3423_v19, %v3419_v12  ;;  %7502 = vmatpush3.bf16.msra.mxu0 %v8397_v8  ;;  %v3792_v8 = vrot.slane %v10551_v6, %v10453_v36  ;;  %v3839_v6 = vld [vmem:[#allocation11 + $0x20] sm:$0xff] }
0x11bf   : > { %7503 = vmatprep.subr.bf16.mxu0 %v8398_v40 }
0x11c0   : > { %v3431_v4 = vadd.f32 %v3429_v46, %v3425_v14 }
0x11c2   : > { %v3432_v59 = vpack.c.bf16 %v3431_v4, %v3430_v57  ;;  %7504 = vmatpush3.bf16.msra.mxu0 %v8399_v45 }
0x11c3   : > { %7845 = vmatprep.subr.bf16.mxu0 %v11793_v5 }
0x11c4   : > { %3574 = vmatmul.mubr.bf16.vlgmr.msra.gmra.mrb[44].mxu1 %v3432_v59 }
0x11c5   : > { %3966 = vmatprep.mubr.bf16.mxu1 %v11792_v3 }
0x1297   : > { %v3575_v35 = vpop.f32.mrb[44].mxu1 }
0x1298   : > { %v3576_v13 = vadd.f32 %v3575_v35, %v3454_v50  ;;  %v3577_v34 = vpop.f32.mrb[45].mxu1 }
0x1299   : > { %v3578_v1 = vadd.f32 %v3577_v34, %v3458_v23  ;;  %v3579_v47 = vpop.f32.mrb[46].mxu1 }
0x129a   : > { %v3580_v33 = vadd.f32 %v3579_v47, %v3454_v50  ;;  %v3581_v25 = vpop.f32.mrb[47].mxu1  ;;  %v3584_v55 = vmax.f32 %v3576_v13, 0.0  ;;  %v7279_v50 = vld [vmem:[#allocation8 + $0x10] ss:$0 sm:$0xff]  ;;  %v4270_v47 = vld [vmem:[#allocation11 + $0x8] sm:$0xf] }
0x129b   : > { %v3582_v43 = vadd.f32 %v3581_v25, %v3458_v23  ;;  %v3585_v60 = vmax.f32 %v3578_v1, 0.0  ;;  %v3838_v25 = vld [vmem:[#allocation11] sm:$0xff] }
0x129c   : > { %v3586_v7 = vmax.f32 %v3580_v33, 0.0  ;;  %v4271_v33 = vld [vmem:[#allocation11 + $0x28] sm:$0xf] }
0x129d   : > { %v3587_v52 = vmax.f32 %v3582_v43, 0.0  ;;  %v7296_v43 = vcombine.low %v4270_v47, %v4271_v33  ;;  %v4280_v47 = vld [vmem:[#allocation11 + $0x148] sm:$0xf] }
0x129e   : > { %v3588_v16 = vpack.c.bf16 %v3586_v7, %v3584_v55  ;;  %v4272_v55 = vld [vmem:[#allocation11 + $0x48] sm:$0xf] }
0x129f   : > { %v3589_v56 = vpack.c.bf16 %v3587_v52, %v3585_v60  ;;  %v4273_v7 = vld [vmem:[#allocation11 + $0x68] sm:$0xf]  ;;  %v7280_v60 = vcombine.low %v3838_v25, %v3839_v6  ;;  %v7281_v52 = vcombine.high %v3838_v25, %v3839_v6 }
0x12a0   : > { %v4281_v33 = vld [vmem:[#allocation11 + $0x168] sm:$0xf] }
0x12a1   : > { %3750 = vmatprep.mubr.bf16.mxu0 %v3589_v56  ;;  %v3841_v56 = vld [vmem:[#allocation11 + $0x60] sm:$0xff]  ;;  %3934 = vmatprep.subr.bf16.mxu1 %v7281_v52  ;;  %v7301_v6 = vcombine.low %v4280_v47, %v4281_v33  ;;  %v4283_v52 = vld [vmem:[#allocation11 + $0x1a8] sm:$0xf] }
0x12a2   : > { %3751 = vmatmul.mubr.bf16.vlgmr.msra.gmra.mrb[48].mxu0 %v3588_v16  ;;  %v3840_v16 = vld [vmem:[#allocation11 + $0x40] sm:$0xff]  ;;  %3935 = vmatpush1.bf16.msra.mxu1 %v7280_v60  ;;  %v4282_v60 = vld [vmem:[#allocation11 + $0x188] sm:$0xf] }
0x12a3   : > { %7861 = vmatprep.mubr.msk.bf16.mxu0 %vm9029_vm0, %v11793_v5  ;;  %7846 = vmatpush3.bf16.msra.mxu0 %v7296_v43 }
0x12a4   : > { %7847 = vmatprep.subr.bf16.mxu0 %v11793_v5 }
0x1375   : > { %v7505_v18 = vpop.f32.mrb[48].mxu0 }
0x1376   : > { %v7506_v49 = vpop.f32.mrb[49].mxu0 }
0x1377   : > { %v7507_v54 = vadd.f32 %v7506_v49, %v7505_v18  ;;  %v7508_v44 = vpop.f32.mrb[50].mxu0  ;;  %v7297_v18 = vcombine.low %v4272_v55, %v4273_v7  ;;  %v7283_v49 = vcombine.high %v3840_v16, %v3841_v56  ;;  %v3850_v55 = vld [vmem:[#allocation11 + $0x180] sm:$0xff] }
0x1378   : > { %v7509_v28 = vpop.f32.mrb[51].mxu0  ;;  %v3851_v7 = vld [vmem:[#allocation11 + $0x1a0] sm:$0xff] }
0x1379   : > { %v3759_v27 = vadd.f32 %v7507_v54, %v10457_v38  ;;  %v7510_v41 = vadd.f32 %v7509_v28, %v7508_v44  ;;  %v7282_v54 = vcombine.low %v3840_v16, %v3841_v56  ;;  %3936 = vmatprep.subr.bf16.mxu1 %v7283_v49  ;;  %7848 = vmatpush3.bf16.msra.mxu0 %v7297_v18  ;;  %v3852_v49 = vld [vmem:[#allocation11 + $0x1c0] sm:$0xff] }
0x137a   : > { %7849 = vmatprep.subr.bf16.mxu0 %v11793_v5  ;;  %v7293_v56 = vcombine.high %v3850_v55, %v3851_v7  ;;  %v7302_v18 = vcombine.low %v4282_v60, %v4283_v52 }
0x137b   : > { %v3760_v9 = vadd.f32 %v7510_v41, %v10460_v15  ;;  %v3765_v51 = vadd.f32 %v3764_v32, %v3759_v27  ;;  %3937 = vmatpush1.bf16.msra.mxu1 %v7282_v54  ;;  %v3853_v54 = vld [vmem:[#allocation11 + $0x1e0] sm:$0xff] }
0x137d   : > { %3767 = vadd.xlane.f32.xlu0 %v3765_v51  ;;  %v3766_v10 = vadd.f32 %v3764_v32, %v3760_v9 }
0x137f   : > { %3769 = vadd.xlane.f32.xlu1 %v3766_v10 }
0x140a   : > { %v3768_v48 = vpop.xlane.xlu0 %3767 }
0x140b   : > { %v3771_v19 = vmul.f32 0.0078125, %v3768_v48  ;;  %v4274_v48 = vld [vmem:[#allocation11 + $0x88] sm:$0xf] }
0x140c   : > { %v3770_v0 = vpop.xlane.xlu1 %3769 }
0x140d   : > { %v3773_v12 = vsub.f32 %v3765_v51, %v3771_v19  ;;  %v3772_v29 = vmul.f32 0.0078125, %v3770_v0  ;;  %v4275_v19 = vld [vmem:[#allocation11 + $0xa8] sm:$0xf] }
0x140e   : > { %v7298_v0 = vcombine.low %v4274_v48, %v4275_v19 }
0x140f   : > { %v3774_v46 = vsub.f32 %v3766_v10, %v3772_v29  ;;  %v3775_v14 = vmul.f32 %v3773_v12, %v3773_v12  ;;  %v3843_v29 = vld [vmem:[#allocation11 + $0xa0] sm:$0xff] }
0x1410   : > { %7850 = vmatpush3.bf16.msra.mxu0 %v7298_v0 }
0x1411   : > { %3777 = vadd.xlane.f32.xlu0 %v3775_v14  ;;  %v3776_v57 = vmul.f32 %v3774_v46, %v3774_v46  ;;  %7851 = vmatprep.subr.bf16.mxu0 %v11793_v5 }
0x1413   : > { %3779 = vadd.xlane.f32.xlu1 %v3776_v57  ;;  %v4276_v57 = vld [vmem:[#allocation11 + $0xc8] sm:$0xf] }
0x149e   : > { %v3778_v4 = vpop.xlane.xlu0 %3777 }
0x149f   : > { %v3781_v59 = vmul.f32 0.0078125, %v3778_v4  ;;  %v4277_v4 = vld [vmem:[#allocation11 + $0xe8] sm:$0xf] }
0x14a0   : > { %v3780_v38 = vpop.xlane.xlu1 %3779 }
0x14a1   : > { %v3783_v37 = vadd.f32 1e-05, %v3781_v59  ;;  %v3782_v53 = vmul.f32 0.0078125, %v3780_v38  ;;  %v3844_v59 = vld [vmem:[#allocation11 + $0xc0] sm:$0xff]  ;;  %v7299_v38 = vcombine.low %v4276_v57, %v4277_v4 }
0x14a3   : > { %8516 = vrsqrt.f32 %v3783_v37  ;;  %v3784_v15 = vadd.f32 1e-05, %v3782_v53  ;;  %v3845_v37 = vld [vmem:[#allocation11 + $0xe0] sm:$0xff]  ;;  %v4278_v53 = vld [vmem:[#allocation11 + $0x108] sm:$0xf]  ;;  %7852 = vmatpush3.bf16.msra.mxu0 %v7299_v38 }
0x14a4   : > { %7853 = vmatprep.subr.bf16.mxu0 %v11793_v5 }
0x14a5   : > { %8518 = vrsqrt.f32 %v3784_v15  ;;  %v4279_v15 = vld [vmem:[#allocation11 + $0x128] sm:$0xf] }
0x14ad   : > { %v8517_v40 = vpop.eup %8516 }
0x14ae   : > { %v3787_v45 = vmul.f32 %v8517_v40, %v3773_v12  ;;  %v3842_v12 = vld [vmem:[#allocation11 + $0x80] sm:$0xff]  ;;  %v7287_v40 = vcombine.high %v3844_v59, %v3845_v37 }
0x14af   : > { %v8519_v17 = vpop.eup %8518  ;;  %v7284_v14 = vcombine.low %v3842_v12, %v3843_v29 }
0x14b0   : > { %v3793_v23 = vmul.f32 %v3792_v8, %v3787_v45  ;;  %v3788_v35 = vmul.f32 %v8519_v17, %v3774_v46  ;;  %v7285_v46 = vcombine.high %v3842_v12, %v3843_v29  ;;  %v3846_v45 = vld [vmem:[#allocation11 + $0x100] sm:$0xff] }
0x14b1   : > { %v3847_v17 = vld [vmem:[#allocation11 + $0x120] sm:$0xff] }
0x14b2   : > { %v10585_v13 = vadd.f32 %v7279_v50, %v3793_v23  ;;  %v3794_v34 = vmul.f32 %v3792_v8, %v3788_v35  ;;  %3938 = vmatprep.subr.bf16.mxu1 %v7285_v46  ;;  %v7286_v8 = vcombine.low %v3844_v59, %v3845_v37  ;;  %v7300_v23 = vcombine.low %v4278_v53, %v4279_v15  ;;  %v3848_v35 = vld [vmem:[#allocation11 + $0x140] sm:$0xff] }
0x14b3   : > { %3939 = vmatpush1.bf16.msra.mxu1 %v7284_v14  ;;  %v7288_v25 = vcombine.low %v3846_v45, %v3847_v17  ;;  %v873_v14 = vld [vmem:[#allocation16 + $0x8] sm:$0xff] }
0x14b4   : > { %3801 = vadd.xlane.f32.xlu0 %v10585_v13  ;;  %v10588_v1 = vadd.f32 %v7279_v50, %v3794_v34  ;;  %v7289_v50 = vcombine.high %v3846_v45, %v3847_v17  ;;  %3940 = vmatprep.subr.bf16.mxu1 %v7287_v40  ;;  %v3849_v34 = vld [vmem:[#allocation11 + $0x160] sm:$0xff]  ;;  %v3826_v57 = vrot.slane %v873_v14, %v9620_v21 }
0x14b5   : > { %v7291_v43 = vcombine.high %v3848_v35, %v3849_v34  ;;  %7854 = vmatpush3.bf16.msra.mxu0 %v7300_v23  ;;  %v7290_v16 = vcombine.low %v3848_v35, %v3849_v34  ;;  %v3832_v38 = vrot.slane %v873_v14, %v9624_v24  ;;  %v8617_v35 = vld [vmem:[%s9633_s14 + $0x8] sm:$0xff] }
0x14b6   : > { %3803 = vadd.xlane.f32.xlu1 %v10588_v1  ;;  %7855 = vmatprep.subr.bf16.mxu0 %v11793_v5 }
0x14b7   : > { %3941 = vmatpush1.bf16.msra.mxu1 %v7286_v8 }
0x14b8   : > { %3942 = vmatprep.subr.bf16.mxu1 %v7289_v50  ;;  %v8616_v50 = vld [vmem:[%s9633_s14] sm:$0xff] }
0x14b9   : > { %7856 = vmatpush3.bf16.msra.mxu0 %v7301_v6 }
0x14ba   : > { %7857 = vmatprep.subr.bf16.mxu0 %v11793_v5 }
0x14bb   : > { %3943 = vmatpush1.bf16.msra.mxu1 %v7288_v25 }
0x14bc   : > { %3944 = vmatprep.subr.bf16.mxu1 %v7291_v43 }
0x14bd   : > { %7858 = vmatpush3.bf16.msra.mxu0 %v7302_v18 }
0x14be   : > { %7859 = vmatprep.subr.bf16.mxu0 %v11793_v5 }
0x14bf   : > { %3945 = vmatpush1.bf16.msra.mxu1 %v7290_v16 }
0x14c0   : > { %3946 = vmatprep.subr.bf16.mxu1 %v7293_v56 }
0x1541   : > { %v3802_v44 = vpop.xlane.xlu0 %3801 }
0x1542   : > { %v3805_v32 = vmul.f32 0.0078125, %v3802_v44  ;;  %v4284_v44 = vld [vmem:[#allocation11 + $0x1c8] sm:$0xf] }
0x1543   : > { %v3804_v28 = vpop.xlane.xlu1 %3803 }
0x1544   : > { %v10594_v27 = vsub.f32 %v10585_v13, %v3805_v32  ;;  %v3806_v41 = vmul.f32 0.0078125, %v3804_v28  ;;  %v4285_v32 = vld [vmem:[#allocation11 + $0x1e8] sm:$0xf]  ;;  %v7292_v28 = vcombine.low %v3850_v55, %v3851_v7 }
0x1546   : > { %v10597_v9 = vsub.f32 %v10588_v1, %v3806_v41  ;;  %v3809_v51 = vmul.f32 %v10594_v27, %v10594_v27  ;;  %v7295_v41 = vcombine.high %v3852_v49, %v3853_v54  ;;  %3947 = vmatpush1.bf16.msra.mxu1 %v7292_v28 }
0x1548   : > { %3811 = vadd.xlane.f32.xlu0 %v3809_v51  ;;  %v3810_v10 = vmul.f32 %v10597_v9, %v10597_v9  ;;  %v7303_v51 = vcombine.low %v4284_v44, %v4285_v32  ;;  %3948 = vmatprep.subr.bf16.mxu1 %v7295_v41 }
0x154a   : > { %3813 = vadd.xlane.f32.xlu1 %v3810_v10  ;;  %v7294_v10 = vcombine.low %v3852_v49, %v3853_v54  ;;  %7860 = vmatpush3.bf16.msra.mxu0 %v7303_v51 }
0x154b   : > { %7889 = vmatprep.subr.bf16.mxu0 %v11793_v5 }
0x154c   : > { %3949 = vmatpush1.bf16.msra.mxu1 %v7294_v10  ;;  %v10662_v10 = vld [vmem:[%s11852_s15] sm:$0xff] }
0x154d   : > { %7865 = vmatprep.subr.bf16.mxu1 %v11793_v5 }
0x15d5   : > { %v3812_v48 = vpop.xlane.xlu0 %3811 }
0x15d6   : > { %v3815_v19 = vmul.f32 0.0078125, %v3812_v48 }
0x15d7   : > { %v3814_v0 = vpop.xlane.xlu1 %3813 }
0x15d8   : > { %v3817_v12 = vadd.f32 1e-05, %v3815_v19  ;;  %v3816_v29 = vmul.f32 0.0078125, %v3814_v0 }
0x15da   : > { %8520 = vrsqrt.f32 %v3817_v12  ;;  %v3818_v46 = vadd.f32 1e-05, %v3816_v29  ;;  %v10678_v12 = vld [vmem:[%s11852_s15 + $0x8] sm:$0xff] }
0x15dc   : > { %8522 = vrsqrt.f32 %v3818_v46  ;;  %v10685_v46 = vld [vmem:[%s11750_s7] sm:$0xff] }
0x15e4   : > { %v8521_v4 = vpop.eup %8520 }
0x15e5   : > { %v3821_v59 = vmul.f32 %v8521_v4, %v10594_v27  ;;  %v872_v27 = vld [vmem:[#allocation16] sm:$0xff]  ;;  %v10697_v4 = vld [vmem:[%s11750_s7 + $0x8] sm:$0xff] }
0x15e6   : > { %v8523_v37 = vpop.eup %8522  ;;  %v3980_v33 = vrot.slane %v872_v27, %v9643_v39  ;;  %v4126_v43 = vrot.slane %v872_v27, %v9620_v21 }
0x15e7   : > { %v3822_v53 = vmul.f32 %v8523_v37, %v10597_v9  ;;  %v3827_v15 = vmul.f32 %v3826_v57, %v3821_v59  ;;  %v4289_v9 = vrot.slane %v872_v27, %v9624_v24 }
0x15e9   : > { %v3828_v8 = vmul.f32 %v3826_v57, %v3822_v53  ;;  %v3833_v40 = vadd.f32 %v3832_v38, %v3827_v15 }
0x15eb   : > { %v3834_v45 = vadd.f32 %v3832_v38, %v3828_v8  ;;  %v3835_v23 = vadd.f32 %v8616_v50, %v3833_v40 }
0x15ed   : > { %v4269_v17 = vpack.c.bf16 %v3834_v45, %v3833_v40  ;;  %v3836_v34 = vadd.f32 %v8617_v35, %v3834_v45 }
0x15ef   : > { %7862 = vmatmul.mubr.bf16.vlgmr.msra.gmra.mrb[52].mxu0 %v4269_v17  ;;  %v3837_v47 = vpack.c.bf16 %v3836_v34, %v3835_v23 }
0x15f0   : > { %7891 = vmatprep.mubr.msk.bf16.mxu0 %vm9029_vm0, %v11793_v5 }
0x15f1   : > { %3967 = vmatmul.mubr.bf16.vlgmr.msra.gmra.mrb[48].mxu1 %v3837_v47 }
0x15f2   : > { %7867 = vmatprep.mubr.msk.bf16.mxu1 %vm9029_vm0, %v11793_v5 }
0x16c2   : > { %v4372_v25 = vpop.f32.mrb[52].mxu0 }
0x16c3   : > { %v7863_v6 = vpop.f32.mrb[53].mxu0  ;;  %v4373_v60 = vadd.f32 %v4372_v25, %v4289_v9 }
0x16c4   : > { %v3968_v55 = vpop.f32.mrb[48].mxu1  ;;  %v4375_v7 = vpop.f32.mrb[54].mxu0 }
0x16c5   : > { %v10623_v52 = vadd.f32 %v3980_v33, %v3968_v55  ;;  %v4376_v16 = vadd.f32 %v4375_v7, %v4289_v9  ;;  %v3970_v56 = vpop.f32.mrb[49].mxu1  ;;  %v7864_v18 = vpop.f32.mrb[55].mxu0 }
0x16c6   : > { %v10625_v49 = vadd.f32 %v4126_v43, %v3970_v56  ;;  %v3972_v54 = vpop.f32.mrb[50].mxu1 }
0x16c7   : > { %3985 = vrot.lane.b32.xlu1 %v10623_v52, %s11860_s11  ;;  %v3974_v24 = vpop.f32.mrb[51].mxu1  ;;  %v4703_v44 = vpack.c.bf16 %v4376_v16, %v4373_v60  ;;  %v10636_v28 = vpack.i.bf16 %v4376_v16, %v4373_v60  ;;  %v10640_v41 = vadd.f32 %v3980_v33, %v3972_v54  ;;  %v4011_v51 = vmul.f32 %v10623_v52, %v9695_v61 }
0x16c8   : > { %v10629_v32 = vadd.f32 %v4126_v43, %v3974_v24  ;;  %4131 = vrot.lane.b32.xlu0 %v10625_v49, %s11860_s11  ;;  %v4067_v48 = vmul.f32 %v10662_v10, %v10623_v52  ;;  %v4157_v0 = vmul.f32 %v10625_v49, %v9680_v58  ;;  %v4213_v14 = vmul.f32 %v10685_v46, %v10625_v49 }
0x16c9   : > { %7890 = vmatpush3.bf16.msra.mxu0 %v4703_v44  ;;  %v4012_v19 = vmul.f32 %v10640_v41, %v9716_v2  ;;  %v4068_v29 = vmul.f32 %v10678_v12, %v10640_v41  ;;  %v4059_v44 = vmul.f32 %v10623_v52, %v9787_v42 }
0x16ca   : > { %7901 = vmatprep.subr.bf16.mxu0 %v11793_v5  ;;  %v4158_v57 = vmul.f32 %v10629_v32, %v9701_v63  ;;  %v4214_v59 = vmul.f32 %v10697_v4, %v10629_v32 }
0x16cb   : > { %4133 = vrot.lane.b32.xlu1 %v10629_v32, %s11860_s11 }
0x16cc   : > { %4137 = vrot.lane.b32.xlu0 %v10625_v49, %s11861_s21 }
0x16cf   : > { %3987 = vrot.lane.b32.xlu1 %v10640_v41, %s11860_s11 }
0x16d0   : > { %3991 = vrot.lane.b32.xlu0 %v10623_v52, %s11861_s21 }
0x16d3   : > { %4139 = vrot.lane.b32.xlu1 %v10629_v32, %s11861_s21 }
0x16d4   : > { %4143 = vrot.lane.b32.xlu0 %v10625_v49, %s11862_s13 }
0x16d7   : > { %3993 = vrot.lane.b32.xlu1 %v10640_v41, %s11861_s21 }
0x16d8   : > { %3997 = vrot.lane.b32.xlu0 %v10623_v52, %s11862_s13 }
0x16db   : > { %4145 = vrot.lane.b32.xlu1 %v10629_v32, %s11862_s13 }
0x16dc   : > { %4027 = vrot.lane.b32.xlu0 %v4011_v51, %s11863_s18 }
0x16df   : > { %3999 = vrot.lane.b32.xlu1 %v10640_v41, %s11862_s13 }
0x16e0   : > { %4083 = vrot.lane.b32.xlu0 %v4067_v48, %s11864_s19 }
0x16e3   : > { %4029 = vrot.lane.b32.xlu1 %v4012_v19, %s11863_s18 }
0x16e4   : > { %4173 = vrot.lane.b32.xlu0 %v4157_v0, %s11863_s18  ;;  %v10771_v0 = vld [vmem:[%s11857_s28] sm:$0xff] }
0x16e7   : > { %4085 = vrot.lane.b32.xlu1 %v4068_v29, %s11864_s19  ;;  %v4003_v29 = vmul.f32 %v10771_v0, %v10623_v52 }
0x16e8   : > { %4229 = vrot.lane.b32.xlu0 %v4213_v14, %s11864_s19 }
0x16eb   : > { %4175 = vrot.lane.b32.xlu1 %v4158_v57, %s11863_s18  ;;  %v10778_v57 = vld [vmem:[%s11857_s28 + $0x8] sm:$0xff] }
0x16ef   : > { %4231 = vrot.lane.b32.xlu1 %v4214_v59, %s11864_s19  ;;  %v4004_v59 = vmul.f32 %v10778_v57, %v10640_v41 }
0x1739   : > { %v10702_v38 = vpop.permute.xlu1 %3985 }
0x173a   : > { %v10704_v37 = vpop.permute.xlu0 %4131  ;;  %v4013_v53 = vmul.f32 %v10702_v38, %v9695_v61  ;;  %v4069_v40 = vmul.f32 %v10662_v10, %v10702_v38 }
0x173b   : > { %v4159_v43 = vmul.f32 %v10704_v37, %v9680_v58  ;;  %v4215_v60 = vmul.f32 %v10685_v46, %v10704_v37 }
0x173c   : > { %4031 = vrot.lane.b32.xlu0 %v4013_v53, %s11863_s18  ;;  %v4060_v53 = vmul.f32 %v10640_v41, %v9807_v62 }
0x173d   : > { %v10709_v15 = vpop.permute.xlu1 %4133 }
0x173e   : > { %v10711_v8 = vpop.permute.xlu0 %4137  ;;  %v4160_v18 = vmul.f32 %v10709_v15, %v9701_v63  ;;  %v4216_v51 = vmul.f32 %v10697_v4, %v10709_v15 }
0x173f   : > { %v4161_v54 = vmul.f32 %v10711_v8, %v9680_v58  ;;  %v4217_v19 = vmul.f32 %v10685_v46, %v10711_v8 }
0x1740   : > { %4087 = vrot.lane.b32.xlu0 %v4069_v40, %s11864_s19 }
0x1741   : > { %v10716_v45 = vpop.permute.xlu1 %3987 }
0x1742   : > { %v10718_v17 = vpop.permute.xlu0 %3991  ;;  %v4014_v50 = vmul.f32 %v10716_v45, %v9716_v2  ;;  %v4070_v47 = vmul.f32 %v10678_v12, %v10716_v45 }
0x1743   : > { %v4015_v23 = vmul.f32 %v10718_v17, %v9695_v61  ;;  %v4071_v27 = vmul.f32 %v10662_v10, %v10718_v17 }
0x1744   : > { %4033 = vrot.lane.b32.xlu1 %v4014_v50, %s11863_s18 }
0x1745   : > { %4035 = vrot.lane.b32.xlu0 %v4015_v23, %s11863_s18  ;;  %v10726_v35 = vpop.permute.xlu1 %4139 }
0x1746   : > { %v10728_v34 = vpop.permute.xlu0 %4143 }
0x1748   : > { %4089 = vrot.lane.b32.xlu1 %v4070_v47, %s11864_s19  ;;  %v4162_v47 = vmul.f32 %v10726_v35, %v9701_v63 }
0x1749   : > { %4091 = vrot.lane.b32.xlu0 %v4071_v27, %s11864_s19  ;;  %v10736_v9 = vpop.permute.xlu1 %3993  ;;  %v4163_v27 = vmul.f32 %v10728_v34, %v9680_v58  ;;  %v4219_v58 = vmul.f32 %v10685_v46, %v10728_v34  ;;  %v4206_v46 = vmul.f32 %v10629_v32, %v9738_v22 }
0x174a   : > { %v10738_v33 = vpop.permute.xlu0 %3997  ;;  %v4016_v25 = vmul.f32 %v10736_v9, %v9716_v2  ;;  %v4072_v7 = vmul.f32 %v10678_v12, %v10736_v9 }
0x174c   : > { %4037 = vrot.lane.b32.xlu1 %v4016_v25, %s11863_s18 }
0x174d   : > { %4177 = vrot.lane.b32.xlu0 %v4159_v43, %s11863_s18  ;;  %v10746_v6 = vpop.permute.xlu1 %4145 }
0x174e   : > { %v4028_v55 = vpop.permute.xlu0 %4027 }
0x174f   : > { %v4051_v50 = vsub.f32 %v4003_v29, %v4028_v55  ;;  %v4205_v55 = vmul.f32 %v10625_v49, %v9736_v20 }
0x1750   : > { %4093 = vrot.lane.b32.xlu1 %v4072_v7, %s11864_s19 }
0x1751   : > { %4233 = vrot.lane.b32.xlu0 %v4215_v60, %s11864_s19  ;;  %v10754_v16 = vpop.permute.xlu1 %3999 }
0x1752   : > { %v4084_v56 = vpop.permute.xlu0 %4083 }
0x1753   : > { %v4107_v14 = vadd.f32 %v4084_v56, %v4059_v44  ;;  %v4218_v56 = vmul.f32 %v10697_v4, %v10726_v35  ;;  %v10810_v44 = vld [vmem:[%s11853_s6 + $0x8] sm:$0xff] }
0x1754   : > { %4179 = vrot.lane.b32.xlu1 %v4160_v18, %s11863_s18  ;;  %v10803_v18 = vld [vmem:[%s11853_s6] sm:$0xff] }
0x1755   : > { %4181 = vrot.lane.b32.xlu0 %v4161_v54, %s11863_s18  ;;  %v4030_v24 = vpop.permute.xlu1 %4029  ;;  %v4115_v25 = vsel %vm1206_vm1, %v4051_v50, %v4107_v14  ;;  %v4149_v54 = vmul.f32 %v10803_v18, %v10625_v49 }
0x1756   : > { %v4174_v48 = vpop.permute.xlu0 %4173  ;;  %v4052_v23 = vsub.f32 %v4004_v59, %v4030_v24  ;;  %v4164_v59 = vmul.f32 %v10746_v6, %v9701_v63  ;;  %v4073_v63 = vmul.f32 %v10662_v10, %v10738_v33 }
0x1757   : > { %v4197_v29 = vsub.f32 %v4149_v54, %v4174_v48  ;;  %v4220_v48 = vmul.f32 %v10697_v4, %v10746_v6  ;;  %v4074_v4 = vmul.f32 %v10678_v12, %v10754_v16 }
0x1758   : > { %4235 = vrot.lane.b32.xlu1 %v4216_v51, %s11864_s19  ;;  %v4150_v51 = vmul.f32 %v10810_v44, %v10629_v32 }
0x1759   : > { %4237 = vrot.lane.b32.xlu0 %v4217_v19, %s11864_s19  ;;  %v4086_v40 = vpop.permute.xlu1 %4085 }
0x175a   : > { %v4108_v52 = vadd.f32 %v4086_v40, %v4060_v53  ;;  %v4230_v41 = vpop.permute.xlu0 %4229  ;;  %v4017_v53 = vmul.f32 %v10738_v33, %v9695_v61 }
0x175b   : > { %v4253_v24 = vadd.f32 %v4230_v41, %v4205_v55 }
0x175c   : > { %v4116_v43 = vsel %vm1206_vm1, %v4052_v23, %v4108_v52  ;;  %4183 = vrot.lane.b32.xlu1 %v4162_v47, %s11863_s18  ;;  %v4018_v52 = vmul.f32 %v10754_v16, %v9716_v2 }
0x175d   : > { %v4415_v7 = vpack.c.bf16 %v4116_v43, %v4115_v25  ;;  %4185 = vrot.lane.b32.xlu0 %v4163_v27, %s11863_s18  ;;  %v4176_v60 = vpop.permute.xlu1 %4175  ;;  %v4261_v40 = vsel %vm1206_vm1, %v4197_v29, %v4253_v24  ;;  %v4151_v24 = vmul.f32 %v10803_v18, %v10704_v37 }
0x175e   : > { %v4198_v14 = vsub.f32 %v4150_v51, %v4176_v60 }
0x1760   : > { %4239 = vrot.lane.b32.xlu1 %v4218_v56, %s11864_s19 }
0x1761   : > { %4241 = vrot.lane.b32.xlu0 %v4219_v58, %s11864_s19  ;;  %v4232_v19 = vpop.permute.xlu1 %4231 }
0x1762   : > { %v4254_v49 = vadd.f32 %v4232_v19, %v4206_v46  ;;  %v4152_v46 = vmul.f32 %v10810_v44, %v10709_v15  ;;  %v4208_v19 = vmul.f32 %v10709_v15, %v9738_v22  ;;  %v4006_v15 = vmul.f32 %v10778_v57, %v10716_v45 }
0x1764   : > { %v4262_v50 = vsel %vm1206_vm1, %v4198_v14, %v4254_v49  ;;  %4187 = vrot.lane.b32.xlu1 %v4164_v59, %s11863_s18 }
0x1765   : > { %4039 = vrot.lane.b32.xlu0 %v4017_v53, %s11863_s18  ;;  %v4419_v32 = vpack.c.bf16 %v4262_v50, %v4261_v40  ;;  %v4062_v40 = vmul.f32 %v10716_v45, %v9807_v62  ;;  %v4210_v45 = vmul.f32 %v10726_v35, %v9738_v22 }
0x1767   : > { %v4427_v23 = vsel %vm1531_vm2, %v4419_v32, 0 }
0x1768   : > { %4243 = vrot.lane.b32.xlu1 %v4220_v48, %s11864_s19  ;;  %7866 = vmatpush3.bf16.xpose.msra.mxu1 %v4427_v23  ;;  %v4061_v23 = vmul.f32 %v10702_v38, %v9787_v42 }
0x1769   : > { %4095 = vrot.lane.b32.xlu0 %v4073_v63, %s11864_s19  ;;  %7871 = vmatprep.subr.bf16.mxu1 %v11793_v5 }
0x176c   : > { %4041 = vrot.lane.b32.xlu1 %v4018_v52, %s11863_s18  ;;  %v4209_v52 = vmul.f32 %v10711_v8, %v9736_v20 }
0x176f   : > { %7868 = vmatmul.mubr.msk.bf16.vlgmr.msra.gmra.mrb[52].mxu1 %vm1531_vm2, %v4415_v7  ;;  %v4207_v7 = vmul.f32 %v10704_v37, %v9736_v20 }
0x1770   : > { %4097 = vrot.lane.b32.xlu1 %v4074_v4, %s11864_s19  ;;  %7873 = vmatprep.mubr.msk.bf16.mxu1 %vm9029_vm0, %v11793_v5 }
0x17ae   : > { %v4032_v10 = vpop.permute.xlu0 %4031 }
0x17b2   : > { %v4088_v47 = vpop.permute.xlu0 %4087 }
0x17b6   : > { %v4034_v27 = vpop.permute.xlu1 %4033 }
0x17b7   : > { %v10843_v25 = vpop.permute.xlu0 %4035 }
0x17ba   : > { %v4090_v43 = vpop.permute.xlu1 %4089 }
0x17bb   : > { %v4092_v41 = vpop.permute.xlu0 %4091  ;;  %v4110_v63 = vadd.f32 %v4090_v43, %v4062_v40 }
0x17be   : > { %v10845_v60 = vpop.permute.xlu1 %4037 }
0x17bf   : > { %v4178_v55 = vpop.permute.xlu0 %4177 }
0x17c0   : > { %v4199_v14 = vsub.f32 %v4151_v24, %v4178_v55  ;;  %v4005_v55 = vmul.f32 %v10771_v0, %v10702_v38  ;;  %v4109_v24 = vadd.f32 %v4088_v47, %v4061_v23  ;;  %v4064_v47 = vmul.f32 %v10736_v9, %v9807_v62 }
0x17c1   : > { %v4155_v23 = vmul.f32 %v10803_v18, %v10728_v34 }
0x17c2   : > { %v4094_v56 = vpop.permute.xlu1 %4093  ;;  %v4053_v43 = vsub.f32 %v4005_v55, %v4032_v10 }
0x17c3   : > { %v4234_v58 = vpop.permute.xlu0 %4233 }
0x17c4   : > { %v4255_v51 = vadd.f32 %v4234_v58, %v4207_v7  ;;  %v4153_v58 = vmul.f32 %v10803_v18, %v10711_v8 }
0x17c6   : > { %v4180_v12 = vpop.permute.xlu1 %4179  ;;  %v4263_v50 = vsel %vm1206_vm1, %v4199_v14, %v4255_v51  ;;  %v4054_v51 = vsub.f32 %v4006_v15, %v4034_v27  ;;  %v4156_v15 = vmul.f32 %v10810_v44, %v10746_v6 }
0x17c7   : > { %v4182_v54 = vpop.permute.xlu0 %4181  ;;  %v4200_v49 = vsub.f32 %v4152_v46, %v4180_v12  ;;  %v4154_v12 = vmul.f32 %v10810_v44, %v10726_v35  ;;  %v4007_v35 = vmul.f32 %v10771_v0, %v10718_v17 }
0x17c8   : > { %v4118_v38 = vsel %vm1206_vm1, %v4054_v51, %v4110_v63 }
0x17ca   : > { %v4236_v29 = vpop.permute.xlu1 %4235 }
0x17cb   : > { %v4256_v59 = vadd.f32 %v4236_v29, %v4208_v19  ;;  %v4238_v53 = vpop.permute.xlu0 %4237  ;;  %v4201_v29 = vsub.f32 %v4153_v58, %v4182_v54  ;;  %v4063_v54 = vmul.f32 %v10718_v17, %v9787_v42  ;;  %v4212_v17 = vmul.f32 %v10746_v6, %v9738_v22 }
0x17cc   : > { %v4257_v46 = vadd.f32 %v4238_v53, %v4209_v52 }
0x17cd   : > { %v4264_v32 = vsel %vm1206_vm1, %v4200_v49, %v4256_v59  ;;  %v4117_v59 = vsel %vm1206_vm1, %v4053_v43, %v4109_v24  ;;  %v4111_v55 = vadd.f32 %v4092_v41, %v4063_v54  ;;  %v4010_v43 = vmul.f32 %v10778_v57, %v10754_v16 }
0x17ce   : > { %v4184_v37 = vpop.permute.xlu1 %4183  ;;  %v4420_v48 = vpack.c.bf16 %v4264_v32, %v4263_v50  ;;  %v4265_v27 = vsel %vm1206_vm1, %v4201_v29, %v4257_v46  ;;  %v4416_v10 = vpack.c.bf16 %v4118_v38, %v4117_v59  ;;  %v4008_v32 = vmul.f32 %v10778_v57, %v10736_v9 }
0x17cf   : > { %v4186_v4 = vpop.permute.xlu0 %4185  ;;  %v4202_v8 = vsub.f32 %v4154_v12, %v4184_v37  ;;  %v4112_v37 = vadd.f32 %v4094_v56, %v4064_v47  ;;  %v4009_v46 = vmul.f32 %v10771_v0, %v10738_v33 }
0x17d0   : > { %v4474_v7 = vsel %vm1531_vm2, %v4420_v48, 0  ;;  %v4211_v48 = vmul.f32 %v10728_v34, %v9736_v20  ;;  %v4056_v9 = vsub.f32 %v4008_v32, %v10845_v60  ;;  %v4055_v20 = vsub.f32 %v4007_v35, %v10843_v25 }
0x17d1   : > { %7872 = vmatpush3.bf16.xpose.msra.mxu1 %v4474_v7  ;;  %v4203_v44 = vsub.f32 %v4155_v23, %v4186_v4  ;;  %v4065_v25 = vmul.f32 %v10738_v33, %v9787_v42 }
0x17d2   : > { %v4240_v19 = vpop.permute.xlu1 %4239  ;;  %7877 = vmatprep.subr.bf16.mxu1 %v11793_v5  ;;  %v4120_v18 = vsel %vm1206_vm1, %v4056_v9, %v4112_v37  ;;  %v4119_v22 = vsel %vm1206_vm1, %v4055_v20, %v4111_v55 }
0x17d3   : > { %v4258_v14 = vadd.f32 %v4240_v19, %v4210_v45  ;;  %v4242_v49 = vpop.permute.xlu0 %4241  ;;  %v4417_v60 = vpack.c.bf16 %v4120_v18, %v4119_v22  ;;  %v4066_v19 = vmul.f32 %v10754_v16, %v9807_v62 }
0x17d4   : > { %v4259_v56 = vadd.f32 %v4242_v49, %v4211_v48 }
0x17d5   : > { %v4266_v53 = vsel %vm1206_vm1, %v4202_v8, %v4258_v14 }
0x17d6   : > { %v4188_v40 = vpop.permute.xlu1 %4187  ;;  %v4421_v50 = vpack.c.bf16 %v4266_v53, %v4265_v27  ;;  %v4267_v6 = vsel %vm1206_vm1, %v4203_v44, %v4259_v56 }
0x17d7   : > { %v4040_v63 = vpop.permute.xlu0 %4039  ;;  %v4204_v58 = vsub.f32 %v4156_v15, %v4188_v40 }
0x17d8   : > { %7874 = vmatmul.mubr.msk.bf16.vlgmr.msra.gmra.mrb[56].mxu1 %vm1531_vm2, %v4416_v10  ;;  %v4521_v52 = vsel %vm1531_vm2, %v4421_v50, 0  ;;  %v4057_v29 = vsub.f32 %v4009_v46, %v4040_v63 }
0x17d9   : > { %7878 = vmatpush3.bf16.xpose.msra.mxu1 %v4521_v52  ;;  %7879 = vmatprep.mubr.msk.bf16.mxu1 %vm9029_vm0, %v11793_v5 }
0x17da   : > { %v4244_v34 = vpop.permute.xlu1 %4243  ;;  %7883 = vmatprep.subr.bf16.mxu1 %v11793_v5 }
0x17db   : > { %v4260_v12 = vadd.f32 %v4244_v34, %v4212_v17  ;;  %v4096_v7 = vpop.permute.xlu0 %4095 }
0x17dc   : > { %v4113_v45 = vadd.f32 %v4096_v7, %v4065_v25 }
0x17dd   : > { %v4268_v41 = vsel %vm1206_vm1, %v4204_v58, %v4260_v12 }
0x17de   : > { %v4042_v24 = vpop.permute.xlu1 %4041  ;;  %v4422_v51 = vpack.c.bf16 %v4268_v41, %v4267_v6  ;;  %v4121_v8 = vsel %vm1206_vm1, %v4057_v29, %v4113_v45 }
0x17df   : > { %v4058_v33 = vsub.f32 %v4010_v43, %v4042_v24 }
0x17e0   : > { %7880 = vmatmul.mubr.msk.bf16.vlgmr.msra.gmra.mrb[60].mxu1 %vm1531_vm2, %v4417_v60  ;;  %v4568_v4 = vsel %vm1531_vm2, %v4422_v51, 0 }
0x17e1   : > { %7884 = vmatpush3.bf16.xpose.msra.mxu1 %v4568_v4  ;;  %7885 = vmatprep.mubr.msk.bf16.mxu1 %vm9029_vm0, %v11793_v5 }
0x17e2   : > { %v4098_v38 = vpop.permute.xlu1 %4097  ;;  %7895 = vmatprep.subr.bf16.mxu1 %v11793_v5 }
0x17e3   : > { %v4114_v0 = vadd.f32 %v4098_v38, %v4066_v19 }
0x17e5   : > { %v4122_v14 = vsel %vm1206_vm1, %v4058_v33, %v4114_v0 }
0x17e6   : > { %v4418_v49 = vpack.c.bf16 %v4122_v14, %v4121_v8 }
0x17e8   : > { %7886 = vmatmul.mubr.msk.bf16.vlgmr.msra.gmra.mrb[64].mxu1 %vm1531_vm2, %v4418_v49 }
0x17e9   : > { %7897 = vmatprep.mubr.msk.bf16.mxu1 %vm9029_vm0, %v11793_v5 }
0x1842   : > { %v4463_v16 = vpop.f32.mrb[52].mxu1 }
0x1843   : > { %v7869_v57 = vpop.f32.mrb[53].mxu1  ;;  %v4611_v59 = vsel %vm1206_vm1, %v4463_v16, -inf }
0x1844   : > { %4612 = vmax.xlane.f32.xlu0 %v4611_v59  ;;  %v4466_v47 = vpop.f32.mrb[54].mxu1 }
0x1845   : > { %v7870_v27 = vpop.f32.mrb[55].mxu1  ;;  %v4614_v53 = vsel %vm1206_vm1, %v4466_v47, -inf }
0x1846   : > { %4615 = vmax.xlane.f32.xlu1 %v4614_v53 }
0x18ab   : > { %v4510_v35 = vpop.f32.mrb[56].mxu1 }
0x18ac   : > { %v7875_v10 = vpop.f32.mrb[57].mxu1  ;;  %v4617_v40 = vsel %vm1206_vm1, %v4510_v35, -inf }
0x18ad   : > { %4618 = vmax.xlane.f32.xlu0 %v4617_v40  ;;  %v4513_v50 = vpop.f32.mrb[58].mxu1 }
0x18ae   : > { %v7876_v54 = vpop.f32.mrb[59].mxu1  ;;  %v4620_v32 = vsel %vm1206_vm1, %v4513_v50, -inf }
0x18b1   : > { %4621 = vmax.xlane.f32.xlu0 %v4620_v32 }
0x18b3   : > { %v4557_v37 = vpop.f32.mrb[60].mxu1 }
0x18b4   : > { %v7881_v48 = vpop.f32.mrb[61].mxu1  ;;  %v4623_v23 = vsel %vm1206_vm1, %v4557_v37, -inf }
0x18b5   : > { %4624 = vmax.xlane.f32.xlu0 %v4623_v23  ;;  %v4560_v15 = vpop.f32.mrb[62].mxu1 }
0x18b6   : > { %v7882_v63 = vpop.f32.mrb[63].mxu1  ;;  %v4626_v52 = vsel %vm1206_vm1, %v4560_v15, -inf }
0x18b7   : > { %4627 = vmax.xlane.f32.xlu1 %v4626_v52 }
0x18bb   : > { %v4604_v17 = vpop.f32.mrb[64].mxu1 }
0x18bc   : > { %v7887_v55 = vpop.f32.mrb[65].mxu1  ;;  %v4629_v9 = vsel %vm1206_vm1, %v4604_v17, -inf }
0x18bd   : > { %4630 = vmax.xlane.f32.xlu0 %v4629_v9  ;;  %v4607_v56 = vpop.f32.mrb[66].mxu1 }
0x18be   : > { %v7888_v20 = vpop.f32.mrb[67].mxu1  ;;  %v4632_v34 = vsel %vm1206_vm1, %v4607_v56, -inf }
0x18bf   : > { %4633 = vmax.xlane.f32.xlu1 %v4632_v34 }
0x18d1   : > { %v4613_v18 = vpop.xlane.xlu0 %4612 }
0x18d2   : > { %v4635_v44 = vsub.f32 %v4463_v16, %v4613_v18 }
0x18d3   : > { %v4616_v58 = vpop.xlane.xlu1 %4615 }
0x18d4   : > { %v4643_v12 = vmul.f32 1.442695, %v4635_v44  ;;  %v4636_v22 = vsub.f32 %v4466_v47, %v4616_v58 }
0x18d6   : > { %8524 = vpow2.f32 %v4643_v12  ;;  %v4645_v6 = vmul.f32 1.442695, %v4636_v22 }
0x18d8   : > { %8526 = vpow2.f32 %v4645_v6 }
0x18e0   : > { %v8525_v41 = vpop.eup %8524 }
0x18e1   : > { %v4659_v60 = vsel %vm1206_vm1, %v8525_v41, 0.0 }
0x18e2   : > { %v8527_v7 = vpop.eup %8526  ;;  %4660 = vadd.xlane.f32.xlu0 %v4659_v60 }
0x18e3   : > { %v4662_v24 = vsel %vm1206_vm1, %v8527_v7, 0.0 }
0x18e4   : > { %4663 = vadd.xlane.f32.xlu1 %v4662_v24 }
0x193a   : > { %v4619_v51 = vpop.xlane.xlu0 %4618 }
0x193b   : > { %v4637_v25 = vsub.f32 %v4510_v35, %v4619_v51 }
0x193d   : > { %v4647_v46 = vmul.f32 1.442695, %v4637_v25 }
0x193e   : > { %v4622_v4 = vpop.xlane.xlu0 %4621 }
0x193f   : > { %8528 = vpow2.f32 %v4647_v46  ;;  %v4638_v45 = vsub.f32 %v4513_v50, %v4622_v4 }
0x1941   : > { %v4649_v43 = vmul.f32 1.442695, %v4638_v45 }
0x1942   : > { %v4625_v19 = vpop.xlane.xlu0 %4624 }
0x1943   : > { %8530 = vpow2.f32 %v4649_v43  ;;  %v4639_v38 = vsub.f32 %v4557_v37, %v4625_v19 }
0x1944   : > { %v4628_v29 = vpop.xlane.xlu1 %4627 }
0x1945   : > { %v4651_v33 = vmul.f32 1.442695, %v4639_v38  ;;  %v4640_v0 = vsub.f32 %v4560_v15, %v4628_v29 }
0x1947   : > { %8532 = vpow2.f32 %v4651_v33  ;;  %v4653_v8 = vmul.f32 1.442695, %v4640_v0 }
0x1949   : > { %v10934_v14 = vpop.eup %8528  ;;  %8534 = vpow2.f32 %v4653_v8 }
0x194a   : > { %v4631_v49 = vpop.xlane.xlu0 %4630  ;;  %v4665_v16 = vsel %vm1206_vm1, %v10934_v14, 0.0 }
0x194b   : > { %v4641_v57 = vsub.f32 %v4604_v17, %v4631_v49  ;;  %4666 = vadd.xlane.f32.xlu0 %v4665_v16 }
0x194c   : > { %v4634_v32 = vpop.xlane.xlu1 %4633 }
0x194d   : > { %v8531_v59 = vpop.eup %8530  ;;  %v4655_v47 = vmul.f32 1.442695, %v4641_v57  ;;  %v4642_v23 = vsub.f32 %v4607_v56, %v4634_v32 }
0x194e   : > { %v4668_v27 = vsel %vm1206_vm1, %v8531_v59, 0.0 }
0x194f   : > { %8536 = vpow2.f32 %v4655_v47  ;;  %4669 = vadd.xlane.f32.xlu1 %v4668_v27  ;;  %v4657_v15 = vmul.f32 1.442695, %v4642_v23  ;;  %v4401_v23 = vld [vmem:[#allocation11 + $0x4c] sm:$0xf] }
0x1951   : > { %v8533_v53 = vpop.eup %8532 }
0x1952   : > { %v4671_v35 = vsel %vm1206_vm1, %v8533_v53, 0.0 }
0x1953   : > { %v8535_v10 = vpop.eup %8534  ;;  %4672 = vadd.xlane.f32.xlu0 %v4671_v35 }
0x1954   : > { %v4674_v40 = vsel %vm1206_vm1, %v8535_v10, 0.0 }
0x1955   : > { %4675 = vadd.xlane.f32.xlu1 %v4674_v40 }
0x1959   : > { %v10941_v50 = vpop.eup %8536 }
0x195a   : > { %v4677_v54 = vsel %vm1206_vm1, %v10941_v50, 0.0 }
0x195b   : > { %4678 = vadd.xlane.f32.xlu0 %v4677_v54 }
0x1966   : > { %8291 = vrot.lane.b32.xlu1 %v10636_v28, %s11861_s21 }
0x196f   : > { %v4661_v37 = vpop.xlane.xlu0 %4660 }
0x1970   : > { %8538 = vrcp.f32 %v4661_v37  ;;  %v4399_v37 = vld [vmem:[#allocation11 + $0xc] sm:$0xf] }
0x1971   : > { %8286 = vrot.lane.b32.xlu0 %v10636_v28, %s11860_s11  ;;  %v4664_v48 = vpop.xlane.xlu1 %4663 }
0x1972   : > { %8540 = vrcp.f32 %v4664_v48  ;;  %v4400_v48 = vld [vmem:[#allocation11 + $0x2c] sm:$0xf] }
0x1973   : > { %8542 = vpow2.f32 %v4657_v15  ;;  %v7312_v15 = vcombine.low %v4399_v37, %v4400_v48 }
0x197a   : > { %v8539_v63 = vpop.eup %8538 }
0x197b   : > { %v4684_v17 = vmul.f32 %v8539_v63, %v8525_v41  ;;  %v4402_v63 = vld [vmem:[#allocation11 + $0x6c] sm:$0xf] }
0x197c   : > { %v8541_v52 = vpop.eup %8540 }
0x197d   : > { %v4686_v55 = vmul.f32 %v8541_v52, %v8527_v7  ;;  %v8543_v20 = vpop.eup %8542 }
0x197e   : > { %v4680_v34 = vsel %vm1206_vm1, %v8543_v20, 0.0 }
0x197f   : > { %v4699_v9 = vpack.c.bf16 %v4686_v55, %v4684_v17  ;;  %v4403_v17 = vld [vmem:[#allocation11 + $0x8c] sm:$0xf] }
0x1980   : > { %v4404_v55 = vld [vmem:[#allocation11 + $0xac] sm:$0xf] }
0x1981   : > { %7892 = vmatmul.mubr.msk.bf16.vlgmr.msra.gmra.mrb[56].mxu0 %vm1206_vm1, %v4699_v9 }
0x1982   : > { %7903 = vmatprep.mubr.msk.bf16.mxu0 %vm9029_vm0, %v11793_v5 }
0x198a   : > { %4681 = vadd.xlane.f32.xlu1 %v4680_v34 }
0x199b   : > { %8296 = vrot.lane.b32.xlu1 %v10636_v28, %s11862_s13 }
0x19d8   : > { %v4667_v56 = vpop.xlane.xlu0 %4666 }
0x19dc   : > { %v4670_v18 = vpop.xlane.xlu1 %4669 }
0x19dd   : > { %8544 = vrcp.f32 %v4670_v18 }
0x19e0   : > { %v4673_v44 = vpop.xlane.xlu0 %4672 }
0x19e1   : > { %8546 = vrcp.f32 %v4673_v44 }
0x19e2   : > { %8548 = vrcp.f32 %v4667_v56  ;;  %v4676_v58 = vpop.xlane.xlu1 %4675 }
0x19e3   : > { %8550 = vrcp.f32 %v4676_v58  ;;  %v7314_v58 = vcombine.low %v4403_v17, %v4404_v55 }
0x19e6   : > { %v8292_v12 = vpop.permute.xlu1 %8291 }
0x19e7   : > { %v8294_v22 = vunpack.i.h.bf16 %v8292_v12  ;;  %v8293_v6 = vunpack.i.l.bf16 %v8292_v12  ;;  %v8545_v7 = vpop.eup %8544 }
0x19e8   : > { %v4679_v41 = vpop.xlane.xlu0 %4678  ;;  %v4690_v45 = vmul.f32 %v8545_v7, %v8531_v59 }
0x19e9   : > { %v4705_v60 = vpack.c.bf16 %v8294_v22, %v8293_v6  ;;  %8552 = vrcp.f32 %v4679_v41  ;;  %v4405_v22 = vld [vmem:[#allocation11 + $0xcc] sm:$0xf] }
0x19ea   : > { %v4406_v6 = vld [vmem:[#allocation11 + $0xec] sm:$0xf] }
0x19eb   : > { %v8547_v24 = vpop.eup %8546  ;;  %7902 = vmatpush3.bf16.msra.mxu0 %v4705_v60  ;;  %v7315_v7 = vcombine.low %v4405_v22, %v4406_v6  ;;  %v10992_v22 = vld [vmem:[%s9507_s20] sm:$0xff]  ;;  %v10995_v6 = vld [vmem:[%s9507_s20 + $0x8] sm:$0xff] }
0x19ec   : > { %v8549_v51 = vpop.eup %8548  ;;  %v8287_v25 = vpop.permute.xlu0 %8286  ;;  %7913 = vmatprep.subr.bf16.mxu0 %v11793_v5  ;;  %v4692_v43 = vmul.f32 %v8547_v24, %v8533_v53  ;;  %v4407_v24 = vld [vmem:[#allocation11 + $0x10c] sm:$0xf] }
0x19ed   : > { %v8551_v28 = vpop.eup %8550  ;;  %v8289_v46 = vunpack.i.h.bf16 %v8287_v25  ;;  %v8288_v4 = vunpack.i.l.bf16 %v8287_v25  ;;  %v4688_v29 = vmul.f32 %v8549_v51, %v10934_v14  ;;  %v4408_v51 = vld [vmem:[#allocation11 + $0x12c] sm:$0xf] }
0x19ee   : > { %v4694_v19 = vmul.f32 %v8551_v28, %v8535_v10  ;;  %v7316_v25 = vcombine.low %v4407_v24, %v4408_v51  ;;  %v4409_v28 = vld [vmem:[#allocation11 + $0x14c] sm:$0xf] }
0x19ef   : > { %v4704_v38 = vpack.c.bf16 %v8289_v46, %v8288_v4  ;;  %v4700_v0 = vpack.c.bf16 %v4690_v45, %v4688_v29  ;;  %v4410_v46 = vld [vmem:[#allocation11 + $0x16c] sm:$0xf] }
0x19f0   : > { %v4701_v33 = vpack.c.bf16 %v4694_v19, %v4692_v43  ;;  %v7317_v4 = vcombine.low %v4409_v28, %v4410_v46  ;;  %v4411_v45 = vld [vmem:[#allocation11 + $0x18c] sm:$0xf]  ;;  %v5170_v28 = vld [vmem:[#allocation11 + $0x134] sm:$0xf] }
0x19f1   : > { %7896 = vmatpush3.bf16.msra.mxu1 %v4704_v38  ;;  %v4412_v43 = vld [vmem:[#allocation11 + $0x1ac] sm:$0xf] }
0x19f2   : > { %7904 = vmatmul.mubr.msk.bf16.vlgmr.msra.gmra.mrb[60].mxu0 %vm1206_vm1, %v4701_v33  ;;  %7907 = vmatprep.subr.bf16.mxu1 %v11793_v5  ;;  %v7318_v19 = vcombine.low %v4411_v45, %v4412_v43  ;;  %v4413_v38 = vld [vmem:[#allocation11 + $0x1cc] sm:$0xf]  ;;  %v5171_v45 = vld [vmem:[#allocation11 + $0x154] sm:$0xf] }
0x19f3   : > { %7929 = vmatprep.mubr.msk.bf16.mxu0 %vm9029_vm0, %v11793_v5  ;;  %v8553_v59 = vpop.eup %8552  ;;  %7914 = vmatpush3.bf16.msra.mxu0 %v7312_v15  ;;  %v4414_v29 = vld [vmem:[#allocation11 + $0x1ec] sm:$0xf]  ;;  %v5172_v43 = vld [vmem:[#allocation11 + $0x174] sm:$0xf] }
0x19f4   : > { %7898 = vmatmul.mubr.msk.bf16.vlgmr.msra.gmra.mrb[68].mxu1 %vm1206_vm1, %v4700_v0  ;;  %v4696_v27 = vmul.f32 %v8553_v59, %v10941_v50  ;;  %v7313_v50 = vcombine.low %v4401_v23, %v4402_v63  ;;  %7915 = vmatprep.subr.bf16.mxu0 %v11793_v5  ;;  %v7319_v33 = vcombine.low %v4413_v38, %v4414_v29  ;;  %v5173_v38 = vld [vmem:[#allocation11 + $0x194] sm:$0xf] }
0x19f5   : > { %7909 = vmatprep.mubr.msk.bf16.mxu1 %vm9029_vm0, %v11793_v5  ;;  %v5174_v29 = vld [vmem:[#allocation11 + $0x1b4] sm:$0xf] }
0x19f7   : > { %7916 = vmatpush3.bf16.msra.mxu0 %v7313_v50 }
0x19f8   : > { %7917 = vmatprep.subr.bf16.mxu0 %v11793_v5 }
0x19fb   : > { %7918 = vmatpush3.bf16.msra.mxu0 %v7314_v58  ;;  %v5167_v58 = vld [vmem:[#allocation11 + $0xd4] sm:$0xf] }
0x19fc   : > { %7919 = vmatprep.subr.bf16.mxu0 %v11793_v5 }
0x19ff   : > { %7920 = vmatpush3.bf16.msra.mxu0 %v7315_v7 }
0x1a00   : > { %7921 = vmatprep.subr.bf16.mxu0 %v11793_v5 }
0x1a03   : > { %7922 = vmatpush3.bf16.msra.mxu0 %v7316_v25  ;;  %v5169_v25 = vld [vmem:[#allocation11 + $0x114] sm:$0xf] }
0x1a04   : > { %7923 = vmatprep.subr.bf16.mxu0 %v11793_v5 }
0x1a07   : > { %7924 = vmatpush3.bf16.msra.mxu0 %v7317_v4  ;;  %v7332_v4 = vcombine.low %v5169_v25, %v5170_v28 }
0x1a08   : > { %7925 = vmatprep.subr.bf16.mxu0 %v11793_v5 }
0x1a0b   : > { %7926 = vmatpush3.bf16.msra.mxu0 %v7318_v19  ;;  %v7333_v19 = vcombine.low %v5171_v45, %v5172_v43 }
0x1a0c   : > { %7927 = vmatprep.subr.bf16.mxu0 %v11793_v5 }
0x1a0f   : > { %7928 = vmatpush3.bf16.msra.mxu0 %v7319_v33  ;;  %v7334_v33 = vcombine.low %v5173_v38, %v5174_v29  ;;  %v11096_v38 = vld [vmem:[%s11866_s17 + $0x18] sm:$0xff] }
0x1a17   : > { %v4682_v8 = vpop.xlane.xlu1 %4681 }
0x1a18   : > { %8554 = vrcp.f32 %v4682_v8 }
0x1a1b   : > { %v8297_v49 = vpop.permute.xlu1 %8296 }
0x1a1c   : > { %v8299_v14 = vunpack.i.h.bf16 %v8297_v49  ;;  %v8298_v16 = vunpack.i.l.bf16 %v8297_v49 }
0x1a1e   : > { %v4706_v57 = vpack.c.bf16 %v8299_v14, %v8298_v16 }
0x1a20   : > { %7908 = vmatpush3.bf16.msra.mxu1 %v4706_v57 }
0x1a21   : > { %7933 = vmatprep.subr.bf16.mxu1 %v11793_v5 }
0x1a22   : > { %v8555_v47 = vpop.eup %8554 }
0x1a23   : > { %v4698_v53 = vmul.f32 %v8555_v47, %v8543_v20 }
0x1a25   : > { %v4702_v35 = vpack.c.bf16 %v4698_v53, %v4696_v27 }
0x1a27   : > { %7910 = vmatmul.mubr.msk.bf16.vlgmr.msra.gmra.mrb[72].mxu1 %vm1206_vm1, %v4702_v35 }
0x1a28   : > { %7949 = vmatprep.mubr.msk.bf16.mxu1 %vm9029_vm0, %v11793_v5 }
0x1a54   : > { %v10969_v10 = vpop.f32.mrb[56].mxu0 }
0x1a55   : > { %v7893_v40 = vpop.f32.mrb[57].mxu0 }
0x1a56   : > { %v10971_v54 = vpop.f32.mrb[58].mxu0 }
0x1a57   : > { %v7894_v32 = vpop.f32.mrb[59].mxu0 }
0x1ac5   : > { %v4832_v52 = vpop.f32.mrb[60].mxu0 }
0x1ac6   : > { %v7905_v9 = vpop.f32.mrb[61].mxu0 }
0x1ac7   : > { %v4788_v20 = vpop.f32.mrb[68].mxu1  ;;  %v4835_v34 = vpop.f32.mrb[62].mxu0  ;;  %v5163_v9 = vld [vmem:[#allocation11 + $0x54] sm:$0xf] }
0x1ac8   : > { %v8305_v56 = vpack.i.bf16 %v4835_v34, %v4832_v52  ;;  %v7899_v18 = vpop.f32.mrb[69].mxu1  ;;  %v7906_v44 = vpop.f32.mrb[63].mxu0 }
0x1ac9   : > { %v4791_v12 = vpop.f32.mrb[70].mxu1  ;;  %v5166_v18 = vld [vmem:[#allocation11 + $0xb4] sm:$0xf] }
0x1aca   : > { %v8300_v41 = vpack.i.bf16 %v4791_v12, %v4788_v20  ;;  %8306 = vrot.lane.b32.xlu0 %v8305_v56, %s11861_s21  ;;  %v7900_v60 = vpop.f32.mrb[71].mxu1  ;;  %v5164_v20 = vld [vmem:[#allocation11 + $0x74] sm:$0xf] }
0x1acb   : > { %v7329_v34 = vcombine.low %v5163_v9, %v5164_v20  ;;  %v5165_v56 = vld [vmem:[#allocation11 + $0x94] sm:$0xf] }
0x1acc   : > { %8301 = vrot.lane.b32.xlu1 %v8300_v41, %s11862_s13  ;;  %v7330_v44 = vcombine.low %v5165_v56, %v5166_v18  ;;  %v5168_v12 = vld [vmem:[#allocation11 + $0xf4] sm:$0xf]  ;;  %v849_v41 = vld [vmem:[%s9514_s26] sm:$0xff] }
0x1acd   : > { %v850_v60 = vld [vmem:[%s9514_s26 + $0x8] sm:$0xff]  ;;  %v5155_v7 = vadd.f32 %v849_v41, %v10992_v22  ;;  %v7331_v24 = vcombine.low %v5167_v58, %v5168_v12 }
0x1ace   : > { %v5156_v51 = vadd.f32 %v850_v60, %v10995_v6 }
0x1ad0   : > { %v5159_v46 = vpack.c.bf16 %v5156_v51, %v5155_v7  ;;  %v11072_v51 = vld [vmem:[%s11866_s17 + $0x8] sm:$0xff] }
0x1afa   : > { %v4876_v0 = vpop.f32.mrb[72].mxu1 }
0x1afb   : > { %v7911_v8 = vpop.f32.mrb[73].mxu1 }
0x1afc   : > { %v4879_v49 = vpop.f32.mrb[74].mxu1  ;;  %v5176_v8 = vld [vmem:[#allocation11 + $0x1f4] sm:$0xf] }
0x1afd   : > { %v8310_v14 = vpack.i.bf16 %v4879_v49, %v4876_v0  ;;  %v7912_v16 = vpop.f32.mrb[75].mxu1  ;;  %v5175_v0 = vld [vmem:[#allocation11 + $0x1d4] sm:$0xf] }
0x1afe   : > { %v11002_v49 = vld [vmem:[%s9507_s20 + $0x10] sm:$0xff] }
0x1aff   : > { %8311 = vrot.lane.b32.xlu1 %v8310_v14, %s11860_s11  ;;  %v11005_v14 = vld [vmem:[%s9507_s20 + $0x18] sm:$0xff]  ;;  %v851_v16 = vld [vmem:[%s9514_s26 + $0x10] sm:$0xff] }
0x1b3c   : > { %v8307_v27 = vpop.permute.xlu0 %8306 }
0x1b3d   : > { %v8309_v40 = vunpack.i.h.bf16 %v8307_v27  ;;  %v8308_v32 = vunpack.i.l.bf16 %v8307_v27 }
0x1b3e   : > { %v8302_v57 = vpop.permute.xlu1 %8301 }
0x1b3f   : > { %v8304_v59 = vunpack.i.h.bf16 %v8302_v57  ;;  %v8303_v47 = vunpack.i.l.bf16 %v8302_v57  ;;  %v852_v57 = vld [vmem:[%s9514_s26 + $0x18] sm:$0xff] }
0x1b40   : > { %v5158_v27 = vadd.f32 %v852_v57, %v11005_v14 }
0x1b41   : > { %v4908_v53 = vsel %vm1531_vm2, %v10971_v54, %v8304_v59  ;;  %v4907_v35 = vsel %vm1531_vm2, %v10969_v10, %v8303_v47  ;;  %v5161_v54 = vld [vmem:[#allocation11 + $0x14] sm:$0xf]  ;;  %v7335_v59 = vcombine.low %v5175_v0, %v5176_v8  ;;  %v5157_v47 = vadd.f32 %v851_v16, %v11002_v49  ;;  %v5048_v8 = vld [vmem:[#allocation11 + $0x50] sm:$0xf] }
0x1b42   : > { %v4909_v15 = vsel %vm2018_vm3, %v4907_v35, %v8308_v32  ;;  %v4910_v63 = vsel %vm2018_vm3, %v4908_v53, %v8309_v40  ;;  %v5162_v10 = vld [vmem:[#allocation11 + $0x34] sm:$0xf]  ;;  %v11014_v35 = vld [vmem:[#allocation16] sm:$0xff]  ;;  %v5049_v16 = vld [vmem:[#allocation11 + $0x70] sm:$0xf] }
0x1b43   : > { %v7328_v55 = vcombine.low %v5161_v54, %v5162_v10  ;;  %v5160_v53 = vpack.c.bf16 %v5158_v27, %v5157_v47  ;;  %v4917_v40 = vrot.slane %v11014_v35, %v10050_v31  ;;  %v5046_v54 = vld [vmem:[#allocation11 + $0x10] sm:$0xf]  ;;  %v5180_v9 = vrot.slane %v11014_v35, %v10065_v30  ;;  %v11112_v27 = vld [vmem:[%s11865_s8] sm:$0xff] }
0x1b44   : > { %v5047_v10 = vld [vmem:[#allocation11 + $0x30] sm:$0xf]  ;;  %v7321_v57 = vcombine.low %v5048_v8, %v5049_v16 }
0x1b45   : > { %7953 = vmatprep.subr.bf16.mxu0 %v7328_v55  ;;  %v5051_v47 = vld [vmem:[#allocation11 + $0xb0] sm:$0xf] }
0x1b71   : > { %v8312_v37 = vpop.permute.xlu1 %8311 }
0x1b72   : > { %v8314_v48 = vunpack.i.h.bf16 %v8312_v37  ;;  %v8313_v23 = vunpack.i.l.bf16 %v8312_v37 }
0x1b74   : > { %v4912_v50 = vsel %vm2021_vm4, %v4910_v63, %v8314_v48  ;;  %v4911_v52 = vsel %vm2021_vm4, %v4909_v15, %v8313_v23 }
0x1b75   : > { %v4913_v17 = vpack.c.bf16 %v4912_v50, %v4911_v52 }
0x1b77   : > { %7930 = vmatmul.mubr.bf16.vlgmr.msra.gmra.mrb[64].mxu0 %v4913_v17  ;;  %v11029_v17 = vld [vmem:[%s11865_s8 + $0x8] sm:$0xff] }
0x1b78   : > { %7954 = vmatpush3.bf16.msra.mxu0 %v7328_v55  ;;  %7969 = vmatprep.mubr.bf16.mxu0 %v5159_v46  ;;  %v7320_v55 = vcombine.low %v5046_v54, %v5047_v10  ;;  %v5056_v10 = vld [vmem:[#allocation11 + $0x150] sm:$0xf] }
0x1b79   : > { %7955 = vmatprep.subr.bf16.mxu0 %v7329_v34 }
0x1b7a   : > { %7934 = vmatpush3.bf16.msra.mxu1 %v7320_v55  ;;  %v5057_v55 = vld [vmem:[#allocation11 + $0x170] sm:$0xf] }
0x1b7b   : > { %7935 = vmatprep.subr.bf16.mxu1 %v11793_v5 }
0x1b7c   : > { %7956 = vmatpush3.bf16.msra.mxu0 %v7329_v34 }
0x1b7d   : > { %7957 = vmatprep.subr.bf16.mxu0 %v7330_v44 }
0x1b7e   : > { %7936 = vmatpush3.bf16.msra.mxu1 %v7321_v57 }
0x1b7f   : > { %7937 = vmatprep.subr.bf16.mxu1 %v11793_v5 }
0x1b80   : > { %7958 = vmatpush3.bf16.msra.mxu0 %v7330_v44 }
0x1b81   : > { %7959 = vmatprep.subr.bf16.mxu0 %v7331_v24 }
0x1b84   : > { %7960 = vmatpush3.bf16.msra.mxu0 %v7331_v24 }
0x1b85   : > { %7961 = vmatprep.subr.bf16.mxu0 %v7332_v4 }
0x1b88   : > { %7962 = vmatpush3.bf16.msra.mxu0 %v7332_v4 }
0x1b89   : > { %7963 = vmatprep.subr.bf16.mxu0 %v7333_v19 }
0x1b8c   : > { %7964 = vmatpush3.bf16.msra.mxu0 %v7333_v19 }
0x1b8d   : > { %7965 = vmatprep.subr.bf16.mxu0 %v7334_v33 }
0x1b90   : > { %7966 = vmatpush3.bf16.msra.mxu0 %v7334_v33 }
0x1b91   : > { %7967 = vmatprep.subr.bf16.mxu0 %v7335_v59 }
0x1b94   : > { %7968 = vmatpush3.bf16.msra.mxu0 %v7335_v59  ;;  %v5050_v59 = vld [vmem:[#allocation11 + $0x90] sm:$0xf] }
0x1b95   : > { %8009 = vmatprep.subr.bf16.mxu0 %v11793_v5 }
0x1b97   : > { %7970 = vmatmul.mubr.bf16.vlgmr.msra.gmra.mrb[68].mxu0 %v5160_v53  ;;  %v7322_v53 = vcombine.low %v5050_v59, %v5051_v47 }
0x1b98   : > { %8013 = vmatprep.mubr.msk.bf16.mxu0 %vm9029_vm0, %v11793_v5 }
0x1b99   : > { %7938 = vmatpush3.bf16.msra.mxu1 %v7322_v53 }
0x1b9a   : > { %7939 = vmatprep.subr.bf16.mxu1 %v11793_v5 }
0x1c4a   : > { %v5000_v32 = vpop.f32.mrb[64].mxu0 }
0x1c4b   : > { %v5001_v37 = vadd.f32 %v5000_v32, %v4917_v40  ;;  %v7931_v48 = vpop.f32.mrb[65].mxu0  ;;  %v5052_v32 = vld [vmem:[#allocation11 + $0xd0] sm:$0xf] }
0x1c4c   : > { %v5003_v23 = vpop.f32.mrb[66].mxu0 }
0x1c4d   : > { %v11019_v15 = vadd.f32 %v5001_v37, %v10585_v13  ;;  %v5004_v63 = vadd.f32 %v5003_v23, %v4917_v40  ;;  %v7932_v50 = vpop.f32.mrb[67].mxu0  ;;  %v11036_v13 = vld [vmem:[%s11865_s8 + $0x10] sm:$0xff]  ;;  %v5053_v37 = vld [vmem:[#allocation11 + $0xf0] sm:$0xf] }
0x1c4e   : > { %v7323_v48 = vcombine.low %v5052_v32, %v5053_v37  ;;  %v5055_v50 = vld [vmem:[#allocation11 + $0x130] sm:$0xf] }
0x1c4f   : > { %v11022_v52 = vadd.f32 %v5004_v63, %v10588_v1  ;;  %5009 = vadd.xlane.f32.xlu0 %v11019_v15  ;;  %v11043_v1 = vld [vmem:[%s11865_s8 + $0x18] sm:$0xff]  ;;  %v5054_v63 = vld [vmem:[#allocation11 + $0x110] sm:$0xf] }
0x1c50   : > { %7940 = vmatpush3.bf16.msra.mxu1 %v7323_v48  ;;  %v7324_v54 = vcombine.low %v5054_v63, %v5055_v50  ;;  %v8627_v50 = vld [vmem:[#allocation16 + $0x8] sm:$0xff] }
0x1c51   : > { %5011 = vadd.xlane.f32.xlu1 %v11022_v52  ;;  %7941 = vmatprep.subr.bf16.mxu1 %v11793_v5 }
0x1c54   : > { %7942 = vmatpush3.bf16.msra.mxu1 %v7324_v54  ;;  %v5034_v54 = vrot.slane %v8627_v50, %v10050_v31 }
0x1c55   : > { %7943 = vmatprep.subr.bf16.mxu1 %v11793_v5 }
0x1c62   : > { %5599 = vrot.lane.b32.xlu1 %v11029_v17, %s11864_s19 }
0x1c66   : > { %5601 = vrot.lane.b32.xlu1 %v11036_v13, %s11864_s19 }
0x1c6a   : > { %5603 = vrot.lane.b32.xlu1 %v11043_v1, %s11864_s19  ;;  %v7971_v20 = vpop.f32.mrb[68].mxu0 }
0x1c6b   : > { %v5263_v34 = vpop.f32.mrb[69].mxu0  ;;  %v11119_v23 = vadd.f32 %v7971_v20, %v5180_v9 }
0x1c6c   : > { %v7972_v56 = vpop.f32.mrb[70].mxu0  ;;  %v11116_v40 = vadd.f32 %v5263_v34, %v5180_v9  ;;  %v7325_v34 = vcombine.low %v5056_v10, %v5057_v55 }
0x1c6d   : > { %v5266_v18 = vpop.f32.mrb[71].mxu0  ;;  %v11052_v58 = vadd.f32 %v7972_v56, %v5180_v9  ;;  %v5058_v56 = vld [vmem:[#allocation11 + $0x190] sm:$0xf] }
0x1c6e   : > { %v11050_v44 = vadd.f32 %v5266_v18, %v5180_v9  ;;  %v5059_v9 = vld [vmem:[#allocation11 + $0x1b0] sm:$0xf]  ;;  %7944 = vmatpush3.bf16.msra.mxu1 %v7325_v34  ;;  %v5737_v63 = vmul.f32 %v11116_v40, %v11112_v27  ;;  %v11170_v34 = vld [vmem:[%s11866_s17 + $0x10] sm:$0xff] }
0x1c6f   : > { %v5740_v0 = vmul.f32 %v11052_v58, %v11043_v1  ;;  %v7326_v20 = vcombine.low %v5058_v56, %v5059_v9  ;;  %7945 = vmatprep.subr.bf16.mxu1 %v11793_v5  ;;  %v5060_v18 = vld [vmem:[#allocation11 + $0x1d0] sm:$0xf]  ;;  %v5040_v9 = vrot.slane %v8627_v50, %v10103_v26 }
0x1c70   : > { %5543 = vrot.lane.b32.xlu1 %v11050_v44, %s11860_s11  ;;  %v5738_v43 = vmul.f32 %v11050_v44, %v11029_v17 }
0x1c72   : > { %7946 = vmatpush3.bf16.msra.mxu1 %v7326_v20 }
0x1c73   : > { %7947 = vmatprep.subr.bf16.mxu1 %v11793_v5 }
0x1c74   : > { %5547 = vrot.lane.b32.xlu1 %v11052_v58, %s11860_s11 }
0x1c78   : > { %5555 = vrot.lane.b32.xlu1 %v11050_v44, %s11861_s21 }
0x1c7c   : > { %5567 = vrot.lane.b32.xlu1 %v11050_v44, %s11862_s13 }
0x1c80   : > { %5559 = vrot.lane.b32.xlu1 %v11052_v58, %s11861_s21 }
0x1c84   : > { %5571 = vrot.lane.b32.xlu1 %v11052_v58, %s11862_s13 }
0x1c88   : > { %5711 = vrot.lane.b32.xlu1 %v11072_v51, %s11864_s19 }
0x1cdc   : > { %v5010_v12 = vpop.xlane.xlu0 %5009 }
0x1cdd   : > { %v5013_v41 = vmul.f32 0.0078125, %v5010_v12  ;;  %v5061_v12 = vld [vmem:[#allocation11 + $0x1f0] sm:$0xf] }
0x1cde   : > { %v5012_v60 = vpop.xlane.xlu1 %5011 }
0x1cdf   : > { %v11067_v7 = vsub.f32 %v11019_v15, %v5013_v41  ;;  %v5014_v24 = vmul.f32 0.0078125, %v5012_v60  ;;  %v7327_v41 = vcombine.low %v5060_v18, %v5061_v12  ;;  %v5280_v60 = vld [vmem:[#allocation11 + $0x18] sm:$0xf] }
0x1ce1   : > { %v11075_v25 = vsub.f32 %v11022_v52, %v5014_v24  ;;  %v5017_v28 = vmul.f32 %v11067_v7, %v11067_v7  ;;  %v5281_v24 = vld [vmem:[#allocation11 + $0x38] sm:$0xf]  ;;  %7948 = vmatpush3.bf16.msra.mxu1 %v7327_v41  ;;  %v5739_v41 = vmul.f32 %v11119_v23, %v11036_v13 }
0x1ce2   : > { %v11081_v46 = vpop.permute.xlu1 %5599 }
0x1ce3   : > { %5019 = vadd.xlane.f32.xlu0 %v5017_v28  ;;  %v5610_v4 = vmul.f32 %v11081_v46, %v11050_v44  ;;  %v5018_v45 = vmul.f32 %v11075_v25, %v11075_v25  ;;  %v7336_v28 = vcombine.low %v5280_v60, %v5281_v24  ;;  %v5282_v24 = vld [vmem:[#allocation11 + $0x58] sm:$0xf] }
0x1ce5   : > { %5643 = vrot.lane.b32.xlu1 %v5610_v4, %s11863_s18  ;;  %7973 = vmatprep.subr.bf16.mxu1 %v7336_v28  ;;  %v11140_v4 = vld [vmem:[%s11866_s17] sm:$0xff] }
0x1ce6   : > { %v11090_v19 = vpop.permute.xlu1 %5601 }
0x1ce7   : > { %5021 = vadd.xlane.f32.xlu0 %v5018_v45  ;;  %v5611_v31 = vmul.f32 %v11090_v19, %v11119_v23 }
0x1ce9   : > { %5771 = vrot.lane.b32.xlu1 %v5738_v43, %s11864_s19 }
0x1cea   : > { %v11098_v29 = vpop.permute.xlu1 %5603 }
0x1ceb   : > { %v5612_v33 = vmul.f32 %v11098_v29, %v11052_v58 }
0x1ced   : > { %5715 = vrot.lane.b32.xlu1 %v11096_v38, %s11864_s19 }
0x1cee   : > { %v11144_v45 = vpop.permute.xlu1 %5543 }
0x1cef   : > { %v5614_v43 = vmul.f32 %v11081_v46, %v11144_v45 }
0x1cf1   : > { %5647 = vrot.lane.b32.xlu1 %v5612_v33, %s11863_s18  ;;  %v5742_v33 = vmul.f32 %v11144_v45, %v11029_v17 }
0x1cf5   : > { %5775 = vrot.lane.b32.xlu1 %v5740_v0, %s11864_s19  ;;  %v11151_v0 = vpop.permute.xlu1 %5547 }
0x1cf6   : > { %v5616_v8 = vmul.f32 %v11098_v29, %v11151_v0 }
0x1cf9   : > { %5651 = vrot.lane.b32.xlu1 %v5614_v43, %s11863_s18  ;;  %v5283_v43 = vld [vmem:[#allocation11 + $0x78] sm:$0xf] }
0x1cfd   : > { %5597 = vrot.lane.b32.xlu0 %v11112_v27, %s11864_s19  ;;  %5779 = vrot.lane.b32.xlu1 %v5742_v33, %s11864_s19  ;;  %v8628_v33 = vld [vmem:[%s9633_s14] sm:$0xff] }
0x1d01   : > { %5541 = vrot.lane.b32.xlu0 %v11116_v40, %s11860_s11  ;;  %5655 = vrot.lane.b32.xlu1 %v5616_v8, %s11863_s18 }
0x1d05   : > { %5545 = vrot.lane.b32.xlu0 %v11119_v23, %s11860_s11 }
0x1d09   : > { %5553 = vrot.lane.b32.xlu0 %v11116_v40, %s11861_s21 }
0x1d0d   : > { %5565 = vrot.lane.b32.xlu0 %v11116_v40, %s11862_s13 }
0x1d11   : > { %5557 = vrot.lane.b32.xlu0 %v11119_v23, %s11861_s21 }
0x1d15   : > { %5569 = vrot.lane.b32.xlu0 %v11119_v23, %s11862_s13 }
0x1d19   : > { %5709 = vrot.lane.b32.xlu0 %v11140_v4, %s11864_s19 }
0x1d70   : > { %v5020_v16 = vpop.xlane.xlu0 %5019 }
0x1d71   : > { %v5023_v57 = vmul.f32 0.0078125, %v5020_v16  ;;  %v8629_v16 = vld [vmem:[%s9633_s14 + $0x8] sm:$0xff] }
0x1d73   : > { %v5025_v59 = vadd.f32 1e-05, %v5023_v57 }
0x1d74   : > { %v5022_v47 = vpop.xlane.xlu0 %5021 }
0x1d75   : > { %8556 = vrsqrt.f32 %v5025_v59  ;;  %v5024_v53 = vmul.f32 0.0078125, %v5022_v47 }
0x1d77   : > { %v5026_v32 = vadd.f32 1e-05, %v5024_v53  ;;  %v7337_v53 = vcombine.low %v5282_v24, %v5283_v43  ;;  %v5294_v24 = vld [vmem:[#allocation11 + $0x1d8] sm:$0xf] }
0x1d78   : > { %v11157_v37 = vpop.permute.xlu0 %5597  ;;  %v5295_v43 = vld [vmem:[#allocation11 + $0x1f8] sm:$0xf] }
0x1d79   : > { %8558 = vrsqrt.f32 %v5026_v32  ;;  %v5609_v48 = vmul.f32 %v11157_v37, %v11116_v40  ;;  %v5278_v32 = vpack.c.bf16 %v10995_v6, %v10992_v22 }
0x1d7b   : > { %5641 = vrot.lane.b32.xlu0 %v5609_v48, %s11863_s18  ;;  %v5284_v48 = vld [vmem:[#allocation11 + $0x98] sm:$0xf] }
0x1d7c   : > { %v11183_v59 = vpop.permute.xlu0 %5541 }
0x1d7d   : > { %v5741_v50 = vmul.f32 %v11183_v59, %v11112_v27 }
0x1d7f   : > { %v8557_v10 = vpop.eup %8556  ;;  %5769 = vrot.lane.b32.xlu0 %v5737_v63, %s11864_s19  ;;  %v5285_v63 = vld [vmem:[#allocation11 + $0xb8] sm:$0xf] }
0x1d80   : > { %v5029_v55 = vmul.f32 %v8557_v10, %v11067_v7  ;;  %v5286_v10 = vld [vmem:[#allocation11 + $0xd8] sm:$0xf] }
0x1d82   : > { %v5035_v56 = vmul.f32 %v5034_v54, %v5029_v55  ;;  %v5287_v55 = vld [vmem:[#allocation11 + $0xf8] sm:$0xf] }
0x1d83   : > { %v8559_v20 = vpop.eup %8558  ;;  %5713 = vrot.lane.b32.xlu0 %v11170_v34, %s11864_s19  ;;  %v7339_v6 = vcombine.low %v5286_v10, %v5287_v55  ;;  %v5578_v10 = vmul.f32 %v11050_v44, %v11072_v51 }
0x1d84   : > { %v5030_v18 = vmul.f32 %v8559_v20, %v11075_v25  ;;  %v5041_v7 = vadd.f32 %v5040_v9, %v5035_v56  ;;  %v5613_v25 = vmul.f32 %v11157_v37, %v11183_v59  ;;  %v11193_v56 = vpop.permute.xlu0 %5545 }
0x1d85   : > { %v5615_v22 = vmul.f32 %v11090_v19, %v11193_v56 }
0x1d86   : > { %v5036_v12 = vmul.f32 %v5034_v54, %v5030_v18  ;;  %v5043_v8 = vadd.f32 %v8628_v33, %v5041_v7  ;;  %v7338_v54 = vcombine.low %v5284_v48, %v5285_v63  ;;  %v5291_v18 = vld [vmem:[#allocation11 + $0x178] sm:$0xf]  ;;  %v7343_v33 = vcombine.low %v5294_v24, %v5295_v43 }
0x1d87   : > { %5645 = vrot.lane.b32.xlu0 %v5611_v31, %s11863_s18  ;;  %v5290_v31 = vld [vmem:[#allocation11 + $0x158] sm:$0xf] }
0x1d88   : > { %v5042_v60 = vadd.f32 %v5040_v9, %v5036_v12  ;;  %v5289_v9 = vld [vmem:[#allocation11 + $0x138] sm:$0xf]  ;;  %v7341_v12 = vcombine.low %v5290_v31, %v5291_v18 }
0x1d89   : > { %v5292_v7 = vld [vmem:[#allocation11 + $0x198] sm:$0xf] }
0x1d8a   : > { %v5044_v57 = vadd.f32 %v8629_v16, %v5042_v60  ;;  %v11204_v16 = vpop.permute.xlu1 %5555 }
0x1d8b   : > { %5773 = vrot.lane.b32.xlu0 %v5739_v41, %s11864_s19  ;;  %v5293_v41 = vld [vmem:[#allocation11 + $0x1b8] sm:$0xf] }
0x1d8c   : > { %v5045_v47 = vpack.c.bf16 %v5044_v57, %v5043_v8  ;;  %v7342_v60 = vcombine.low %v5292_v7, %v5293_v41  ;;  %v5279_v8 = vpack.c.bf16 %v11005_v14, %v11002_v49 }
0x1d8e   : > { %7950 = vmatmul.mubr.bf16.vlgmr.msra.gmra.mrb[76].mxu1 %v5045_v47  ;;  %v11206_v57 = vpop.permute.xlu1 %5567  ;;  %v11210_v47 = vpop.permute.xlu0 %5553 }
0x1d8f   : > { %7974 = vmatpush3.bf16.msra.mxu1 %v7336_v28  ;;  %5649 = vrot.lane.b32.xlu0 %v5613_v25, %s11863_s18  ;;  %v5288_v28 = vld [vmem:[#allocation11 + $0x118] sm:$0xf] }
0x1d90   : > { %7975 = vmatprep.subr.bf16.mxu1 %v7337_v53  ;;  %7989 = vmatprep.mubr.bf16.mxu1 %v5278_v32  ;;  %v7340_v20 = vcombine.low %v5288_v28, %v5289_v9 }
0x1d92   : > { %v11208_v25 = vpop.permute.xlu1 %5559  ;;  %v11214_v32 = vpop.permute.xlu0 %5565 }
0x1d93   : > { %7976 = vmatpush3.bf16.msra.mxu1 %v7337_v53  ;;  %5777 = vrot.lane.b32.xlu0 %v5741_v50, %s11864_s19 }
0x1d94   : > { %7977 = vmatprep.subr.bf16.mxu1 %v7338_v54 }
0x1d96   : > { %v11212_v53 = vpop.permute.xlu1 %5571  ;;  %v11218_v14 = vpop.permute.xlu0 %5557 }
0x1d97   : > { %7978 = vmatpush3.bf16.msra.mxu1 %v7338_v54  ;;  %5653 = vrot.lane.b32.xlu0 %v5615_v22, %s11863_s18 }
0x1d98   : > { %7979 = vmatprep.subr.bf16.mxu1 %v7339_v6 }
0x1d9a   : > { %v11216_v49 = vpop.permute.xlu1 %5711  ;;  %v11220_v63 = vpop.permute.xlu0 %5569 }
0x1d9b   : > { %7980 = vmatpush3.bf16.msra.mxu1 %v7339_v6  ;;  %v5722_v55 = vmul.f32 %v11216_v49, %v11050_v44 }
0x1d9c   : > { %7981 = vmatprep.subr.bf16.mxu1 %v7340_v20 }
0x1d9e   : > { %v5644_v48 = vpop.permute.xlu1 %5643  ;;  %v11222_v54 = vpop.permute.xlu0 %5709 }
0x1d9f   : > { %7982 = vmatpush3.bf16.msra.mxu1 %v7340_v20  ;;  %v5690_v28 = vsub.f32 %v5578_v10, %v5644_v48  ;;  %v5577_v20 = vmul.f32 %v11116_v40, %v11140_v4  ;;  %v5721_v31 = vmul.f32 %v11222_v54, %v11116_v40 }
0x1da0   : > { %7983 = vmatprep.subr.bf16.mxu1 %v7341_v12 }
0x1da2   : > { %v5772_v50 = vpop.permute.xlu1 %5771 }
0x1da3   : > { %7984 = vmatpush3.bf16.msra.mxu1 %v7341_v12  ;;  %v5818_v9 = vadd.f32 %v5772_v50, %v5722_v55 }
0x1da4   : > { %7985 = vmatprep.subr.bf16.mxu1 %v7342_v60 }
0x1da6   : > { %v11228_v22 = vpop.permute.xlu1 %5715 }
0x1da7   : > { %7986 = vmatpush3.bf16.msra.mxu1 %v7342_v60  ;;  %v5834_v60 = vsel %vm1206_vm1, %v5690_v28, %v5818_v9  ;;  %v5724_v48 = vmul.f32 %v11228_v22, %v11052_v58 }
0x1da8   : > { %7987 = vmatprep.subr.bf16.mxu1 %v7343_v33 }
0x1daa   : > { %v5648_v41 = vpop.permute.xlu1 %5647 }
0x1dab   : > { %7988 = vmatpush3.bf16.msra.mxu1 %v7343_v33 }
0x1dac   : > { %7993 = vmatprep.subr.bf16.mxu1 %v11793_v5 }
0x1dae   : > { %7990 = vmatmul.mubr.bf16.vlgmr.msra.gmra.mrb[80].mxu1 %v5279_v8  ;;  %v5580_v8 = vmul.f32 %v11052_v58, %v11096_v38  ;;  %v5776_v40 = vpop.permute.xlu1 %5775 }
0x1daf   : > { %7997 = vmatprep.mubr.msk.bf16.mxu1 %vm9029_vm0, %v11793_v5  ;;  %v5820_v55 = vadd.f32 %v5776_v40, %v5724_v48  ;;  %v5743_v48 = vmul.f32 %v11193_v56, %v11036_v13  ;;  %v5618_v40 = vmul.f32 %v11081_v46, %v11204_v16 }
0x1db0   : > { %v5692_v10 = vsub.f32 %v5580_v8, %v5648_v41  ;;  %v5065_v41 = vrot.slane %v11014_v35, %v10103_v26  ;;  %v5744_v26 = vmul.f32 %v11151_v0, %v11043_v1 }
0x1ded   : > { %v5642_v6 = vpop.permute.xlu0 %5641 }
0x1dee   : > { %v5689_v12 = vsub.f32 %v5577_v20, %v5642_v6  ;;  %v5579_v6 = vmul.f32 %v11119_v23, %v11170_v34 }
0x1df1   : > { %v5770_v18 = vpop.permute.xlu0 %5769 }
0x1df2   : > { %v5817_v7 = vadd.f32 %v5770_v18, %v5721_v31  ;;  %v5836_v18 = vsel %vm1206_vm1, %v5692_v10, %v5820_v55  ;;  %v5745_v10 = vmul.f32 %v11210_v47, %v11112_v27  ;;  %v5746_v55 = vmul.f32 %v11204_v16, %v11029_v17 }
0x1df4   : > { %v5833_v24 = vsel %vm1206_vm1, %v5689_v12, %v5817_v7 }
0x1df5   : > { %v11236_v44 = vpop.permute.xlu0 %5713  ;;  %v5909_v43 = vpack.c.bf16 %v5834_v60, %v5833_v24 }
0x1df6   : > { %v5723_v28 = vmul.f32 %v11236_v44, %v11119_v23 }
0x1df7   : > { %v5921_v33 = vsel %vm1531_vm2, %v5909_v43, 0 }
0x1df8   : > { %7994 = vmatpush3.bf16.xpose.msra.mxu1 %v5921_v33 }
0x1df9   : > { %v5646_v50 = vpop.permute.xlu0 %5645  ;;  %7995 = vmatprep.subr.bf16.mxu1 %v11793_v5 }
0x1dfa   : > { %v5691_v20 = vsub.f32 %v5579_v6, %v5646_v50  ;;  %v5617_v50 = vmul.f32 %v11157_v37, %v11210_v47  ;;  %v5621_v6 = vmul.f32 %v11157_v37, %v11214_v32  ;;  %v5747_v37 = vmul.f32 %v11218_v14, %v11036_v13 }
0x1dfd   : > { %v5774_v9 = vpop.permute.xlu0 %5773 }
0x1dfe   : > { %v5819_v31 = vadd.f32 %v5774_v9, %v5723_v28  ;;  %v5622_v28 = vmul.f32 %v11081_v46, %v11206_v57  ;;  %v5749_v9 = vmul.f32 %v11214_v32, %v11112_v27  ;;  %v5620_v46 = vmul.f32 %v11098_v29, %v11208_v25 }
0x1e00   : > { %v5835_v58 = vsel %vm1206_vm1, %v5691_v20, %v5819_v31  ;;  %v5750_v20 = vmul.f32 %v11206_v57, %v11029_v17  ;;  %v5619_v31 = vmul.f32 %v11090_v19, %v11218_v14  ;;  %v5748_v17 = vmul.f32 %v11208_v25, %v11043_v1 }
0x1e01   : > { %v5910_v12 = vpack.c.bf16 %v5836_v18, %v5835_v58  ;;  %v8630_v58 = vld [vmem:[%s11852_s15] sm:$0xff] }
0x1e03   : > { %v5924_v7 = vsel %vm1531_vm2, %v5910_v12, 0 }
0x1e04   : > { %7996 = vmatpush3.bf16.xpose.msra.mxu1 %v5924_v7  ;;  %v11326_v7 = vld [vmem:[%s11852_s15 + $0x8] sm:$0xff] }
0x1e05   : > { %8001 = vmatprep.subr.bf16.mxu1 %v11793_v5 }
0x1e61   : > { %v5148_v60 = vpop.f32.mrb[76].mxu1 }
0x1e62   : > { %v11254_v24 = vadd.f32 %v5148_v60, %v5065_v41  ;;  %v7951_v23 = vpop.f32.mrb[77].mxu1  ;;  %v5623_v60 = vmul.f32 %v11090_v19, %v11220_v63  ;;  %v11343_v19 = vpop.permute.xlu0 %5649 }
0x1e63   : > { %v5151_v43 = vpop.f32.mrb[78].mxu1  ;;  %v5624_v23 = vmul.f32 %v11098_v29, %v11212_v53 }
0x1e64   : > { %v11256_v33 = vadd.f32 %v5151_v43, %v5065_v41  ;;  %5399 = vrot.lane.b32.xlu0 %v11254_v24, %s11860_s11  ;;  %v7952_v8 = vpop.f32.mrb[79].mxu1  ;;  %v5425_v27 = vmul.f32 %v11254_v24, %v9695_v61  ;;  %v5481_v12 = vmul.f32 %v8630_v58, %v11254_v24  ;;  %v5751_v43 = vmul.f32 %v11220_v63, %v11036_v13 }
0x1e65   : > { %v5752_v8 = vmul.f32 %v11212_v53, %v11043_v1 }
0x1e66   : > { %5401 = vrot.lane.b32.xlu1 %v11256_v33, %s11860_s11  ;;  %v5426_v18 = vmul.f32 %v11256_v33, %v9716_v2  ;;  %v5482_v41 = vmul.f32 %v11326_v7, %v11256_v33 }
0x1e68   : > { %5781 = vrot.lane.b32.xlu0 %v5743_v48, %s11864_s19  ;;  %v11345_v48 = vpop.permute.xlu1 %5651 }
0x1e6a   : > { %5783 = vrot.lane.b32.xlu1 %v5744_v26, %s11864_s19  ;;  %v11347_v26 = vpop.permute.xlu0 %5777 }
0x1e6c   : > { %5405 = vrot.lane.b32.xlu0 %v11254_v24, %s11861_s21  ;;  %v11349_v29 = vpop.permute.xlu1 %5779 }
0x1e6e   : > { %5659 = vrot.lane.b32.xlu1 %v5618_v40, %s11863_s18  ;;  %v11351_v40 = vpop.permute.xlu0 %5653 }
0x1e70   : > { %5411 = vrot.lane.b32.xlu0 %v11254_v24, %s11862_s13  ;;  %v11353_v13 = vpop.permute.xlu1 %5655 }
0x1e72   : > { %5407 = vrot.lane.b32.xlu1 %v11256_v33, %s11861_s21 }
0x1e74   : > { %5657 = vrot.lane.b32.xlu0 %v5617_v50, %s11863_s18 }
0x1e76   : > { %5413 = vrot.lane.b32.xlu1 %v11256_v33, %s11862_s13 }
0x1e78   : > { %5785 = vrot.lane.b32.xlu0 %v5745_v10, %s11864_s19 }
0x1e7a   : > { %5787 = vrot.lane.b32.xlu1 %v5746_v55, %s11864_s19 }
0x1e7c   : > { %5665 = vrot.lane.b32.xlu0 %v5621_v6, %s11863_s18 }
0x1e7e   : > { %5667 = vrot.lane.b32.xlu1 %v5622_v28, %s11863_s18 }
0x1e80   : > { %5793 = vrot.lane.b32.xlu0 %v5749_v9, %s11864_s19 }
0x1e82   : > { %5795 = vrot.lane.b32.xlu1 %v5750_v20, %s11864_s19 }
0x1e84   : > { %5661 = vrot.lane.b32.xlu0 %v5619_v31, %s11863_s18 }
0x1e86   : > { %5663 = vrot.lane.b32.xlu1 %v5620_v46, %s11863_s18 }
0x1e88   : > { %5789 = vrot.lane.b32.xlu0 %v5747_v37, %s11864_s19 }
0x1e8a   : > { %5791 = vrot.lane.b32.xlu1 %v5748_v17, %s11864_s19 }
0x1e8c   : > { %5441 = vrot.lane.b32.xlu0 %v5425_v27, %s11863_s18 }
0x1e8e   : > { %5443 = vrot.lane.b32.xlu1 %v5426_v18, %s11863_s18 }
0x1e90   : > { %5497 = vrot.lane.b32.xlu0 %v5481_v12, %s11864_s19 }
0x1e92   : > { %5499 = vrot.lane.b32.xlu1 %v5482_v41, %s11864_s19 }
0x1e94   : > { %5669 = vrot.lane.b32.xlu0 %v5623_v60, %s11863_s18 }
0x1e96   : > { %5671 = vrot.lane.b32.xlu1 %v5624_v23, %s11863_s18 }
0x1e98   : > { %5797 = vrot.lane.b32.xlu0 %v5751_v43, %s11864_s19 }
0x1e9a   : > { %5799 = vrot.lane.b32.xlu1 %v5752_v8, %s11864_s19  ;;  %v5729_v8 = vmul.f32 %v11222_v54, %v11210_v47 }
0x1ed6   : > { %v11355_v50 = vpop.permute.xlu0 %5399 }
0x1ed7   : > { %v5427_v1 = vmul.f32 %v11355_v50, %v9695_v61  ;;  %v5483_v28 = vmul.f32 %v8630_v58, %v11355_v50 }
0x1ed8   : > { %v11359_v10 = vpop.permute.xlu1 %5401 }
0x1ed9   : > { %v5428_v55 = vmul.f32 %v11359_v10, %v9716_v2  ;;  %5445 = vrot.lane.b32.xlu0 %v5427_v1, %s11863_s18  ;;  %v5484_v20 = vmul.f32 %v11326_v7, %v11359_v10  ;;  %v5586_v1 = vmul.f32 %v11204_v16, %v11072_v51 }
0x1eda   : > { %v11364_v6 = vpop.permute.xlu0 %5781 }
0x1edb   : > { %5447 = vrot.lane.b32.xlu1 %v5428_v55, %s11863_s18 }
0x1edc   : > { %v11368_v9 = vpop.permute.xlu1 %5783 }
0x1edd   : > { %5501 = vrot.lane.b32.xlu0 %v5483_v28, %s11864_s19 }
0x1ede   : > { %v11373_v31 = vpop.permute.xlu0 %5405 }
0x1edf   : > { %v5429_v46 = vmul.f32 %v11373_v31, %v9695_v61  ;;  %5503 = vrot.lane.b32.xlu1 %v5484_v20, %s11864_s19  ;;  %v5485_v27 = vmul.f32 %v8630_v58, %v11373_v31 }
0x1ee0   : > { %v5660_v37 = vpop.permute.xlu1 %5659 }
0x1ee1   : > { %5449 = vrot.lane.b32.xlu0 %v5429_v46, %s11863_s18  ;;  %v5730_v46 = vmul.f32 %v11216_v49, %v11204_v16  ;;  %v5698_v3 = vsub.f32 %v5586_v1, %v5660_v37  ;;  %v5733_v1 = vmul.f32 %v11222_v54, %v11214_v32 }
0x1ee2   : > { %v11379_v17 = vpop.permute.xlu0 %5411 }
0x1ee3   : > { %v5431_v60 = vmul.f32 %v11379_v17, %v9695_v61  ;;  %v5487_v28 = vmul.f32 %v8630_v58, %v11379_v17  ;;  %v5585_v61 = vmul.f32 %v11210_v47, %v11140_v4 }
0x1ee4   : > { %v11382_v18 = vpop.permute.xlu1 %5407 }
0x1ee5   : > { %v5430_v12 = vmul.f32 %v11382_v18, %v9716_v2  ;;  %5505 = vrot.lane.b32.xlu0 %v5485_v27, %s11864_s19  ;;  %v5486_v43 = vmul.f32 %v11326_v7, %v11382_v18  ;;  %v11405_v27 = vpop.f32.mrb[80].mxu1 }
0x1ee6   : > { %v5658_v41 = vpop.permute.xlu0 %5657 }
0x1ee7   : > { %5451 = vrot.lane.b32.xlu1 %v5430_v12, %s11863_s18  ;;  %v5697_v5 = vsub.f32 %v5585_v61, %v5658_v41 }
0x1ee8   : > { %v11390_v23 = vpop.permute.xlu1 %5413 }
0x1ee9   : > { %5453 = vrot.lane.b32.xlu0 %v5431_v60, %s11863_s18  ;;  %v11407_v60 = vpop.f32.mrb[81].mxu1  ;;  %v5432_v21 = vmul.f32 %v11390_v23, %v9716_v2  ;;  %v5488_v41 = vmul.f32 %v11326_v7, %v11390_v23  ;;  %v5589_v2 = vmul.f32 %v11214_v32, %v11140_v4 }
0x1eea   : > { %v5786_v55 = vpop.permute.xlu0 %5785  ;;  %v11412_v47 = vpop.f32.mrb[82].mxu1 }
0x1eeb   : > { %v5825_v20 = vadd.f32 %v5786_v55, %v5729_v8  ;;  %5507 = vrot.lane.b32.xlu1 %v5486_v43, %s11864_s19  ;;  %v11414_v43 = vpop.f32.mrb[83].mxu1 }
0x1eec   : > { %v5788_v12 = vpop.permute.xlu1 %5787 }
0x1eed   : > { %v5826_v58 = vadd.f32 %v5788_v12, %v5730_v46  ;;  %5509 = vrot.lane.b32.xlu0 %v5487_v28, %s11864_s19  ;;  %v5841_v16 = vsel %vm1206_vm1, %v5697_v5, %v5825_v20  ;;  %v5590_v28 = vmul.f32 %v11206_v57, %v11072_v51  ;;  %v11867_v46 = vmov 0.0  }
0x1eee   : > { %v5666_v8 = vpop.permute.xlu0 %5665 }
0x1eef   : > { %v5842_v55 = vsel %vm1206_vm1, %v5698_v3, %v5826_v58  ;;  %5455 = vrot.lane.b32.xlu1 %v5432_v21, %s11863_s18  ;;  %v5701_v3 = vsub.f32 %v5589_v2, %v5666_v8  ;;  %v5734_v21 = vmul.f32 %v11216_v49, %v11206_v57  ;;  %v5582_v57 = vmul.f32 %v11144_v45, %v11072_v51 }
0x1ef0   : > { %v5668_v39 = vpop.permute.xlu1 %5667  ;;  %v5913_v37 = vpack.c.bf16 %v5842_v55, %v5841_v16  ;;  %v5726_v2 = vmul.f32 %v11216_v49, %v11144_v45  ;;  %v5732_v51 = vmul.f32 %v11228_v22, %v11208_v25 }
0x1ef1   : > { %v5702_v12 = vsub.f32 %v5590_v28, %v5668_v39  ;;  %v5581_v39 = vmul.f32 %v11183_v59, %v11140_v4  ;;  %v5694_v45 = vsub.f32 %v5582_v57, %v11345_v48  ;;  %v11477_v57 = vld [vmem:[%s11857_s28 + $0x8] sm:$0xff] }
0x1ef2   : > { %v5794_v61 = vpop.permute.xlu0 %5793  ;;  %v6021_v5 = vsel %vm1531_vm2, %v5913_v37, 0 }
0x1ef3   : > { %v5829_v20 = vadd.f32 %v5794_v61, %v5733_v1  ;;  %8010 = vmatpush3.bf16.xpose.msra.mxu0 %v6021_v5  ;;  %5511 = vrot.lane.b32.xlu1 %v5488_v41, %s11864_s19  ;;  %v5731_v41 = vmul.f32 %v11236_v44, %v11218_v14  ;;  %v5725_v1 = vmul.f32 %v11222_v54, %v11183_v59  ;;  %s6925_s19 = scalar_lea.sflag [#allocation4], %s9503_s4 }
0x1ef4   : > { %v5796_v7 = vpop.permute.xlu1 %5795  ;;  %8011 = vmatprep.subr.bf16.mxu0 %v11867_v46  ;;  %v5587_v61 = vmul.f32 %v11218_v14, %v11170_v34  ;;  %v5588_v5 = vmul.f32 %v11208_v25, %v11096_v38  ;;  %v5693_v49 = vsub.f32 %v5581_v39, %v11343_v19  ;;  %v5822_v59 = vadd.f32 %v11349_v29, %v5726_v2 }
0x1ef5   : > { %v11433_v32 = vsel %vm1206_vm1, %v5701_v3, %v5829_v20  ;;  %v5830_v58 = vadd.f32 %v5796_v7, %v5734_v21  ;;  %v5821_v54 = vadd.f32 %v11347_v26, %v5725_v1  ;;  %v5473_v25 = vmul.f32 %v11254_v24, %v9787_v42  ;;  %v11470_v26 = vld [vmem:[%s11857_s28] sm:$0xff] }
0x1ef6   : > { %v5662_v16 = vpop.permute.xlu0 %5661  ;;  %v5417_v29 = vmul.f32 %v11470_v26, %v11254_v24  ;;  %v5418_v39 = vmul.f32 %v11477_v57, %v11256_v33  ;;  %v5474_v1 = vmul.f32 %v11256_v33, %v9807_v62  ;;  %v5728_v24 = vmul.f32 %v11228_v22, %v11151_v0 }
0x1ef7   : > { %v11436_v55 = vsel %vm1206_vm1, %v5702_v12, %v5830_v58  ;;  %v5699_v21 = vsub.f32 %v5587_v61, %v5662_v16  ;;  %v5838_v16 = vsel %vm1206_vm1, %v5694_v45, %v5822_v59  ;;  %v5837_v48 = vsel %vm1206_vm1, %v5693_v49, %v5821_v54 }
0x1ef8   : > { %v5664_v8 = vpop.permute.xlu1 %5663  ;;  %v5915_v37 = vpack.c.bf16 %v11436_v55, %v11433_v32  ;;  %v5584_v61 = vmul.f32 %v11151_v0, %v11096_v38  ;;  %v5824_v33 = vadd.f32 %v11368_v9, %v5728_v24  ;;  %v5477_v32 = vmul.f32 %v11373_v31, %v9787_v42 }
0x1ef9   : > { %v5700_v4 = vsub.f32 %v5588_v5, %v5664_v8 }
0x1efa   : > { %v5790_v28 = vpop.permute.xlu0 %5789  ;;  %v5696_v54 = vsub.f32 %v5584_v61, %v11353_v13  ;;  %v5736_v61 = vmul.f32 %v11228_v22, %v11212_v53 }
0x1efb   : > { %v5827_v3 = vadd.f32 %v5790_v28, %v5731_v41 }
0x1efc   : > { %v5792_v20 = vpop.permute.xlu1 %5791 }
0x1efd   : > { %v5828_v7 = vadd.f32 %v5792_v20, %v5732_v51  ;;  %v5843_v12 = vsel %vm1206_vm1, %v5699_v21, %v5827_v3  ;;  %v5583_v21 = vmul.f32 %v11193_v56, %v11170_v34 }
0x1efe   : > { %v5442_v14 = vpop.permute.xlu0 %5441 }
0x1eff   : > { %v5844_v58 = vsel %vm1206_vm1, %v5700_v4, %v5828_v7  ;;  %v5465_v3 = vsub.f32 %v5417_v29, %v5442_v14  ;;  %v5911_v4 = vpack.c.bf16 %v5838_v16, %v5837_v48  ;;  %v5727_v7 = vmul.f32 %v11236_v44, %v11193_v56 }
0x1f00   : > { %v5444_v41 = vpop.permute.xlu1 %5443  ;;  %v5914_v28 = vpack.c.bf16 %v5844_v58, %v5843_v12  ;;  %v5695_v12 = vsub.f32 %v5583_v21, %v11351_v40  ;;  %v5840_v58 = vsel %vm1206_vm1, %v5696_v54, %v5824_v33  ;;  %v5475_v48 = vmul.f32 %v11355_v50, %v9787_v42 }
0x1f01   : > { %v5466_v51 = vsub.f32 %v5418_v39, %v5444_v41  ;;  %v5823_v0 = vadd.f32 %v11364_v6, %v5727_v7  ;;  %v5971_v14 = vsel %vm1531_vm2, %v5911_v4, 0  ;;  %v5420_v29 = vmul.f32 %v11477_v57, %v11359_v10 }
0x1f02   : > { %v5498_v8 = vpop.permute.xlu0 %5497  ;;  %v6024_v19 = vsel %vm1531_vm2, %v5914_v28, 0  ;;  %v5591_v33 = vmul.f32 %v11220_v63, %v11170_v34  ;;  %v5299_v34 = vrot.slane %v11014_v35, %v10372_v11  ;;  %v5421_v54 = vmul.f32 %v11470_v26, %v11373_v31 }
0x1f03   : > { %v5521_v2 = vadd.f32 %v5498_v8, %v5473_v25  ;;  %8012 = vmatpush3.bf16.xpose.msra.mxu0 %v6024_v19  ;;  %v5839_v56 = vsel %vm1206_vm1, %v5695_v12, %v5823_v0  ;;  %v5419_v19 = vmul.f32 %v11470_v26, %v11355_v50  ;;  %v5735_v50 = vmul.f32 %v11236_v44, %v11220_v63 }
0x1f04   : > { %v5500_v5 = vpop.permute.xlu1 %5499  ;;  %8025 = vmatprep.subr.bf16.mxu0 %v11867_v46  ;;  %v5912_v9 = vpack.c.bf16 %v5840_v58, %v5839_v56  ;;  %v5478_v12 = vmul.f32 %v11382_v18, %v9807_v62  ;;  %v5391_v35 = vadd.f32 %v11405_v27, %v5299_v34  ;;  %v5383_v56 = vadd.f32 %v11407_v60, %v5299_v34 }
0x1f05   : > { %v5522_v20 = vadd.f32 %v5500_v5, %v5474_v1  ;;  %v5529_v45 = vsel %vm1206_vm1, %v5465_v3, %v5521_v2  ;;  %v5476_v2 = vmul.f32 %v11359_v10, %v9807_v62  ;;  %v5479_v60 = vmul.f32 %v11379_v17, %v9787_v42 }
0x1f06   : > { %v5974_v13 = vsel %vm1531_vm2, %v5912_v9, 0  ;;  %v5670_v6 = vpop.permute.xlu0 %5669  ;;  %v5394_v9 = vadd.f32 %v11412_v47, %v5299_v34  ;;  %v5423_v47 = vmul.f32 %v11470_v26, %v11379_v17 }
0x1f07   : > { %v5530_v49 = vsel %vm1206_vm1, %v5466_v51, %v5522_v20  ;;  %v5592_v51 = vmul.f32 %v11212_v53, %v11096_v38  ;;  %v6071_v38 = vsel %vm1531_vm2, %v5915_v37, 0  ;;  %v5703_v53 = vsub.f32 %v5591_v33, %v5670_v6 }
0x1f08   : > { %v5905_v59 = vpack.c.bf16 %v5530_v49, %v5529_v45  ;;  %v5672_v41 = vpop.permute.xlu1 %5671 }
0x1f09   : > { %v5704_v22 = vsub.f32 %v5592_v51, %v5672_v41 }
0x1f0a   : > { %7998 = vmatmul.mubr.msk.bf16.vlgmr.msra.gmra.mrb[84].mxu1 %vm1531_vm2, %v5905_v59  ;;  %v5798_v28 = vpop.permute.xlu0 %5797 }
0x1f0b   : > { %8002 = vmatpush3.bf16.xpose.msra.mxu1 %v5971_v14  ;;  %8005 = vmatprep.mubr.msk.bf16.mxu1 %vm9029_vm0, %v11867_v46  ;;  %v5831_v45 = vadd.f32 %v5798_v28, %v5735_v50  ;;  %v5422_v14 = vmul.f32 %v11477_v57, %v11382_v18 }
0x1f0c   : > { %8003 = vmatprep.subr.bf16.mxu1 %v11867_v46  ;;  %v5800_v40 = vpop.permute.xlu1 %5799 }
0x1f0d   : > { %v5832_v21 = vadd.f32 %v5800_v40, %v5736_v61  ;;  %v5847_v63 = vsel %vm1206_vm1, %v5703_v53, %v5831_v45 }
0x1f0f   : > { %v5848_v44 = vsel %vm1206_vm1, %v5704_v22, %v5832_v21 }
0x1f10   : > { %v5916_v37 = vpack.c.bf16 %v5848_v44, %v5847_v63 }
0x1f12   : > { %v6074_v31 = vsel %vm1531_vm2, %v5916_v37, 0 }
0x1f13   : > { %8004 = vmatpush3.bf16.xpose.msra.mxu1 %v5974_v13  ;;  %v5386_v13 = vadd.f32 %v11414_v43, %v5299_v34 }
0x1f14   : > { %8017 = vmatprep.subr.bf16.mxu1 %v11867_v46 }
0x1f15   : > { %v6209_v27 = vpack.c.bf16 %v5386_v13, %v5383_v56 }
0x1f4b   : > { %v5446_v25 = vpop.permute.xlu0 %5445 }
0x1f4c   : > { %v5467_v5 = vsub.f32 %v5419_v19, %v5446_v25  ;;  %v5424_v19 = vmul.f32 %v11477_v57, %v11390_v23 }
0x1f4d   : > { %v5448_v16 = vpop.permute.xlu1 %5447 }
0x1f4e   : > { %v5468_v24 = vsub.f32 %v5420_v29, %v5448_v16  ;;  %v5480_v29 = vmul.f32 %v11390_v23, %v9807_v62  ;;  %v11571_v62 = vpack.i.bf16 %v5394_v9, %v5391_v35  ;;  %v8315_v23 = vpack.i.bf16 %v5386_v13, %v5383_v56 }
0x1f4f   : > { %v5502_v8 = vpop.permute.xlu0 %5501 }
0x1f50   : > { %v5523_v39 = vadd.f32 %v5502_v8, %v5475_v48  ;;  %v6210_v8 = vpack.c.bf16 %v5394_v9, %v5391_v35 }
0x1f51   : > { %v5504_v1 = vpop.permute.xlu1 %5503 }
0x1f52   : > { %v5524_v3 = vadd.f32 %v5504_v1, %v5476_v2  ;;  %v5531_v4 = vsel %vm1206_vm1, %v5467_v5, %v5523_v39 }
0x1f53   : > { %v5450_v20 = vpop.permute.xlu0 %5449 }
0x1f54   : > { %v5532_v7 = vsel %vm1206_vm1, %v5468_v24, %v5524_v3  ;;  %v5469_v6 = vsub.f32 %v5421_v54, %v5450_v20 }
0x1f55   : > { %v5906_v10 = vpack.c.bf16 %v5532_v7, %v5531_v4 }
0x1f57   : > { %v5506_v49 = vpop.permute.xlu0 %5505  ;;  %8006 = vmatmul.mubr.msk.bf16.vlgmr.msra.gmra.mrb[88].mxu1 %vm1531_vm2, %v5906_v10 }
0x1f58   : > { %8018 = vmatpush3.bf16.xpose.msra.mxu1 %v6071_v38  ;;  %8021 = vmatprep.mubr.msk.bf16.mxu1 %vm9029_vm0, %v11867_v46  ;;  %v5525_v0 = vadd.f32 %v5506_v49, %v5477_v32 }
0x1f59   : > { %v5452_v59 = vpop.permute.xlu1 %5451  ;;  %8019 = vmatprep.subr.bf16.mxu1 %v11867_v46 }
0x1f5a   : > { %v5470_v41 = vsub.f32 %v5422_v14, %v5452_v59  ;;  %v5533_v40 = vsel %vm1206_vm1, %v5469_v6, %v5525_v0 }
0x1f5b   : > { %v5454_v55 = vpop.permute.xlu0 %5453 }
0x1f5c   : > { %v5471_v42 = vsub.f32 %v5423_v47, %v5454_v55 }
0x1f5d   : > { %v5508_v58 = vpop.permute.xlu1 %5507 }
0x1f5e   : > { %v5526_v28 = vadd.f32 %v5508_v58, %v5478_v12 }
0x1f5f   : > { %v5510_v16 = vpop.permute.xlu0 %5509 }
0x1f60   : > { %v5534_v25 = vsel %vm1206_vm1, %v5470_v41, %v5526_v28  ;;  %8020 = vmatpush3.bf16.xpose.msra.mxu1 %v6074_v31  ;;  %v5527_v43 = vadd.f32 %v5510_v16, %v5479_v60 }
0x1f61   : > { %v5907_v18 = vpack.c.bf16 %v5534_v25, %v5533_v40  ;;  %v5456_v48 = vpop.permute.xlu1 %5455  ;;  %8033 = vmatprep.subr.bf16.mxu1 %v11867_v46 }
0x1f62   : > { %v5472_v2 = vsub.f32 %v5424_v19, %v5456_v48  ;;  %v5535_v17 = vsel %vm1206_vm1, %v5471_v42, %v5527_v43 }
0x1f63   : > { %8014 = vmatmul.mubr.msk.bf16.vlgmr.msra.gmra.mrb[72].mxu0 %vm1531_vm2, %v5907_v18 }
0x1f64   : > { %8026 = vmatpush3.bf16.msra.mxu0 %v6209_v27  ;;  %8029 = vmatprep.mubr.msk.bf16.mxu0 %vm9029_vm0, %v11867_v46 }
0x1f65   : > { %v5512_v39 = vpop.permute.xlu1 %5511  ;;  %8027 = vmatprep.subr.bf16.mxu0 %v11867_v46 }
0x1f66   : > { %v5528_v1 = vadd.f32 %v5512_v39, %v5480_v29 }
0x1f68   : > { %v5536_v26 = vsel %vm1206_vm1, %v5472_v2, %v5528_v1  ;;  %8028 = vmatpush3.bf16.msra.mxu0 %v6210_v8 }
0x1f69   : > { %v5908_v61 = vpack.c.bf16 %v5536_v26, %v5535_v17  ;;  %8041 = vmatprep.subr.bf16.mxu0 %v11867_v46 }
0x1f6b   : > { %8022 = vmatmul.mubr.msk.bf16.vlgmr.msra.gmra.mrb[92].mxu1 %vm1531_vm2, %v5908_v61 }
0x1f6c   : > { %8037 = vmatprep.mubr.msk.bf16.mxu1 %vm9029_vm0, %v11867_v46 }
0x1fdd   : > { %v5960_v57 = vpop.f32.mrb[84].mxu1 }
0x1fde   : > { %v7999_v5 = vpop.f32.mrb[85].mxu1  ;;  %v6117_v24 = vsel %vm1531_vm2, %v5960_v57, -inf }
0x1fdf   : > { %6118 = vmax.xlane.f32.xlu0 %v6117_v24  ;;  %v5963_v3 = vpop.f32.mrb[86].mxu1 }
0x1fe0   : > { %v8000_v51 = vpop.f32.mrb[87].mxu1  ;;  %v6120_v20 = vsel %vm1531_vm2, %v5963_v3, -inf }
0x1fe1   : > { %6121 = vmax.xlane.f32.xlu1 %v6120_v20 }
0x202a   : > { %v6010_v50 = vpop.f32.mrb[88].mxu1 }
0x202b   : > { %v8007_v21 = vpop.f32.mrb[89].mxu1  ;;  %v6123_v4 = vsel %vm1531_vm2, %v6010_v50, -inf }
0x202c   : > { %6124 = vmax.xlane.f32.xlu0 %v6123_v4  ;;  %v6013_v7 = vpop.f32.mrb[90].mxu1 }
0x202d   : > { %v8008_v10 = vpop.f32.mrb[91].mxu1  ;;  %v6126_v33 = vsel %vm1531_vm2, %v6013_v7, -inf }
0x2030   : > { %6127 = vmax.xlane.f32.xlu0 %v6126_v33 }
0x2036   : > { %v6060_v22 = vpop.f32.mrb[72].mxu0 }
0x2037   : > { %v8015_v45 = vpop.f32.mrb[73].mxu0  ;;  %v6129_v49 = vsel %vm1531_vm2, %v6060_v22, -inf }
0x2038   : > { %v6063_v38 = vpop.f32.mrb[74].mxu0  ;;  %6130 = vmax.xlane.f32.xlu0 %v6129_v49 }
0x2039   : > { %v8016_v53 = vpop.f32.mrb[75].mxu0  ;;  %v6132_v44 = vsel %vm1531_vm2, %v6063_v38, -inf }
0x203a   : > { %6133 = vmax.xlane.f32.xlu1 %v6132_v44 }
0x203e   : > { %v6110_v59 = vpop.f32.mrb[92].mxu1 }
0x203f   : > { %v8023_v34 = vpop.f32.mrb[93].mxu1  ;;  %v6135_v63 = vsel %vm1531_vm2, %v6110_v59, -inf }
0x2040   : > { %6136 = vmax.xlane.f32.xlu0 %v6135_v63  ;;  %v6113_v32 = vpop.f32.mrb[94].mxu1 }
0x2041   : > { %v8024_v55 = vpop.f32.mrb[95].mxu1  ;;  %v6138_v37 = vsel %vm1531_vm2, %v6113_v32, -inf }
0x2042   : > { %6139 = vmax.xlane.f32.xlu1 %v6138_v37 }
0x2053   : > { %8321 = vrot.lane.b32.xlu1 %v11571_v62, %s11860_s11 }
0x2056   : > { %8316 = vrot.lane.b32.xlu0 %v8315_v23, %s11860_s11 }
0x2057   : > { %8326 = vrot.lane.b32.xlu1 %v8315_v23, %s11861_s21 }
0x205b   : > { %8331 = vrot.lane.b32.xlu1 %v8315_v23, %s11862_s13 }
0x206c   : > { %v6119_v54 = vpop.xlane.xlu0 %6118 }
0x206d   : > { %v6141_v0 = vsub.f32 %v5960_v57, %v6119_v54 }
0x206e   : > { %v6122_v14 = vpop.xlane.xlu1 %6121 }
0x206f   : > { %v6149_v12 = vmul.f32 1.442695, %v6141_v0  ;;  %v6142_v58 = vsub.f32 %v5963_v3, %v6122_v14 }
0x2071   : > { %8560 = vpow2.f32 %v6149_v12  ;;  %v6151_v35 = vmul.f32 1.442695, %v6142_v58 }
0x2073   : > { %8562 = vpow2.f32 %v6151_v35 }
0x207b   : > { %v11586_v56 = vpop.eup %8560 }
0x207c   : > { %v6165_v9 = vsel %vm1531_vm2, %v11586_v56, 0.0 }
0x207d   : > { %v11590_v13 = vpop.eup %8562  ;;  %6166 = vadd.xlane.f32.xlu0 %v6165_v9 }
0x207e   : > { %v6168_v6 = vsel %vm1531_vm2, %v11590_v13, 0.0 }
0x207f   : > { %6169 = vadd.xlane.f32.xlu1 %v6168_v6 }
0x20b9   : > { %v6125_v41 = vpop.xlane.xlu0 %6124 }
0x20ba   : > { %v6143_v28 = vsub.f32 %v6010_v50, %v6125_v41 }
0x20bc   : > { %v6153_v31 = vmul.f32 1.442695, %v6143_v28 }
0x20bd   : > { %v6128_v40 = vpop.xlane.xlu0 %6127 }
0x20be   : > { %8564 = vpow2.f32 %v6153_v31  ;;  %v6144_v25 = vsub.f32 %v6013_v7, %v6128_v40 }
0x20c0   : > { %v6155_v18 = vmul.f32 1.442695, %v6144_v25 }
0x20c2   : > { %8566 = vpow2.f32 %v6155_v18 }
0x20c5   : > { %v6131_v16 = vpop.xlane.xlu0 %6130 }
0x20c6   : > { %v6145_v48 = vsub.f32 %v6060_v22, %v6131_v16 }
0x20c7   : > { %v6134_v27 = vpop.xlane.xlu1 %6133 }
0x20c8   : > { %v11594_v8 = vpop.eup %8564  ;;  %v6157_v60 = vmul.f32 1.442695, %v6145_v48  ;;  %v6146_v47 = vsub.f32 %v6063_v38, %v6134_v27 }
0x20c9   : > { %v6171_v43 = vsel %vm1531_vm2, %v11594_v8, 0.0 }
0x20ca   : > { %8568 = vpow2.f32 %v6157_v60  ;;  %v6159_v19 = vmul.f32 1.442695, %v6146_v47  ;;  %6172 = vadd.xlane.f32.xlu0 %v6171_v43 }
0x20cc   : > { %v11598_v29 = vpop.eup %8566  ;;  %8570 = vpow2.f32 %v6159_v19 }
0x20cd   : > { %v6137_v39 = vpop.xlane.xlu0 %6136  ;;  %v6174_v42 = vsel %vm1531_vm2, %v11598_v29, 0.0 }
0x20ce   : > { %v6147_v2 = vsub.f32 %v6110_v59, %v6137_v39  ;;  %6175 = vadd.xlane.f32.xlu1 %v6174_v42 }
0x20cf   : > { %v6140_v1 = vpop.xlane.xlu1 %6139 }
0x20d0   : > { %v6161_v17 = vmul.f32 1.442695, %v6147_v2  ;;  %v6148_v26 = vsub.f32 %v6113_v32, %v6140_v1 }
0x20d1   : > { %v8317_v61 = vpop.permute.xlu0 %8316 }
0x20d2   : > { %8572 = vpow2.f32 %v6161_v17  ;;  %v6163_v23 = vmul.f32 1.442695, %v6148_v26  ;;  %v8319_v57 = vunpack.i.h.bf16 %v8317_v61  ;;  %v8318_v5 = vunpack.i.l.bf16 %v8317_v61 }
0x20d3   : > { %v8322_v24 = vpop.permute.xlu1 %8321 }
0x20d4   : > { %v11602_v3 = vpop.eup %8568  ;;  %8574 = vpow2.f32 %v6163_v23  ;;  %v6211_v51 = vpack.c.bf16 %v8319_v57, %v8318_v5  ;;  %v8324_v20 = vunpack.i.h.bf16 %v8322_v24  ;;  %v8323_v50 = vunpack.i.l.bf16 %v8322_v24  ;;  %v5889_v24 = vld [vmem:[#allocation11 + $0x1c] sm:$0xf] }
0x20d5   : > { %v6177_v21 = vsel %vm1531_vm2, %v11602_v3, 0.0  ;;  %v11868_v5 = vmov 0  }
0x20d6   : > { %v11606_v4 = vpop.eup %8570  ;;  %6178 = vadd.xlane.f32.xlu0 %v6177_v21  ;;  %8034 = vmatpush3.bf16.msra.mxu1 %v6211_v51  ;;  %v6212_v10 = vpack.c.bf16 %v8324_v20, %v8323_v50  ;;  %v5891_v51 = vld [vmem:[#allocation11 + $0x5c] sm:$0xf] }
0x20d7   : > { %v6180_v7 = vsel %vm1531_vm2, %v11606_v4, 0.0  ;;  %8035 = vmatprep.subr.bf16.mxu1 %v11867_v46  ;;  %v8327_v38 = vpop.permute.xlu1 %8326  ;;  %v5892_v50 = vld [vmem:[#allocation11 + $0x7c] sm:$0xf] }
0x20d8   : > { %6181 = vadd.xlane.f32.xlu1 %v6180_v7  ;;  %v8329_v32 = vunpack.i.h.bf16 %v8327_v38  ;;  %v8328_v55 = vunpack.i.l.bf16 %v8327_v38  ;;  %v7353_v21 = vcombine.low %v5891_v51, %v5892_v50 }
0x20da   : > { %8036 = vmatpush3.bf16.msra.mxu1 %v6212_v10  ;;  %v6213_v14 = vpack.c.bf16 %v8329_v32, %v8328_v55 }
0x20db   : > { %8049 = vmatprep.subr.bf16.mxu1 %v11867_v46  ;;  %v8332_v53 = vpop.permute.xlu1 %8331 }
0x20dc   : > { %v11612_v33 = vpop.eup %8572  ;;  %v8333_v6 = vunpack.i.l.bf16 %v8332_v53 }
0x20dd   : > { %v6183_v22 = vsel %vm1531_vm2, %v11612_v33, 0.0 }
0x20de   : > { %v11616_v45 = vpop.eup %8574  ;;  %6184 = vadd.xlane.f32.xlu0 %v6183_v22  ;;  %v5893_v22 = vld [vmem:[#allocation11 + $0x9c] sm:$0xf] }
0x20df   : > { %v6186_v49 = vsel %vm1531_vm2, %v11616_v45, 0.0 }
0x20e0   : > { %6187 = vadd.xlane.f32.xlu1 %v6186_v49  ;;  %v5895_v49 = vld [vmem:[#allocation11 + $0xdc] sm:$0xf] }
0x20f1   : > { %8341 = vrot.lane.b32.xlu1 %v11571_v62, %s11862_s13 }
0x20f4   : > { %8336 = vrot.lane.b32.xlu0 %v11571_v62, %s11861_s21 }
0x210a   : > { %v6167_v44 = vpop.xlane.xlu0 %6166 }
0x210b   : > { %8576 = vrcp.f32 %v6167_v44 }
0x210c   : > { %v6170_v59 = vpop.xlane.xlu1 %6169 }
0x210d   : > { %8578 = vrcp.f32 %v6170_v59  ;;  %v5897_v59 = vld [vmem:[#allocation11 + $0x11c] sm:$0xf] }
0x2115   : > { %v8577_v34 = vpop.eup %8576 }
0x2116   : > { %v6190_v37 = vmul.f32 %v8577_v34, %v11586_v56  ;;  %v5898_v34 = vld [vmem:[#allocation11 + $0x13c] sm:$0xf] }
0x2117   : > { %v8579_v63 = vpop.eup %8578  ;;  %v7356_v55 = vcombine.low %v5897_v59, %v5898_v34 }
0x2118   : > { %v6192_v54 = vmul.f32 %v8579_v63, %v11590_v13  ;;  %v8334_v13 = vunpack.i.h.bf16 %v8332_v53  ;;  %v5896_v53 = vld [vmem:[#allocation11 + $0xfc] sm:$0xf] }
0x2119   : > { %v7355_v44 = vcombine.low %v5895_v49, %v5896_v53  ;;  %v8405_v49 = vld [vmem:[#allocation13 + $0x14] ss:$8 sps:$4 sm:$0xff]  }
0x211a   : > { %v6205_v0 = vpack.c.bf16 %v6192_v54, %v6190_v37  ;;  %v6215_v40 = vpack.c.bf16 %v8334_v13, %v8333_v6  ;;  %v5903_v6 = vld [vmem:[#allocation11 + $0x1dc] sm:$0xf] }
0x211c   : > { %8030 = vmatmul.mubr.msk.bf16.vlgmr.msra.gmra.mrb[76].mxu0 %vm1531_vm2, %v6205_v0 }
0x211d   : > { %8042 = vmatpush3.bf16.msra.mxu0 %v6213_v14  ;;  %8045 = vmatprep.mubr.msk.bf16.mxu0 %vm9029_vm0, %v11867_v46  ;;  %v5899_v14 = vld [vmem:[#allocation11 + $0x15c] sm:$0xf] }
0x211e   : > { %8043 = vmatprep.subr.bf16.mxu0 %v11867_v46 }
0x2157   : > { %v6173_v62 = vpop.xlane.xlu0 %6172 }
0x2158   : > { %8580 = vrcp.f32 %v6173_v62  ;;  %v5900_v62 = vld [vmem:[#allocation11 + $0x17c] sm:$0xf] }
0x215b   : > { %v6176_v12 = vpop.xlane.xlu1 %6175 }
0x215c   : > { %8582 = vrcp.f32 %v6176_v12  ;;  %v5901_v12 = vld [vmem:[#allocation11 + $0x19c] sm:$0xf] }
0x2162   : > { %v8581_v35 = vpop.eup %8580 }
0x2163   : > { %v6179_v58 = vpop.xlane.xlu0 %6178  ;;  %v6194_v41 = vmul.f32 %v8581_v35, %v11594_v8  ;;  %v5902_v35 = vld [vmem:[#allocation11 + $0x1bc] sm:$0xf] }
0x2164   : > { %8584 = vrcp.f32 %v6179_v58  ;;  %v7357_v58 = vcombine.low %v5899_v14, %v5900_v62  ;;  %v8414_v14 = vld [vmem:[#allocation13 + $0x44] ss:$8 sps:$4 sm:$0xff]   ;;  %v8412_v62 = vld [vmem:[#allocation13 + $0x40] ss:$8 sps:$4 sm:$0xff]  }
0x2165   : > { %v6182_v56 = vpop.xlane.xlu1 %6181 }
0x2166   : > { %v8583_v9 = vpop.eup %8582  ;;  %8586 = vrcp.f32 %v6182_v56  ;;  %v7358_v56 = vcombine.low %v5901_v12, %v5902_v35  ;;  %v8417_v12 = vld [vmem:[#allocation13 + $0x54] ss:$8 sps:$4 sm:$0xff]   ;;  %v8420_v35 = vld [vmem:[#allocation13 + $0x64] ss:$8 sps:$4 sm:$0xff]  }
0x2167   : > { %v6196_v28 = vmul.f32 %v8583_v9, %v11598_v29 }
0x2169   : > { %v6206_v31 = vpack.c.bf16 %v6196_v28, %v6194_v41  ;;  %v5904_v41 = vld [vmem:[#allocation11 + $0x1fc] sm:$0xf] }
0x216b   : > { %v6185_v25 = vpop.xlane.xlu0 %6184  ;;  %8038 = vmatmul.mubr.msk.bf16.vlgmr.msra.gmra.mrb[96].mxu1 %vm1531_vm2, %v6206_v31  ;;  %v7359_v31 = vcombine.low %v5903_v6, %v5904_v41  ;;  %v8424_v6 = vld [vmem:[#allocation14 + $0x40] sm:$0xff]  }
0x216c   : > { %8588 = vrcp.f32 %v6185_v25  ;;  %8050 = vmatpush3.bf16.msra.mxu1 %v6215_v40  ;;  %8053 = vmatprep.mubr.msk.bf16.mxu1 %vm9029_vm0, %v11867_v46  ;;  %v8425_v41 = vld [vmem:[#allocation14] sm:$0xff]  }
0x216d   : > { %v6188_v18 = vpop.xlane.xlu1 %6187  ;;  %8051 = vmatprep.subr.bf16.mxu1 %v11867_v46 }
0x216e   : > { %8590 = vrcp.f32 %v6188_v18  ;;  %v8585_v16 = vpop.eup %8584 }
0x216f   : > { %v8337_v48 = vpop.permute.xlu0 %8336  ;;  %v6198_v42 = vmul.f32 %v8585_v16, %v11602_v3  ;;  %v5890_v3 = vld [vmem:[#allocation11 + $0x3c] sm:$0xf] }
0x2170   : > { %v8587_v27 = vpop.eup %8586  ;;  %v8339_v8 = vunpack.i.h.bf16 %v8337_v48  ;;  %v8338_v60 = vunpack.i.l.bf16 %v8337_v48  ;;  %v7352_v20 = vcombine.low %v5889_v24, %v5890_v3  ;;  %v8634_v24 = vld [vmem:[#allocation16] sm:$0xff] }
0x2171   : > { %v6200_v47 = vmul.f32 %v8587_v27, %v11606_v4  ;;  %v8342_v43 = vpop.permute.xlu1 %8341  ;;  %v6427_v3 = vrot.slane %v8634_v24, %v10453_v36 }
0x2172   : > { %v6214_v19 = vpack.c.bf16 %v8339_v8, %v8338_v60  ;;  %v8344_v29 = vunpack.i.h.bf16 %v8342_v43  ;;  %v8343_v39 = vunpack.i.l.bf16 %v8342_v43 }
0x2173   : > { %v6207_v1 = vpack.c.bf16 %v6200_v47, %v6198_v42 }
0x2174   : > { %v6216_v2 = vpack.c.bf16 %v8344_v29, %v8343_v39  ;;  %8044 = vmatpush3.bf16.msra.mxu0 %v6214_v19 }
0x2175   : > { %8057 = vmatprep.subr.bf16.mxu0 %v11867_v46 }
0x2176   : > { %v8589_v17 = vpop.eup %8588  ;;  %8052 = vmatpush3.bf16.msra.mxu1 %v6216_v2 }
0x2177   : > { %8046 = vmatmul.mubr.msk.bf16.vlgmr.msra.gmra.mrb[80].mxu0 %vm1531_vm2, %v6207_v1  ;;  %v6202_v61 = vmul.f32 %v8589_v17, %v11612_v33 }
0x2178   : > { %v8591_v26 = vpop.eup %8590  ;;  %8073 = vmatprep.mubr.msk.bf16.mxu0 %vm9029_vm0, %v11867_v46  ;;  %8058 = vmatpush3.bf16.msra.mxu0 %v7352_v20 }
0x2179   : > { %v6204_v23 = vmul.f32 %v8591_v26, %v11616_v45  ;;  %8059 = vmatprep.subr.bf16.mxu0 %v11867_v46  ;;  %v5894_v45 = vld [vmem:[#allocation11 + $0xbc] sm:$0xf] }
0x217a   : > { %v7354_v38 = vcombine.low %v5893_v22, %v5894_v45  ;;  %v8400_v22 = vld [vmem:[#allocation13] ss:$8 sps:$4 sm:$0xff]   ;;  %v8402_v45 = vld [vmem:[#allocation13 + $0x4] ss:$8 sps:$4 sm:$0xff]  }
0x217b   : > { %v6208_v57 = vpack.c.bf16 %v6204_v23, %v6202_v61  ;;  %6662 = vmatprep.subr.bf16.mxu1 %v8402_v45  ;;  %v11870_v45 = vld [vmem:[#allocation28_spill] sm:$0xff] }
0x217c   : > { %8060 = vmatpush3.bf16.msra.mxu0 %v7353_v21 }
0x217d   : > { %8054 = vmatmul.mubr.msk.bf16.vlgmr.msra.gmra.mrb[100].mxu1 %vm1531_vm2, %v6208_v57  ;;  %8061 = vmatprep.subr.bf16.mxu0 %v11867_v46 }
0x217e   : > { %6694 = vmatprep.mubr.bf16.mxu1 %v11868_v5  ;;  %6663 = vmatpush1.bf16.msra.mxu1 %v8400_v22 }
0x217f   : > { %6664 = vmatprep.subr.bf16.mxu1 %v8405_v49 }
0x2180   : > { %8062 = vmatpush3.bf16.msra.mxu0 %v7354_v38  ;;  %v8403_v38 = vld [vmem:[#allocation13 + $0x10] ss:$8 sps:$4 sm:$0xff]  }
0x2181   : > { %8063 = vmatprep.subr.bf16.mxu0 %v11867_v46 }
0x2182   : > { %6665 = vmatpush1.bf16.msra.mxu1 %v8403_v38 }
0x2184   : > { %8064 = vmatpush3.bf16.msra.mxu0 %v7355_v44 }
0x2185   : > { %8065 = vmatprep.subr.bf16.mxu0 %v11867_v46 }
0x2188   : > { %8066 = vmatpush3.bf16.msra.mxu0 %v7356_v55  ;;  %v8408_v55 = vld [vmem:[#allocation13 + $0x24] ss:$8 sps:$4 sm:$0xff]  }
0x2189   : > { %8067 = vmatprep.subr.bf16.mxu0 %v11867_v46  ;;  %6666 = vmatprep.subr.bf16.mxu1 %v8408_v55 }
0x218c   : > { %8068 = vmatpush3.bf16.msra.mxu0 %v7357_v58  ;;  %v8415_v58 = vld [vmem:[#allocation13 + $0x50] ss:$8 sps:$4 sm:$0xff]  }
0x218d   : > { %8069 = vmatprep.subr.bf16.mxu0 %v11867_v46 }
0x2190   : > { %8070 = vmatpush3.bf16.msra.mxu0 %v7358_v56  ;;  %v8418_v56 = vld [vmem:[#allocation13 + $0x60] ss:$8 sps:$4 sm:$0xff]  }
0x2191   : > { %8071 = vmatprep.subr.bf16.mxu0 %v11867_v46 }
0x2194   : > { %8072 = vmatpush3.bf16.msra.mxu0 %v7359_v31  ;;  %v8427_v31 = vld [vmem:[#allocation14 + $0x8] sm:$0xff]  }
0x2195   : > { %7607 = vmatprep.subr.bf16.mxu0 %v8424_v6 }
0x21ef   : > { %v6254_v4 = vpop.f32.mrb[76].mxu0 }
0x21f0   : > { %v8031_v7 = vpop.f32.mrb[77].mxu0 }
0x21f1   : > { %v6257_v10 = vpop.f32.mrb[78].mxu0 }
0x21f2   : > { %v8032_v33 = vpop.f32.mrb[79].mxu0 }
0x223e   : > { %v6298_v63 = vpop.f32.mrb[96].mxu1 }
0x223f   : > { %v8039_v32 = vpop.f32.mrb[97].mxu1 }
0x2240   : > { %v6301_v37 = vpop.f32.mrb[98].mxu1 }
0x2241   : > { %v8345_v54 = vpack.i.bf16 %v6301_v37, %v6298_v63  ;;  %v8040_v0 = vpop.f32.mrb[99].mxu1  ;;  %v8406_v37 = vld [vmem:[#allocation13 + $0x20] ss:$8 sps:$4 sm:$0xff]  }
0x2242   : > { %6667 = vmatpush1.bf16.msra.mxu1 %v8406_v37  ;;  %v8409_v0 = vld [vmem:[#allocation13 + $0x30] ss:$8 sps:$4 sm:$0xff]  }
0x2243   : > { %8346 = vrot.lane.b32.xlu0 %v8345_v54, %s11862_s13  ;;  %v8411_v54 = vld [vmem:[#allocation13 + $0x34] ss:$8 sps:$4 sm:$0xff]  }
0x2244   : > { %6668 = vmatprep.subr.bf16.mxu1 %v8411_v54 }
0x2246   : > { %6669 = vmatpush1.bf16.msra.mxu1 %v8409_v0 }
0x2247   : > { %6670 = vmatprep.subr.bf16.mxu1 %v8414_v14 }
0x224a   : > { %v6342_v9 = vpop.f32.mrb[80].mxu0  ;;  %6671 = vmatpush1.bf16.msra.mxu1 %v8412_v62 }
0x224b   : > { %v8047_v13 = vpop.f32.mrb[81].mxu0  ;;  %6672 = vmatprep.subr.bf16.mxu1 %v8417_v12 }
0x224c   : > { %v6345_v28 = vpop.f32.mrb[82].mxu0  ;;  %v8421_v13 = vld [vmem:[#allocation13 + $0x70] ss:$8 sps:$4 sm:$0xff]  }
0x224d   : > { %v8350_v40 = vpack.i.bf16 %v6345_v28, %v6342_v9  ;;  %v8048_v25 = vpop.f32.mrb[83].mxu0  ;;  %v8423_v9 = vld [vmem:[#allocation13 + $0x74] ss:$8 sps:$4 sm:$0xff]   ;;  %v8426_v28 = vld [vmem:[#allocation14 + $0x48] sm:$0xff]  }
0x224e   : > { %6673 = vmatpush1.bf16.msra.mxu1 %v8415_v58  ;;  %v8429_v25 = vld [vmem:[#allocation14 + $0x10] sm:$0xff]  }
0x224f   : > { %8351 = vrot.lane.b32.xlu1 %v8350_v40, %s11861_s21  ;;  %6674 = vmatprep.subr.bf16.mxu1 %v8420_v35  ;;  %v8428_v40 = vld [vmem:[#allocation14 + $0x50] sm:$0xff]   ;;  %s7402_s21 = sshll.u32 %s9165_s3, 8  ;;  %s9036_s3 = smov [#allocation19]  }
0x2250   : > { %v6386_v18 = vpop.f32.mrb[100].mxu1  ;;  %s11697_s18 = scalar_lea.hbm %s11871_s2, %s7402_s21  ;;  %s8924_s5 = sshll.u32 %s9036_s3, 4  ;;  %s8925_s5 = int_to_ptr.vmem [resolvable:$false] %s8924_s5 }
0x2251   : > { %v8055_v16 = vpop.f32.mrb[101].mxu1 }
0x2252   : > { %v6389_v48 = vpop.f32.mrb[102].mxu1  ;;  %6675 = vmatpush1.bf16.msra.mxu1 %v8418_v56  ;;  %v8431_v16 = vld [vmem:[#allocation14 + $0x18] sm:$0xff]  }
0x2253   : > { %v8355_v27 = vpack.i.bf16 %v6389_v48, %v6386_v18  ;;  %v8056_v8 = vpop.f32.mrb[103].mxu1  ;;  %6676 = vmatprep.subr.bf16.mxu1 %v8423_v9  ;;  %v8430_v18 = vld [vmem:[#allocation14 + $0x58] sm:$0xff]   ;;  %v8432_v48 = vld [vmem:[#allocation14 + $0x60] sm:$0xff]  }
0x2254   : > { %v8434_v8 = vld [vmem:[#allocation14 + $0x68] sm:$0xff]  }
0x2255   : > { %8356 = vrot.lane.b32.xlu0 %v8355_v27, %s11860_s11  ;;  %v8433_v27 = vld [vmem:[#allocation14 + $0x20] sm:$0xff]   ;;  %s7162_s11 = sshll.u32 %s9503_s4, 4 }
0x2256   : > { %6677 = vmatpush1.bf16.msra.mxu1 %v8421_v13  ;;  %s829_s13 = scalar_lea.vmem [#allocation19], %s7162_s11  ;;  %s8926_s11 = scalar_lea.vmem %s8925_s5, 512 }
0x2257   : > { %s6938_s14 = sshll.u32 %s829_s13, 4  ;;  %s11699_s14 = int_to_ptr.vmem [resolvable:$true] %s6938_s14 }
0x2258   : > { %s8920_s10 = scalar_lea.vmem %s11699_s14, 256  ;;  %p8927_p3 = scmp.lt.s32.totalorder %s11699_s14, %s8925_s5 }
0x2259   : > { %p8921_p2 = scmp.ne.s32.totalorder %s11699_s14, %s8920_s10  ;;  %p8928_p10 = scmp.lt.s32.totalorder %s8926_s11, %s8920_s10 }
0x225b   : > { %p8922_p8 = pnand %p8921_p2, %p11872_p5  ;;  %p8929_p1 = por %p8928_p10, %p8927_p3 }
0x225d   : > { %p8923_p4 = pneg %p8922_p8 }
0x225f   : > { %p8930_p11 = pnand %p8929_p1, %p8923_p4 }
0x22b5   : > { %v8347_v60 = vpop.permute.xlu0 %8346 }
0x22b6   : > { %v8349_v43 = vunpack.i.h.bf16 %v8347_v60  ;;  %v8348_v19 = vunpack.i.l.bf16 %v8347_v60 }
0x22b8   : > { %v6417_v42 = vsel %vm1531_vm2, %v6254_v4, %v8348_v19  ;;  %v6418_v2 = vsel %vm1531_vm2, %v6257_v10, %v8349_v43 }
0x22c1   : > { %v8352_v47 = vpop.permute.xlu1 %8351 }
0x22c2   : > { %v8354_v29 = vunpack.i.h.bf16 %v8352_v47  ;;  %v8353_v39 = vunpack.i.l.bf16 %v8352_v47 }
0x22c4   : > { %v6420_v26 = vsel %vm2018_vm3, %v6418_v2, %v8354_v29  ;;  %v6419_v61 = vsel %vm2018_vm3, %v6417_v42, %v8353_v39  ;;  %v11677_v2 = vld [vmem:[#allocation16 + $0x8] sm:$0xff] }
0x22c7   : > { %v8357_v46 = vpop.permute.xlu0 %8356 }
0x22c8   : > { %v8359_v1 = vunpack.i.h.bf16 %v8357_v46  ;;  %v8358_v17 = vunpack.i.l.bf16 %v8357_v46 }
0x22ca   : > { %v6421_v23 = vsel %vm2021_vm4, %v6419_v61, %v8358_v17  ;;  %v6422_v57 = vsel %vm2021_vm4, %v6420_v26, %v8359_v1  ;;  %v6544_v1 = vrot.slane %v11677_v2, %v10065_v30  ;;  %v8439_v30 = vld [vmem:[#allocation14 + $0x38] sm:$0xff]  }
0x22cb   : > { %v6423_v5 = vpack.c.bf16 %v6422_v57, %v6421_v23  ;;  %v6550_v23 = vrot.slane %v11677_v2, %v10372_v11 }
0x22cd   : > { %8074 = vmatmul.mubr.bf16.vlgmr.msra.gmra.mrb[84].mxu0 %v6423_v5 }
0x22ce   : > { %7608 = vmatpush3.bf16.msra.mxu0 %v8425_v41 }
0x22cf   : > { %7609 = vmatprep.subr.bf16.mxu0 %v8426_v28 }
0x22d2   : > { %7610 = vmatpush3.bf16.msra.mxu0 %v8427_v31 }
0x22d3   : > { %7611 = vmatprep.subr.bf16.mxu0 %v8428_v40 }
0x22d6   : > { %7612 = vmatpush3.bf16.msra.mxu0 %v8429_v25 }
0x22d7   : > { %7613 = vmatprep.subr.bf16.mxu0 %v8430_v18 }
0x22da   : > { %7614 = vmatpush3.bf16.msra.mxu0 %v8431_v16 }
0x22db   : > { %7615 = vmatprep.subr.bf16.mxu0 %v8432_v48 }
0x22de   : > { %7616 = vmatpush3.bf16.msra.mxu0 %v8433_v27 }
0x22df   : > { %7617 = vmatprep.subr.bf16.mxu0 %v8434_v8 }
0x23a0   : > { %v6510_v51 = vpop.f32.mrb[84].mxu0 }
0x23a1   : > { %v6511_v20 = vadd.f32 %v6510_v51, %v6427_v3  ;;  %v8075_v50 = vpop.f32.mrb[85].mxu0  ;;  %v8435_v51 = vld [vmem:[#allocation14 + $0x28] sm:$0xff]  }
0x23a2   : > { %v6513_v21 = vpop.f32.mrb[86].mxu0  ;;  %7618 = vmatpush3.bf16.msra.mxu0 %v8435_v51  ;;  %v8437_v50 = vld [vmem:[#allocation14 + $0x30] sm:$0xff]  }
0x23a3   : > { %v11664_v4 = vadd.f32 %v6511_v20, %v11019_v15  ;;  %v6514_v7 = vadd.f32 %v6513_v21, %v6427_v3  ;;  %v8076_v10 = vpop.f32.mrb[87].mxu0  ;;  %v8436_v20 = vld [vmem:[#allocation14 + $0x70] sm:$0xff]   ;;  %v8438_v21 = vld [vmem:[#allocation14 + $0x78] sm:$0xff]  }
0x23a4   : > { %7619 = vmatprep.subr.bf16.mxu0 %v8436_v20  ;;  %v11869_v10 = vld [vmem:[#allocation29_spill] sm:$0xff] }
0x23a5   : > { %v11667_v33 = vadd.f32 %v6514_v7, %v11022_v52  ;;  %6519 = vadd.xlane.f32.xlu1 %v11664_v4  ;;  %v6570_v7 = vld [vmem:[#allocation17] sm:$0x3]  ;;  %v6885_v35 = vrot.slane %v11677_v2, %v11869_v10 }
0x23a6   : > { %7620 = vmatpush3.bf16.msra.mxu0 %v8437_v50  ;;  %v6575_v22 = vrot.slane %v6570_v7, %v11869_v10  ;;  %v6579_v11 = vrot.slane %v6570_v7, %v11870_v45 }
0x23a7   : > { %6521 = vadd.xlane.f32.xlu0 %v11667_v33  ;;  %7621 = vmatprep.subr.bf16.mxu0 %v8438_v21 }
0x23aa   : > { %7622 = vmatpush3.bf16.msra.mxu0 %v8439_v30 }
0x2432   : > { %v6520_v53 = vpop.xlane.xlu1 %6519 }
0x2433   : > { %v6523_v15 = vmul.f32 0.0078125, %v6520_v53 }
0x2434   : > { %v6522_v44 = vpop.xlane.xlu0 %6521 }
0x2435   : > { %v6525_v59 = vsub.f32 %v11664_v4, %v6523_v15  ;;  %v6524_v34 = vmul.f32 0.0078125, %v6522_v44 }
0x2437   : > { %v11673_v52 = vsub.f32 %v11667_v33, %v6524_v34  ;;  %v6527_v63 = vmul.f32 %v6525_v59, %v6525_v59 }
0x2439   : > { %6529 = vadd.xlane.f32.xlu0 %v6527_v63  ;;  %v6528_v32 = vmul.f32 %v11673_v52, %v11673_v52 }
0x243d   : > { %6531 = vadd.xlane.f32.xlu0 %v6528_v32 }
0x24c6   : > { %v6530_v60 = vpop.xlane.xlu0 %6529 }
0x24c7   : > { %v6533_v47 = vmul.f32 0.0078125, %v6530_v60 }
0x24c9   : > { %v6535_v43 = vadd.f32 1e-05, %v6533_v47 }
0x24ca   : > { %v6532_v19 = vpop.xlane.xlu0 %6531 }
0x24cb   : > { %8592 = vrsqrt.f32 %v6535_v43  ;;  %v6534_v29 = vmul.f32 0.0078125, %v6532_v19 }
0x24cd   : > { %v6536_v39 = vadd.f32 1e-05, %v6534_v29  ;;  %v6913_v29 = vrot.slane %v11677_v2, %v10453_v36 }
0x24cf   : > { %8594 = vrsqrt.f32 %v6536_v39 }
0x24d5   : > { %v8593_v46 = vpop.eup %8592 }
0x24d6   : > { %v6539_v42 = vmul.f32 %v8593_v46, %v6525_v59 }
0x24d8   : > { %v6545_v61 = vmul.f32 %v6544_v1, %v6539_v42 }
0x24d9   : > { %v8595_v17 = vpop.eup %8594 }
0x24da   : > { %v6540_v26 = vmul.f32 %v8595_v17, %v11673_v52  ;;  %v6551_v5 = vadd.f32 %v6550_v23, %v6545_v61 }
0x24dc   : > { %v6546_v57 = vmul.f32 %v6544_v1, %v6540_v26  ;;  %v7392_v1 = vld [vmem:[#allocation16 + $0x10] ss:$0 sm:$0xff] }
0x24de   : > { %v6552_v24 = vadd.f32 %v6550_v23, %v6546_v57 }
0x24e0   : > { %v6553_v3 = vpack.c.bf16 %v6552_v24, %v6551_v5 }
0x24e2   : > { %6695 = vmatmul.mubr.bf16.vlgmr.msra.gmra.mrb[104].mxu1 %v6553_v3 }
0x25b5   : > { %v6696_v49 = vpop.f32.mrb[104].mxu1 }
0x25b6   : > { %v6697_v38 = vadd.f32 %v6696_v49, %v6575_v22  ;;  %v6698_v53 = vpop.f32.mrb[105].mxu1 }
0x25b7   : > { %v6699_v15 = vadd.f32 %v6698_v53, %v6579_v11  ;;  %v6700_v44 = vpop.f32.mrb[106].mxu1 }
0x25b8   : > { %v6701_v59 = vadd.f32 %v6700_v44, %v6575_v22  ;;  %v6702_v34 = vpop.f32.mrb[107].mxu1  ;;  %v6705_v63 = vmax.f32 %v6697_v38, 0.0 }
0x25b9   : > { %v6703_v52 = vadd.f32 %v6702_v34, %v6579_v11  ;;  %v6706_v55 = vmax.f32 %v6699_v15, 0.0 }
0x25ba   : > { %v6707_v32 = vmax.f32 %v6701_v59, 0.0 }
0x25bb   : > { %v6708_v37 = vmax.f32 %v6703_v52, 0.0 }
0x25bc   : > { %v6709_v54 = vpack.c.bf16 %v6707_v32, %v6705_v63 }
0x25bd   : > { %v6710_v0 = vpack.c.bf16 %v6708_v37, %v6706_v55 }
0x25bf   : > { %6871 = vmatprep.mubr.bf16.mxu0 %v6710_v0 }
0x25c0   : > { %6872 = vmatmul.mubr.bf16.vlgmr.msra.gmra.mrb[88].mxu0 %v6709_v54 }
0x2693   : > { %v7623_v14 = vpop.f32.mrb[88].mxu0 }
0x2694   : > { %v7624_v62 = vpop.f32.mrb[89].mxu0 }
0x2695   : > { %v7625_v12 = vadd.f32 %v7624_v62, %v7623_v14  ;;  %v7626_v58 = vpop.f32.mrb[90].mxu0 }
0x2696   : > { %v7627_v56 = vpop.f32.mrb[91].mxu0 }
0x2697   : > { %v6880_v9 = vadd.f32 %v7625_v12, %v11664_v4  ;;  %v7628_v13 = vadd.f32 %v7627_v56, %v7626_v58 }
0x2699   : > { %v6881_v6 = vadd.f32 %v7628_v13, %v11667_v33  ;;  %v6886_v41 = vadd.f32 %v6885_v35, %v6880_v9 }
0x269b   : > { %6888 = vadd.xlane.f32.xlu1 %v6886_v41  ;;  %v6887_v28 = vadd.f32 %v6885_v35, %v6881_v6 }
0x269d   : > { %6890 = vadd.xlane.f32.xlu0 %v6887_v28 }
0x2728   : > { %v6889_v31 = vpop.xlane.xlu1 %6888 }
0x2729   : > { %v6892_v40 = vmul.f32 0.0078125, %v6889_v31 }
0x272a   : > { %v6891_v25 = vpop.xlane.xlu0 %6890 }
0x272b   : > { %v6894_v18 = vsub.f32 %v6886_v41, %v6892_v40  ;;  %v6893_v16 = vmul.f32 0.0078125, %v6891_v25 }
0x272d   : > { %v6895_v48 = vsub.f32 %v6887_v28, %v6893_v16  ;;  %v6896_v27 = vmul.f32 %v6894_v18, %v6894_v18 }
0x272f   : > { %6898 = vadd.xlane.f32.xlu1 %v6896_v27  ;;  %v6897_v8 = vmul.f32 %v6895_v48, %v6895_v48 }
0x2731   : > { %6900 = vadd.xlane.f32.xlu0 %v6897_v8 }
0x27bc   : > { %v6899_v60 = vpop.xlane.xlu1 %6898 }
0x27bd   : > { %v6902_v4 = vmul.f32 0.0078125, %v6899_v60 }
0x27be   : > { %v6901_v47 = vpop.xlane.xlu0 %6900 }
0x27bf   : > { %v6904_v33 = vadd.f32 1e-05, %v6902_v4  ;;  %v6903_v43 = vmul.f32 0.0078125, %v6901_v47 }
0x27c1   : > { %8596 = vrsqrt.f32 %v6904_v33  ;;  %v6905_v19 = vadd.f32 1e-05, %v6903_v43 }
0x27c3   : > { %8598 = vrsqrt.f32 %v6905_v19 }
0x27cb   : > { %v8597_v39 = vpop.eup %8596 }
0x27cc   : > { %v6908_v46 = vmul.f32 %v8597_v39, %v6894_v18 }
0x27cd   : > { %v8599_v42 = vpop.eup %8598 }
0x27ce   : > { %v6914_v17 = vmul.f32 %v6913_v29, %v6908_v46  ;;  %v6909_v26 = vmul.f32 %v8599_v42, %v6895_v48 }
0x27d0   : > { %v6920_v61 = vadd.f32 %v7392_v1, %v6914_v17  ;;  %v6915_v23 = vmul.f32 %v6913_v29, %v6909_v26 }
0x27d2   : > { %v6921_v36 = vadd.f32 %v7392_v1, %v6915_v23  ;;  %6922 = vst [vmem:[%s829_s13] sm:$0xff] %v6920_v61 }
0x27d4   : > { %6923 = vst [vmem:[%s829_s13 + $0x8] sm:$0xff] %v6921_v36 }
0x27d5   : > { %8933 = shalt.err (!%p8930_p11)
}
0x27d6   : > { %s8934_s21 = scalar_lea.hbm %s11697_s18, 256  ;;  %s8938_s26 = scalar_lea.hbm %s11871_s2, 512 }
0x27d7   : > { %p8935_p12 = scmp.ne.s32.totalorder %s11697_s18, %s8934_s21  ;;  %p8939_p7 = scmp.lt.u32.totalorder %s11697_s18, %s11871_s2 }
0x27d8   : > { %p8940_p9 = scmp.lt.u32.totalorder %s8938_s26, %s8934_s21  ;;  %p8942_p2 = scmp.lt.u32.totalorder %s8934_s21, %s11697_s18 }
0x27d9   : > { %p8936_p6 = pnand %p8935_p12, %p11872_p5 }
0x27da   : > { %p8941_p0 = por %p8940_p9, %p8939_p7 }
0x27db   : > { %p8937_p13 = pneg %p8936_p6 }
0x27dc   : > { %p8943_p8 = por %p8942_p2, %p8941_p0 }
0x27de   : > { %p8944_p4 = pnand %p8943_p8, %p8937_p13 }
0x27e0   : > { %8947 = shalt.err (!%p8944_p4)
}
0x27e1   : > { %s9037_s10 = smov 128   ;;  %s9038_s11 = smov 8  }
0x27e2   : > { %8113 = dma.vmem_to_hbm [thread:$0]  (%p11872_p5), %s11699_s14, 256, %s11697_s18, %s6925_s19, %s9037_s10, %s9037_s10, %s9038_s11  }
0x27e3 PF: > { %s6953_s13 = sand.u32 1, %s8998_s1   ;;  %p11873_p3 = scmp.ne.s32.totalorder %s11836_s9, 0 }
0x27e4   : > { %p11874_p10 = scmp.ge.s32.totalorder %s9010_s24, 2  ;;  %s6954_s21 = scalar_lea.sflag [#allocation4], %s6953_s13 }
0x27e6   : > { %p8148_p1 = pnand %p11874_p10, %p11873_p3 }
0x27e8   : > { %8993 = dma.done.wait (!%p8148_p1), %s6954_s21, 256  }
0x27e9   : > { %8995 = vsyncadd (!%p8148_p1), %s6954_s21, 4294967040  ;;  %p40_p11 = scmp.ge.s32.totalorder %s9381_s27, 4   ;;  %s11875_s1 = smov %s9002_s22 }
0x27ea   : > { %s11876_s22 = smov %s9006_s23  ;;  %s11877_s23 = smov %s9392_s25 }
0x27eb   : > { %s11878_s24 = smov %s9381_s27  ;;  %42 = sbr.rel (!%p40_p11) target bundleno = 32 (0x20), region = 196 }
0x27f2   :  { %6959 = vsyncpa [#allocation3], 1 }
0x27f3   :  { %6961 = vsyncpa [#allocation3 + $0x1], 1 }
0x27f4   :  { %6962 = vsyncpa [#allocation6], 1 }
0x27f5   :  { %6964 = vsyncpa [#allocation6 + $0x1], 1 }
0x27f6   :  { %6965 = vsyncpa [#allocation9], 1 }
0x27f7   :  { %6966 = vsyncpa [#allocation12], 1 }
0x27f8   :  { %6967 = vsyncpa [#allocation15], 1 }
0x27f9   :  { %6968 = vsyncpa [#allocation18], 1 }
0x27fa   :  { %6969 = vsyncpa [#allocation4], 1 }
0x27fb   :  { %6971 = vsyncpa [#allocation4 + $0x1], 1 }

</bundles_post_ra>
